<compile_context>
chip_gen: v7x
topology: tpu7x:2x2x1
jax: 0.10.0
libtpu: 0.0.40
codegen_flags: <defaults>
</compile_context>

<pallas_src>
import math
from functools import partial

import jax
import jax.numpy as jnp
from jax.experimental import pallas as pl
from jax.experimental.pallas import tpu as pltpu

LN_EPS = 1e-5
_F32 = jnp.float32
# Explicit scoped-VMEM cap: below v7x's 64 MiB physical, above v5e/v6e defaults.
_VMEM_LIMIT = 48 * 1024 * 1024


# ----------------------------- in-kernel helpers -----------------------------
def _layer_norm_rows(x, w, b):
    mu = jnp.mean(x, axis=-1, keepdims=True)
    xc = x - mu
    var = jnp.mean(xc * xc, axis=-1, keepdims=True)
    return xc * jax.lax.rsqrt(var + LN_EPS) * w + b


def _sigmoid(v):
    # 1/(1+exp(-v)) is IEEE-stable in f32 (exp overflow flushes the result to 0/1 exactly).
    return 1.0 / (1.0 + jnp.exp(-v))


def _silu(v):
    return v * _sigmoid(v)


def _softplus(v):
    # numerically stable softplus
    return jnp.maximum(v, 0.0) + jnp.log1p(jnp.exp(-jnp.abs(v)))


def _erf(x):
    # Abramowitz & Stegun 7.1.26 (max abs err ~1.5e-7 == f32 rounding level).
    # Used so the exact-erf GELU fuses into the MLP kernel without relying on a
    # Mosaic erf lowering.
    a1, a2, a3, a4, a5 = 0.254829592, -0.284496736, 1.421413741, -1.453152027, 1.061405429
    p = 0.3275911
    ax = jnp.abs(x)
    t = 1.0 / (1.0 + p * ax)
    poly = ((((a5 * t + a4) * t + a3) * t + a2) * t + a1) * t
    y = 1.0 - poly * jnp.exp(-ax * ax)
    return jnp.where(x >= 0.0, y, -y)


def _gelu_exact(x):
    return 0.5 * x * (1.0 + _erf(x * 0.7071067811865476))


# -------------- fused MLP tail (attn-residual add + norm2+fc1+GELU+fc2+res) ---
def _mlp_block_kernel(res_ref, att_ref, n2w_ref, n2b_ref,
                      w1_ref, b1_ref, w2_ref, b2_ref, o_ref):
    # x = res_x + attention-branch output, fused here (saves one HBM round trip).
    x = res_ref[...].astype(_F32) + att_ref[...].astype(_F32)     # (TR, d)
    h = _layer_norm_rows(x, n2w_ref[...], n2b_ref[...])
    h = jnp.dot(h, w1_ref[...], preferred_element_type=_F32) + b1_ref[...]
    h = _gelu_exact(h)                                            # GELU stays in-register
    y = jnp.dot(h, w2_ref[...], preferred_element_type=_F32) + b2_ref[...]
    o_ref[...] = (x + y).astype(o_ref.dtype)


def mlp_block(res2d, att2d, n2w, n2b, fc1_wt, fc1_b, fc2_wt, fc2_b, *, max_rows=256):
    R, d = res2d.shape
    hidden = fc1_wt.shape[1]
    tr = R if R <= max_rows else max_rows                          # row-tiled, pipelined
    grid = (pl.cdiv(R, tr),)
    return pl.pallas_call(
        _mlp_block_kernel,
        grid=grid,
        in_specs=[
            pl.BlockSpec((tr, d), lambda i: (i, 0)),
            pl.BlockSpec((tr, d), lambda i: (i, 0)),
            pl.BlockSpec((1, d), lambda i: (0, 0)),
            pl.BlockSpec((1, d), lambda i: (0, 0)),
            pl.BlockSpec((d, hidden), lambda i: (0, 0)),
            pl.BlockSpec((1, hidden), lambda i: (0, 0)),
            pl.BlockSpec((hidden, d), lambda i: (0, 0)),
            pl.BlockSpec((1, d), lambda i: (0, 0)),
        ],
        out_specs=pl.BlockSpec((tr, d), lambda i: (i, 0)),
        out_shape=jax.ShapeDtypeStruct((R, d), res2d.dtype),
        compiler_params=pltpu.CompilerParams(
            dimension_semantics=("parallel",),
            vmem_limit_bytes=_VMEM_LIMIT),
    )(res2d, att2d, n2w, n2b, fc1_wt, fc1_b, fc2_wt, fc2_b)


# ------------------ fused spatial attention (norm1 + MHA) ---------------------
def _mha_kernel(x_ref, n1w_ref, n1b_ref, wqkv_t_ref, bqkv_ref, wo_t_ref, bo_ref,
                o_ref, *, num_heads):
    x = x_ref[...].astype(_F32)                                   # (Nj, L, E)
    Nj, L, E = x.shape
    hd = E // num_heads
    scale = float(hd) ** -0.5

    xf = x.reshape(Nj * L, E)
    h = _layer_norm_rows(xf, n1w_ref[...], n1b_ref[...])          # fused norm1
    # QKV projection: one full-width MXU matmul for all heads / all batch items.
    qkv = jnp.dot(h, wqkv_t_ref[...], preferred_element_type=_F32) + bqkv_ref[...]

    ctxs = []
    for hh in range(num_heads):
        # scale folded into q once per head
        q = (qkv[:, hh * hd:(hh + 1) * hd] * scale).reshape(Nj, L, hd)
        k = qkv[:, E + hh * hd:E + (hh + 1) * hd].reshape(Nj, L, hd)
        v = qkv[:, 2 * E + hh * hd:2 * E + (hh + 1) * hd].reshape(Nj, L, hd)
        s = jnp.einsum('bld,bmd->blm', q, k, preferred_element_type=_F32)
        s = s - jnp.max(s, axis=-1, keepdims=True)
        p = jnp.exp(s)
        p = p / jnp.sum(p, axis=-1, keepdims=True)
        ctx = jnp.einsum('blm,bmd->bld', p, v, preferred_element_type=_F32)
        ctxs.append(ctx.reshape(Nj * L, hd))
    ctx = jnp.concatenate(ctxs, axis=-1)                          # (Nj*L, E)
    out = jnp.dot(ctx, wo_t_ref[...], preferred_element_type=_F32) + bo_ref[...]
    o_ref[...] = out.reshape(Nj, L, E).astype(o_ref.dtype)


def mha_block(xs_tok, n1w, n1b, wqkv_t, bqkv, wo_t, bo, num_heads, *, max_batch=8):
    # xs_tok: (n+1, B*t, d) -- softmax attention over the B*t axis (nn.MultiheadAttention
    # batch_first=False convention), independently per token index.
    Nbatch, L, E = xs_tok.shape
    nb = Nbatch if Nbatch <= max_batch else max_batch             # batched grid steps
    grid = (pl.cdiv(Nbatch, nb),)
    kernel = partial(_mha_kernel, num_heads=num_heads)
    return pl.pallas_call(
        kernel,
        grid=grid,
        in_specs=[
            pl.BlockSpec((nb, L, E), lambda i: (i, 0, 0)),
            pl.BlockSpec((1, E), lambda i: (0, 0)),
            pl.BlockSpec((1, E), lambda i: (0, 0)),
            pl.BlockSpec((E, 3 * E), lambda i: (0, 0)),
            pl.BlockSpec((1, 3 * E), lambda i: (0, 0)),
            pl.BlockSpec((E, E), lambda i: (0, 0)),
            pl.BlockSpec((1, E), lambda i: (0, 0)),
        ],
        out_specs=pl.BlockSpec((nb, L, E), lambda i: (i, 0, 0)),
        out_shape=jax.ShapeDtypeStruct((Nbatch, L, E), xs_tok.dtype),
        compiler_params=pltpu.CompilerParams(
            dimension_semantics=("parallel",),
            vmem_limit_bytes=_VMEM_LIMIT),
    )(xs_tok, n1w, n1b, wqkv_t, bqkv, wo_t, bo)


# ---------- fused temporal branch: norm3 + bidirectional Mamba + residual -----
def _temporal_kernel(x_ref, n3w_ref, n3b_ref, inproj_wt_ref,
                     convw_f_ref, convb_f_ref, xproj_wt_f_ref, dtw_t_f_ref, dtb_f_ref,
                     alog_t_f_ref, d_f_ref,
                     convw_b_ref, convb_b_ref, xproj_wt_b_ref, dtw_t_b_ref, dtb_b_ref,
                     alog_t_b_ref, d_b_ref,
                     outproj_wt_ref, o_ref,
                     u_sc, y_sc,
                     *, d_conv, dt_rank, d_state, d_inner):
    x = x_ref[...].astype(_F32)                                   # (Nb, L, d_model)
    Nb, L, dm = x.shape
    xf = x.reshape(Nb * L, dm)

    # norm3 + in_proj (Mamba in_proj has no bias); everything batched over Nb*L rows.
    hn = _layer_norm_rows(xf, n3w_ref[...], n3b_ref[...])
    xz = jnp.dot(hn, inproj_wt_ref[...], preferred_element_type=_F32)   # (Nb*L, 2*d_inner)
    xm = xz[:, :d_inner]
    z = xz[:, d_inner:]
    gate = _silu(z)                       # shared SiLU(z) gate (flip(z) then flip back == z)
    xm3 = xm.reshape(Nb, L, d_inner)

    def run_direction(convw_ref, convb_ref, xproj_wt_ref, dtw_t_ref, dtb_ref,
                      alog_t_ref, dvec_ref, reverse, accumulate):
        # --- depthwise conv: causal (fwd) / anti-causal (bwd == conv on the flipped seq),
        #     via static shifted slice-accumulation into VMEM scratch (no zero-pad concat).
        #     Bias + zero-shift tap initialise the accumulator in one store.
        convw = convw_ref[...].astype(_F32)                       # (d_conv, d_inner)
        convb = convb_ref[...].astype(_F32)                       # (1, d_inner)
        w_last = convw[d_conv - 1:d_conv, :][None]                # (1, 1, d_inner)
        u_sc[...] = w_last * xm3 + convb[None]
        for k in range(d_conv - 1):
            w_k = convw[k:k + 1, :][None]                         # (1, 1, d_inner)
            sh = d_conv - 1 - k
            if sh < L:
                if not reverse:     # out[l] += w[k] * x[l - sh]
                    u_sc[:, sh:, :] += w_k * xm3[:, :L - sh, :]
                else:               # out[l] += w[k] * x[l + sh]
                    u_sc[:, :L - sh, :] += w_k * xm3[:, sh:, :]
        u3 = _silu(u_sc[...])                                     # (Nb, L, d_inner)
        u = u3.reshape(Nb * L, d_inner)

        # --- input-dependent SSM parameters (vectorized over all rows).
        x_dbl = jnp.dot(u, xproj_wt_ref[...], preferred_element_type=_F32)
        delta = jnp.dot(x_dbl[:, :dt_rank], dtw_t_ref[...],
                        preferred_element_type=_F32) + dtb_ref[...]
        delta = _softplus(delta)                                  # (Nb*L, d_inner)
        Bm = x_dbl[:, dt_rank:dt_rank + d_state]                  # (Nb*L, d_state)
        Cm4 = x_dbl[:, dt_rank + d_state:].reshape(Nb, L, d_state)
        At = -jnp.exp(alog_t_ref[...].astype(_F32))               # (d_state, d_inner) == A.T

        # --- hoist exp / broadcasts off the serial chain (precompute dA, dB*u).
        dA4 = jnp.exp(delta[:, None, :] * At[None, :, :]).reshape(Nb, L, d_state, d_inner)
        dBu4 = (Bm[:, :, None] * (delta * u)[:, None, :]).reshape(Nb, L, d_state, d_inner)

        # --- selective scan: Nb sequences in parallel; only h = a*h + b + readout
        #     remains per-step.  First direction stores, second accumulates (no
        #     zero-init pass, no forward-direction read-modify-writes).
        # TODO(synk): switch to lax.fori_loop + dynamic ref indexing for very long L.
        h = jnp.zeros((Nb, d_state, d_inner), _F32)
        for step in range(L):
            l = step if not reverse else L - 1 - step
            h = dA4[:, l] * h + dBu4[:, l]
            y_l = jnp.sum(Cm4[:, l][:, :, None] * h, axis=1)      # (Nb, d_inner)
            if accumulate:
                y_sc[:, l:l + 1, :] += y_l[:, None, :]
            else:
                y_sc[:, l:l + 1, :] = y_l[:, None, :]
        # skip connection D * u, vectorized outside the scan.
        y_sc[...] += u3 * dvec_ref[...][None]

    run_direction(convw_f_ref, convb_f_ref, xproj_wt_f_ref, dtw_t_f_ref, dtb_f_ref,
                  alog_t_f_ref, d_f_ref, reverse=False, accumulate=False)
    run_direction(convw_b_ref, convb_b_ref, xproj_wt_b_ref, dtw_t_b_ref, dtb_b_ref,
                  alog_t_b_ref, d_b_ref, reverse=True, accumulate=True)

    y = y_sc[...].reshape(Nb * L, d_inner) * gate                 # SiLU(z) gate
    out = jnp.dot(y, outproj_wt_ref[...], preferred_element_type=_F32)   # out_proj, no bias
    o_ref[...] = (x + out.reshape(Nb, L, dm)).astype(o_ref.dtype)        # + residual


def temporal_block(xt, n3w, n3b, mp, *, max_batch=8):
    # xt: (B*n, t, d_model).  Returns time_residual = xt + Mamba(norm3(xt)).
    Bn, L, dm = xt.shape
    d_inner = mp["in_proj_wt"].shape[1] // 2
    d_conv = mp["conv_w"].shape[0]
    dt_rank = mp["dt_wt"].shape[0]
    d_state = mp["A_log_t"].shape[0]
    dbc = dt_rank + 2 * d_state
    nb = Bn if Bn <= max_batch else max_batch                     # batched grid steps
    grid = (pl.cdiv(Bn, nb),)
    kernel = partial(_temporal_kernel, d_conv=d_conv, dt_rank=dt_rank,
                     d_state=d_state, d_inner=d_inner)

    def w2(shape):
        return pl.BlockSpec(shape, lambda i: (0, 0))

    return pl.pallas_call(
        kernel,
        grid=grid,
        in_specs=[
            pl.BlockSpec((nb, L, dm), lambda i: (i, 0, 0)),
            w2((1, dm)), w2((1, dm)),
            w2((dm, 2 * d_inner)),
            w2((d_conv, d_inner)), w2((1, d_inner)),
            w2((d_inner, dbc)), w2((dt_rank, d_inner)), w2((1, d_inner)),
            w2((d_state, d_inner)), w2((1, d_inner)),
            w2((d_conv, d_inner)), w2((1, d_inner)),
            w2((d_inner, dbc)), w2((dt_rank, d_inner)), w2((1, d_inner)),
            w2((d_state, d_inner)), w2((1, d_inner)),
            w2((d_inner, dm)),
        ],
        out_specs=pl.BlockSpec((nb, L, dm), lambda i: (i, 0, 0)),
        out_shape=jax.ShapeDtypeStruct((Bn, L, dm), xt.dtype),
        scratch_shapes=[
            pltpu.VMEM((nb, L, d_inner), _F32),   # conv accumulator
            pltpu.VMEM((nb, L, d_inner), _F32),   # scan-output accumulator (both directions)
        ],
        compiler_params=pltpu.CompilerParams(
            dimension_semantics=("parallel",),
            vmem_limit_bytes=_VMEM_LIMIT),
    )(xt, n3w, n3b, mp["in_proj_wt"],
      mp["conv_w"], mp["conv_b"], mp["xproj_wt"], mp["dt_wt"], mp["dt_b"],
      mp["A_log_t"], mp["D"],
      mp["conv_w_b"], mp["conv_b_b"], mp["xproj_wt_b"], mp["dt_wt_b"], mp["dt_b_b"],
      mp["A_log_t_b"], mp["D_b"],
      mp["out_proj_wt"])


# ------------------------------- SpaceTimeBlock -------------------------------
def space_time_block_forward(x, params, time_n, space_f, num_heads):
    B, Ntok, d = x.shape
    n, t = time_n, space_f
    assert Ntok == 1 + n * t

    init_cls_token = x[:, :1]                                     # (B, 1, d)
    res_x = x

    # temporal branch: 'b (n t) d -> (b n) t d', then fused norm3+Mamba+residual.
    xt = x[:, 1:].reshape(B * n, t, d)
    time_residual = temporal_block(xt, params["norm3_w"], params["norm3_b"],
                                   params["mamba"])               # (B*n, t, d)

    # spatial attention branch.  nn.MultiheadAttention (batch_first=False) treats the
    # (b t) axis as the sequence and the token axis (n+1) as the batch, so we build the
    # input directly in token-major layout (n+1, B*t, d): no transposes around the kernel.
    cls_rep = jnp.broadcast_to(init_cls_token, (B, t, d)).reshape(1, B * t, d)
    spatial = time_residual.reshape(B, n, t, d).transpose(1, 0, 2, 3).reshape(n, B * t, d)
    xs_tok = jnp.concatenate([cls_rep, spatial], axis=0)          # (n+1, B*t, d)

    so_tok = mha_block(xs_tok, params["norm1_w"], params["norm1_b"],
                       params["attn_in_wt"], params["attn_in_b"],
                       params["attn_out_wt"], params["attn_out_b"], num_heads)

    cls_mean = so_tok[0].reshape(B, t, d).mean(axis=1, keepdims=True)        # (B, 1, d)
    sp = so_tok[1:].reshape(n, B, t, d).transpose(1, 0, 2, 3).reshape(B, n * t, d)
    attn_full = jnp.concatenate([cls_mean, sp], axis=1)           # 'frozen-in-time' branch

    # fused MLP tail: (res_x + attn) residual add + norm2 -> fc1 -> GELU -> fc2 -> +residual.
    out = mlp_block(res_x.reshape(B * Ntok, d), attn_full.reshape(B * Ntok, d),
                    params["norm2_w"], params["norm2_b"],
                    params["fc1_wt"], params["fc1_b"],
                    params["fc2_wt"], params["fc2_b"])
    return out.reshape(B, Ntok, d)


# ------------------------------- parameter init --------------------------------
def init_params(key, dim, mlp_ratio=4.0, d_state=16, d_conv=4):
    """All matmul weights are stored pre-transposed into (in, out) kernel layout
    (PyTorch nn.Linear stores (out, in)); depthwise conv weight (d_inner, 1, d_conv)
    is stored as (d_conv, d_inner); A_log (d_inner, d_state) is stored transposed."""
    d_inner = dim                           # Mamba(expand=1)
    dt_rank = math.ceil(dim / 16)
    hidden = int(dim * mlp_ratio)
    ks = jax.random.split(key, 20)

    def nrm(k, shape, scale=0.05):
        return (scale * jax.random.normal(k, shape)).astype(_F32)

    # A_log init: row s of the transposed layout is filled with (s+1).
    A_log_t = jnp.log(jnp.tile(jnp.arange(1, d_state + 1, dtype=_F32)[:, None], (1, d_inner)))

    mamba = dict(
        in_proj_wt=nrm(ks[0], (dim, 2 * d_inner)),
        conv_w=nrm(ks[1], (d_conv, d_inner), 0.2),
        conv_b=nrm(ks[2], (1, d_inner), 0.05),
        xproj_wt=nrm(ks[3], (d_inner, dt_rank + 2 * d_state)),
        dt_wt=nrm(ks[4], (dt_rank, d_inner), 0.1),
        dt_b=jax.random.uniform(ks[5], (1, d_inner), minval=-4.0, maxval=-2.0).astype(_F32),
        A_log_t=A_log_t,
        D=jnp.ones((1, d_inner), _F32),
        conv_w_b=nrm(ks[6], (d_conv, d_inner), 0.2),
        conv_b_b=nrm(ks[7], (1, d_inner), 0.05),
        xproj_wt_b=nrm(ks[8], (d_inner, dt_rank + 2 * d_state)),
        dt_wt_b=nrm(ks[9], (dt_rank, d_inner), 0.1),
        dt_b_b=jax.random.uniform(ks[10], (1, d_inner), minval=-4.0, maxval=-2.0).astype(_F32),
        A_log_t_b=A_log_t,
        D_b=jnp.ones((1, d_inner), _F32),
        out_proj_wt=nrm(ks[11], (d_inner, dim)),
    )
    return dict(
        norm1_w=jnp.ones((1, dim), _F32), norm1_b=jnp.zeros((1, dim), _F32),
        norm2_w=jnp.ones((1, dim), _F32), norm2_b=jnp.zeros((1, dim), _F32),
        norm3_w=jnp.ones((1, dim), _F32), norm3_b=jnp.zeros((1, dim), _F32),
        attn_in_wt=nrm(ks[12], (dim, 3 * dim)),
        attn_in_b=jnp.zeros((1, 3 * dim), _F32),
        attn_out_wt=nrm(ks[13], (dim, dim)),
        attn_out_b=jnp.zeros((1, dim), _F32),
        fc1_wt=nrm(ks[14], (dim, hidden)),
        fc1_b=jnp.zeros((1, hidden), _F32),
        fc2_wt=nrm(ks[15], (hidden, dim)),
        fc2_b=jnp.zeros((1, dim), _F32),
        mamba=mamba,
    )


if __name__ == "__main__":
    B, dim, num_heads = 2, 32, 4
    time_n, space_f = 4, 4                  # n spatial groups, t frames
    key = jax.random.PRNGKey(0)
    kx, kp = jax.random.split(key)
    x = jax.random.normal(kx, (B, 1 + time_n * space_f, dim), dtype=jnp.float32)
    params = init_params(kp, dim)

    fwd = jax.jit(partial(space_time_block_forward,
                          time_n=time_n, space_f=space_f, num_heads=num_heads))
    out = jax.block_until_ready(fwd(x, params))
    assert out.shape == x.shape
    assert bool(jnp.all(jnp.isfinite(out)))
    print("KERNEL_OK")
</pallas_src>

<mosaic_0001>
module attributes {stable_mosaic.version = 11 : i64} {
  func.func @_temporal_kernel(%arg0: i32, %arg1: memref<8x4x32xf32, #tpu.memory_space<vmem>>, %arg2: memref<1x32xf32, #tpu.memory_space<vmem>>, %arg3: memref<1x32xf32, #tpu.memory_space<vmem>>, %arg4: memref<32x64xf32, #tpu.memory_space<vmem>>, %arg5: memref<4x32xf32, #tpu.memory_space<vmem>>, %arg6: memref<1x32xf32, #tpu.memory_space<vmem>>, %arg7: memref<32x34xf32, #tpu.memory_space<vmem>>, %arg8: memref<2x32xf32, #tpu.memory_space<vmem>>, %arg9: memref<1x32xf32, #tpu.memory_space<vmem>>, %arg10: memref<16x32xf32, #tpu.memory_space<vmem>>, %arg11: memref<1x32xf32, #tpu.memory_space<vmem>>, %arg12: memref<4x32xf32, #tpu.memory_space<vmem>>, %arg13: memref<1x32xf32, #tpu.memory_space<vmem>>, %arg14: memref<32x34xf32, #tpu.memory_space<vmem>>, %arg15: memref<2x32xf32, #tpu.memory_space<vmem>>, %arg16: memref<1x32xf32, #tpu.memory_space<vmem>>, %arg17: memref<16x32xf32, #tpu.memory_space<vmem>>, %arg18: memref<1x32xf32, #tpu.memory_space<vmem>>, %arg19: memref<32x32xf32, #tpu.memory_space<vmem>>, %arg20: memref<8x4x32xf32, #tpu.memory_space<vmem>>, %arg21: memref<8x4x32xf32, #tpu.memory_space<vmem>>, %arg22: memref<8x4x32xf32, #tpu.memory_space<vmem>>) attributes {dimension_semantics = [#tpu.dimension_semantics<parallel>], iteration_bounds = array<i64: 1>, scalar_prefetch = 0 : i64, scratch_operands = 2 : i64, tpu.core_type = #tpu.core_type<tc>, window_params = [{transform_indices = @transform_0, window_bounds = array<i64: 8, 4, 32>}, {pipeline_mode = #tpu.pipeline_mode<synchronous>, transform_indices = @transform_1, window_bounds = array<i64: 1, 32>}, {pipeline_mode = #tpu.pipeline_mode<synchronous>, transform_indices = @transform_2, window_bounds = array<i64: 1, 32>}, {pipeline_mode = #tpu.pipeline_mode<synchronous>, transform_indices = @transform_3, window_bounds = array<i64: 32, 64>}, {pipeline_mode = #tpu.pipeline_mode<synchronous>, transform_indices = @transform_4, window_bounds = array<i64: 4, 32>}, {pipeline_mode = #tpu.pipeline_mode<synchronous>, transform_indices = @transform_5, window_bounds = array<i64: 1, 32>}, {pipeline_mode = #tpu.pipeline_mode<synchronous>, transform_indices = @transform_6, window_bounds = array<i64: 32, 34>}, {pipeline_mode = #tpu.pipeline_mode<synchronous>, transform_indices = @transform_7, window_bounds = array<i64: 2, 32>}, {pipeline_mode = #tpu.pipeline_mode<synchronous>, transform_indices = @transform_8, window_bounds = array<i64: 1, 32>}, {pipeline_mode = #tpu.pipeline_mode<synchronous>, transform_indices = @transform_9, window_bounds = array<i64: 16, 32>}, {pipeline_mode = #tpu.pipeline_mode<synchronous>, transform_indices = @transform_10, window_bounds = array<i64: 1, 32>}, {pipeline_mode = #tpu.pipeline_mode<synchronous>, transform_indices = @transform_11, window_bounds = array<i64: 4, 32>}, {pipeline_mode = #tpu.pipeline_mode<synchronous>, transform_indices = @transform_12, window_bounds = array<i64: 1, 32>}, {pipeline_mode = #tpu.pipeline_mode<synchronous>, transform_indices = @transform_13, window_bounds = array<i64: 32, 34>}, {pipeline_mode = #tpu.pipeline_mode<synchronous>, transform_indices = @transform_14, window_bounds = array<i64: 2, 32>}, {pipeline_mode = #tpu.pipeline_mode<synchronous>, transform_indices = @transform_15, window_bounds = array<i64: 1, 32>}, {pipeline_mode = #tpu.pipeline_mode<synchronous>, transform_indices = @transform_16, window_bounds = array<i64: 16, 32>}, {pipeline_mode = #tpu.pipeline_mode<synchronous>, transform_indices = @transform_17, window_bounds = array<i64: 1, 32>}, {pipeline_mode = #tpu.pipeline_mode<synchronous>, transform_indices = @transform_18, window_bounds = array<i64: 32, 32>}, {transform_indices = @transform_19, window_bounds = array<i64: 8, 4, 32>}]} {
    %c0 = arith.constant 0 : index
    %c0_0 = arith.constant 0 : index
    %c0_1 = arith.constant 0 : index
    %0 = vector.load %arg1[%c0, %c0_0, %c0_1] : memref<8x4x32xf32, #tpu.memory_space<vmem>>, vector<8x4x32xf32>
    %1 = vector.shape_cast %0 : vector<8x4x32xf32> to vector<32x32xf32>
    %c0_2 = arith.constant 0 : index
    %c0_3 = arith.constant 0 : index
    %2 = vector.load %arg2[%c0_2, %c0_3] : memref<1x32xf32, #tpu.memory_space<vmem>>, vector<1x32xf32>
    %c0_4 = arith.constant 0 : index
    %c0_5 = arith.constant 0 : index
    %3 = vector.load %arg3[%c0_4, %c0_5] : memref<1x32xf32, #tpu.memory_space<vmem>>, vector<1x32xf32>
    %cst = arith.constant dense<0.000000e+00> : vector<32xf32>
    %4 = vector.multi_reduction <add>, %1, %cst [1] : vector<32x32xf32> to vector<32xf32>
    %5 = vector.shape_cast %4 : vector<32xf32> to vector<32x1xf32>
    %cst_6 = arith.constant 3.200000e+01 : f32
    %6 = vector.broadcast %cst_6 : f32 to vector<32x1xf32>
    %7 = arith.divf %5, %6 : vector<32x1xf32>
    %8 = vector.broadcast %7 : vector<32x1xf32> to vector<32x32xf32>
    %9 = arith.subf %1, %8 : vector<32x32xf32>
    %10 = arith.mulf %9, %9 : vector<32x32xf32>
    %cst_7 = arith.constant dense<0.000000e+00> : vector<32xf32>
    %11 = vector.multi_reduction <add>, %10, %cst_7 [1] : vector<32x32xf32> to vector<32xf32>
    %12 = vector.shape_cast %11 : vector<32xf32> to vector<32x1xf32>
    %cst_8 = arith.constant 3.200000e+01 : f32
    %13 = vector.broadcast %cst_8 : f32 to vector<32x1xf32>
    %14 = arith.divf %12, %13 : vector<32x1xf32>
    %cst_9 = arith.constant 9.99999974E-6 : f32
    %15 = vector.broadcast %cst_9 : f32 to vector<32x1xf32>
    %16 = arith.addf %14, %15 : vector<32x1xf32>
    %17 = math.rsqrt %16 : vector<32x1xf32>
    %18 = vector.broadcast %17 : vector<32x1xf32> to vector<32x32xf32>
    %19 = arith.mulf %9, %18 : vector<32x32xf32>
    %20 = vector.broadcast %2 : vector<1x32xf32> to vector<32x32xf32>
    %21 = arith.mulf %19, %20 : vector<32x32xf32>
    %22 = vector.broadcast %3 : vector<1x32xf32> to vector<32x32xf32>
    %23 = arith.addf %21, %22 : vector<32x32xf32>
    %c0_10 = arith.constant 0 : index
    %c0_11 = arith.constant 0 : index
    %24 = vector.load %arg4[%c0_10, %c0_11] : memref<32x64xf32, #tpu.memory_space<vmem>>, vector<32x64xf32>
    %cst_12 = arith.constant dense<0.000000e+00> : vector<32x64xf32>
    %25 = tpu.matmul %23, %24, %cst_12 {dimension_numbers = #tpu.dot_dimension_numbers<[1], [0], [0], [1], [0, 0, 1, 1], [], []>} : vector<32x32xf32>, vector<32x64xf32>, vector<32x64xf32> -> vector<32x64xf32>
    %26 = vector.extract_strided_slice %25 {offsets = [0, 0], sizes = [32, 32], strides = [1, 1]} : vector<32x64xf32> to vector<32x32xf32>
    %27 = vector.extract_strided_slice %25 {offsets = [0, 32], sizes = [32, 32], strides = [1, 1]} : vector<32x64xf32> to vector<32x32xf32>
    %cst_13 = arith.constant 0.000000e+00 : f32
    %28 = vector.broadcast %cst_13 : f32 to vector<32x32xf32>
    %29 = arith.subf %28, %27 : vector<32x32xf32>
    %30 = math.exp %29 : vector<32x32xf32>
    %cst_14 = arith.constant 1.000000e+00 : f32
    %31 = vector.broadcast %cst_14 : f32 to vector<32x32xf32>
    %32 = arith.addf %31, %30 : vector<32x32xf32>
    %cst_15 = arith.constant 1.000000e+00 : f32
    %33 = vector.broadcast %cst_15 : f32 to vector<32x32xf32>
    %34 = arith.divf %33, %32 : vector<32x32xf32>
    %35 = arith.mulf %27, %34 : vector<32x32xf32>
    %36 = vector.shape_cast %26 : vector<32x32xf32> to vector<8x4x32xf32>
    %c0_16 = arith.constant 0 : index
    %c0_17 = arith.constant 0 : index
    %37 = vector.load %arg5[%c0_16, %c0_17] : memref<4x32xf32, #tpu.memory_space<vmem>>, vector<4x32xf32>
    %c0_18 = arith.constant 0 : index
    %c0_19 = arith.constant 0 : index
    %38 = vector.load %arg6[%c0_18, %c0_19] : memref<1x32xf32, #tpu.memory_space<vmem>>, vector<1x32xf32>
    %39 = vector.extract_strided_slice %37 {offsets = [3, 0], sizes = [1, 32], strides = [1, 1]} : vector<4x32xf32> to vector<1x32xf32>
    %40 = vector.shape_cast %39 : vector<1x32xf32> to vector<1x1x32xf32>
    %41 = vector.broadcast %40 : vector<1x1x32xf32> to vector<8x4x32xf32>
    %42 = arith.mulf %41, %36 : vector<8x4x32xf32>
    %43 = vector.shape_cast %38 : vector<1x32xf32> to vector<1x1x32xf32>
    %44 = vector.broadcast %43 : vector<1x1x32xf32> to vector<8x4x32xf32>
    %45 = arith.addf %42, %44 : vector<8x4x32xf32>
    %c0_20 = arith.constant 0 : index
    %c0_21 = arith.constant 0 : index
    %c0_22 = arith.constant 0 : index
    %46 = vector.load %arg21[%c0_20, %c0_21, %c0_22] : memref<8x4x32xf32, #tpu.memory_space<vmem>>, vector<8x4x32xf32>
    tpu.vector_store %arg21[%c0_20, %c0_21, %c0_22], %45 {strides = array<i32>} : memref<8x4x32xf32, #tpu.memory_space<vmem>>, vector<8x4x32xf32>,
    %47 = vector.extract_strided_slice %37 {offsets = [0, 0], sizes = [1, 32], strides = [1, 1]} : vector<4x32xf32> to vector<1x32xf32>
    %48 = vector.shape_cast %47 : vector<1x32xf32> to vector<1x1x32xf32>
    %c0_23 = arith.constant 0 : index
    %c3 = arith.constant 3 : index
    %c0_24 = arith.constant 0 : index
    %49 = vector.load %arg21[%c0_23, %c3, %c0_24] : memref<8x4x32xf32, #tpu.memory_space<vmem>>, vector<8x1x32xf32>
    %50 = vector.extract_strided_slice %36 {offsets = [0, 0, 0], sizes = [8, 1, 32], strides = [1, 1, 1]} : vector<8x4x32xf32> to vector<8x1x32xf32>
    %51 = vector.broadcast %48 : vector<1x1x32xf32> to vector<8x1x32xf32>
    %52 = arith.mulf %51, %50 : vector<8x1x32xf32>
    %53 = arith.addf %49, %52 : vector<8x1x32xf32>
    %c0_25 = arith.constant 0 : index
    %c3_26 = arith.constant 3 : index
    %c0_27 = arith.constant 0 : index
    %54 = vector.load %arg21[%c0_25, %c3_26, %c0_27] : memref<8x4x32xf32, #tpu.memory_space<vmem>>, vector<8x1x32xf32>
    tpu.vector_store %arg21[%c0_25, %c3_26, %c0_27], %53 {strides = array<i32>} : memref<8x4x32xf32, #tpu.memory_space<vmem>>, vector<8x1x32xf32>,
    %55 = vector.extract_strided_slice %37 {offsets = [1, 0], sizes = [1, 32], strides = [1, 1]} : vector<4x32xf32> to vector<1x32xf32>
    %56 = vector.shape_cast %55 : vector<1x32xf32> to vector<1x1x32xf32>
    %c0_28 = arith.constant 0 : index
    %c2 = arith.constant 2 : index
    %c0_29 = arith.constant 0 : index
    %57 = vector.load %arg21[%c0_28, %c2, %c0_29] : memref<8x4x32xf32, #tpu.memory_space<vmem>>, vector<8x2x32xf32>
    %58 = vector.extract_strided_slice %36 {offsets = [0, 0, 0], sizes = [8, 2, 32], strides = [1, 1, 1]} : vector<8x4x32xf32> to vector<8x2x32xf32>
    %59 = vector.broadcast %56 : vector<1x1x32xf32> to vector<8x2x32xf32>
    %60 = arith.mulf %59, %58 : vector<8x2x32xf32>
    %61 = arith.addf %57, %60 : vector<8x2x32xf32>
    %c0_30 = arith.constant 0 : index
    %c2_31 = arith.constant 2 : index
    %c0_32 = arith.constant 0 : index
    %62 = vector.load %arg21[%c0_30, %c2_31, %c0_32] : memref<8x4x32xf32, #tpu.memory_space<vmem>>, vector<8x2x32xf32>
    tpu.vector_store %arg21[%c0_30, %c2_31, %c0_32], %61 {strides = array<i32>} : memref<8x4x32xf32, #tpu.memory_space<vmem>>, vector<8x2x32xf32>,
    %63 = vector.extract_strided_slice %37 {offsets = [2, 0], sizes = [1, 32], strides = [1, 1]} : vector<4x32xf32> to vector<1x32xf32>
    %64 = vector.shape_cast %63 : vector<1x32xf32> to vector<1x1x32xf32>
    %c0_33 = arith.constant 0 : index
    %c1 = arith.constant 1 : index
    %c0_34 = arith.constant 0 : index
    %65 = vector.load %arg21[%c0_33, %c1, %c0_34] : memref<8x4x32xf32, #tpu.memory_space<vmem>>, vector<8x3x32xf32>
    %66 = vector.extract_strided_slice %36 {offsets = [0, 0, 0], sizes = [8, 3, 32], strides = [1, 1, 1]} : vector<8x4x32xf32> to vector<8x3x32xf32>
    %67 = vector.broadcast %64 : vector<1x1x32xf32> to vector<8x3x32xf32>
    %68 = arith.mulf %67, %66 : vector<8x3x32xf32>
    %69 = arith.addf %65, %68 : vector<8x3x32xf32>
    %c0_35 = arith.constant 0 : index
    %c1_36 = arith.constant 1 : index
    %c0_37 = arith.constant 0 : index
    %70 = vector.load %arg21[%c0_35, %c1_36, %c0_37] : memref<8x4x32xf32, #tpu.memory_space<vmem>>, vector<8x3x32xf32>
    tpu.vector_store %arg21[%c0_35, %c1_36, %c0_37], %69 {strides = array<i32>} : memref<8x4x32xf32, #tpu.memory_space<vmem>>, vector<8x3x32xf32>,
    %c0_38 = arith.constant 0 : index
    %c0_39 = arith.constant 0 : index
    %c0_40 = arith.constant 0 : index
    %71 = vector.load %arg21[%c0_38, %c0_39, %c0_40] : memref<8x4x32xf32, #tpu.memory_space<vmem>>, vector<8x4x32xf32>
    %cst_41 = arith.constant 0.000000e+00 : f32
    %72 = vector.broadcast %cst_41 : f32 to vector<8x4x32xf32>
    %73 = arith.subf %72, %71 : vector<8x4x32xf32>
    %74 = math.exp %73 : vector<8x4x32xf32>
    %cst_42 = arith.constant 1.000000e+00 : f32
    %75 = vector.broadcast %cst_42 : f32 to vector<8x4x32xf32>
    %76 = arith.addf %75, %74 : vector<8x4x32xf32>
    %cst_43 = arith.constant 1.000000e+00 : f32
    %77 = vector.broadcast %cst_43 : f32 to vector<8x4x32xf32>
    %78 = arith.divf %77, %76 : vector<8x4x32xf32>
    %79 = arith.mulf %71, %78 : vector<8x4x32xf32>
    %80 = vector.shape_cast %79 : vector<8x4x32xf32> to vector<32x32xf32>
    %c0_44 = arith.constant 0 : index
    %c0_45 = arith.constant 0 : index
    %81 = vector.load %arg7[%c0_44, %c0_45] : memref<32x34xf32, #tpu.memory_space<vmem>>, vector<32x34xf32>
    %cst_46 = arith.constant dense<0.000000e+00> : vector<32x34xf32>
    %82 = tpu.matmul %80, %81, %cst_46 {dimension_numbers = #tpu.dot_dimension_numbers<[1], [0], [0], [1], [0, 0, 1, 1], [], []>} : vector<32x32xf32>, vector<32x34xf32>, vector<32x34xf32> -> vector<32x34xf32>
    %83 = vector.extract_strided_slice %82 {offsets = [0, 0], sizes = [32, 2], strides = [1, 1]} : vector<32x34xf32> to vector<32x2xf32>
    %c0_47 = arith.constant 0 : index
    %c0_48 = arith.constant 0 : index
    %84 = vector.load %arg8[%c0_47, %c0_48] : memref<2x32xf32, #tpu.memory_space<vmem>>, vector<2x32xf32>
    %cst_49 = arith.constant dense<0.000000e+00> : vector<32x32xf32>
    %85 = tpu.matmul %83, %84, %cst_49 {dimension_numbers = #tpu.dot_dimension_numbers<[1], [0], [0], [1], [0, 0, 1, 1], [], []>} : vector<32x2xf32>, vector<2x32xf32>, vector<32x32xf32> -> vector<32x32xf32>
    %c0_50 = arith.constant 0 : index
    %c0_51 = arith.constant 0 : index
    %86 = vector.load %arg9[%c0_50, %c0_51] : memref<1x32xf32, #tpu.memory_space<vmem>>, vector<1x32xf32>
    %87 = vector.broadcast %86 : vector<1x32xf32> to vector<32x32xf32>
    %88 = arith.addf %85, %87 : vector<32x32xf32>
    %cst_52 = arith.constant 0.000000e+00 : f32
    %89 = vector.broadcast %cst_52 : f32 to vector<32x32xf32>
    %90 = arith.maximumf %88, %89 : vector<32x32xf32>
    %91 = math.absf %88 : vector<32x32xf32>
    %cst_53 = arith.constant 0.000000e+00 : f32
    %92 = vector.broadcast %cst_53 : f32 to vector<32x32xf32>
    %93 = arith.subf %92, %91 : vector<32x32xf32>
    %94 = math.exp %93 : vector<32x32xf32>
    %95 = math.log1p %94 : vector<32x32xf32>
    %96 = arith.addf %90, %95 : vector<32x32xf32>
    %97 = vector.extract_strided_slice %82 {offsets = [0, 2], sizes = [32, 16], strides = [1, 1]} : vector<32x34xf32> to vector<32x16xf32>
    %98 = vector.extract_strided_slice %82 {offsets = [0, 18], sizes = [32, 16], strides = [1, 1]} : vector<32x34xf32> to vector<32x16xf32>
    %99 = vector.shape_cast %98 : vector<32x16xf32> to vector<8x4x16xf32>
    %c0_54 = arith.constant 0 : index
    %c0_55 = arith.constant 0 : index
    %100 = vector.load %arg10[%c0_54, %c0_55] : memref<16x32xf32, #tpu.memory_space<vmem>>, vector<16x32xf32>
    %101 = math.exp %100 : vector<16x32xf32>
    %cst_56 = arith.constant 0.000000e+00 : f32
    %102 = vector.broadcast %cst_56 : f32 to vector<16x32xf32>
    %103 = arith.subf %102, %101 : vector<16x32xf32>
    %104 = vector.shape_cast %96 : vector<32x32xf32> to vector<32x1x32xf32>
    %105 = vector.shape_cast %103 : vector<16x32xf32> to vector<1x16x32xf32>
    %106 = vector.broadcast %104 : vector<32x1x32xf32> to vector<32x16x32xf32>
    %107 = vector.broadcast %105 : vector<1x16x32xf32> to vector<32x16x32xf32>
    %108 = arith.mulf %106, %107 : vector<32x16x32xf32>
    %109 = math.exp %108 : vector<32x16x32xf32>
    %110 = vector.shape_cast %109 : vector<32x16x32xf32> to vector<8x4x16x32xf32>
    %111 = vector.shape_cast %97 : vector<32x16xf32> to vector<32x16x1xf32>
    %112 = arith.mulf %96, %80 : vector<32x32xf32>
    %113 = vector.shape_cast %112 : vector<32x32xf32> to vector<32x1x32xf32>
    %114 = vector.broadcast %111 : vector<32x16x1xf32> to vector<32x16x32xf32>
    %115 = vector.broadcast %113 : vector<32x1x32xf32> to vector<32x16x32xf32>
    %116 = arith.mulf %114, %115 : vector<32x16x32xf32>
    %117 = vector.shape_cast %116 : vector<32x16x32xf32> to vector<8x4x16x32xf32>
    %cst_57 = arith.constant 0.000000e+00 : f32
    %118 = vector.broadcast %cst_57 : f32 to vector<8x16x32xf32>
    %119 = vector.extract_strided_slice %110 {offsets = [0, 0, 0, 0], sizes = [8, 1, 16, 32], strides = [1, 1, 1, 1]} : vector<8x4x16x32xf32> to vector<8x1x16x32xf32>
    %120 = vector.shape_cast %119 : vector<8x1x16x32xf32> to vector<8x16x32xf32>
    %121 = arith.mulf %120, %118 : vector<8x16x32xf32>
    %122 = vector.extract_strided_slice %117 {offsets = [0, 0, 0, 0], sizes = [8, 1, 16, 32], strides = [1, 1, 1, 1]} : vector<8x4x16x32xf32> to vector<8x1x16x32xf32>
    %123 = vector.shape_cast %122 : vector<8x1x16x32xf32> to vector<8x16x32xf32>
    %124 = arith.addf %121, %123 : vector<8x16x32xf32>
    %125 = vector.extract_strided_slice %99 {offsets = [0, 0, 0], sizes = [8, 1, 16], strides = [1, 1, 1]} : vector<8x4x16xf32> to vector<8x1x16xf32>
    %126 = vector.shape_cast %125 : vector<8x1x16xf32> to vector<8x16xf32>
    %127 = vector.shape_cast %126 : vector<8x16xf32> to vector<8x16x1xf32>
    %128 = vector.broadcast %127 : vector<8x16x1xf32> to vector<8x16x32xf32>
    %129 = arith.mulf %128, %124 : vector<8x16x32xf32>
    %cst_58 = arith.constant dense<0.000000e+00> : vector<8x32xf32>
    %130 = vector.multi_reduction <add>, %129, %cst_58 [1] : vector<8x16x32xf32> to vector<8x32xf32>
    %131 = vector.shape_cast %130 : vector<8x32xf32> to vector<8x1x32xf32>
    %c0_59 = arith.constant 0 : index
    %c0_60 = arith.constant 0 : index
    %c0_61 = arith.constant 0 : index
    %132 = vector.load %arg22[%c0_59, %c0_60, %c0_61] : memref<8x4x32xf32, #tpu.memory_space<vmem>>, vector<8x1x32xf32>
    tpu.vector_store %arg22[%c0_59, %c0_60, %c0_61], %131 {strides = array<i32>} : memref<8x4x32xf32, #tpu.memory_space<vmem>>, vector<8x1x32xf32>,
    %133 = vector.extract_strided_slice %110 {offsets = [0, 1, 0, 0], sizes = [8, 1, 16, 32], strides = [1, 1, 1, 1]} : vector<8x4x16x32xf32> to vector<8x1x16x32xf32>
    %134 = vector.shape_cast %133 : vector<8x1x16x32xf32> to vector<8x16x32xf32>
    %135 = arith.mulf %134, %124 : vector<8x16x32xf32>
    %136 = vector.extract_strided_slice %117 {offsets = [0, 1, 0, 0], sizes = [8, 1, 16, 32], strides = [1, 1, 1, 1]} : vector<8x4x16x32xf32> to vector<8x1x16x32xf32>
    %137 = vector.shape_cast %136 : vector<8x1x16x32xf32> to vector<8x16x32xf32>
    %138 = arith.addf %135, %137 : vector<8x16x32xf32>
    %139 = vector.extract_strided_slice %99 {offsets = [0, 1, 0], sizes = [8, 1, 16], strides = [1, 1, 1]} : vector<8x4x16xf32> to vector<8x1x16xf32>
    %140 = vector.shape_cast %139 : vector<8x1x16xf32> to vector<8x16xf32>
    %141 = vector.shape_cast %140 : vector<8x16xf32> to vector<8x16x1xf32>
    %142 = vector.broadcast %141 : vector<8x16x1xf32> to vector<8x16x32xf32>
    %143 = arith.mulf %142, %138 : vector<8x16x32xf32>
    %cst_62 = arith.constant dense<0.000000e+00> : vector<8x32xf32>
    %144 = vector.multi_reduction <add>, %143, %cst_62 [1] : vector<8x16x32xf32> to vector<8x32xf32>
    %145 = vector.shape_cast %144 : vector<8x32xf32> to vector<8x1x32xf32>
    %c0_63 = arith.constant 0 : index
    %c1_64 = arith.constant 1 : index
    %c0_65 = arith.constant 0 : index
    %146 = vector.load %arg22[%c0_63, %c1_64, %c0_65] : memref<8x4x32xf32, #tpu.memory_space<vmem>>, vector<8x1x32xf32>
    tpu.vector_store %arg22[%c0_63, %c1_64, %c0_65], %145 {strides = array<i32>} : memref<8x4x32xf32, #tpu.memory_space<vmem>>, vector<8x1x32xf32>,
    %147 = vector.extract_strided_slice %110 {offsets = [0, 2, 0, 0], sizes = [8, 1, 16, 32], strides = [1, 1, 1, 1]} : vector<8x4x16x32xf32> to vector<8x1x16x32xf32>
    %148 = vector.shape_cast %147 : vector<8x1x16x32xf32> to vector<8x16x32xf32>
    %149 = arith.mulf %148, %138 : vector<8x16x32xf32>
    %150 = vector.extract_strided_slice %117 {offsets = [0, 2, 0, 0], sizes = [8, 1, 16, 32], strides = [1, 1, 1, 1]} : vector<8x4x16x32xf32> to vector<8x1x16x32xf32>
    %151 = vector.shape_cast %150 : vector<8x1x16x32xf32> to vector<8x16x32xf32>
    %152 = arith.addf %149, %151 : vector<8x16x32xf32>
    %153 = vector.extract_strided_slice %99 {offsets = [0, 2, 0], sizes = [8, 1, 16], strides = [1, 1, 1]} : vector<8x4x16xf32> to vector<8x1x16xf32>
    %154 = vector.shape_cast %153 : vector<8x1x16xf32> to vector<8x16xf32>
    %155 = vector.shape_cast %154 : vector<8x16xf32> to vector<8x16x1xf32>
    %156 = vector.broadcast %155 : vector<8x16x1xf32> to vector<8x16x32xf32>
    %157 = arith.mulf %156, %152 : vector<8x16x32xf32>
    %cst_66 = arith.constant dense<0.000000e+00> : vector<8x32xf32>
    %158 = vector.multi_reduction <add>, %157, %cst_66 [1] : vector<8x16x32xf32> to vector<8x32xf32>
    %159 = vector.shape_cast %158 : vector<8x32xf32> to vector<8x1x32xf32>
    %c0_67 = arith.constant 0 : index
    %c2_68 = arith.constant 2 : index
    %c0_69 = arith.constant 0 : index
    %160 = vector.load %arg22[%c0_67, %c2_68, %c0_69] : memref<8x4x32xf32, #tpu.memory_space<vmem>>, vector<8x1x32xf32>
    tpu.vector_store %arg22[%c0_67, %c2_68, %c0_69], %159 {strides = array<i32>} : memref<8x4x32xf32, #tpu.memory_space<vmem>>, vector<8x1x32xf32>,
    %161 = vector.extract_strided_slice %110 {offsets = [0, 3, 0, 0], sizes = [8, 1, 16, 32], strides = [1, 1, 1, 1]} : vector<8x4x16x32xf32> to vector<8x1x16x32xf32>
    %162 = vector.shape_cast %161 : vector<8x1x16x32xf32> to vector<8x16x32xf32>
    %163 = arith.mulf %162, %152 : vector<8x16x32xf32>
    %164 = vector.extract_strided_slice %117 {offsets = [0, 3, 0, 0], sizes = [8, 1, 16, 32], strides = [1, 1, 1, 1]} : vector<8x4x16x32xf32> to vector<8x1x16x32xf32>
    %165 = vector.shape_cast %164 : vector<8x1x16x32xf32> to vector<8x16x32xf32>
    %166 = arith.addf %163, %165 : vector<8x16x32xf32>
    %167 = vector.extract_strided_slice %99 {offsets = [0, 3, 0], sizes = [8, 1, 16], strides = [1, 1, 1]} : vector<8x4x16xf32> to vector<8x1x16xf32>
    %168 = vector.shape_cast %167 : vector<8x1x16xf32> to vector<8x16xf32>
    %169 = vector.shape_cast %168 : vector<8x16xf32> to vector<8x16x1xf32>
    %170 = vector.broadcast %169 : vector<8x16x1xf32> to vector<8x16x32xf32>
    %171 = arith.mulf %170, %166 : vector<8x16x32xf32>
    %cst_70 = arith.constant dense<0.000000e+00> : vector<8x32xf32>
    %172 = vector.multi_reduction <add>, %171, %cst_70 [1] : vector<8x16x32xf32> to vector<8x32xf32>
    %173 = vector.shape_cast %172 : vector<8x32xf32> to vector<8x1x32xf32>
    %c0_71 = arith.constant 0 : index
    %c3_72 = arith.constant 3 : index
    %c0_73 = arith.constant 0 : index
    %174 = vector.load %arg22[%c0_71, %c3_72, %c0_73] : memref<8x4x32xf32, #tpu.memory_space<vmem>>, vector<8x1x32xf32>
    tpu.vector_store %arg22[%c0_71, %c3_72, %c0_73], %173 {strides = array<i32>} : memref<8x4x32xf32, #tpu.memory_space<vmem>>, vector<8x1x32xf32>,
    %c0_74 = arith.constant 0 : index
    %c0_75 = arith.constant 0 : index
    %c0_76 = arith.constant 0 : index
    %175 = vector.load %arg22[%c0_74, %c0_75, %c0_76] : memref<8x4x32xf32, #tpu.memory_space<vmem>>, vector<8x4x32xf32>
    %c0_77 = arith.constant 0 : index
    %c0_78 = arith.constant 0 : index
    %176 = vector.load %arg11[%c0_77, %c0_78] : memref<1x32xf32, #tpu.memory_space<vmem>>, vector<1x32xf32>
    %177 = vector.shape_cast %176 : vector<1x32xf32> to vector<1x1x32xf32>
    %178 = vector.broadcast %177 : vector<1x1x32xf32> to vector<8x4x32xf32>
    %179 = arith.mulf %79, %178 : vector<8x4x32xf32>
    %180 = arith.addf %175, %179 : vector<8x4x32xf32>
    %c0_79 = arith.constant 0 : index
    %c0_80 = arith.constant 0 : index
    %c0_81 = arith.constant 0 : index
    %181 = vector.load %arg22[%c0_79, %c0_80, %c0_81] : memref<8x4x32xf32, #tpu.memory_space<vmem>>, vector<8x4x32xf32>
    tpu.vector_store %arg22[%c0_79, %c0_80, %c0_81], %180 {strides = array<i32>} : memref<8x4x32xf32, #tpu.memory_space<vmem>>, vector<8x4x32xf32>,
    %c0_82 = arith.constant 0 : index
    %c0_83 = arith.constant 0 : index
    %182 = vector.load %arg12[%c0_82, %c0_83] : memref<4x32xf32, #tpu.memory_space<vmem>>, vector<4x32xf32>
    %c0_84 = arith.constant 0 : index
    %c0_85 = arith.constant 0 : index
    %183 = vector.load %arg13[%c0_84, %c0_85] : memref<1x32xf32, #tpu.memory_space<vmem>>, vector<1x32xf32>
    %184 = vector.extract_strided_slice %182 {offsets = [3, 0], sizes = [1, 32], strides = [1, 1]} : vector<4x32xf32> to vector<1x32xf32>
    %185 = vector.shape_cast %184 : vector<1x32xf32> to vector<1x1x32xf32>
    %186 = vector.broadcast %185 : vector<1x1x32xf32> to vector<8x4x32xf32>
    %187 = arith.mulf %186, %36 : vector<8x4x32xf32>
    %188 = vector.shape_cast %183 : vector<1x32xf32> to vector<1x1x32xf32>
    %189 = vector.broadcast %188 : vector<1x1x32xf32> to vector<8x4x32xf32>
    %190 = arith.addf %187, %189 : vector<8x4x32xf32>
    %c0_86 = arith.constant 0 : index
    %c0_87 = arith.constant 0 : index
    %c0_88 = arith.constant 0 : index
    %191 = vector.load %arg21[%c0_86, %c0_87, %c0_88] : memref<8x4x32xf32, #tpu.memory_space<vmem>>, vector<8x4x32xf32>
    tpu.vector_store %arg21[%c0_86, %c0_87, %c0_88], %190 {strides = array<i32>} : memref<8x4x32xf32, #tpu.memory_space<vmem>>, vector<8x4x32xf32>,
    %192 = vector.extract_strided_slice %182 {offsets = [0, 0], sizes = [1, 32], strides = [1, 1]} : vector<4x32xf32> to vector<1x32xf32>
    %193 = vector.shape_cast %192 : vector<1x32xf32> to vector<1x1x32xf32>
    %c0_89 = arith.constant 0 : index
    %c0_90 = arith.constant 0 : index
    %c0_91 = arith.constant 0 : index
    %194 = vector.load %arg21[%c0_89, %c0_90, %c0_91] : memref<8x4x32xf32, #tpu.memory_space<vmem>>, vector<8x1x32xf32>
    %195 = vector.extract_strided_slice %36 {offsets = [0, 3, 0], sizes = [8, 1, 32], strides = [1, 1, 1]} : vector<8x4x32xf32> to vector<8x1x32xf32>
    %196 = vector.broadcast %193 : vector<1x1x32xf32> to vector<8x1x32xf32>
    %197 = arith.mulf %196, %195 : vector<8x1x32xf32>
    %198 = arith.addf %194, %197 : vector<8x1x32xf32>
    %c0_92 = arith.constant 0 : index
    %c0_93 = arith.constant 0 : index
    %c0_94 = arith.constant 0 : index
    %199 = vector.load %arg21[%c0_92, %c0_93, %c0_94] : memref<8x4x32xf32, #tpu.memory_space<vmem>>, vector<8x1x32xf32>
    tpu.vector_store %arg21[%c0_92, %c0_93, %c0_94], %198 {strides = array<i32>} : memref<8x4x32xf32, #tpu.memory_space<vmem>>, vector<8x1x32xf32>,
    %200 = vector.extract_strided_slice %182 {offsets = [1, 0], sizes = [1, 32], strides = [1, 1]} : vector<4x32xf32> to vector<1x32xf32>
    %201 = vector.shape_cast %200 : vector<1x32xf32> to vector<1x1x32xf32>
    %c0_95 = arith.constant 0 : index
    %c0_96 = arith.constant 0 : index
    %c0_97 = arith.constant 0 : index
    %202 = vector.load %arg21[%c0_95, %c0_96, %c0_97] : memref<8x4x32xf32, #tpu.memory_space<vmem>>, vector<8x2x32xf32>
    %203 = vector.extract_strided_slice %36 {offsets = [0, 2, 0], sizes = [8, 2, 32], strides = [1, 1, 1]} : vector<8x4x32xf32> to vector<8x2x32xf32>
    %204 = vector.broadcast %201 : vector<1x1x32xf32> to vector<8x2x32xf32>
    %205 = arith.mulf %204, %203 : vector<8x2x32xf32>
    %206 = arith.addf %202, %205 : vector<8x2x32xf32>
    %c0_98 = arith.constant 0 : index
    %c0_99 = arith.constant 0 : index
    %c0_100 = arith.constant 0 : index
    %207 = vector.load %arg21[%c0_98, %c0_99, %c0_100] : memref<8x4x32xf32, #tpu.memory_space<vmem>>, vector<8x2x32xf32>
    tpu.vector_store %arg21[%c0_98, %c0_99, %c0_100], %206 {strides = array<i32>} : memref<8x4x32xf32, #tpu.memory_space<vmem>>, vector<8x2x32xf32>,
    %208 = vector.extract_strided_slice %182 {offsets = [2, 0], sizes = [1, 32], strides = [1, 1]} : vector<4x32xf32> to vector<1x32xf32>
    %209 = vector.shape_cast %208 : vector<1x32xf32> to vector<1x1x32xf32>
    %c0_101 = arith.constant 0 : index
    %c0_102 = arith.constant 0 : index
    %c0_103 = arith.constant 0 : index
    %210 = vector.load %arg21[%c0_101, %c0_102, %c0_103] : memref<8x4x32xf32, #tpu.memory_space<vmem>>, vector<8x3x32xf32>
    %211 = vector.extract_strided_slice %36 {offsets = [0, 1, 0], sizes = [8, 3, 32], strides = [1, 1, 1]} : vector<8x4x32xf32> to vector<8x3x32xf32>
    %212 = vector.broadcast %209 : vector<1x1x32xf32> to vector<8x3x32xf32>
    %213 = arith.mulf %212, %211 : vector<8x3x32xf32>
    %214 = arith.addf %210, %213 : vector<8x3x32xf32>
    %c0_104 = arith.constant 0 : index
    %c0_105 = arith.constant 0 : index
    %c0_106 = arith.constant 0 : index
    %215 = vector.load %arg21[%c0_104, %c0_105, %c0_106] : memref<8x4x32xf32, #tpu.memory_space<vmem>>, vector<8x3x32xf32>
    tpu.vector_store %arg21[%c0_104, %c0_105, %c0_106], %214 {strides = array<i32>} : memref<8x4x32xf32, #tpu.memory_space<vmem>>, vector<8x3x32xf32>,
    %c0_107 = arith.constant 0 : index
    %c0_108 = arith.constant 0 : index
    %c0_109 = arith.constant 0 : index
    %216 = vector.load %arg21[%c0_107, %c0_108, %c0_109] : memref<8x4x32xf32, #tpu.memory_space<vmem>>, vector<8x4x32xf32>
    %cst_110 = arith.constant 0.000000e+00 : f32
    %217 = vector.broadcast %cst_110 : f32 to vector<8x4x32xf32>
    %218 = arith.subf %217, %216 : vector<8x4x32xf32>
    %219 = math.exp %218 : vector<8x4x32xf32>
    %cst_111 = arith.constant 1.000000e+00 : f32
    %220 = vector.broadcast %cst_111 : f32 to vector<8x4x32xf32>
    %221 = arith.addf %220, %219 : vector<8x4x32xf32>
    %cst_112 = arith.constant 1.000000e+00 : f32
    %222 = vector.broadcast %cst_112 : f32 to vector<8x4x32xf32>
    %223 = arith.divf %222, %221 : vector<8x4x32xf32>
    %224 = arith.mulf %216, %223 : vector<8x4x32xf32>
    %225 = vector.shape_cast %224 : vector<8x4x32xf32> to vector<32x32xf32>
    %c0_113 = arith.constant 0 : index
    %c0_114 = arith.constant 0 : index
    %226 = vector.load %arg14[%c0_113, %c0_114] : memref<32x34xf32, #tpu.memory_space<vmem>>, vector<32x34xf32>
    %cst_115 = arith.constant dense<0.000000e+00> : vector<32x34xf32>
    %227 = tpu.matmul %225, %226, %cst_115 {dimension_numbers = #tpu.dot_dimension_numbers<[1], [0], [0], [1], [0, 0, 1, 1], [], []>} : vector<32x32xf32>, vector<32x34xf32>, vector<32x34xf32> -> vector<32x34xf32>
    %228 = vector.extract_strided_slice %227 {offsets = [0, 0], sizes = [32, 2], strides = [1, 1]} : vector<32x34xf32> to vector<32x2xf32>
    %c0_116 = arith.constant 0 : index
    %c0_117 = arith.constant 0 : index
    %229 = vector.load %arg15[%c0_116, %c0_117] : memref<2x32xf32, #tpu.memory_space<vmem>>, vector<2x32xf32>
    %cst_118 = arith.constant dense<0.000000e+00> : vector<32x32xf32>
    %230 = tpu.matmul %228, %229, %cst_118 {dimension_numbers = #tpu.dot_dimension_numbers<[1], [0], [0], [1], [0, 0, 1, 1], [], []>} : vector<32x2xf32>, vector<2x32xf32>, vector<32x32xf32> -> vector<32x32xf32>
    %c0_119 = arith.constant 0 : index
    %c0_120 = arith.constant 0 : index
    %231 = vector.load %arg16[%c0_119, %c0_120] : memref<1x32xf32, #tpu.memory_space<vmem>>, vector<1x32xf32>
    %232 = vector.broadcast %231 : vector<1x32xf32> to vector<32x32xf32>
    %233 = arith.addf %230, %232 : vector<32x32xf32>
    %cst_121 = arith.constant 0.000000e+00 : f32
    %234 = vector.broadcast %cst_121 : f32 to vector<32x32xf32>
    %235 = arith.maximumf %233, %234 : vector<32x32xf32>
    %236 = math.absf %233 : vector<32x32xf32>
    %cst_122 = arith.constant 0.000000e+00 : f32
    %237 = vector.broadcast %cst_122 : f32 to vector<32x32xf32>
    %238 = arith.subf %237, %236 : vector<32x32xf32>
    %239 = math.exp %238 : vector<32x32xf32>
    %240 = math.log1p %239 : vector<32x32xf32>
    %241 = arith.addf %235, %240 : vector<32x32xf32>
    %242 = vector.extract_strided_slice %227 {offsets = [0, 2], sizes = [32, 16], strides = [1, 1]} : vector<32x34xf32> to vector<32x16xf32>
    %243 = vector.extract_strided_slice %227 {offsets = [0, 18], sizes = [32, 16], strides = [1, 1]} : vector<32x34xf32> to vector<32x16xf32>
    %244 = vector.shape_cast %243 : vector<32x16xf32> to vector<8x4x16xf32>
    %c0_123 = arith.constant 0 : index
    %c0_124 = arith.constant 0 : index
    %245 = vector.load %arg17[%c0_123, %c0_124] : memref<16x32xf32, #tpu.memory_space<vmem>>, vector<16x32xf32>
    %246 = math.exp %245 : vector<16x32xf32>
    %cst_125 = arith.constant 0.000000e+00 : f32
    %247 = vector.broadcast %cst_125 : f32 to vector<16x32xf32>
    %248 = arith.subf %247, %246 : vector<16x32xf32>
    %249 = vector.shape_cast %241 : vector<32x32xf32> to vector<32x1x32xf32>
    %250 = vector.shape_cast %248 : vector<16x32xf32> to vector<1x16x32xf32>
    %251 = vector.broadcast %249 : vector<32x1x32xf32> to vector<32x16x32xf32>
    %252 = vector.broadcast %250 : vector<1x16x32xf32> to vector<32x16x32xf32>
    %253 = arith.mulf %251, %252 : vector<32x16x32xf32>
    %254 = math.exp %253 : vector<32x16x32xf32>
    %255 = vector.shape_cast %254 : vector<32x16x32xf32> to vector<8x4x16x32xf32>
    %256 = vector.shape_cast %242 : vector<32x16xf32> to vector<32x16x1xf32>
    %257 = arith.mulf %241, %225 : vector<32x32xf32>
    %258 = vector.shape_cast %257 : vector<32x32xf32> to vector<32x1x32xf32>
    %259 = vector.broadcast %256 : vector<32x16x1xf32> to vector<32x16x32xf32>
    %260 = vector.broadcast %258 : vector<32x1x32xf32> to vector<32x16x32xf32>
    %261 = arith.mulf %259, %260 : vector<32x16x32xf32>
    %262 = vector.shape_cast %261 : vector<32x16x32xf32> to vector<8x4x16x32xf32>
    %cst_126 = arith.constant 0.000000e+00 : f32
    %263 = vector.broadcast %cst_126 : f32 to vector<8x16x32xf32>
    %264 = vector.extract_strided_slice %255 {offsets = [0, 3, 0, 0], sizes = [8, 1, 16, 32], strides = [1, 1, 1, 1]} : vector<8x4x16x32xf32> to vector<8x1x16x32xf32>
    %265 = vector.shape_cast %264 : vector<8x1x16x32xf32> to vector<8x16x32xf32>
    %266 = arith.mulf %265, %263 : vector<8x16x32xf32>
    %267 = vector.extract_strided_slice %262 {offsets = [0, 3, 0, 0], sizes = [8, 1, 16, 32], strides = [1, 1, 1, 1]} : vector<8x4x16x32xf32> to vector<8x1x16x32xf32>
    %268 = vector.shape_cast %267 : vector<8x1x16x32xf32> to vector<8x16x32xf32>
    %269 = arith.addf %266, %268 : vector<8x16x32xf32>
    %270 = vector.extract_strided_slice %244 {offsets = [0, 3, 0], sizes = [8, 1, 16], strides = [1, 1, 1]} : vector<8x4x16xf32> to vector<8x1x16xf32>
    %271 = vector.shape_cast %270 : vector<8x1x16xf32> to vector<8x16xf32>
    %272 = vector.shape_cast %271 : vector<8x16xf32> to vector<8x16x1xf32>
    %273 = vector.broadcast %272 : vector<8x16x1xf32> to vector<8x16x32xf32>
    %274 = arith.mulf %273, %269 : vector<8x16x32xf32>
    %cst_127 = arith.constant dense<0.000000e+00> : vector<8x32xf32>
    %275 = vector.multi_reduction <add>, %274, %cst_127 [1] : vector<8x16x32xf32> to vector<8x32xf32>
    %c0_128 = arith.constant 0 : index
    %c3_129 = arith.constant 3 : index
    %c0_130 = arith.constant 0 : index
    %276 = vector.load %arg22[%c0_128, %c3_129, %c0_130] : memref<8x4x32xf32, #tpu.memory_space<vmem>>, vector<8x1x32xf32>
    %277 = vector.shape_cast %275 : vector<8x32xf32> to vector<8x1x32xf32>
    %278 = arith.addf %276, %277 : vector<8x1x32xf32>
    %c0_131 = arith.constant 0 : index
    %c3_132 = arith.constant 3 : index
    %c0_133 = arith.constant 0 : index
    %279 = vector.load %arg22[%c0_131, %c3_132, %c0_133] : memref<8x4x32xf32, #tpu.memory_space<vmem>>, vector<8x1x32xf32>
    tpu.vector_store %arg22[%c0_131, %c3_132, %c0_133], %278 {strides = array<i32>} : memref<8x4x32xf32, #tpu.memory_space<vmem>>, vector<8x1x32xf32>,
    %280 = vector.extract_strided_slice %255 {offsets = [0, 2, 0, 0], sizes = [8, 1, 16, 32], strides = [1, 1, 1, 1]} : vector<8x4x16x32xf32> to vector<8x1x16x32xf32>
    %281 = vector.shape_cast %280 : vector<8x1x16x32xf32> to vector<8x16x32xf32>
    %282 = arith.mulf %281, %269 : vector<8x16x32xf32>
    %283 = vector.extract_strided_slice %262 {offsets = [0, 2, 0, 0], sizes = [8, 1, 16, 32], strides = [1, 1, 1, 1]} : vector<8x4x16x32xf32> to vector<8x1x16x32xf32>
    %284 = vector.shape_cast %283 : vector<8x1x16x32xf32> to vector<8x16x32xf32>
    %285 = arith.addf %282, %284 : vector<8x16x32xf32>
    %286 = vector.extract_strided_slice %244 {offsets = [0, 2, 0], sizes = [8, 1, 16], strides = [1, 1, 1]} : vector<8x4x16xf32> to vector<8x1x16xf32>
    %287 = vector.shape_cast %286 : vector<8x1x16xf32> to vector<8x16xf32>
    %288 = vector.shape_cast %287 : vector<8x16xf32> to vector<8x16x1xf32>
    %289 = vector.broadcast %288 : vector<8x16x1xf32> to vector<8x16x32xf32>
    %290 = arith.mulf %289, %285 : vector<8x16x32xf32>
    %cst_134 = arith.constant dense<0.000000e+00> : vector<8x32xf32>
    %291 = vector.multi_reduction <add>, %290, %cst_134 [1] : vector<8x16x32xf32> to vector<8x32xf32>
    %c0_135 = arith.constant 0 : index
    %c2_136 = arith.constant 2 : index
    %c0_137 = arith.constant 0 : index
    %292 = vector.load %arg22[%c0_135, %c2_136, %c0_137] : memref<8x4x32xf32, #tpu.memory_space<vmem>>, vector<8x1x32xf32>
    %293 = vector.shape_cast %291 : vector<8x32xf32> to vector<8x1x32xf32>
    %294 = arith.addf %292, %293 : vector<8x1x32xf32>
    %c0_138 = arith.constant 0 : index
    %c2_139 = arith.constant 2 : index
    %c0_140 = arith.constant 0 : index
    %295 = vector.load %arg22[%c0_138, %c2_139, %c0_140] : memref<8x4x32xf32, #tpu.memory_space<vmem>>, vector<8x1x32xf32>
    tpu.vector_store %arg22[%c0_138, %c2_139, %c0_140], %294 {strides = array<i32>} : memref<8x4x32xf32, #tpu.memory_space<vmem>>, vector<8x1x32xf32>,
    %296 = vector.extract_strided_slice %255 {offsets = [0, 1, 0, 0], sizes = [8, 1, 16, 32], strides = [1, 1, 1, 1]} : vector<8x4x16x32xf32> to vector<8x1x16x32xf32>
    %297 = vector.shape_cast %296 : vector<8x1x16x32xf32> to vector<8x16x32xf32>
    %298 = arith.mulf %297, %285 : vector<8x16x32xf32>
    %299 = vector.extract_strided_slice %262 {offsets = [0, 1, 0, 0], sizes = [8, 1, 16, 32], strides = [1, 1, 1, 1]} : vector<8x4x16x32xf32> to vector<8x1x16x32xf32>
    %300 = vector.shape_cast %299 : vector<8x1x16x32xf32> to vector<8x16x32xf32>
    %301 = arith.addf %298, %300 : vector<8x16x32xf32>
    %302 = vector.extract_strided_slice %244 {offsets = [0, 1, 0], sizes = [8, 1, 16], strides = [1, 1, 1]} : vector<8x4x16xf32> to vector<8x1x16xf32>
    %303 = vector.shape_cast %302 : vector<8x1x16xf32> to vector<8x16xf32>
    %304 = vector.shape_cast %303 : vector<8x16xf32> to vector<8x16x1xf32>
    %305 = vector.broadcast %304 : vector<8x16x1xf32> to vector<8x16x32xf32>
    %306 = arith.mulf %305, %301 : vector<8x16x32xf32>
    %cst_141 = arith.constant dense<0.000000e+00> : vector<8x32xf32>
    %307 = vector.multi_reduction <add>, %306, %cst_141 [1] : vector<8x16x32xf32> to vector<8x32xf32>
    %c0_142 = arith.constant 0 : index
    %c1_143 = arith.constant 1 : index
    %c0_144 = arith.constant 0 : index
    %308 = vector.load %arg22[%c0_142, %c1_143, %c0_144] : memref<8x4x32xf32, #tpu.memory_space<vmem>>, vector<8x1x32xf32>
    %309 = vector.shape_cast %307 : vector<8x32xf32> to vector<8x1x32xf32>
    %310 = arith.addf %308, %309 : vector<8x1x32xf32>
    %c0_145 = arith.constant 0 : index
    %c1_146 = arith.constant 1 : index
    %c0_147 = arith.constant 0 : index
    %311 = vector.load %arg22[%c0_145, %c1_146, %c0_147] : memref<8x4x32xf32, #tpu.memory_space<vmem>>, vector<8x1x32xf32>
    tpu.vector_store %arg22[%c0_145, %c1_146, %c0_147], %310 {strides = array<i32>} : memref<8x4x32xf32, #tpu.memory_space<vmem>>, vector<8x1x32xf32>,
    %312 = vector.extract_strided_slice %255 {offsets = [0, 0, 0, 0], sizes = [8, 1, 16, 32], strides = [1, 1, 1, 1]} : vector<8x4x16x32xf32> to vector<8x1x16x32xf32>
    %313 = vector.shape_cast %312 : vector<8x1x16x32xf32> to vector<8x16x32xf32>
    %314 = arith.mulf %313, %301 : vector<8x16x32xf32>
    %315 = vector.extract_strided_slice %262 {offsets = [0, 0, 0, 0], sizes = [8, 1, 16, 32], strides = [1, 1, 1, 1]} : vector<8x4x16x32xf32> to vector<8x1x16x32xf32>
    %316 = vector.shape_cast %315 : vector<8x1x16x32xf32> to vector<8x16x32xf32>
    %317 = arith.addf %314, %316 : vector<8x16x32xf32>
    %318 = vector.extract_strided_slice %244 {offsets = [0, 0, 0], sizes = [8, 1, 16], strides = [1, 1, 1]} : vector<8x4x16xf32> to vector<8x1x16xf32>
    %319 = vector.shape_cast %318 : vector<8x1x16xf32> to vector<8x16xf32>
    %320 = vector.shape_cast %319 : vector<8x16xf32> to vector<8x16x1xf32>
    %321 = vector.broadcast %320 : vector<8x16x1xf32> to vector<8x16x32xf32>
    %322 = arith.mulf %321, %317 : vector<8x16x32xf32>
    %cst_148 = arith.constant dense<0.000000e+00> : vector<8x32xf32>
    %323 = vector.multi_reduction <add>, %322, %cst_148 [1] : vector<8x16x32xf32> to vector<8x32xf32>
    %c0_149 = arith.constant 0 : index
    %c0_150 = arith.constant 0 : index
    %c0_151 = arith.constant 0 : index
    %324 = vector.load %arg22[%c0_149, %c0_150, %c0_151] : memref<8x4x32xf32, #tpu.memory_space<vmem>>, vector<8x1x32xf32>
    %325 = vector.shape_cast %323 : vector<8x32xf32> to vector<8x1x32xf32>
    %326 = arith.addf %324, %325 : vector<8x1x32xf32>
    %c0_152 = arith.constant 0 : index
    %c0_153 = arith.constant 0 : index
    %c0_154 = arith.constant 0 : index
    %327 = vector.load %arg22[%c0_152, %c0_153, %c0_154] : memref<8x4x32xf32, #tpu.memory_space<vmem>>, vector<8x1x32xf32>
    tpu.vector_store %arg22[%c0_152, %c0_153, %c0_154], %326 {strides = array<i32>} : memref<8x4x32xf32, #tpu.memory_space<vmem>>, vector<8x1x32xf32>,
    %c0_155 = arith.constant 0 : index
    %c0_156 = arith.constant 0 : index
    %c0_157 = arith.constant 0 : index
    %328 = vector.load %arg22[%c0_155, %c0_156, %c0_157] : memref<8x4x32xf32, #tpu.memory_space<vmem>>, vector<8x4x32xf32>
    %c0_158 = arith.constant 0 : index
    %c0_159 = arith.constant 0 : index
    %329 = vector.load %arg18[%c0_158, %c0_159] : memref<1x32xf32, #tpu.memory_space<vmem>>, vector<1x32xf32>
    %330 = vector.shape_cast %329 : vector<1x32xf32> to vector<1x1x32xf32>
    %331 = vector.broadcast %330 : vector<1x1x32xf32> to vector<8x4x32xf32>
    %332 = arith.mulf %224, %331 : vector<8x4x32xf32>
    %333 = arith.addf %328, %332 : vector<8x4x32xf32>
    %c0_160 = arith.constant 0 : index
    %c0_161 = arith.constant 0 : index
    %c0_162 = arith.constant 0 : index
    %334 = vector.load %arg22[%c0_160, %c0_161, %c0_162] : memref<8x4x32xf32, #tpu.memory_space<vmem>>, vector<8x4x32xf32>
    tpu.vector_store %arg22[%c0_160, %c0_161, %c0_162], %333 {strides = array<i32>} : memref<8x4x32xf32, #tpu.memory_space<vmem>>, vector<8x4x32xf32>,
    %c0_163 = arith.constant 0 : index
    %c0_164 = arith.constant 0 : index
    %c0_165 = arith.constant 0 : index
    %335 = vector.load %arg22[%c0_163, %c0_164, %c0_165] : memref<8x4x32xf32, #tpu.memory_space<vmem>>, vector<8x4x32xf32>
    %336 = vector.shape_cast %335 : vector<8x4x32xf32> to vector<32x32xf32>
    %337 = arith.mulf %336, %35 : vector<32x32xf32>
    %c0_166 = arith.constant 0 : index
    %c0_167 = arith.constant 0 : index
    %338 = vector.load %arg19[%c0_166, %c0_167] : memref<32x32xf32, #tpu.memory_space<vmem>>, vector<32x32xf32>
    %cst_168 = arith.constant dense<0.000000e+00> : vector<32x32xf32>
    %339 = tpu.matmul %337, %338, %cst_168 {dimension_numbers = #tpu.dot_dimension_numbers<[1], [0], [0], [1], [0, 0, 1, 1], [], []>} : vector<32x32xf32>, vector<32x32xf32>, vector<32x32xf32> -> vector<32x32xf32>
    %340 = vector.shape_cast %339 : vector<32x32xf32> to vector<8x4x32xf32>
    %341 = arith.addf %0, %340 : vector<8x4x32xf32>
    %c0_169 = arith.constant 0 : index
    %c0_170 = arith.constant 0 : index
    %c0_171 = arith.constant 0 : index
    %342 = vector.load %arg20[%c0_169, %c0_170, %c0_171] : memref<8x4x32xf32, #tpu.memory_space<vmem>>, vector<8x4x32xf32>
    tpu.vector_store %arg20[%c0_169, %c0_170, %c0_171], %341 {strides = array<i32>} : memref<8x4x32xf32, #tpu.memory_space<vmem>>, vector<8x4x32xf32>,
    return
  }
  func.func @transform_0(%arg0: i32) -> (i32, i32, i32) {
    %c0_i32 = arith.constant 0 : i32
    %c0_i32_0 = arith.constant 0 : i32
    %c0_i32_1 = arith.constant 0 : i32
    return %arg0, %c0_i32, %c0_i32_0 : i32, i32, i32
  }
  func.func @transform_1(%arg0: i32) -> (i32, i32) {
    %c0_i32 = arith.constant 0 : i32
    %c0_i32_0 = arith.constant 0 : i32
    %c0_i32_1 = arith.constant 0 : i32
    return %c0_i32, %c0_i32_0 : i32, i32
  }
  func.func @transform_2(%arg0: i32) -> (i32, i32) {
    %c0_i32 = arith.constant 0 : i32
    %c0_i32_0 = arith.constant 0 : i32
    %c0_i32_1 = arith.constant 0 : i32
    return %c0_i32, %c0_i32_0 : i32, i32
  }
  func.func @transform_3(%arg0: i32) -> (i32, i32) {
    %c0_i32 = arith.constant 0 : i32
    %c0_i32_0 = arith.constant 0 : i32
    %c0_i32_1 = arith.constant 0 : i32
    return %c0_i32, %c0_i32_0 : i32, i32
  }
  func.func @transform_4(%arg0: i32) -> (i32, i32) {
    %c0_i32 = arith.constant 0 : i32
    %c0_i32_0 = arith.constant 0 : i32
    %c0_i32_1 = arith.constant 0 : i32
    return %c0_i32, %c0_i32_0 : i32, i32
  }
  func.func @transform_5(%arg0: i32) -> (i32, i32) {
    %c0_i32 = arith.constant 0 : i32
    %c0_i32_0 = arith.constant 0 : i32
    %c0_i32_1 = arith.constant 0 : i32
    return %c0_i32, %c0_i32_0 : i32, i32
  }
  func.func @transform_6(%arg0: i32) -> (i32, i32) {
    %c0_i32 = arith.constant 0 : i32
    %c0_i32_0 = arith.constant 0 : i32
    %c0_i32_1 = arith.constant 0 : i32
    return %c0_i32, %c0_i32_0 : i32, i32
  }
  func.func @transform_7(%arg0: i32) -> (i32, i32) {
    %c0_i32 = arith.constant 0 : i32
    %c0_i32_0 = arith.constant 0 : i32
    %c0_i32_1 = arith.constant 0 : i32
    return %c0_i32, %c0_i32_0 : i32, i32
  }
  func.func @transform_8(%arg0: i32) -> (i32, i32) {
    %c0_i32 = arith.constant 0 : i32
    %c0_i32_0 = arith.constant 0 : i32
    %c0_i32_1 = arith.constant 0 : i32
    return %c0_i32, %c0_i32_0 : i32, i32
  }
  func.func @transform_9(%arg0: i32) -> (i32, i32) {
    %c0_i32 = arith.constant 0 : i32
    %c0_i32_0 = arith.constant 0 : i32
    %c0_i32_1 = arith.constant 0 : i32
    return %c0_i32, %c0_i32_0 : i32, i32
  }
  func.func @transform_10(%arg0: i32) -> (i32, i32) {
    %c0_i32 = arith.constant 0 : i32
    %c0_i32_0 = arith.constant 0 : i32
    %c0_i32_1 = arith.constant 0 : i32
    return %c0_i32, %c0_i32_0 : i32, i32
  }
  func.func @transform_11(%arg0: i32) -> (i32, i32) {
    %c0_i32 = arith.constant 0 : i32
    %c0_i32_0 = arith.constant 0 : i32
    %c0_i32_1 = arith.constant 0 : i32
    return %c0_i32, %c0_i32_0 : i32, i32
  }
  func.func @transform_12(%arg0: i32) -> (i32, i32) {
    %c0_i32 = arith.constant 0 : i32
    %c0_i32_0 = arith.constant 0 : i32
    %c0_i32_1 = arith.constant 0 : i32
    return %c0_i32, %c0_i32_0 : i32, i32
  }
  func.func @transform_13(%arg0: i32) -> (i32, i32) {
    %c0_i32 = arith.constant 0 : i32
    %c0_i32_0 = arith.constant 0 : i32
    %c0_i32_1 = arith.constant 0 : i32
    return %c0_i32, %c0_i32_0 : i32, i32
  }
  func.func @transform_14(%arg0: i32) -> (i32, i32) {
    %c0_i32 = arith.constant 0 : i32
    %c0_i32_0 = arith.constant 0 : i32
    %c0_i32_1 = arith.constant 0 : i32
    return %c0_i32, %c0_i32_0 : i32, i32
  }
  func.func @transform_15(%arg0: i32) -> (i32, i32) {
    %c0_i32 = arith.constant 0 : i32
    %c0_i32_0 = arith.constant 0 : i32
    %c0_i32_1 = arith.constant 0 : i32
    return %c0_i32, %c0_i32_0 : i32, i32
  }
  func.func @transform_16(%arg0: i32) -> (i32, i32) {
    %c0_i32 = arith.constant 0 : i32
    %c0_i32_0 = arith.constant 0 : i32
    %c0_i32_1 = arith.constant 0 : i32
    return %c0_i32, %c0_i32_0 : i32, i32
  }
  func.func @transform_17(%arg0: i32) -> (i32, i32) {
    %c0_i32 = arith.constant 0 : i32
    %c0_i32_0 = arith.constant 0 : i32
    %c0_i32_1 = arith.constant 0 : i32
    return %c0_i32, %c0_i32_0 : i32, i32
  }
  func.func @transform_18(%arg0: i32) -> (i32, i32) {
    %c0_i32 = arith.constant 0 : i32
    %c0_i32_0 = arith.constant 0 : i32
    %c0_i32_1 = arith.constant 0 : i32
    return %c0_i32, %c0_i32_0 : i32, i32
  }
  func.func @transform_19(%arg0: i32) -> (i32, i32, i32) {
    %c0_i32 = arith.constant 0 : i32
    %c0_i32_0 = arith.constant 0 : i32
    %c0_i32_1 = arith.constant 0 : i32
    return %arg0, %c0_i32, %c0_i32_0 : i32, i32, i32
  }
}

module attributes {stable_mosaic.version = 11 : i64} {
  func.func @_mha_kernel(%arg0: i32, %arg1: memref<5x8x32xf32, #tpu.memory_space<vmem>>, %arg2: memref<1x32xf32, #tpu.memory_space<vmem>>, %arg3: memref<1x32xf32, #tpu.memory_space<vmem>>, %arg4: memref<32x96xf32, #tpu.memory_space<vmem>>, %arg5: memref<1x96xf32, #tpu.memory_space<vmem>>, %arg6: memref<32x32xf32, #tpu.memory_space<vmem>>, %arg7: memref<1x32xf32, #tpu.memory_space<vmem>>, %arg8: memref<5x8x32xf32, #tpu.memory_space<vmem>>) attributes {dimension_semantics = [#tpu.dimension_semantics<parallel>], iteration_bounds = array<i64: 1>, scalar_prefetch = 0 : i64, scratch_operands = 0 : i64, tpu.core_type = #tpu.core_type<tc>, window_params = [{transform_indices = @transform_0, window_bounds = array<i64: 5, 8, 32>}, {pipeline_mode = #tpu.pipeline_mode<synchronous>, transform_indices = @transform_1, window_bounds = array<i64: 1, 32>}, {pipeline_mode = #tpu.pipeline_mode<synchronous>, transform_indices = @transform_2, window_bounds = array<i64: 1, 32>}, {pipeline_mode = #tpu.pipeline_mode<synchronous>, transform_indices = @transform_3, window_bounds = array<i64: 32, 96>}, {pipeline_mode = #tpu.pipeline_mode<synchronous>, transform_indices = @transform_4, window_bounds = array<i64: 1, 96>}, {pipeline_mode = #tpu.pipeline_mode<synchronous>, transform_indices = @transform_5, window_bounds = array<i64: 32, 32>}, {pipeline_mode = #tpu.pipeline_mode<synchronous>, transform_indices = @transform_6, window_bounds = array<i64: 1, 32>}, {transform_indices = @transform_7, window_bounds = array<i64: 5, 8, 32>}]} {
    %c0 = arith.constant 0 : index
    %c0_0 = arith.constant 0 : index
    %c0_1 = arith.constant 0 : index
    %0 = vector.load %arg1[%c0, %c0_0, %c0_1] : memref<5x8x32xf32, #tpu.memory_space<vmem>>, vector<5x8x32xf32>
    %1 = vector.shape_cast %0 : vector<5x8x32xf32> to vector<40x32xf32>
    %c0_2 = arith.constant 0 : index
    %c0_3 = arith.constant 0 : index
    %2 = vector.load %arg2[%c0_2, %c0_3] : memref<1x32xf32, #tpu.memory_space<vmem>>, vector<1x32xf32>
    %c0_4 = arith.constant 0 : index
    %c0_5 = arith.constant 0 : index
    %3 = vector.load %arg3[%c0_4, %c0_5] : memref<1x32xf32, #tpu.memory_space<vmem>>, vector<1x32xf32>
    %cst = arith.constant dense<0.000000e+00> : vector<40xf32>
    %4 = vector.multi_reduction <add>, %1, %cst [1] : vector<40x32xf32> to vector<40xf32>
    %5 = vector.shape_cast %4 : vector<40xf32> to vector<40x1xf32>
    %cst_6 = arith.constant 3.200000e+01 : f32
    %6 = vector.broadcast %cst_6 : f32 to vector<40x1xf32>
    %7 = arith.divf %5, %6 : vector<40x1xf32>
    %8 = vector.broadcast %7 : vector<40x1xf32> to vector<40x32xf32>
    %9 = arith.subf %1, %8 : vector<40x32xf32>
    %10 = arith.mulf %9, %9 : vector<40x32xf32>
    %cst_7 = arith.constant dense<0.000000e+00> : vector<40xf32>
    %11 = vector.multi_reduction <add>, %10, %cst_7 [1] : vector<40x32xf32> to vector<40xf32>
    %12 = vector.shape_cast %11 : vector<40xf32> to vector<40x1xf32>
    %cst_8 = arith.constant 3.200000e+01 : f32
    %13 = vector.broadcast %cst_8 : f32 to vector<40x1xf32>
    %14 = arith.divf %12, %13 : vector<40x1xf32>
    %cst_9 = arith.constant 9.99999974E-6 : f32
    %15 = vector.broadcast %cst_9 : f32 to vector<40x1xf32>
    %16 = arith.addf %14, %15 : vector<40x1xf32>
    %17 = math.rsqrt %16 : vector<40x1xf32>
    %18 = vector.broadcast %17 : vector<40x1xf32> to vector<40x32xf32>
    %19 = arith.mulf %9, %18 : vector<40x32xf32>
    %20 = vector.broadcast %2 : vector<1x32xf32> to vector<40x32xf32>
    %21 = arith.mulf %19, %20 : vector<40x32xf32>
    %22 = vector.broadcast %3 : vector<1x32xf32> to vector<40x32xf32>
    %23 = arith.addf %21, %22 : vector<40x32xf32>
    %c0_10 = arith.constant 0 : index
    %c0_11 = arith.constant 0 : index
    %24 = vector.load %arg4[%c0_10, %c0_11] : memref<32x96xf32, #tpu.memory_space<vmem>>, vector<32x96xf32>
    %cst_12 = arith.constant dense<0.000000e+00> : vector<40x96xf32>
    %25 = tpu.matmul %23, %24, %cst_12 {dimension_numbers = #tpu.dot_dimension_numbers<[1], [0], [0], [1], [0, 0, 1, 1], [], []>} : vector<40x32xf32>, vector<32x96xf32>, vector<40x96xf32> -> vector<40x96xf32>
    %c0_13 = arith.constant 0 : index
    %c0_14 = arith.constant 0 : index
    %26 = vector.load %arg5[%c0_13, %c0_14] : memref<1x96xf32, #tpu.memory_space<vmem>>, vector<1x96xf32>
    %27 = vector.broadcast %26 : vector<1x96xf32> to vector<40x96xf32>
    %28 = arith.addf %25, %27 : vector<40x96xf32>
    %29 = vector.extract_strided_slice %28 {offsets = [0, 0], sizes = [40, 8], strides = [1, 1]} : vector<40x96xf32> to vector<40x8xf32>
    %cst_15 = arith.constant 0.353553385 : f32
    %30 = vector.broadcast %cst_15 : f32 to vector<40x8xf32>
    %31 = arith.mulf %29, %30 : vector<40x8xf32>
    %32 = vector.shape_cast %31 : vector<40x8xf32> to vector<5x8x8xf32>
    %33 = vector.extract_strided_slice %28 {offsets = [0, 32], sizes = [40, 8], strides = [1, 1]} : vector<40x96xf32> to vector<40x8xf32>
    %34 = vector.shape_cast %33 : vector<40x8xf32> to vector<5x8x8xf32>
    %35 = vector.extract_strided_slice %28 {offsets = [0, 64], sizes = [40, 8], strides = [1, 1]} : vector<40x96xf32> to vector<40x8xf32>
    %36 = vector.shape_cast %35 : vector<40x8xf32> to vector<5x8x8xf32>
    "tpu.trace_start"() <{level = 10 : i32, message = "bld,bmd->blm"}> : () -> ()
    %cst_16 = arith.constant dense<0.000000e+00> : vector<5x8x8xf32>
    %37 = tpu.matmul %32, %34, %cst_16 {dimension_numbers = #tpu.dot_dimension_numbers<[2], [2], [1], [1], [0, 0, 0, 1, 1, 1], [0], [0]>} : vector<5x8x8xf32>, vector<5x8x8xf32>, vector<5x8x8xf32> -> vector<5x8x8xf32>
    "tpu.trace_stop"() : () -> ()
    %cst_17 = arith.constant dense<0xFF800000> : vector<5x8xf32>
    %38 = vector.multi_reduction <maximumf>, %37, %cst_17 [2] : vector<5x8x8xf32> to vector<5x8xf32>
    %39 = vector.shape_cast %38 : vector<5x8xf32> to vector<5x8x1xf32>
    %40 = vector.broadcast %39 : vector<5x8x1xf32> to vector<5x8x8xf32>
    %41 = arith.subf %37, %40 : vector<5x8x8xf32>
    %42 = math.exp %41 : vector<5x8x8xf32>
    %cst_18 = arith.constant dense<0.000000e+00> : vector<5x8xf32>
    %43 = vector.multi_reduction <add>, %42, %cst_18 [2] : vector<5x8x8xf32> to vector<5x8xf32>
    %44 = vector.shape_cast %43 : vector<5x8xf32> to vector<5x8x1xf32>
    %45 = vector.broadcast %44 : vector<5x8x1xf32> to vector<5x8x8xf32>
    %46 = arith.divf %42, %45 : vector<5x8x8xf32>
    "tpu.trace_start"() <{level = 10 : i32, message = "blm,bmd->bld"}> : () -> ()
    %cst_19 = arith.constant dense<0.000000e+00> : vector<5x8x8xf32>
    %47 = tpu.matmul %46, %36, %cst_19 {dimension_numbers = #tpu.dot_dimension_numbers<[2], [1], [1], [2], [0, 0, 0, 1, 1, 2], [0], [0]>} : vector<5x8x8xf32>, vector<5x8x8xf32>, vector<5x8x8xf32> -> vector<5x8x8xf32>
    "tpu.trace_stop"() : () -> ()
    %48 = vector.shape_cast %47 : vector<5x8x8xf32> to vector<40x8xf32>
    %49 = vector.extract_strided_slice %28 {offsets = [0, 8], sizes = [40, 8], strides = [1, 1]} : vector<40x96xf32> to vector<40x8xf32>
    %cst_20 = arith.constant 0.353553385 : f32
    %50 = vector.broadcast %cst_20 : f32 to vector<40x8xf32>
    %51 = arith.mulf %49, %50 : vector<40x8xf32>
    %52 = vector.shape_cast %51 : vector<40x8xf32> to vector<5x8x8xf32>
    %53 = vector.extract_strided_slice %28 {offsets = [0, 40], sizes = [40, 8], strides = [1, 1]} : vector<40x96xf32> to vector<40x8xf32>
    %54 = vector.shape_cast %53 : vector<40x8xf32> to vector<5x8x8xf32>
    %55 = vector.extract_strided_slice %28 {offsets = [0, 72], sizes = [40, 8], strides = [1, 1]} : vector<40x96xf32> to vector<40x8xf32>
    %56 = vector.shape_cast %55 : vector<40x8xf32> to vector<5x8x8xf32>
    "tpu.trace_start"() <{level = 10 : i32, message = "bld,bmd->blm"}> : () -> ()
    %cst_21 = arith.constant dense<0.000000e+00> : vector<5x8x8xf32>
    %57 = tpu.matmul %52, %54, %cst_21 {dimension_numbers = #tpu.dot_dimension_numbers<[2], [2], [1], [1], [0, 0, 0, 1, 1, 1], [0], [0]>} : vector<5x8x8xf32>, vector<5x8x8xf32>, vector<5x8x8xf32> -> vector<5x8x8xf32>
    "tpu.trace_stop"() : () -> ()
    %cst_22 = arith.constant dense<0xFF800000> : vector<5x8xf32>
    %58 = vector.multi_reduction <maximumf>, %57, %cst_22 [2] : vector<5x8x8xf32> to vector<5x8xf32>
    %59 = vector.shape_cast %58 : vector<5x8xf32> to vector<5x8x1xf32>
    %60 = vector.broadcast %59 : vector<5x8x1xf32> to vector<5x8x8xf32>
    %61 = arith.subf %57, %60 : vector<5x8x8xf32>
    %62 = math.exp %61 : vector<5x8x8xf32>
    %cst_23 = arith.constant dense<0.000000e+00> : vector<5x8xf32>
    %63 = vector.multi_reduction <add>, %62, %cst_23 [2] : vector<5x8x8xf32> to vector<5x8xf32>
    %64 = vector.shape_cast %63 : vector<5x8xf32> to vector<5x8x1xf32>
    %65 = vector.broadcast %64 : vector<5x8x1xf32> to vector<5x8x8xf32>
    %66 = arith.divf %62, %65 : vector<5x8x8xf32>
    "tpu.trace_start"() <{level = 10 : i32, message = "blm,bmd->bld"}> : () -> ()
    %cst_24 = arith.constant dense<0.000000e+00> : vector<5x8x8xf32>
    %67 = tpu.matmul %66, %56, %cst_24 {dimension_numbers = #tpu.dot_dimension_numbers<[2], [1], [1], [2], [0, 0, 0, 1, 1, 2], [0], [0]>} : vector<5x8x8xf32>, vector<5x8x8xf32>, vector<5x8x8xf32> -> vector<5x8x8xf32>
    "tpu.trace_stop"() : () -> ()
    %68 = vector.shape_cast %67 : vector<5x8x8xf32> to vector<40x8xf32>
    %69 = vector.extract_strided_slice %28 {offsets = [0, 16], sizes = [40, 8], strides = [1, 1]} : vector<40x96xf32> to vector<40x8xf32>
    %cst_25 = arith.constant 0.353553385 : f32
    %70 = vector.broadcast %cst_25 : f32 to vector<40x8xf32>
    %71 = arith.mulf %69, %70 : vector<40x8xf32>
    %72 = vector.shape_cast %71 : vector<40x8xf32> to vector<5x8x8xf32>
    %73 = vector.extract_strided_slice %28 {offsets = [0, 48], sizes = [40, 8], strides = [1, 1]} : vector<40x96xf32> to vector<40x8xf32>
    %74 = vector.shape_cast %73 : vector<40x8xf32> to vector<5x8x8xf32>
    %75 = vector.extract_strided_slice %28 {offsets = [0, 80], sizes = [40, 8], strides = [1, 1]} : vector<40x96xf32> to vector<40x8xf32>
    %76 = vector.shape_cast %75 : vector<40x8xf32> to vector<5x8x8xf32>
    "tpu.trace_start"() <{level = 10 : i32, message = "bld,bmd->blm"}> : () -> ()
    %cst_26 = arith.constant dense<0.000000e+00> : vector<5x8x8xf32>
    %77 = tpu.matmul %72, %74, %cst_26 {dimension_numbers = #tpu.dot_dimension_numbers<[2], [2], [1], [1], [0, 0, 0, 1, 1, 1], [0], [0]>} : vector<5x8x8xf32>, vector<5x8x8xf32>, vector<5x8x8xf32> -> vector<5x8x8xf32>
    "tpu.trace_stop"() : () -> ()
    %cst_27 = arith.constant dense<0xFF800000> : vector<5x8xf32>
    %78 = vector.multi_reduction <maximumf>, %77, %cst_27 [2] : vector<5x8x8xf32> to vector<5x8xf32>
    %79 = vector.shape_cast %78 : vector<5x8xf32> to vector<5x8x1xf32>
    %80 = vector.broadcast %79 : vector<5x8x1xf32> to vector<5x8x8xf32>
    %81 = arith.subf %77, %80 : vector<5x8x8xf32>
    %82 = math.exp %81 : vector<5x8x8xf32>
    %cst_28 = arith.constant dense<0.000000e+00> : vector<5x8xf32>
    %83 = vector.multi_reduction <add>, %82, %cst_28 [2] : vector<5x8x8xf32> to vector<5x8xf32>
    %84 = vector.shape_cast %83 : vector<5x8xf32> to vector<5x8x1xf32>
    %85 = vector.broadcast %84 : vector<5x8x1xf32> to vector<5x8x8xf32>
    %86 = arith.divf %82, %85 : vector<5x8x8xf32>
    "tpu.trace_start"() <{level = 10 : i32, message = "blm,bmd->bld"}> : () -> ()
    %cst_29 = arith.constant dense<0.000000e+00> : vector<5x8x8xf32>
    %87 = tpu.matmul %86, %76, %cst_29 {dimension_numbers = #tpu.dot_dimension_numbers<[2], [1], [1], [2], [0, 0, 0, 1, 1, 2], [0], [0]>} : vector<5x8x8xf32>, vector<5x8x8xf32>, vector<5x8x8xf32> -> vector<5x8x8xf32>
    "tpu.trace_stop"() : () -> ()
    %88 = vector.shape_cast %87 : vector<5x8x8xf32> to vector<40x8xf32>
    %89 = vector.extract_strided_slice %28 {offsets = [0, 24], sizes = [40, 8], strides = [1, 1]} : vector<40x96xf32> to vector<40x8xf32>
    %cst_30 = arith.constant 0.353553385 : f32
    %90 = vector.broadcast %cst_30 : f32 to vector<40x8xf32>
    %91 = arith.mulf %89, %90 : vector<40x8xf32>
    %92 = vector.shape_cast %91 : vector<40x8xf32> to vector<5x8x8xf32>
    %93 = vector.extract_strided_slice %28 {offsets = [0, 56], sizes = [40, 8], strides = [1, 1]} : vector<40x96xf32> to vector<40x8xf32>
    %94 = vector.shape_cast %93 : vector<40x8xf32> to vector<5x8x8xf32>
    %95 = vector.extract_strided_slice %28 {offsets = [0, 88], sizes = [40, 8], strides = [1, 1]} : vector<40x96xf32> to vector<40x8xf32>
    %96 = vector.shape_cast %95 : vector<40x8xf32> to vector<5x8x8xf32>
    "tpu.trace_start"() <{level = 10 : i32, message = "bld,bmd->blm"}> : () -> ()
    %cst_31 = arith.constant dense<0.000000e+00> : vector<5x8x8xf32>
    %97 = tpu.matmul %92, %94, %cst_31 {dimension_numbers = #tpu.dot_dimension_numbers<[2], [2], [1], [1], [0, 0, 0, 1, 1, 1], [0], [0]>} : vector<5x8x8xf32>, vector<5x8x8xf32>, vector<5x8x8xf32> -> vector<5x8x8xf32>
    "tpu.trace_stop"() : () -> ()
    %cst_32 = arith.constant dense<0xFF800000> : vector<5x8xf32>
    %98 = vector.multi_reduction <maximumf>, %97, %cst_32 [2] : vector<5x8x8xf32> to vector<5x8xf32>
    %99 = vector.shape_cast %98 : vector<5x8xf32> to vector<5x8x1xf32>
    %100 = vector.broadcast %99 : vector<5x8x1xf32> to vector<5x8x8xf32>
    %101 = arith.subf %97, %100 : vector<5x8x8xf32>
    %102 = math.exp %101 : vector<5x8x8xf32>
    %cst_33 = arith.constant dense<0.000000e+00> : vector<5x8xf32>
    %103 = vector.multi_reduction <add>, %102, %cst_33 [2] : vector<5x8x8xf32> to vector<5x8xf32>
    %104 = vector.shape_cast %103 : vector<5x8xf32> to vector<5x8x1xf32>
    %105 = vector.broadcast %104 : vector<5x8x1xf32> to vector<5x8x8xf32>
    %106 = arith.divf %102, %105 : vector<5x8x8xf32>
    "tpu.trace_start"() <{level = 10 : i32, message = "blm,bmd->bld"}> : () -> ()
    %cst_34 = arith.constant dense<0.000000e+00> : vector<5x8x8xf32>
    %107 = tpu.matmul %106, %96, %cst_34 {dimension_numbers = #tpu.dot_dimension_numbers<[2], [1], [1], [2], [0, 0, 0, 1, 1, 2], [0], [0]>} : vector<5x8x8xf32>, vector<5x8x8xf32>, vector<5x8x8xf32> -> vector<5x8x8xf32>
    "tpu.trace_stop"() : () -> ()
    %108 = vector.shape_cast %107 : vector<5x8x8xf32> to vector<40x8xf32>
    %109 = tpu.concatenate %48, %68, %88, %108 in 1 : vector<40x8xf32>, vector<40x8xf32>, vector<40x8xf32>, vector<40x8xf32> -> vector<40x32xf32>
    %c0_35 = arith.constant 0 : index
    %c0_36 = arith.constant 0 : index
    %110 = vector.load %arg6[%c0_35, %c0_36] : memref<32x32xf32, #tpu.memory_space<vmem>>, vector<32x32xf32>
    %cst_37 = arith.constant dense<0.000000e+00> : vector<40x32xf32>
    %111 = tpu.matmul %109, %110, %cst_37 {dimension_numbers = #tpu.dot_dimension_numbers<[1], [0], [0], [1], [0, 0, 1, 1], [], []>} : vector<40x32xf32>, vector<32x32xf32>, vector<40x32xf32> -> vector<40x32xf32>
    %c0_38 = arith.constant 0 : index
    %c0_39 = arith.constant 0 : index
    %112 = vector.load %arg7[%c0_38, %c0_39] : memref<1x32xf32, #tpu.memory_space<vmem>>, vector<1x32xf32>
    %113 = vector.broadcast %112 : vector<1x32xf32> to vector<40x32xf32>
    %114 = arith.addf %111, %113 : vector<40x32xf32>
    %115 = vector.shape_cast %114 : vector<40x32xf32> to vector<5x8x32xf32>
    %c0_40 = arith.constant 0 : index
    %c0_41 = arith.constant 0 : index
    %c0_42 = arith.constant 0 : index
    %116 = vector.load %arg8[%c0_40, %c0_41, %c0_42] : memref<5x8x32xf32, #tpu.memory_space<vmem>>, vector<5x8x32xf32>
    tpu.vector_store %arg8[%c0_40, %c0_41, %c0_42], %115 {strides = array<i32>} : memref<5x8x32xf32, #tpu.memory_space<vmem>>, vector<5x8x32xf32>,
    return
  }
  func.func @transform_0(%arg0: i32) -> (i32, i32, i32) {
    %c0_i32 = arith.constant 0 : i32
    %c0_i32_0 = arith.constant 0 : i32
    %c0_i32_1 = arith.constant 0 : i32
    return %arg0, %c0_i32, %c0_i32_0 : i32, i32, i32
  }
  func.func @transform_1(%arg0: i32) -> (i32, i32) {
    %c0_i32 = arith.constant 0 : i32
    %c0_i32_0 = arith.constant 0 : i32
    %c0_i32_1 = arith.constant 0 : i32
    return %c0_i32, %c0_i32_0 : i32, i32
  }
  func.func @transform_2(%arg0: i32) -> (i32, i32) {
    %c0_i32 = arith.constant 0 : i32
    %c0_i32_0 = arith.constant 0 : i32
    %c0_i32_1 = arith.constant 0 : i32
    return %c0_i32, %c0_i32_0 : i32, i32
  }
  func.func @transform_3(%arg0: i32) -> (i32, i32) {
    %c0_i32 = arith.constant 0 : i32
    %c0_i32_0 = arith.constant 0 : i32
    %c0_i32_1 = arith.constant 0 : i32
    return %c0_i32, %c0_i32_0 : i32, i32
  }
  func.func @transform_4(%arg0: i32) -> (i32, i32) {
    %c0_i32 = arith.constant 0 : i32
    %c0_i32_0 = arith.constant 0 : i32
    %c0_i32_1 = arith.constant 0 : i32
    return %c0_i32, %c0_i32_0 : i32, i32
  }
  func.func @transform_5(%arg0: i32) -> (i32, i32) {
    %c0_i32 = arith.constant 0 : i32
    %c0_i32_0 = arith.constant 0 : i32
    %c0_i32_1 = arith.constant 0 : i32
    return %c0_i32, %c0_i32_0 : i32, i32
  }
  func.func @transform_6(%arg0: i32) -> (i32, i32) {
    %c0_i32 = arith.constant 0 : i32
    %c0_i32_0 = arith.constant 0 : i32
    %c0_i32_1 = arith.constant 0 : i32
    return %c0_i32, %c0_i32_0 : i32, i32
  }
  func.func @transform_7(%arg0: i32) -> (i32, i32, i32) {
    %c0_i32 = arith.constant 0 : i32
    %c0_i32_0 = arith.constant 0 : i32
    %c0_i32_1 = arith.constant 0 : i32
    return %arg0, %c0_i32, %c0_i32_0 : i32, i32, i32
  }
}

module attributes {stable_mosaic.version = 11 : i64} {
  func.func @_mlp_block_kernel(%arg0: i32, %arg1: memref<34x32xf32, #tpu.memory_space<vmem>>, %arg2: memref<34x32xf32, #tpu.memory_space<vmem>>, %arg3: memref<1x32xf32, #tpu.memory_space<vmem>>, %arg4: memref<1x32xf32, #tpu.memory_space<vmem>>, %arg5: memref<32x128xf32, #tpu.memory_space<vmem>>, %arg6: memref<1x128xf32, #tpu.memory_space<vmem>>, %arg7: memref<128x32xf32, #tpu.memory_space<vmem>>, %arg8: memref<1x32xf32, #tpu.memory_space<vmem>>, %arg9: memref<34x32xf32, #tpu.memory_space<vmem>>) attributes {dimension_semantics = [#tpu.dimension_semantics<parallel>], iteration_bounds = array<i64: 1>, scalar_prefetch = 0 : i64, scratch_operands = 0 : i64, tpu.core_type = #tpu.core_type<tc>, window_params = [{transform_indices = @transform_0, window_bounds = array<i64: 34, 32>}, {transform_indices = @transform_1, window_bounds = array<i64: 34, 32>}, {pipeline_mode = #tpu.pipeline_mode<synchronous>, transform_indices = @transform_2, window_bounds = array<i64: 1, 32>}, {pipeline_mode = #tpu.pipeline_mode<synchronous>, transform_indices = @transform_3, window_bounds = array<i64: 1, 32>}, {pipeline_mode = #tpu.pipeline_mode<synchronous>, transform_indices = @transform_4, window_bounds = array<i64: 32, 128>}, {pipeline_mode = #tpu.pipeline_mode<synchronous>, transform_indices = @transform_5, window_bounds = array<i64: 1, 128>}, {pipeline_mode = #tpu.pipeline_mode<synchronous>, transform_indices = @transform_6, window_bounds = array<i64: 128, 32>}, {pipeline_mode = #tpu.pipeline_mode<synchronous>, transform_indices = @transform_7, window_bounds = array<i64: 1, 32>}, {transform_indices = @transform_8, window_bounds = array<i64: 34, 32>}]} {
    %c0 = arith.constant 0 : index
    %c0_0 = arith.constant 0 : index
    %0 = vector.load %arg1[%c0, %c0_0] : memref<34x32xf32, #tpu.memory_space<vmem>>, vector<34x32xf32>
    %c0_1 = arith.constant 0 : index
    %c0_2 = arith.constant 0 : index
    %1 = vector.load %arg2[%c0_1, %c0_2] : memref<34x32xf32, #tpu.memory_space<vmem>>, vector<34x32xf32>
    %2 = arith.addf %0, %1 : vector<34x32xf32>
    %c0_3 = arith.constant 0 : index
    %c0_4 = arith.constant 0 : index
    %3 = vector.load %arg3[%c0_3, %c0_4] : memref<1x32xf32, #tpu.memory_space<vmem>>, vector<1x32xf32>
    %c0_5 = arith.constant 0 : index
    %c0_6 = arith.constant 0 : index
    %4 = vector.load %arg4[%c0_5, %c0_6] : memref<1x32xf32, #tpu.memory_space<vmem>>, vector<1x32xf32>
    %cst = arith.constant dense<0.000000e+00> : vector<34xf32>
    %5 = vector.multi_reduction <add>, %2, %cst [1] : vector<34x32xf32> to vector<34xf32>
    %6 = vector.shape_cast %5 : vector<34xf32> to vector<34x1xf32>
    %cst_7 = arith.constant 3.200000e+01 : f32
    %7 = vector.broadcast %cst_7 : f32 to vector<34x1xf32>
    %8 = arith.divf %6, %7 : vector<34x1xf32>
    %9 = vector.broadcast %8 : vector<34x1xf32> to vector<34x32xf32>
    %10 = arith.subf %2, %9 : vector<34x32xf32>
    %11 = arith.mulf %10, %10 : vector<34x32xf32>
    %cst_8 = arith.constant dense<0.000000e+00> : vector<34xf32>
    %12 = vector.multi_reduction <add>, %11, %cst_8 [1] : vector<34x32xf32> to vector<34xf32>
    %13 = vector.shape_cast %12 : vector<34xf32> to vector<34x1xf32>
    %cst_9 = arith.constant 3.200000e+01 : f32
    %14 = vector.broadcast %cst_9 : f32 to vector<34x1xf32>
    %15 = arith.divf %13, %14 : vector<34x1xf32>
    %cst_10 = arith.constant 9.99999974E-6 : f32
    %16 = vector.broadcast %cst_10 : f32 to vector<34x1xf32>
    %17 = arith.addf %15, %16 : vector<34x1xf32>
    %18 = math.rsqrt %17 : vector<34x1xf32>
    %19 = vector.broadcast %18 : vector<34x1xf32> to vector<34x32xf32>
    %20 = arith.mulf %10, %19 : vector<34x32xf32>
    %21 = vector.broadcast %3 : vector<1x32xf32> to vector<34x32xf32>
    %22 = arith.mulf %20, %21 : vector<34x32xf32>
    %23 = vector.broadcast %4 : vector<1x32xf32> to vector<34x32xf32>
    %24 = arith.addf %22, %23 : vector<34x32xf32>
    %c0_11 = arith.constant 0 : index
    %c0_12 = arith.constant 0 : index
    %25 = vector.load %arg5[%c0_11, %c0_12] : memref<32x128xf32, #tpu.memory_space<vmem>>, vector<32x128xf32>
    %cst_13 = arith.constant dense<0.000000e+00> : vector<34x128xf32>
    %26 = tpu.matmul %24, %25, %cst_13 {dimension_numbers = #tpu.dot_dimension_numbers<[1], [0], [0], [1], [0, 0, 1, 1], [], []>} : vector<34x32xf32>, vector<32x128xf32>, vector<34x128xf32> -> vector<34x128xf32>
    %c0_14 = arith.constant 0 : index
    %c0_15 = arith.constant 0 : index
    %27 = vector.load %arg6[%c0_14, %c0_15] : memref<1x128xf32, #tpu.memory_space<vmem>>, vector<1x128xf32>
    %28 = vector.broadcast %27 : vector<1x128xf32> to vector<34x128xf32>
    %29 = arith.addf %26, %28 : vector<34x128xf32>
    %cst_16 = arith.constant 5.000000e-01 : f32
    %30 = vector.broadcast %cst_16 : f32 to vector<34x128xf32>
    %31 = arith.mulf %30, %29 : vector<34x128xf32>
    %cst_17 = arith.constant 0.707106769 : f32
    %32 = vector.broadcast %cst_17 : f32 to vector<34x128xf32>
    %33 = arith.mulf %29, %32 : vector<34x128xf32>
    %34 = math.absf %33 : vector<34x128xf32>
    %cst_18 = arith.constant 0.327591091 : f32
    %35 = vector.broadcast %cst_18 : f32 to vector<34x128xf32>
    %36 = arith.mulf %35, %34 : vector<34x128xf32>
    %cst_19 = arith.constant 1.000000e+00 : f32
    %37 = vector.broadcast %cst_19 : f32 to vector<34x128xf32>
    %38 = arith.addf %37, %36 : vector<34x128xf32>
    %cst_20 = arith.constant 1.000000e+00 : f32
    %39 = vector.broadcast %cst_20 : f32 to vector<34x128xf32>
    %40 = arith.divf %39, %38 : vector<34x128xf32>
    %cst_21 = arith.constant 1.06140542 : f32
    %41 = vector.broadcast %cst_21 : f32 to vector<34x128xf32>
    %42 = arith.mulf %41, %40 : vector<34x128xf32>
    %cst_22 = arith.constant -1.45315206 : f32
    %43 = vector.broadcast %cst_22 : f32 to vector<34x128xf32>
    %44 = arith.addf %42, %43 : vector<34x128xf32>
    %45 = arith.mulf %44, %40 : vector<34x128xf32>
    %cst_23 = arith.constant 1.42141378 : f32
    %46 = vector.broadcast %cst_23 : f32 to vector<34x128xf32>
    %47 = arith.addf %45, %46 : vector<34x128xf32>
    %48 = arith.mulf %47, %40 : vector<34x128xf32>
    %cst_24 = arith.constant -0.284496725 : f32
    %49 = vector.broadcast %cst_24 : f32 to vector<34x128xf32>
    %50 = arith.addf %48, %49 : vector<34x128xf32>
    %51 = arith.mulf %50, %40 : vector<34x128xf32>
    %cst_25 = arith.constant 0.254829586 : f32
    %52 = vector.broadcast %cst_25 : f32 to vector<34x128xf32>
    %53 = arith.addf %51, %52 : vector<34x128xf32>
    %54 = arith.mulf %53, %40 : vector<34x128xf32>
    %cst_26 = arith.constant 0.000000e+00 : f32
    %55 = vector.broadcast %cst_26 : f32 to vector<34x128xf32>
    %56 = arith.subf %55, %34 : vector<34x128xf32>
    %57 = arith.mulf %56, %34 : vector<34x128xf32>
    %58 = math.exp %57 : vector<34x128xf32>
    %59 = arith.mulf %54, %58 : vector<34x128xf32>
    %cst_27 = arith.constant 1.000000e+00 : f32
    %60 = vector.broadcast %cst_27 : f32 to vector<34x128xf32>
    %61 = arith.subf %60, %59 : vector<34x128xf32>
    %cst_28 = arith.constant 0.000000e+00 : f32
    %62 = vector.broadcast %cst_28 : f32 to vector<34x128xf32>
    %63 = arith.cmpf oge, %33, %62 : vector<34x128xf32>
    %cst_29 = arith.constant 0.000000e+00 : f32
    %64 = vector.broadcast %cst_29 : f32 to vector<34x128xf32>
    %65 = arith.subf %64, %61 : vector<34x128xf32>
    %66 = arith.select %63, %61, %65 : vector<34x128xi1>, vector<34x128xf32>
    %cst_30 = arith.constant 1.000000e+00 : f32
    %67 = vector.broadcast %cst_30 : f32 to vector<34x128xf32>
    %68 = arith.addf %67, %66 : vector<34x128xf32>
    %69 = arith.mulf %31, %68 : vector<34x128xf32>
    %c0_31 = arith.constant 0 : index
    %c0_32 = arith.constant 0 : index
    %70 = vector.load %arg7[%c0_31, %c0_32] : memref<128x32xf32, #tpu.memory_space<vmem>>, vector<128x32xf32>
    %cst_33 = arith.constant dense<0.000000e+00> : vector<34x32xf32>
    %71 = tpu.matmul %69, %70, %cst_33 {dimension_numbers = #tpu.dot_dimension_numbers<[1], [0], [0], [1], [0, 0, 1, 1], [], []>} : vector<34x128xf32>, vector<128x32xf32>, vector<34x32xf32> -> vector<34x32xf32>
    %c0_34 = arith.constant 0 : index
    %c0_35 = arith.constant 0 : index
    %72 = vector.load %arg8[%c0_34, %c0_35] : memref<1x32xf32, #tpu.memory_space<vmem>>, vector<1x32xf32>
    %73 = vector.broadcast %72 : vector<1x32xf32> to vector<34x32xf32>
    %74 = arith.addf %71, %73 : vector<34x32xf32>
    %75 = arith.addf %2, %74 : vector<34x32xf32>
    %c0_36 = arith.constant 0 : index
    %c0_37 = arith.constant 0 : index
    %76 = vector.load %arg9[%c0_36, %c0_37] : memref<34x32xf32, #tpu.memory_space<vmem>>, vector<34x32xf32>
    tpu.vector_store %arg9[%c0_36, %c0_37], %75 {strides = array<i32>} : memref<34x32xf32, #tpu.memory_space<vmem>>, vector<34x32xf32>,
    return
  }
  func.func @transform_0(%arg0: i32) -> (i32, i32) {
    %c0_i32 = arith.constant 0 : i32
    %c0_i32_0 = arith.constant 0 : i32
    return %arg0, %c0_i32 : i32, i32
  }
  func.func @transform_1(%arg0: i32) -> (i32, i32) {
    %c0_i32 = arith.constant 0 : i32
    %c0_i32_0 = arith.constant 0 : i32
    return %arg0, %c0_i32 : i32, i32
  }
  func.func @transform_2(%arg0: i32) -> (i32, i32) {
    %c0_i32 = arith.constant 0 : i32
    %c0_i32_0 = arith.constant 0 : i32
    %c0_i32_1 = arith.constant 0 : i32
    return %c0_i32, %c0_i32_0 : i32, i32
  }
  func.func @transform_3(%arg0: i32) -> (i32, i32) {
    %c0_i32 = arith.constant 0 : i32
    %c0_i32_0 = arith.constant 0 : i32
    %c0_i32_1 = arith.constant 0 : i32
    return %c0_i32, %c0_i32_0 : i32, i32
  }
  func.func @transform_4(%arg0: i32) -> (i32, i32) {
    %c0_i32 = arith.constant 0 : i32
    %c0_i32_0 = arith.constant 0 : i32
    %c0_i32_1 = arith.constant 0 : i32
    return %c0_i32, %c0_i32_0 : i32, i32
  }
  func.func @transform_5(%arg0: i32) -> (i32, i32) {
    %c0_i32 = arith.constant 0 : i32
    %c0_i32_0 = arith.constant 0 : i32
    %c0_i32_1 = arith.constant 0 : i32
    return %c0_i32, %c0_i32_0 : i32, i32
  }
  func.func @transform_6(%arg0: i32) -> (i32, i32) {
    %c0_i32 = arith.constant 0 : i32
    %c0_i32_0 = arith.constant 0 : i32
    %c0_i32_1 = arith.constant 0 : i32
    return %c0_i32, %c0_i32_0 : i32, i32
  }
  func.func @transform_7(%arg0: i32) -> (i32, i32) {
    %c0_i32 = arith.constant 0 : i32
    %c0_i32_0 = arith.constant 0 : i32
    %c0_i32_1 = arith.constant 0 : i32
    return %c0_i32, %c0_i32_0 : i32, i32
  }
  func.func @transform_8(%arg0: i32) -> (i32, i32) {
    %c0_i32 = arith.constant 0 : i32
    %c0_i32_0 = arith.constant 0 : i32
    return %arg0, %c0_i32 : i32, i32
  }
}

</mosaic_0001>

<bundles_post_ra>
// kernel: space_time_block_forward.5
= control target key start
LH: loop header
LB: loop body
LE: loop exit
PB: predicated region body
PF: predicated region fallthrough
CT: control target
= control target key end

     0   :  { %vm46_vm0 = vcmask 261120   ;;  %vm59_vm1 = vcmask 254976   ;;  %v702_v50 = vmov 0.0|0.0   ;;  %vm703_vm2 = vmmov 0   ;;  %s1015_s0 = inlined_call_operand.vmem [shape: f32[34,32], index: 0, kind: input, shape index: {}]   ;;  %s1016_s1 = inlined_call_operand.vmem [shape: f32[34,32], index: 1, kind: input, shape index: {}]   ;;  %s1017_s4 = inlined_call_operand.vmem [shape: f32[32,128], index: 4, kind: input, shape index: {}]   ;;  %s1018_s2 = inlined_call_operand.vmem [shape: f32[1,32], index: 2, kind: input, shape index: {}]   ;;  %s1019_s3 = inlined_call_operand.vmem [shape: f32[1,32], index: 3, kind: input, shape index: {}]   ;;  %s1020_s6 = inlined_call_operand.vmem [shape: f32[128,32], index: 6, kind: input, shape index: {}]   ;;  %s1021_s5 = inlined_call_operand.vmem [shape: f32[1,128], index: 5, kind: input, shape index: {}]   ;;  %s1022_s7 = inlined_call_operand.vmem [shape: f32[1,32], index: 7, kind: input, shape index: {}]   ;;  %s1023_s8 = inlined_call_operand.vmem [shape: f32[34,32], index: 8, kind: output, shape index: {}]  }
   0x1   :  { %v29_v0 = vld [vmem:[%s1015_s0] sm:$0xff]  ;;  %v31_v2 = vld [vmem:[%s1015_s0 + $0x10] sm:$0xff]  ;;  %v30_v5 = vld [vmem:[%s1015_s0 + $0x8] sm:$0xff]  ;;  %623 = vmatprep.subr.bf16.mxu0 %v702_v50  ;;  %v704_v51 = vmov 0.0   ;;  %653 = vmatprep.subr.bf16.mxu1 %v702_v50 }
   0x2   :  { %v34_v1 = vld [vmem:[%s1016_s1] sm:$0xff]  ;;  %v36_v4 = vld [vmem:[%s1016_s1 + $0x10] sm:$0xff]  ;;  %v35_v6 = vld [vmem:[%s1016_s1 + $0x8] sm:$0xff]  ;;  %561 = vmatprep.mubr.msk.f32.mxu0 %vm703_vm2, %v704_v51  ;;  %611 = vmatprep.mubr.msk.f32.mxu1 %vm703_vm2, %v704_v51 }
   0x3   :  { %v759_v3 = vadd.f32 %v34_v1, %v29_v0  ;;  %v770_v7 = vadd.f32 %v36_v4, %v31_v2  ;;  %v772_v8 = vadd.f32 %v35_v6, %v30_v5  ;;  %v32_v9 = vld [vmem:[%s1015_s0 + $0x18] sm:$0xff]  ;;  %v33_v11 = vld [vmem:[%s1015_s0 + $0x20] sm:$0x3]  ;;  %v137_v46 = vld [vmem:[%s1017_s4 + $0x8] sm:$0xff] }
   0x4   :  { %v37_v10 = vld [vmem:[%s1016_s1 + $0x18] sm:$0xff]  ;;  %v38_v14 = vld [vmem:[%s1016_s1 + $0x20] sm:$0x3]  ;;  %v138_v48 = vld [vmem:[%s1017_s4 + $0x10] sm:$0xff] }
   0x5   :  { %v47_v12 = vsel %vm46_vm0, %v759_v3, 0.0  ;;  %v785_v13 = vadd.f32 %v37_v10, %v32_v9  ;;  %v53_v15 = vsel %vm46_vm0, %v770_v7, 0.0  ;;  %v50_v16 = vsel %vm46_vm0, %v772_v8, 0.0  ;;  %v136_v45 = vld [vmem:[%s1017_s4] sm:$0xff]  ;;  %v139_v49 = vld [vmem:[%s1017_s4 + $0x18] sm:$0xff] }
   0x6   :  { %48 = vadd.xlane.f32.xlu0 %v47_v12  ;;  %54 = vadd.xlane.f32.xlu1 %v53_v15  ;;  %v794_v17 = vadd.f32 %v38_v14, %v33_v11  ;;  %v624_v47 = vpack.c.bf16 %v137_v46, %v136_v45  ;;  %v627_v52 = vpack.c.bf16 %v139_v49, %v138_v48  ;;  %v514_v6 = vld [vmem:[%s1018_s2] ss:$0 sm:$0xff]  ;;  %v397_v46 = vld [vmem:[%s1020_s6 + $0x50] sm:$0xff] }
   0x7   :  { %v56_v18 = vsel %vm46_vm0, %v785_v13, 0.0  ;;  %v515_v10 = vld [vmem:[%s1019_s3] ss:$0 sm:$0xff] }
   0x8   :  { %v60_v19 = vsel %vm59_vm1, %v794_v17, 0.0  ;;  %625 = vmatpush3.bf16.msra.mxu0 %v624_v47  ;;  %v398_v47 = vld [vmem:[%s1020_s6 + $0x58] sm:$0xff]  ;;  %v399_v49 = vld [vmem:[%s1020_s6 + $0x60] sm:$0xff] }
   0x9   :  { %626 = vmatprep.subr.bf16.mxu0 %v702_v50  ;;  %v645_v48 = vpack.c.bf16 %v398_v47, %v397_v46 }
   0xa   :  { %51 = vadd.xlane.f32.xlu0 %v50_v16  ;;  %57 = vadd.xlane.f32.xlu1 %v56_v18 }
   0xc   :  { %628 = vmatpush3.bf16.msra.mxu0 %v627_v52  ;;  %v400_v52 = vld [vmem:[%s1020_s6 + $0x68] sm:$0xff] }
   0xd   :  { %629 = vmatprep.subr.bf16.mxu0 %v702_v50 }
   0xe   :  { %61 = vadd.xlane.f32.xlu0 %v60_v19 }
  0x93   :  { %v49_v20 = vpop.xlane.xlu0 %48  ;;  %v55_v22 = vpop.xlane.xlu1 %54 }
  0x94   :  { %v64_v21 = vmul.f32 0.03125, %v49_v20  ;;  %v66_v23 = vmul.f32 0.03125, %v55_v22 }
  0x96   :  { %v801_v24 = vsub.f32 %v759_v3, %v64_v21  ;;  %v804_v25 = vsub.f32 %v770_v7, %v66_v23 }
  0x97   :  { %v52_v26 = vpop.xlane.xlu0 %51  ;;  %v58_v28 = vpop.xlane.xlu1 %57 }
  0x98   :  { %v65_v27 = vmul.f32 0.03125, %v52_v26  ;;  %v74_v29 = vmul.f32 %v801_v24, %v801_v24  ;;  %v67_v30 = vmul.f32 0.03125, %v58_v28  ;;  %v76_v31 = vmul.f32 %v804_v25, %v804_v25 }
  0x9a   :  { %v811_v32 = vsub.f32 %v772_v8, %v65_v27  ;;  %v79_v33 = vsel %vm46_vm0, %v74_v29, 0.0  ;;  %v815_v34 = vsub.f32 %v785_v13, %v67_v30  ;;  %v85_v37 = vsel %vm46_vm0, %v76_v31, 0.0  ;;  %v387_v31 = vld [vmem:[%s1020_s6] sm:$0xff] }
  0x9b   :  { %80 = vadd.xlane.f32.xlu1 %v79_v33  ;;  %v62_v35 = vpop.xlane.xlu0 %61 }
  0x9c   :  { %v68_v36 = vmul.f32 0.03125, %v62_v35  ;;  %v75_v38 = vmul.f32 %v811_v32, %v811_v32  ;;  %v77_v39 = vmul.f32 %v815_v34, %v815_v34  ;;  %v390_v35 = vld [vmem:[%s1020_s6 + $0x18] sm:$0xff] }
  0x9e   :  { %v823_v40 = vsub.f32 %v794_v17, %v68_v36  ;;  %v82_v41 = vsel %vm46_vm0, %v75_v38, 0.0  ;;  %v88_v42 = vsel %vm46_vm0, %v77_v39, 0.0  ;;  %v392_v38 = vld [vmem:[%s1020_s6 + $0x28] sm:$0xff] }
  0x9f   :  { %86 = vadd.xlane.f32.xlu1 %v85_v37  ;;  %83 = vadd.xlane.f32.xlu0 %v82_v41  ;;  %v391_v37 = vld [vmem:[%s1020_s6 + $0x20] sm:$0xff]  ;;  %v394_v41 = vld [vmem:[%s1020_s6 + $0x38] sm:$0xff] }
  0xa0   :  { %v78_v43 = vmul.f32 %v823_v40, %v823_v40  ;;  %v636_v39 = vpack.c.bf16 %v392_v38, %v391_v37 }
  0xa2   :  { %v91_v44 = vsel %vm59_vm1, %v78_v43, 0.0  ;;  %v395_v43 = vld [vmem:[%s1020_s6 + $0x40] sm:$0xff] }
  0xa3   :  { %89 = vadd.xlane.f32.xlu0 %v88_v42  ;;  %92 = vadd.xlane.f32.xlu1 %v91_v44  ;;  %v396_v44 = vld [vmem:[%s1020_s6 + $0x48] sm:$0xff] }
  0xa4   :  { %v642_v45 = vpack.c.bf16 %v396_v44, %v395_v43 }
 0x128   :  { %v81_v53 = vpop.xlane.xlu1 %80 }
 0x129   :  { %v94_v54 = vmul.f32 0.03125, %v81_v53  ;;  %v648_v53 = vpack.c.bf16 %v400_v52, %v399_v49 }
 0x12b   :  { %v99_v55 = vadd.f32 1e-05, %v94_v54  ;;  %v401_v54 = vld [vmem:[%s1020_s6 + $0x70] sm:$0xff] }
 0x12c   :  { %v87_v56 = vpop.xlane.xlu1 %86  ;;  %v84_v57 = vpop.xlane.xlu0 %83 }
 0x12d   :  { %672 = vrsqrt.f32 %v99_v55  ;;  %v96_v58 = vmul.f32 0.03125, %v87_v56  ;;  %v95_v59 = vmul.f32 0.03125, %v84_v57  ;;  %v402_v55 = vld [vmem:[%s1020_s6 + $0x78] sm:$0xff]  ;;  %v516_v57 = vld [vmem:[%s1021_s5] ss:$0 sm:$0xff] }
 0x12e   :  { %v651_v56 = vpack.c.bf16 %v402_v55, %v401_v54 }
 0x12f   :  { %v101_v60 = vadd.f32 1e-05, %v96_v58  ;;  %v100_v61 = vadd.f32 1e-05, %v95_v59 }
 0x130   :  { %v93_v62 = vpop.xlane.xlu1 %92  ;;  %v90_v63 = vpop.xlane.xlu0 %89 }
 0x131   :  { %674 = vrsqrt.f32 %v101_v60  ;;  %v98_v0 = vmul.f32 0.03125, %v93_v62  ;;  %v97_v1 = vmul.f32 0.03125, %v90_v63 }
 0x132   :  { %676 = vrsqrt.f32 %v100_v61 }
 0x133   :  { %v102_v2 = vadd.f32 1e-05, %v97_v1  ;;  %v103_v4 = vadd.f32 1e-05, %v98_v0 }
 0x135   :  { %678 = vrsqrt.f32 %v102_v2 }
 0x136   :  { %680 = vrsqrt.f32 %v103_v4 }
 0x137   :  { %v673_v5 = vpop.eup %672 }
 0x138   :  { %v109_v9 = vmul.f32 %v673_v5, %v801_v24 }
 0x13a   :  { %v120_v11 = vmul.f32 %v514_v6, %v109_v9 }
 0x13b   :  { %v675_v12 = vpop.eup %674 }
 0x13c   :  { %v677_v14 = vpop.eup %676  ;;  %v131_v15 = vadd.f32 %v515_v10, %v120_v11  ;;  %v111_v18 = vmul.f32 %v675_v12, %v804_v25 }
 0x13d   :  { %v110_v16 = vmul.f32 %v677_v14, %v811_v32  ;;  %v388_v32 = vld [vmem:[%s1020_s6 + $0x8] sm:$0xff] }
 0x13e   :  { %562 = vmatmul.mubr.msk.f32.vlgmr.msra.gmra.mrb[0].mxu0 %vm46_vm0, %v131_v15  ;;  %v122_v22 = vmul.f32 %v514_v6, %v111_v18  ;;  %v630_v33 = vpack.c.bf16 %v388_v32, %v387_v31 }
 0x13f   :  { %564 = vmatprep.mubr.msk.f32.mxu0 %vm703_vm2, %v704_v51  ;;  %v121_v19 = vmul.f32 %v514_v6, %v110_v16  ;;  %v679_v20 = vpop.eup %678 }
 0x140   :  { %v112_v23 = vmul.f32 %v679_v20, %v815_v34  ;;  %v681_v24 = vpop.eup %680  ;;  %v133_v26 = vadd.f32 %v515_v10, %v122_v22  ;;  %631 = vmatpush3.bf16.msra.mxu0 %v630_v33  ;;  %661 = vmatpush3.bf16.msra.mxu1 %v630_v33  ;;  %v389_v34 = vld [vmem:[%s1020_s6 + $0x10] sm:$0xff] }
 0x141   :  { %v132_v21 = vadd.f32 %v515_v10, %v121_v19  ;;  %v113_v25 = vmul.f32 %v681_v24, %v823_v40  ;;  %632 = vmatprep.subr.bf16.mxu0 %v702_v50  ;;  %654 = vmatprep.subr.bf16.mxu1 %v702_v50  ;;  %v633_v36 = vpack.c.bf16 %v390_v35, %v389_v34  ;;  %v393_v40 = vld [vmem:[%s1020_s6 + $0x30] sm:$0xff] }
 0x142   :  { %v123_v27 = vmul.f32 %v514_v6, %v112_v23  ;;  %v639_v42 = vpack.c.bf16 %v394_v41, %v393_v40 }
 0x143   :  { %565 = vmatmul.mubr.msk.f32.gmra.mrb[2].mxu0 %vm46_vm0, %v132_v21  ;;  %v124_v29 = vmul.f32 %v514_v6, %v113_v25 }
 0x144   :  { %567 = vmatprep.mubr.msk.f32.mxu0 %vm703_vm2, %v704_v51  ;;  %v134_v28 = vadd.f32 %v515_v10, %v123_v27  ;;  %634 = vmatpush3.bf16.msra.mxu0 %v633_v36 }
 0x145   :  { %v135_v30 = vadd.f32 %v515_v10, %v124_v29  ;;  %662 = vmatpush3.bf16.msra.mxu1 %v633_v36  ;;  %635 = vmatprep.subr.bf16.mxu0 %v702_v50 }
 0x146   :  { %655 = vmatprep.subr.bf16.mxu1 %v702_v50 }
 0x147   :  { %568 = vmatmul.mubr.msk.f32.gmra.mrb[4].mxu0 %vm46_vm0, %v133_v26 }
 0x148   :  { %570 = vmatprep.mubr.msk.f32.mxu0 %vm703_vm2, %v704_v51  ;;  %637 = vmatpush3.bf16.msra.mxu0 %v636_v39 }
 0x149   :  { %663 = vmatpush3.bf16.msra.mxu1 %v636_v39  ;;  %638 = vmatprep.subr.bf16.mxu0 %v702_v50 }
 0x14a   :  { %656 = vmatprep.subr.bf16.mxu1 %v702_v50 }
 0x14b   :  { %571 = vmatmul.mubr.msk.f32.gmra.mrb[6].mxu0 %vm46_vm0, %v134_v28 }
 0x14c   :  { %573 = vmatprep.mubr.msk.f32.mxu0 %vm703_vm2, %v704_v51  ;;  %640 = vmatpush3.bf16.msra.mxu0 %v639_v42 }
 0x14d   :  { %664 = vmatpush3.bf16.msra.mxu1 %v639_v42  ;;  %641 = vmatprep.subr.bf16.mxu0 %v702_v50 }
 0x14e   :  { %657 = vmatprep.subr.bf16.mxu1 %v702_v50 }
 0x14f   :  { %574 = vmatmul.mubr.msk.f32.gmra.mrb[8].mxu0 %vm46_vm0, %v135_v30 }
 0x150   :  { %608 = vmatprep.mubr.msk.f32.mxu0 %vm703_vm2, %v704_v51  ;;  %643 = vmatpush3.bf16.msra.mxu0 %v642_v45 }
 0x151   :  { %665 = vmatpush3.bf16.msra.mxu1 %v642_v45  ;;  %644 = vmatprep.subr.bf16.mxu0 %v702_v50 }
 0x152   :  { %658 = vmatprep.subr.bf16.mxu1 %v702_v50 }
 0x154   :  { %646 = vmatpush3.bf16.msra.mxu0 %v645_v48 }
 0x155   :  { %666 = vmatpush3.bf16.msra.mxu1 %v645_v48  ;;  %647 = vmatprep.subr.bf16.mxu0 %v702_v50 }
 0x156   :  { %659 = vmatprep.subr.bf16.mxu1 %v702_v50 }
 0x158   :  { %649 = vmatpush3.bf16.msra.mxu0 %v648_v53 }
 0x159   :  { %667 = vmatpush3.bf16.msra.mxu1 %v648_v53  ;;  %650 = vmatprep.subr.bf16.mxu0 %v702_v50 }
 0x15a   :  { %660 = vmatprep.subr.bf16.mxu1 %v702_v50 }
 0x15c   :  { %652 = vmatpush3.bf16.msra.mxu0 %v651_v56 }
 0x15d   :  { %668 = vmatpush3.bf16.msra.mxu1 %v651_v56 }
 0x211   :  { %v228_v58 = vpop.f32.mrb[0].mxu0 }
 0x212   :  { %v941_v59 = vadd.f32 %v516_v57, %v228_v58  ;;  %v563_v60 = vpop.f32.mrb[1].mxu0 }
 0x214   :  { %v944_v61 = vmul.f32 0.70710677, %v941_v59 }
 0x216   :  { %v262_v62 = vand.u32 2147483647, %v944_v61  ;;  %v233_v63 = vpop.f32.mrb[2].mxu0  ;;  %vm362_vm3 = vcmp.ge.f32.partialorder %v944_v61, 0.0 }
 0x217   :  { %v947_v0 = vadd.f32 %v516_v57, %v233_v63  ;;  %v566_v50 = vpop.f32.mrb[3].mxu0 }
 0x218   :  { %v267_v1 = vmul.f32 0.3275911, %v262_v62  ;;  %v332_v21 = vsub.f32 0.0, %v262_v62 }
 0x219   :  { %v950_v2 = vmul.f32 0.70710677, %v947_v0 }
 0x21a   :  { %v272_v4 = vadd.f32 1.0, %v267_v1  ;;  %v238_v5 = vpop.f32.mrb[4].mxu0  ;;  %v337_v30 = vmul.f32 %v332_v21, %v262_v62 }
 0x21b   :  { %v263_v6 = vand.u32 2147483647, %v950_v2  ;;  %v953_v9 = vadd.f32 %v516_v57, %v238_v5  ;;  %v569_v10 = vpop.f32.mrb[5].mxu0  ;;  %vm363_vm4 = vcmp.ge.f32.partialorder %v950_v2, 0.0 }
 0x21c   :  { %682 = vrcp.f32 %v272_v4  ;;  %v342_v38 = vmul.f32 1.442695, %v337_v30 }
 0x21d   :  { %v268_v11 = vmul.f32 0.3275911, %v263_v6  ;;  %v956_v12 = vmul.f32 0.70710677, %v953_v9  ;;  %v333_v33 = vsub.f32 0.0, %v263_v6  ;;  %v254_v2 = vmul.f32 0.5, %v953_v9 }
 0x21e   :  { %v243_v14 = vpop.f32.mrb[6].mxu0 }
 0x21f   :  { %v273_v15 = vadd.f32 1.0, %v268_v11  ;;  %v264_v16 = vand.u32 2147483647, %v956_v12  ;;  %v572_v18 = vpop.f32.mrb[7].mxu0  ;;  %v959_v19 = vadd.f32 %v516_v57, %v243_v14  ;;  %v338_v41 = vmul.f32 %v333_v33, %v263_v6 }
 0x220   :  { %vm364_vm5 = vcmp.ge.f32.partialorder %v956_v12, 0.0 }
 0x221   :  { %684 = vrcp.f32 %v273_v15  ;;  %v269_v20 = vmul.f32 0.3275911, %v264_v16  ;;  %v962_v22 = vmul.f32 0.70710677, %v959_v19  ;;  %v334_v42 = vsub.f32 0.0, %v264_v16 }
 0x222   :  { %v248_v23 = vpop.f32.mrb[8].mxu0  ;;  %v344_v49 = vmul.f32 1.442695, %v338_v41 }
 0x223   :  { %v274_v24 = vadd.f32 1.0, %v269_v20  ;;  %v964_v26 = vadd.f32 %v516_v57, %v248_v23  ;;  %v575_v27 = vpop.f32.mrb[9].mxu0  ;;  %v265_v25 = vand.u32 2147483647, %v962_v22  ;;  %v339_v52 = vmul.f32 %v334_v42, %v264_v16 }
 0x224   :  { %vm365_vm6 = vcmp.ge.f32.partialorder %v962_v22, 0.0 }
 0x225   :  { %686 = vrcp.f32 %v274_v24  ;;  %v968_v28 = vmul.f32 0.70710677, %v964_v26  ;;  %v270_v31 = vmul.f32 0.3275911, %v265_v25  ;;  %v335_v53 = vsub.f32 0.0, %v265_v25 }
 0x226   :  { %v683_v29 = vpop.eup %682  ;;  %v346_v62 = vmul.f32 1.442695, %v339_v52 }
 0x227   :  { %v287_v32 = vmul.f32 1.0614054, %v683_v29  ;;  %v266_v34 = vand.u32 2147483647, %v968_v28  ;;  %v275_v35 = vadd.f32 1.0, %v270_v31  ;;  %v340_v1 = vmul.f32 %v335_v53, %v265_v25 }
 0x228   :  { %vm366_vm7 = vcmp.ge.f32.partialorder %v968_v28, 0.0 }
 0x229   :  { %v292_v36 = vadd.f32 -1.4531521, %v287_v32  ;;  %v271_v37 = vmul.f32 0.3275911, %v266_v34  ;;  %688 = vrcp.f32 %v275_v35  ;;  %v336_v63 = vsub.f32 0.0, %v266_v34 }
 0x22a   :  { %v348_v23 = vmul.f32 1.442695, %v340_v1 }
 0x22b   :  { %v685_v39 = vpop.eup %684  ;;  %v297_v40 = vmul.f32 %v683_v29, %v292_v36  ;;  %v276_v43 = vadd.f32 1.0, %v271_v37  ;;  %v341_v18 = vmul.f32 %v336_v63, %v266_v34 }
 0x22c   :  { %v288_v44 = vmul.f32 1.0614054, %v685_v39 }
 0x22d   :  { %v302_v45 = vadd.f32 1.4214138, %v297_v40  ;;  %690 = vrcp.f32 %v276_v43  ;;  %v350_v37 = vmul.f32 1.442695, %v341_v18 }
 0x22e   :  { %692 = vpow2.f32 %v342_v38  ;;  %v293_v46 = vadd.f32 -1.4531521, %v288_v44 }
 0x22f   :  { %v687_v47 = vpop.eup %686  ;;  %v307_v48 = vmul.f32 %v683_v29, %v302_v45  ;;  %694 = vpow2.f32 %v344_v49 }
 0x230   :  { %v298_v54 = vmul.f32 %v685_v39, %v293_v46  ;;  %v289_v55 = vmul.f32 1.0614054, %v687_v47  ;;  %696 = vpow2.f32 %v346_v62 }
 0x231   :  { %v312_v56 = vadd.f32 -0.28449672, %v307_v48  ;;  %698 = vpow2.f32 %v348_v23  ;;  %v252_v48 = vmul.f32 0.5, %v941_v59 }
 0x232   :  { %v303_v57 = vadd.f32 1.4214138, %v298_v54  ;;  %v294_v58 = vadd.f32 -1.4531521, %v289_v55  ;;  %700 = vpow2.f32 %v350_v37 }
 0x233   :  { %v317_v60 = vmul.f32 %v683_v29, %v312_v56  ;;  %v689_v50 = vpop.eup %688 }
 0x234   :  { %v308_v4 = vmul.f32 %v685_v39, %v303_v57  ;;  %v299_v5 = vmul.f32 %v687_v47, %v294_v58  ;;  %v290_v10 = vmul.f32 1.0614054, %v689_v50 }
 0x235   :  { %v322_v6 = vadd.f32 0.2548296, %v317_v60 }
 0x236   :  { %v313_v11 = vadd.f32 -0.28449672, %v308_v4  ;;  %v304_v14 = vadd.f32 1.4214138, %v299_v5  ;;  %v295_v20 = vadd.f32 -1.4531521, %v290_v10 }
 0x237   :  { %v691_v15 = vpop.eup %690  ;;  %v327_v16 = vmul.f32 %v683_v29, %v322_v6  ;;  %v253_v5 = vmul.f32 0.5, %v947_v0 }
 0x238   :  { %v693_v21 = vpop.eup %692  ;;  %v318_v24 = vmul.f32 %v685_v39, %v313_v11  ;;  %v309_v27 = vmul.f32 %v687_v47, %v304_v14  ;;  %v291_v30 = vmul.f32 1.0614054, %v691_v15  ;;  %v300_v32 = vmul.f32 %v689_v50, %v295_v20 }
 0x239   :  { %v352_v31 = vmul.f32 %v693_v21, %v327_v16  ;;  %v695_v42 = vpop.eup %694 }
 0x23a   :  { %v323_v33 = vadd.f32 0.2548296, %v318_v24  ;;  %v314_v25 = vadd.f32 -0.28449672, %v309_v27  ;;  %v296_v35 = vadd.f32 -1.4531521, %v291_v30 }
 0x23b   :  { %v357_v36 = vsub.f32 1.0, %v352_v31  ;;  %v305_v38 = vadd.f32 1.4214138, %v300_v32  ;;  %v255_v32 = vmul.f32 0.5, %v959_v19  ;;  %v522_v19 = vld [vmem:[%s1022_s7] ss:$0 sm:$0xff] }
 0x23c   :  { %v328_v40 = vmul.f32 %v685_v39, %v323_v33  ;;  %v319_v41 = vmul.f32 %v687_v47, %v314_v25  ;;  %v301_v29 = vmul.f32 %v691_v15, %v296_v35  ;;  %v697_v39 = vpop.eup %696  ;;  %v256_v35 = vmul.f32 0.5, %v964_v26 }
 0x23d   :  { %v367_v34 = vsub.f32 0.0, %v357_v36  ;;  %v310_v43 = vmul.f32 %v689_v50, %v305_v38  ;;  %v699_v11 = vpop.eup %698 }
 0x23e   :  { %v353_v44 = vmul.f32 %v695_v42, %v328_v40  ;;  %v324_v45 = vadd.f32 0.2548296, %v319_v41  ;;  %v306_v46 = vadd.f32 1.4214138, %v301_v29  ;;  %v701_v23 = vpop.eup %700 }
 0x23f   :  { %v372_v49 = vsel %vm362_vm3, %v357_v36, %v367_v34  ;;  %v315_v52 = vadd.f32 -0.28449672, %v310_v43 }
 0x240   :  { %v377_v53 = vadd.f32 1.0, %v372_v49  ;;  %v358_v54 = vsub.f32 1.0, %v353_v44  ;;  %v329_v55 = vmul.f32 %v687_v47, %v324_v45  ;;  %v311_v56 = vmul.f32 %v691_v15, %v306_v46 }
 0x241   :  { %v320_v57 = vmul.f32 %v689_v50, %v315_v52 }
 0x242   :  { %v382_v58 = vmul.f32 %v377_v53, %v252_v48  ;;  %v368_v60 = vsub.f32 0.0, %v358_v54  ;;  %v354_v62 = vmul.f32 %v697_v39, %v329_v55  ;;  %v316_v63 = vadd.f32 -0.28449672, %v311_v56 }
 0x243   :  { %v325_v61 = vadd.f32 0.2548296, %v320_v57 }
 0x244   :  { %609 = vmatmul.mubr.f32.vlgmr.msra.gmra.mrb[10].mxu0 %v382_v58  ;;  %v373_v1 = vsel %vm363_vm4, %v358_v54, %v368_v60  ;;  %v359_v4 = vsub.f32 1.0, %v354_v62  ;;  %v321_v59 = vmul.f32 %v691_v15, %v316_v63 }
 0x245   :  { %v378_v6 = vadd.f32 1.0, %v373_v1  ;;  %v330_v10 = vmul.f32 %v689_v50, %v325_v61 }
 0x246   :  { %v369_v47 = vsub.f32 0.0, %v359_v4  ;;  %v326_v14 = vadd.f32 0.2548296, %v321_v59 }
 0x247   :  { %v383_v16 = vmul.f32 %v378_v6, %v253_v5  ;;  %v355_v18 = vmul.f32 %v699_v11, %v330_v10 }
 0x248   :  { %v374_v20 = vsel %vm364_vm5, %v359_v4, %v369_v47  ;;  %v331_v21 = vmul.f32 %v691_v15, %v326_v14 }
 0x249   :  { %612 = vmatmul.mubr.f32.vlgmr.msra.gmra.mrb[0].mxu1 %v383_v16  ;;  %v379_v24 = vadd.f32 1.0, %v374_v20  ;;  %v360_v27 = vsub.f32 1.0, %v355_v18 }
 0x24a   :  { %614 = vmatprep.mubr.msk.f32.mxu1 %vm703_vm2, %v704_v51  ;;  %v356_v0 = vmul.f32 %v701_v23, %v331_v21 }
 0x24b   :  { %v384_v50 = vmul.f32 %v379_v24, %v254_v2  ;;  %v370_v30 = vsub.f32 0.0, %v360_v27 }
 0x24c   :  { %v361_v31 = vsub.f32 1.0, %v356_v0 }
 0x24d   :  { %615 = vmatmul.mubr.f32.gmra.mrb[2].mxu1 %v384_v50  ;;  %v375_v12 = vsel %vm365_vm6, %v360_v27, %v370_v30 }
 0x24e   :  { %617 = vmatprep.mubr.msk.f32.mxu1 %vm703_vm2, %v704_v51  ;;  %v380_v9 = vadd.f32 1.0, %v375_v12  ;;  %v371_v15 = vsub.f32 0.0, %v361_v31 }
 0x250   :  { %v385_v33 = vmul.f32 %v380_v9, %v255_v32  ;;  %v376_v25 = vsel %vm366_vm7, %v361_v31, %v371_v15 }
 0x251   :  { %v381_v36 = vadd.f32 1.0, %v376_v25 }
 0x252   :  { %618 = vmatmul.mubr.f32.gmra.mrb[4].mxu1 %v385_v33 }
 0x253   :  { %620 = vmatprep.mubr.msk.f32.mxu1 %vm703_vm2, %v704_v51  ;;  %v386_v22 = vmul.f32 %v381_v36, %v256_v35 }
 0x256   :  { %621 = vmatmul.mubr.f32.gmra.mrb[6].mxu1 %v386_v22 }
 0x317   :  { %v476_v37 = vpop.f32.mrb[10].mxu0 }
 0x318   :  { %v477_v38 = vadd.f32 %v522_v19, %v476_v37  ;;  %v610_v40 = vpop.f32.mrb[11].mxu0 }
 0x31a   :  { %v500_v28 = vadd.f32 %v477_v38, %v759_v3 }
 0x31c   :  { %505 = vst.msk [vmem:[%s1023_s8] sm:$0xff] %vm46_vm0, %v500_v28  ;;  %v481_v26 = vpop.f32.mrb[0].mxu1 }
 0x31d   :  { %v482_v41 = vadd.f32 %v522_v19, %v481_v26  ;;  %v613_v29 = vpop.f32.mrb[1].mxu1 }
 0x31f   :  { %v501_v51 = vadd.f32 %v482_v41, %v772_v8 }
 0x320   :  { %v486_v42 = vpop.f32.mrb[2].mxu1 }
 0x321   :  { %506 = vst.msk [vmem:[%s1023_s8 + $0x8] sm:$0xff] %vm46_vm0, %v501_v51  ;;  %v487_v34 = vadd.f32 %v522_v19, %v486_v42  ;;  %v616_v43 = vpop.f32.mrb[3].mxu1 }
 0x323   :  { %v502_v3 = vadd.f32 %v487_v34, %v770_v7 }
 0x325   :  { %507 = vst.msk [vmem:[%s1023_s8 + $0x10] sm:$0xff] %vm46_vm0, %v502_v3  ;;  %v491_v44 = vpop.f32.mrb[4].mxu1 }
 0x326   :  { %v492_v45 = vadd.f32 %v522_v19, %v491_v44  ;;  %v619_v46 = vpop.f32.mrb[5].mxu1 }
 0x328   :  { %v503_v8 = vadd.f32 %v492_v45, %v785_v13 }
 0x329   :  { %v496_v48 = vpop.f32.mrb[6].mxu1 }
 0x32a   :  { %508 = vst.msk [vmem:[%s1023_s8 + $0x18] sm:$0xff] %vm46_vm0, %v503_v8  ;;  %v497_v49 = vadd.f32 %v522_v19, %v496_v48  ;;  %v622_v52 = vpop.f32.mrb[7].mxu1 }
 0x32c   :  { %v504_v7 = vadd.f32 %v497_v49, %v794_v17 }
 0x32e   :  { %509 = vst.msk [vmem:[%s1023_s8 + $0x20] sm:$0x3] %vm59_vm1, %v504_v7 }

// kernel: space_time_block_forward.4
= control target key start
LH: loop header
LB: loop body
LE: loop exit
PB: predicated region body
PF: predicated region fallthrough
CT: control target
= control target key end

     0   :  { %vm33_vm0 = vcmask 261120   ;;  %v4287_v40 = vmov 0.0|0.0   ;;  %vm4288_vm1 = vmmov 0   ;;  %v4289_v41 = vmov 0.0   ;;  %s4290_s21 = smov 96   ;;  %s4292_s22 = smov 88   ;;  %s4891_s0 = inlined_call_operand.vmem [shape: f32[5,8,32], index: 0, kind: input, shape index: {}]   ;;  %s4892_s3 = inlined_call_operand.vmem [shape: f32[32,96], index: 3, kind: input, shape index: {}]   ;;  %s4893_s1 = inlined_call_operand.vmem [shape: f32[1,32], index: 1, kind: input, shape index: {}]   ;;  %s4894_s2 = inlined_call_operand.vmem [shape: f32[1,32], index: 2, kind: input, shape index: {}]   ;;  %s4895_s4 = inlined_call_operand.vmem [shape: f32[1,96], index: 4, kind: input, shape index: {}]   ;;  %s4896_s5 = inlined_call_operand.vmem [shape: f32[32,32], index: 5, kind: input, shape index: {}]   ;;  %s4897_s6 = inlined_call_operand.vmem [shape: f32[1,32], index: 6, kind: input, shape index: {}]   ;;  %s4898_s7 = inlined_call_operand.vmem [shape: f32[5,8,32], index: 7, kind: output, shape index: {}]  }
   0x1   :  { %v26_v0 = vld [vmem:[%s4891_s0] sm:$0xff]  ;;  %v28_v1 = vld [vmem:[%s4891_s0 + $0x10] sm:$0xff]  ;;  %v27_v2 = vld [vmem:[%s4891_s0 + $0x8] sm:$0xff]  ;;  %4164 = vmatprep.subr.bf16.mxu0 %v4287_v40  ;;  %3926 = vmatprep.mubr.msk.f32.mxu0 %vm4288_vm1, %v4289_v41  ;;  %vm246_vm2 = vcmask 64512   ;;  %s4293_s23 = smov 120   ;;  %s4294_s24 = smov 56  }
   0x2   :  { %v34_v3 = vsel %vm33_vm0, %v26_v0, 0.0  ;;  %v40_v4 = vsel %vm33_vm0, %v28_v1, 0.0  ;;  %v29_v5 = vld [vmem:[%s4891_s0 + $0x18] sm:$0xff]  ;;  %v37_v6 = vsel %vm33_vm0, %v27_v2, 0.0  ;;  %v30_v8 = vld [vmem:[%s4891_s0 + $0x20] sm:$0xff]  ;;  %v123_v36 = vld [vmem:[%s4892_s3 + $0x8] sm:$0xff]  ;;  %4176 = vmatprep.subr.bf16.mxu1 %v4287_v40  ;;  %3935 = vmatprep.mubr.msk.f32.mxu1 %vm4288_vm1, %v4289_v41 }
   0x3   :  { %35 = vadd.xlane.f32.xlu0 %v34_v3  ;;  %41 = vadd.xlane.f32.xlu1 %v40_v4  ;;  %v43_v7 = vsel %vm33_vm0, %v29_v5, 0.0  ;;  %v46_v9 = vsel %vm33_vm0, %v30_v8, 0.0  ;;  %v122_v35 = vld [vmem:[%s4892_s3] sm:$0xff]  ;;  %v124_v38 = vld [vmem:[%s4892_s3 + $0x10] sm:$0xff]  ;;  %v125_v39 = vld [vmem:[%s4892_s3 + $0x18] sm:$0xff]  ;;  %s4295_s25 = smov 80  }
   0x4   :  { %v4165_v37 = vpack.c.bf16 %v123_v36, %v122_v35  ;;  %v4168_v42 = vpack.c.bf16 %v125_v39, %v124_v38  ;;  %v3746_v59 = vld [vmem:[%s4893_s1] ss:$0 sm:$0xff]  ;;  %s4296_s26 = smov 112   ;;  %s4297_s27 = smov 48   ;;  %vm3609_vm3 = vcmask 130048   ;;  %vm3615_vm4 = vcmask 195584  }
   0x5   :  { %v3747_v61 = vld [vmem:[%s4894_s2] ss:$0 sm:$0xff]  ;;  %s4298_s28 = smov 72   ;;  %s4299_s29 = smov 104  }
   0x6   :  { %4166 = vmatpush3.bf16.msra.mxu0 %v4165_v37  ;;  %4178 = vmatpush3.bf16.msra.mxu1 %v4165_v37  ;;  %s4300_s30 = smov 40   ;;  %s4301_s8 = smov 16  }
   0x7   :  { %38 = vadd.xlane.f32.xlu0 %v37_v6  ;;  %44 = vadd.xlane.f32.xlu1 %v43_v7  ;;  %s4302_s9 = smov 8   ;;  %s4303_s17 = smov 24  }
   0x8   :  { %4167 = vmatprep.subr.bf16.mxu0 %v4287_v40  ;;  %4177 = vmatprep.subr.bf16.mxu1 %v4287_v40 }
   0xa   :  { %4169 = vmatpush3.bf16.msra.mxu0 %v4168_v42  ;;  %4179 = vmatpush3.bf16.msra.mxu1 %v4168_v42 }
   0xb   :  { %47 = vadd.xlane.f32.xlu0 %v46_v9  ;;  %3971 = vmatprep.subr.mxu0 %v4289_v41 }
   0xc   :  { %3941 = vmatprep.subr.mxu1 %v4289_v41 }
  0x90   :  { %v36_v10 = vpop.xlane.xlu0 %35  ;;  %v42_v11 = vpop.xlane.xlu1 %41 }
  0x91   :  { %v50_v12 = vmul.f32 0.03125, %v36_v10  ;;  %v52_v13 = vmul.f32 0.03125, %v42_v11 }
  0x93   :  { %v4364_v14 = vsub.f32 %v26_v0, %v50_v12  ;;  %v4366_v15 = vsub.f32 %v28_v1, %v52_v13 }
  0x94   :  { %v39_v16 = vpop.xlane.xlu0 %38  ;;  %v45_v17 = vpop.xlane.xlu1 %44 }
  0x95   :  { %v51_v18 = vmul.f32 0.03125, %v39_v16  ;;  %v53_v19 = vmul.f32 0.03125, %v45_v17  ;;  %v60_v20 = vmul.f32 %v4364_v14, %v4364_v14  ;;  %v62_v21 = vmul.f32 %v4366_v15, %v4366_v15  ;;  %v3748_v16 = vld [vmem:[%s4895_s4] ss:$0 sm:$0xff]  ;;  %s4291_s4 = smov 64  }
  0x97   :  { %v4372_v22 = vsub.f32 %v27_v2, %v51_v18  ;;  %v4374_v23 = vsub.f32 %v29_v5, %v53_v19  ;;  %v65_v24 = vsel %vm33_vm0, %v60_v20, 0.0  ;;  %v71_v27 = vsel %vm33_vm0, %v62_v21, 0.0 }
  0x98   :  { %66 = vadd.xlane.f32.xlu1 %v65_v24  ;;  %v48_v25 = vpop.xlane.xlu0 %47 }
  0x99   :  { %v54_v26 = vmul.f32 0.03125, %v48_v25  ;;  %v61_v28 = vmul.f32 %v4372_v22, %v4372_v22  ;;  %v63_v29 = vmul.f32 %v4374_v23, %v4374_v23 }
  0x9b   :  { %v4382_v30 = vsub.f32 %v30_v8, %v54_v26  ;;  %v68_v31 = vsel %vm33_vm0, %v61_v28, 0.0  ;;  %v74_v32 = vsel %vm33_vm0, %v63_v29, 0.0 }
  0x9c   :  { %72 = vadd.xlane.f32.xlu1 %v71_v27  ;;  %69 = vadd.xlane.f32.xlu0 %v68_v31 }
  0x9d   :  { %v64_v33 = vmul.f32 %v4382_v30, %v4382_v30 }
  0x9f   :  { %v77_v34 = vsel %vm33_vm0, %v64_v33, 0.0 }
  0xa0   :  { %75 = vadd.xlane.f32.xlu0 %v74_v32  ;;  %78 = vadd.xlane.f32.xlu1 %v77_v34 }
 0x125   :  { %v67_v43 = vpop.xlane.xlu1 %66 }
 0x126   :  { %v80_v44 = vmul.f32 0.03125, %v67_v43 }
 0x128   :  { %v85_v45 = vadd.f32 1e-05, %v80_v44 }
 0x129   :  { %v73_v46 = vpop.xlane.xlu1 %72  ;;  %v70_v47 = vpop.xlane.xlu0 %69 }
 0x12a   :  { %4197 = vrsqrt.f32 %v85_v45  ;;  %v82_v48 = vmul.f32 0.03125, %v73_v46  ;;  %v81_v49 = vmul.f32 0.03125, %v70_v47 }
 0x12c   :  { %v87_v50 = vadd.f32 1e-05, %v82_v48  ;;  %v86_v51 = vadd.f32 1e-05, %v81_v49 }
 0x12d   :  { %v79_v52 = vpop.xlane.xlu1 %78  ;;  %v76_v53 = vpop.xlane.xlu0 %75 }
 0x12e   :  { %4199 = vrsqrt.f32 %v87_v50  ;;  %v84_v54 = vmul.f32 0.03125, %v79_v52  ;;  %v83_v55 = vmul.f32 0.03125, %v76_v53 }
 0x12f   :  { %4201 = vrsqrt.f32 %v86_v51 }
 0x130   :  { %v89_v56 = vadd.f32 1e-05, %v84_v54  ;;  %v88_v57 = vadd.f32 1e-05, %v83_v55 }
 0x132   :  { %4203 = vrsqrt.f32 %v89_v56 }
 0x133   :  { %4205 = vrsqrt.f32 %v88_v57 }
 0x134   :  { %v4198_v58 = vpop.eup %4197 }
 0x135   :  { %v95_v60 = vmul.f32 %v4198_v58, %v4364_v14 }
 0x137   :  { %v106_v62 = vmul.f32 %v3746_v59, %v95_v60 }
 0x138   :  { %v4200_v63 = vpop.eup %4199 }
 0x139   :  { %v4202_v0 = vpop.eup %4201  ;;  %v117_v1 = vadd.f32 %v3747_v61, %v106_v62  ;;  %v97_v3 = vmul.f32 %v4200_v63, %v4366_v15 }
 0x13a   :  { %v96_v2 = vmul.f32 %v4202_v0, %v4372_v22 }
 0x13b   :  { %3927 = vmatmul.mubr.msk.f32.vlgmr.msra.gmra.mrb[0].mxu0 %vm33_vm0, %v117_v1  ;;  %v108_v8 = vmul.f32 %v3746_v59, %v97_v3 }
 0x13c   :  { %v4204_v4 = vpop.eup %4203  ;;  %3929 = vmatprep.mubr.msk.f32.mxu0 %vm4288_vm1, %v4289_v41  ;;  %v107_v5 = vmul.f32 %v3746_v59, %v96_v2 }
 0x13d   :  { %v4206_v6 = vpop.eup %4205  ;;  %v99_v10 = vmul.f32 %v4204_v4, %v4382_v30  ;;  %v119_v12 = vadd.f32 %v3747_v61, %v108_v8 }
 0x13e   :  { %v118_v7 = vadd.f32 %v3747_v61, %v107_v5  ;;  %v98_v9 = vmul.f32 %v4206_v6, %v4374_v23 }
 0x13f   :  { %v110_v14 = vmul.f32 %v3746_v59, %v99_v10 }
 0x140   :  { %3930 = vmatmul.mubr.msk.f32.gmra.mrb[2].mxu0 %vm33_vm0, %v118_v7  ;;  %v109_v11 = vmul.f32 %v3746_v59, %v98_v9 }
 0x141   :  { %3932 = vmatprep.mubr.msk.f32.mxu0 %vm4288_vm1, %v4289_v41  ;;  %v121_v15 = vadd.f32 %v3747_v61, %v110_v14 }
 0x142   :  { %v120_v13 = vadd.f32 %v3747_v61, %v109_v11 }
 0x144   :  { %3933 = vmatmul.mubr.msk.f32.gmra.mrb[4].mxu0 %vm33_vm0, %v119_v12  ;;  %3936 = vmatmul.mubr.msk.f32.vlgmr.msra.gmra.mrb[0].mxu1 %vm33_vm0, %v120_v13 }
 0x145   :  { %3938 = vmatprep.mubr.msk.f32.mxu1 %vm4288_vm1, %v4289_v41  ;;  %3973 = vmatprep.mubr.msk.f32.mxu0 %vm4288_vm1, %v4289_v41 }
 0x148   :  { %3939 = vmatmul.mubr.msk.f32.gmra.mrb[2].mxu1 %vm33_vm0, %v121_v15 }
 0x149   :  { %3943 = vmatprep.mubr.msk.f32.mxu1 %vm4288_vm1, %v4289_v41 }
 0x20e   :  { %v214_v17 = vpop.f32.mrb[0].mxu0 }
 0x20f   :  { %v4440_v18 = vadd.f32 %v3748_v16, %v214_v17  ;;  %v3928_v19 = vpop.f32.mrb[1].mxu0 }
 0x211   :  { %244 = vrot.lane.b32.xlu0 %v4440_v18, %s4290_s21  ;;  %v4457_v33 = vmul.f32 0.35355338, %v4440_v18 }
 0x213   :  { %v219_v20 = vpop.f32.mrb[2].mxu0 }
 0x214   :  { %v4443_v21 = vadd.f32 %v3748_v16, %v219_v20  ;;  %v3931_v22 = vpop.f32.mrb[3].mxu0 }
 0x216   :  { %323 = vrot.lane.b32.xlu1 %v4443_v21, %s4290_s21  ;;  %v4466_v35 = vmul.f32 0.35355338, %v4443_v21 }
 0x217   :  { %v224_v23 = vpop.f32.mrb[4].mxu0  ;;  %v229_v24 = vpop.f32.mrb[0].mxu1 }
 0x218   :  { %v4446_v25 = vadd.f32 %v3748_v16, %v224_v23  ;;  %v3934_v26 = vpop.f32.mrb[5].mxu0  ;;  %v3937_v27 = vpop.f32.mrb[1].mxu1  ;;  %v4449_v29 = vadd.f32 %v3748_v16, %v229_v24 }
 0x21a   :  { %401 = vrot.lane.b32.xlu1 %v4446_v25, %s4290_s21  ;;  %v4475_v37 = vmul.f32 0.35355338, %v4446_v25  ;;  %v4484_v39 = vmul.f32 0.35355338, %v4449_v29 }
 0x21b   :  { %v234_v28 = vpop.f32.mrb[2].mxu1 }
 0x21c   :  { %v4451_v30 = vadd.f32 %v3748_v16, %v234_v28  ;;  %v3940_v31 = vpop.f32.mrb[3].mxu1 }
 0x21e   :  { %479 = vrot.lane.b32.xlu1 %v4449_v29, %s4290_s21  ;;  %557 = vrot.lane.b32.xlu0 %v4451_v30, %s4290_s21  ;;  %v4493_v43 = vmul.f32 0.35355338, %v4451_v30 }
 0x283   :  { %v245_v32 = vpop.permute.xlu0 %244 }
 0x284   :  { %3942 = vmatpush3.xpose.msk.msra.mxu1 %vm246_vm2, %v245_v32 }
 0x285   :  { %3946 = vmatprep.subr.mxu1 %v4289_v41 }
 0x287   :  { %3944 = vmatmul.mubr.msk.f32.vlgmr.msra.gmra.mrb[4].mxu1 %vm246_vm2, %v4457_v33 }
 0x288   :  { %v324_v34 = vpop.permute.xlu1 %323  ;;  %3948 = vmatprep.mubr.msk.f32.mxu1 %vm4288_vm1, %v4289_v41 }
 0x289   :  { %3947 = vmatpush3.xpose.msk.msra.mxu1 %vm246_vm2, %v324_v34 }
 0x28a   :  { %3951 = vmatprep.subr.mxu1 %v4289_v41 }
 0x28c   :  { %v402_v36 = vpop.permute.xlu1 %401  ;;  %3949 = vmatmul.mubr.msk.f32.vlgmr.msra.gmra.mrb[6].mxu1 %vm246_vm2, %v4466_v35 }
 0x28d   :  { %3952 = vmatpush3.xpose.msk.msra.mxu1 %vm246_vm2, %v402_v36  ;;  %3953 = vmatprep.mubr.msk.f32.mxu1 %vm4288_vm1, %v4289_v41 }
 0x28e   :  { %3956 = vmatprep.subr.mxu1 %v4289_v41 }
 0x290   :  { %v480_v38 = vpop.permute.xlu1 %479  ;;  %3954 = vmatmul.mubr.msk.f32.vlgmr.msra.gmra.mrb[8].mxu1 %vm246_vm2, %v4475_v37  ;;  %v558_v42 = vpop.permute.xlu0 %557 }
 0x291   :  { %3957 = vmatpush3.xpose.msk.msra.mxu1 %vm246_vm2, %v480_v38  ;;  %3958 = vmatprep.mubr.msk.f32.mxu1 %vm4288_vm1, %v4289_v41 }
 0x292   :  { %3961 = vmatprep.subr.mxu1 %v4289_v41 }
 0x294   :  { %3959 = vmatmul.mubr.msk.f32.vlgmr.msra.gmra.mrb[10].mxu1 %vm246_vm2, %v4484_v39 }
 0x295   :  { %3962 = vmatpush3.xpose.msk.msra.mxu1 %vm246_vm2, %v558_v42  ;;  %3963 = vmatprep.mubr.msk.f32.mxu1 %vm4288_vm1, %v4289_v41 }
 0x296   :  { %3966 = vmatprep.subr.mxu1 %v4289_v41 }
 0x298   :  { %3964 = vmatmul.mubr.msk.f32.vlgmr.msra.gmra.mrb[12].mxu1 %vm246_vm2, %v4493_v43 }
 0x299   :  { %3968 = vmatprep.mubr.msk.f32.mxu1 %vm4288_vm1, %v4289_v41 }
 0x35a   :  { %v318_v44 = vpop.f32.mrb[4].mxu1 }
 0x35b   :  { %v3945_v45 = vpop.f32.mrb[5].mxu1  ;;  %v634_v46 = vsel %vm246_vm2, %v318_v44, -inf }
 0x35c   :  { %635 = vmax.xlane.f32.xlu1 %v634_v46 }
 0x35f   :  { %v396_v47 = vpop.f32.mrb[6].mxu1 }
 0x360   :  { %v3950_v48 = vpop.f32.mrb[7].mxu1  ;;  %v637_v49 = vsel %vm246_vm2, %v396_v47, -inf }
 0x361   :  { %638 = vmax.xlane.f32.xlu0 %v637_v49 }
 0x363   :  { %v474_v50 = vpop.f32.mrb[8].mxu1 }
 0x364   :  { %v3955_v51 = vpop.f32.mrb[9].mxu1  ;;  %v640_v52 = vsel %vm246_vm2, %v474_v50, -inf }
 0x365   :  { %641 = vmax.xlane.f32.xlu0 %v640_v52 }
 0x367   :  { %v552_v53 = vpop.f32.mrb[10].mxu1 }
 0x368   :  { %v3960_v54 = vpop.f32.mrb[11].mxu1  ;;  %v643_v55 = vsel %vm246_vm2, %v552_v53, -inf }
 0x369   :  { %644 = vmax.xlane.f32.xlu0 %v643_v55 }
 0x36b   :  { %v630_v56 = vpop.f32.mrb[12].mxu1 }
 0x36c   :  { %v3965_v57 = vpop.f32.mrb[13].mxu1  ;;  %v646_v58 = vsel %vm246_vm2, %v630_v56, -inf }
 0x36d   :  { %647 = vmax.xlane.f32.xlu1 %v646_v58 }
 0x37e   :  { %765 = vrot.lane.b32.xlu1 %v4443_v21, %s4291_s4 }
 0x37f   :  { %689 = vrot.lane.b32.xlu0 %v4440_v18, %s4291_s4 }
 0x382   :  { %917 = vrot.lane.b32.xlu1 %v4449_v29, %s4291_s4 }
 0x383   :  { %1071 = vrot.lane.b32.xlu0 %v4440_v18, %s4292_s22 }
 0x386   :  { %841 = vrot.lane.b32.xlu1 %v4446_v25, %s4291_s4 }
 0x387   :  { %1149 = vrot.lane.b32.xlu0 %v4443_v21, %s4292_s22 }
 0x38a   :  { %993 = vrot.lane.b32.xlu1 %v4451_v30, %s4291_s4 }
 0x38e   :  { %1069 = vrot.lane.b32.xlu1 %v4457_v33, %s4293_s23 }
 0x392   :  { %1227 = vrot.lane.b32.xlu1 %v4446_v25, %s4292_s22 }
 0x3e9   :  { %v636_v59 = vpop.xlane.xlu1 %635 }
 0x3ea   :  { %v649_v60 = vsub.f32 %v318_v44, %v636_v59 }
 0x3ec   :  { %v654_v61 = vmul.f32 1.442695, %v649_v60 }
 0x3ee   :  { %4207 = vpow2.f32 %v654_v61  ;;  %v639_v62 = vpop.xlane.xlu0 %638 }
 0x3ef   :  { %v650_v63 = vsub.f32 %v396_v47, %v639_v62 }
 0x3f1   :  { %v656_v0 = vmul.f32 1.442695, %v650_v63 }
 0x3f2   :  { %v642_v1 = vpop.xlane.xlu0 %641 }
 0x3f3   :  { %4209 = vpow2.f32 %v656_v0  ;;  %v651_v2 = vsub.f32 %v474_v50, %v642_v1 }
 0x3f5   :  { %v658_v3 = vmul.f32 1.442695, %v651_v2 }
 0x3f6   :  { %v645_v4 = vpop.xlane.xlu0 %644 }
 0x3f7   :  { %4211 = vpow2.f32 %v658_v3  ;;  %v652_v5 = vsub.f32 %v552_v53, %v645_v4 }
 0x3f8   :  { %v4208_v6 = vpop.eup %4207 }
 0x3f9   :  { %v660_v7 = vmul.f32 1.442695, %v652_v5  ;;  %v664_v8 = vsel %vm246_vm2, %v4208_v6, 0.0 }
 0x3fa   :  { %v648_v9 = vpop.xlane.xlu1 %647  ;;  %v690_v10 = vpop.permute.xlu0 %689  ;;  %665 = vadd.xlane.f32.xlu0 %v664_v8 }
 0x3fb   :  { %4213 = vpow2.f32 %v660_v7  ;;  %v653_v11 = vsub.f32 %v630_v56, %v648_v9  ;;  %3967 = vmatpush3.msra.mxu1 %v690_v10 }
 0x3fc   :  { %3976 = vmatprep.subr.mxu1 %v4289_v41 }
 0x3fd   :  { %v4210_v12 = vpop.eup %4209  ;;  %v662_v13 = vmul.f32 1.442695, %v653_v11 }
 0x3fe   :  { %v766_v14 = vpop.permute.xlu1 %765  ;;  %v667_v15 = vsel %vm246_vm2, %v4210_v12, 0.0  ;;  %v1072_v28 = vpop.permute.xlu0 %1071 }
 0x3ff   :  { %4215 = vpow2.f32 %v662_v13  ;;  %3972 = vmatpush3.msra.mxu0 %v766_v14  ;;  %668 = vadd.xlane.f32.xlu1 %v667_v15 }
 0x400   :  { %3981 = vmatprep.subr.mxu0 %v4289_v41 }
 0x401   :  { %v4212_v16 = vpop.eup %4211 }
 0x402   :  { %v670_v17 = vsel %vm246_vm2, %v4212_v16, 0.0  ;;  %v918_v24 = vpop.permute.xlu1 %917  ;;  %v1150_v32 = vpop.permute.xlu0 %1149 }
 0x403   :  { %671 = vadd.xlane.f32.xlu0 %v670_v17 }
 0x405   :  { %v4214_v19 = vpop.eup %4213 }
 0x406   :  { %v673_v20 = vsel %vm246_vm2, %v4214_v19, 0.0  ;;  %v842_v26 = vpop.permute.xlu1 %841 }
 0x407   :  { %674 = vadd.xlane.f32.xlu1 %v673_v20 }
 0x409   :  { %v4216_v22 = vpop.eup %4215 }
 0x40a   :  { %v676_v23 = vsel %vm246_vm2, %v4216_v22, 0.0  ;;  %v994_v27 = vpop.permute.xlu1 %993 }
 0x40b   :  { %677 = vadd.xlane.f32.xlu0 %v676_v23 }
 0x40e   :  { %v1070_v31 = vpop.permute.xlu1 %1069 }
 0x412   :  { %v1228_v36 = vpop.permute.xlu1 %1227 }
 0x418   :  { %1225 = vrot.lane.b32.xlu1 %v4475_v37, %s4293_s23 }
 0x41c   :  { %1383 = vrot.lane.b32.xlu1 %v4451_v30, %s4292_s22 }
 0x420   :  { %1381 = vrot.lane.b32.xlu1 %v4493_v43, %s4293_s23 }
 0x421   :  { %1147 = vrot.lane.b32.xlu0 %v4466_v35, %s4293_s23 }
 0x425   :  { %1305 = vrot.lane.b32.xlu0 %v4449_v29, %s4292_s22 }
 0x429   :  { %1303 = vrot.lane.b32.xlu0 %v4484_v39, %s4293_s23 }
 0x487   :  { %v666_v34 = vpop.xlane.xlu0 %665 }
 0x488   :  { %4217 = vrcp.f32 %v666_v34 }
 0x48c   :  { %v669_v38 = vpop.xlane.xlu1 %668 }
 0x48d   :  { %4219 = vrcp.f32 %v669_v38 }
 0x490   :  { %v672_v42 = vpop.xlane.xlu0 %671 }
 0x491   :  { %4221 = vrcp.f32 %v672_v42 }
 0x492   :  { %v4218_v44 = vpop.eup %4217 }
 0x493   :  { %v680_v45 = vmul.f32 %v4218_v44, %v4208_v6 }
 0x494   :  { %v675_v46 = vpop.xlane.xlu1 %674 }
 0x495   :  { %4223 = vrcp.f32 %v675_v46  ;;  %3969 = vmatmul.mubr.msk.f32.vlgmr.msra.gmra.mrb[14].mxu1 %vm246_vm2, %v680_v45 }
 0x496   :  { %3977 = vmatpush3.msra.mxu1 %v842_v26  ;;  %3978 = vmatprep.mubr.msk.f32.mxu1 %vm4288_vm1, %v4289_v41 }
 0x497   :  { %v4220_v47 = vpop.eup %4219  ;;  %3986 = vmatprep.subr.mxu1 %v4289_v41 }
 0x498   :  { %v682_v48 = vmul.f32 %v4220_v47, %v4210_v12  ;;  %v678_v49 = vpop.xlane.xlu0 %677  ;;  %v1226_v54 = vpop.permute.xlu1 %1225 }
 0x499   :  { %4225 = vrcp.f32 %v678_v49 }
 0x49a   :  { %3974 = vmatmul.mubr.msk.f32.vlgmr.msra.gmra.mrb[6].mxu0 %vm246_vm2, %v682_v48 }
 0x49b   :  { %v4222_v50 = vpop.eup %4221  ;;  %3982 = vmatpush3.msra.mxu0 %v918_v24  ;;  %3983 = vmatprep.mubr.msk.f32.mxu0 %vm4288_vm1, %v4289_v41 }
 0x49c   :  { %v684_v51 = vmul.f32 %v4222_v50, %v4212_v16  ;;  %3991 = vmatprep.subr.mxu0 %v4289_v41  ;;  %v1148_v55 = vpop.permute.xlu0 %1147  ;;  %v1384_v58 = vpop.permute.xlu1 %1383 }
 0x49e   :  { %3979 = vmatmul.mubr.msk.f32.vlgmr.msra.gmra.mrb[16].mxu1 %vm246_vm2, %v684_v51 }
 0x49f   :  { %v4224_v52 = vpop.eup %4223  ;;  %3987 = vmatpush3.msra.mxu1 %v994_v27  ;;  %3988 = vmatprep.mubr.msk.f32.mxu1 %vm4288_vm1, %v4289_v41 }
 0x4a0   :  { %v686_v53 = vmul.f32 %v4224_v52, %v4214_v19  ;;  %3996 = vmatprep.subr.mxu1 %v4289_v41  ;;  %v1306_v59 = vpop.permute.xlu0 %1305  ;;  %v1382_v60 = vpop.permute.xlu1 %1381 }
 0x4a2   :  { %3984 = vmatmul.mubr.msk.f32.vlgmr.msra.gmra.mrb[8].mxu0 %vm246_vm2, %v686_v53 }
 0x4a3   :  { %v4226_v56 = vpop.eup %4225  ;;  %3992 = vmatpush3.xpose.msk.msra.mxu0 %vm246_vm2, %v1072_v28  ;;  %3993 = vmatprep.mubr.msk.f32.mxu0 %vm4288_vm1, %v4289_v41 }
 0x4a4   :  { %v688_v57 = vmul.f32 %v4226_v56, %v4216_v22  ;;  %4001 = vmatprep.subr.mxu0 %v4289_v41  ;;  %v1304_v61 = vpop.permute.xlu0 %1303 }
 0x4a6   :  { %3989 = vmatmul.mubr.msk.f32.vlgmr.msra.gmra.mrb[18].mxu1 %vm246_vm2, %v688_v57  ;;  %3994 = vmatmul.mubr.msk.f32.vlgmr.msra.gmra.mrb[10].mxu0 %vm246_vm2, %v1070_v31 }
 0x4a7   :  { %3997 = vmatpush3.xpose.msk.msra.mxu1 %vm246_vm2, %v1150_v32  ;;  %4002 = vmatpush3.xpose.msk.msra.mxu0 %vm246_vm2, %v1228_v36 }
 0x4a8   :  { %3998 = vmatprep.mubr.msk.f32.mxu1 %vm4288_vm1, %v4289_v41  ;;  %4003 = vmatprep.mubr.msk.f32.mxu0 %vm4288_vm1, %v4289_v41 }
 0x4a9   :  { %4006 = vmatprep.subr.mxu1 %v4289_v41  ;;  %4011 = vmatprep.subr.mxu0 %v4289_v41 }
 0x4aa   :  { %3999 = vmatmul.mubr.msk.f32.vlgmr.msra.gmra.mrb[20].mxu1 %vm246_vm2, %v1148_v55  ;;  %4004 = vmatmul.mubr.msk.f32.vlgmr.msra.gmra.mrb[12].mxu0 %vm246_vm2, %v1226_v54 }
 0x4ab   :  { %4007 = vmatpush3.xpose.msk.msra.mxu1 %vm246_vm2, %v1306_v59  ;;  %4012 = vmatpush3.xpose.msk.msra.mxu0 %vm246_vm2, %v1384_v58 }
 0x4ac   :  { %4008 = vmatprep.mubr.msk.f32.mxu1 %vm4288_vm1, %v4289_v41  ;;  %4013 = vmatprep.mubr.msk.f32.mxu0 %vm4288_vm1, %v4289_v41 }
 0x4ad   :  { %4021 = vmatprep.subr.mxu0 %v4289_v41  ;;  %4016 = vmatprep.subr.mxu1 %v4289_v41 }
 0x4ae   :  { %4009 = vmatmul.mubr.msk.f32.vlgmr.msra.gmra.mrb[22].mxu1 %vm246_vm2, %v1304_v61  ;;  %4014 = vmatmul.mubr.msk.f32.vlgmr.msra.gmra.mrb[14].mxu0 %vm246_vm2, %v1382_v60 }
 0x4af   :  { %4018 = vmatprep.mubr.msk.f32.mxu1 %vm4288_vm1, %v4289_v41  ;;  %4023 = vmatprep.mubr.msk.f32.mxu0 %vm4288_vm1, %v4289_v41 }
 0x568   :  { %v4580_v62 = vpop.f32.mrb[14].mxu1 }
 0x569   :  { %v3970_v63 = vpop.f32.mrb[15].mxu1 }
 0x56d   :  { %v4582_v0 = vpop.f32.mrb[6].mxu0 }
 0x56e   :  { %v3975_v1 = vpop.f32.mrb[7].mxu0 }
 0x571   :  { %v4584_v2 = vpop.f32.mrb[16].mxu1 }
 0x572   :  { %v3980_v3 = vpop.f32.mrb[17].mxu1 }
 0x575   :  { %v4586_v4 = vpop.f32.mrb[8].mxu0 }
 0x576   :  { %v3985_v5 = vpop.f32.mrb[9].mxu0 }
 0x579   :  { %v4588_v6 = vpop.f32.mrb[18].mxu1  ;;  %v1143_v7 = vpop.f32.mrb[10].mxu0 }
 0x57a   :  { %v3990_v8 = vpop.f32.mrb[19].mxu1  ;;  %v3995_v9 = vpop.f32.mrb[11].mxu0  ;;  %v1459_v10 = vsel %vm246_vm2, %v1143_v7, -inf }
 0x57b   :  { %1460 = vmax.xlane.f32.xlu0 %v1459_v10 }
 0x57d   :  { %v1221_v11 = vpop.f32.mrb[20].mxu1  ;;  %v1299_v12 = vpop.f32.mrb[12].mxu0 }
 0x57e   :  { %v4000_v13 = vpop.f32.mrb[21].mxu1  ;;  %v4005_v14 = vpop.f32.mrb[13].mxu0  ;;  %v1465_v15 = vsel %vm246_vm2, %v1299_v12, -inf  ;;  %v1462_v16 = vsel %vm246_vm2, %v1221_v11, -inf }
 0x57f   :  { %1466 = vmax.xlane.f32.xlu0 %v1465_v15  ;;  %1463 = vmax.xlane.f32.xlu1 %v1462_v16 }
 0x581   :  { %v1377_v17 = vpop.f32.mrb[22].mxu1  ;;  %v1455_v19 = vpop.f32.mrb[14].mxu0 }
 0x582   :  { %v4010_v20 = vpop.f32.mrb[23].mxu1  ;;  %v4015_v22 = vpop.f32.mrb[15].mxu0  ;;  %v1468_v23 = vsel %vm246_vm2, %v1377_v17, -inf  ;;  %v1471_v24 = vsel %vm246_vm2, %v1455_v19, -inf }
 0x583   :  { %1469 = vmax.xlane.f32.xlu0 %v1468_v23 }
 0x587   :  { %1472 = vmax.xlane.f32.xlu0 %v1471_v24 }
 0x590   :  { %1590 = vrot.lane.b32.xlu1 %v4443_v21, %s4294_s24 }
 0x594   :  { %1666 = vrot.lane.b32.xlu1 %v4446_v25, %s4294_s24 }
 0x598   :  { %1742 = vrot.lane.b32.xlu1 %v4449_v29, %s4294_s24 }
 0x59c   :  { %1896 = vrot.lane.b32.xlu1 %v4440_v18, %s4295_s25 }
 0x59d   :  { %1514 = vrot.lane.b32.xlu0 %v4440_v18, %s4294_s24 }
 0x5a0   :  { %1894 = vrot.lane.b32.xlu1 %v4457_v33, %s4296_s26 }
 0x5a1   :  { %1818 = vrot.lane.b32.xlu0 %v4451_v30, %s4294_s24 }
 0x5a5   :  { %1974 = vrot.lane.b32.xlu0 %v4443_v21, %s4295_s25 }
 0x608   :  { %v1461_v26 = vpop.xlane.xlu0 %1460 }
 0x609   :  { %v1474_v27 = vsub.f32 %v1143_v7, %v1461_v26 }
 0x60b   :  { %v1479_v28 = vmul.f32 1.442695, %v1474_v27 }
 0x60c   :  { %v1464_v31 = vpop.xlane.xlu1 %1463  ;;  %v1467_v32 = vpop.xlane.xlu0 %1466 }
 0x60d   :  { %4227 = vpow2.f32 %v1479_v28  ;;  %v1475_v34 = vsub.f32 %v1221_v11, %v1464_v31  ;;  %v1476_v36 = vsub.f32 %v1299_v12, %v1467_v32 }
 0x60f   :  { %v1481_v38 = vmul.f32 1.442695, %v1475_v34  ;;  %v1483_v42 = vmul.f32 1.442695, %v1476_v36 }
 0x610   :  { %v1591_v44 = vpop.permute.xlu1 %1590  ;;  %v1470_v45 = vpop.xlane.xlu0 %1469 }
 0x611   :  { %4229 = vpow2.f32 %v1481_v38  ;;  %v1477_v46 = vsub.f32 %v1377_v17, %v1470_v45  ;;  %4022 = vmatpush3.msra.mxu0 %v1591_v44 }
 0x612   :  { %4231 = vpow2.f32 %v1483_v42  ;;  %4031 = vmatprep.subr.mxu0 %v4289_v41 }
 0x613   :  { %v1485_v47 = vmul.f32 1.442695, %v1477_v46 }
 0x614   :  { %v1473_v48 = vpop.xlane.xlu0 %1472  ;;  %v1667_v63 = vpop.permute.xlu1 %1666 }
 0x615   :  { %4233 = vpow2.f32 %v1485_v47  ;;  %v1478_v58 = vsub.f32 %v1455_v19, %v1473_v48 }
 0x617   :  { %v4228_v49 = vpop.eup %4227  ;;  %v1487_v59 = vmul.f32 1.442695, %v1478_v58 }
 0x618   :  { %v1515_v50 = vpop.permute.xlu0 %1514  ;;  %v1489_v51 = vsel %vm246_vm2, %v4228_v49, 0.0  ;;  %v1743_v1 = vpop.permute.xlu1 %1742 }
 0x619   :  { %1490 = vadd.xlane.f32.xlu1 %v1489_v51  ;;  %4017 = vmatpush3.msra.mxu1 %v1515_v50  ;;  %4235 = vpow2.f32 %v1487_v59 }
 0x61a   :  { %4026 = vmatprep.subr.mxu1 %v4289_v41 }
 0x61b   :  { %v4230_v52 = vpop.eup %4229 }
 0x61c   :  { %v4232_v53 = vpop.eup %4231  ;;  %v1492_v54 = vsel %vm246_vm2, %v4230_v52, 0.0  ;;  %v1897_v3 = vpop.permute.xlu1 %1896 }
 0x61d   :  { %1493 = vadd.xlane.f32.xlu0 %v1492_v54  ;;  %v1495_v55 = vsel %vm246_vm2, %v4232_v53, 0.0  ;;  %v1819_v5 = vpop.permute.xlu0 %1818 }
 0x61e   :  { %1496 = vadd.xlane.f32.xlu1 %v1495_v55 }
 0x61f   :  { %v4234_v56 = vpop.eup %4233 }
 0x620   :  { %v1498_v57 = vsel %vm246_vm2, %v4234_v56, 0.0  ;;  %v1895_v7 = vpop.permute.xlu1 %1894 }
 0x621   :  { %1499 = vadd.xlane.f32.xlu0 %v1498_v57  ;;  %v1975_v8 = vpop.permute.xlu0 %1974 }
 0x623   :  { %v4236_v60 = vpop.eup %4235 }
 0x624   :  { %v1501_v61 = vsel %vm246_vm2, %v4236_v60, 0.0 }
 0x62f   :  { %2052 = vrot.lane.b32.xlu1 %v4446_v25, %s4295_s25 }
 0x637   :  { %1972 = vrot.lane.b32.xlu0 %v4466_v35, %s4296_s26 }
 0x63b   :  { %2130 = vrot.lane.b32.xlu0 %v4449_v29, %s4295_s25 }
 0x63f   :  { %2128 = vrot.lane.b32.xlu0 %v4484_v39, %s4296_s26 }
 0x643   :  { %2206 = vrot.lane.b32.xlu0 %v4493_v43, %s4296_s26 }
 0x653   :  { %1502 = vadd.xlane.f32.xlu1 %v1501_v61 }
 0x664   :  { %2050 = vrot.lane.b32.xlu1 %v4475_v37, %s4296_s26 }
 0x668   :  { %2208 = vrot.lane.b32.xlu1 %v4451_v30, %s4295_s25 }
 0x6a6   :  { %v1491_v9 = vpop.xlane.xlu1 %1490 }
 0x6a7   :  { %4237 = vrcp.f32 %v1491_v9 }
 0x6aa   :  { %v1494_v10 = vpop.xlane.xlu0 %1493 }
 0x6ab   :  { %v1497_v11 = vpop.xlane.xlu1 %1496  ;;  %4239 = vrcp.f32 %v1494_v10 }
 0x6ac   :  { %4241 = vrcp.f32 %v1497_v11 }
 0x6ae   :  { %v1500_v12 = vpop.xlane.xlu0 %1499 }
 0x6af   :  { %4243 = vrcp.f32 %v1500_v12  ;;  %v2053_v23 = vpop.permute.xlu1 %2052 }
 0x6b1   :  { %v4238_v13 = vpop.eup %4237 }
 0x6b2   :  { %v1505_v14 = vmul.f32 %v4238_v13, %v4228_v49  ;;  %v1973_v24 = vpop.permute.xlu0 %1972 }
 0x6b4   :  { %4019 = vmatmul.mubr.msk.f32.vlgmr.msra.gmra.mrb[24].mxu1 %vm246_vm2, %v1505_v14 }
 0x6b5   :  { %v4240_v15 = vpop.eup %4239  ;;  %4027 = vmatpush3.msra.mxu1 %v1667_v63  ;;  %4028 = vmatprep.mubr.msk.f32.mxu1 %vm4288_vm1, %v4289_v41 }
 0x6b6   :  { %v4242_v16 = vpop.eup %4241  ;;  %v1507_v17 = vmul.f32 %v4240_v15, %v4230_v52  ;;  %4036 = vmatprep.subr.mxu1 %v4289_v41  ;;  %v2131_v26 = vpop.permute.xlu0 %2130 }
 0x6b7   :  { %v1509_v19 = vmul.f32 %v4242_v16, %v4232_v53 }
 0x6b8   :  { %4024 = vmatmul.mubr.msk.f32.vlgmr.msra.gmra.mrb[16].mxu0 %vm246_vm2, %v1507_v17 }
 0x6b9   :  { %v4244_v20 = vpop.eup %4243  ;;  %4029 = vmatmul.mubr.msk.f32.vlgmr.msra.gmra.mrb[26].mxu1 %vm246_vm2, %v1509_v19  ;;  %4032 = vmatpush3.msra.mxu0 %v1743_v1 }
 0x6ba   :  { %v1511_v22 = vmul.f32 %v4244_v20, %v4234_v56  ;;  %4037 = vmatpush3.msra.mxu1 %v1819_v5  ;;  %4033 = vmatprep.mubr.msk.f32.mxu0 %vm4288_vm1, %v4289_v41  ;;  %v2129_v31 = vpop.permute.xlu0 %2128 }
 0x6bb   :  { %4041 = vmatprep.subr.mxu0 %v4289_v41  ;;  %4038 = vmatprep.mubr.msk.f32.mxu1 %vm4288_vm1, %v4289_v41 }
 0x6bc   :  { %4034 = vmatmul.mubr.msk.f32.vlgmr.msra.gmra.mrb[18].mxu0 %vm246_vm2, %v1511_v22  ;;  %4046 = vmatprep.subr.mxu1 %v4289_v41 }
 0x6bd   :  { %4043 = vmatprep.mubr.msk.f32.mxu0 %vm4288_vm1, %v4289_v41 }
 0x6be   :  { %v2207_v36 = vpop.permute.xlu0 %2206 }
 0x6c0   :  { %4042 = vmatpush3.xpose.msk.msra.mxu0 %vm246_vm2, %v1897_v3 }
 0x6c1   :  { %4051 = vmatprep.subr.mxu0 %v4289_v41 }
 0x6c3   :  { %4044 = vmatmul.mubr.msk.f32.vlgmr.msra.gmra.mrb[20].mxu0 %vm246_vm2, %v1895_v7 }
 0x6c4   :  { %4052 = vmatpush3.xpose.msk.msra.mxu0 %vm246_vm2, %v2053_v23  ;;  %4053 = vmatprep.mubr.msk.f32.mxu0 %vm4288_vm1, %v4289_v41 }
 0x6c5   :  { %4061 = vmatprep.subr.mxu0 %v4289_v41 }
 0x6e0   :  { %v1503_v27 = vpop.xlane.xlu1 %1502 }
 0x6e1   :  { %4245 = vrcp.f32 %v1503_v27 }
 0x6e4   :  { %v2051_v28 = vpop.permute.xlu1 %2050 }
 0x6e5   :  { %4054 = vmatmul.mubr.msk.f32.vlgmr.msra.gmra.mrb[22].mxu0 %vm246_vm2, %v2051_v28 }
 0x6e6   :  { %4063 = vmatprep.mubr.msk.f32.mxu0 %vm4288_vm1, %v4289_v41 }
 0x6e8   :  { %v2209_v32 = vpop.permute.xlu1 %2208 }
 0x6e9   :  { %4062 = vmatpush3.xpose.msk.msra.mxu0 %vm246_vm2, %v2209_v32 }
 0x6ea   :  { %4071 = vmatprep.subr.mxu0 %v4289_v41 }
 0x6eb   :  { %v4246_v34 = vpop.eup %4245 }
 0x6ec   :  { %v1513_v38 = vmul.f32 %v4246_v34, %v4236_v60  ;;  %4064 = vmatmul.mubr.msk.f32.vlgmr.msra.gmra.mrb[24].mxu0 %vm246_vm2, %v2207_v36 }
 0x6ed   :  { %4073 = vmatprep.mubr.msk.f32.mxu0 %vm4288_vm1, %v4289_v41 }
 0x6ee   :  { %4039 = vmatmul.mubr.msk.f32.vlgmr.msra.gmra.mrb[28].mxu1 %vm246_vm2, %v1513_v38 }
 0x6ef   :  { %4047 = vmatpush3.xpose.msk.msra.mxu1 %vm246_vm2, %v1975_v8  ;;  %4048 = vmatprep.mubr.msk.f32.mxu1 %vm4288_vm1, %v4289_v41 }
 0x6f0   :  { %4056 = vmatprep.subr.mxu1 %v4289_v41 }
 0x6f2   :  { %4049 = vmatmul.mubr.msk.f32.vlgmr.msra.gmra.mrb[30].mxu1 %vm246_vm2, %v1973_v24 }
 0x6f3   :  { %4057 = vmatpush3.xpose.msk.msra.mxu1 %vm246_vm2, %v2131_v26  ;;  %4058 = vmatprep.mubr.msk.f32.mxu1 %vm4288_vm1, %v4289_v41 }
 0x6f4   :  { %4066 = vmatprep.subr.mxu1 %v4289_v41 }
 0x6f6   :  { %4059 = vmatmul.mubr.msk.f32.vlgmr.msra.gmra.mrb[32].mxu1 %vm246_vm2, %v2129_v31 }
 0x6f7   :  { %4068 = vmatprep.mubr.msk.f32.mxu1 %vm4288_vm1, %v4289_v41 }
 0x787   :  { %v4670_v42 = vpop.f32.mrb[24].mxu1 }
 0x788   :  { %v4020_v44 = vpop.f32.mrb[25].mxu1 }
 0x78b   :  { %v4672_v45 = vpop.f32.mrb[16].mxu0 }
 0x78c   :  { %v4674_v46 = vpop.f32.mrb[26].mxu1  ;;  %v4025_v47 = vpop.f32.mrb[17].mxu0 }
 0x78d   :  { %v4030_v48 = vpop.f32.mrb[27].mxu1 }
 0x78f   :  { %v4676_v49 = vpop.f32.mrb[18].mxu0 }
 0x790   :  { %v4035_v50 = vpop.f32.mrb[19].mxu0 }
 0x796   :  { %v1968_v51 = vpop.f32.mrb[20].mxu0 }
 0x797   :  { %v4045_v52 = vpop.f32.mrb[21].mxu0  ;;  %v2284_v53 = vsel %vm246_vm2, %v1968_v51, -inf }
 0x798   :  { %2285 = vmax.xlane.f32.xlu1 %v2284_v53 }
 0x7a9   :  { %2415 = vrot.lane.b32.xlu1 %v4443_v21, %s4297_s27 }
 0x7ad   :  { %2567 = vrot.lane.b32.xlu1 %v4449_v29, %s4297_s27 }
 0x7b1   :  { %2491 = vrot.lane.b32.xlu1 %v4446_v25, %s4297_s27 }
 0x7b8   :  { %v2124_v54 = vpop.f32.mrb[22].mxu0 }
 0x7b9   :  { %v4055_v55 = vpop.f32.mrb[23].mxu0  ;;  %v2290_v5 = vsel %vm246_vm2, %v2124_v54, -inf }
 0x7bf   :  { %v2280_v56 = vpop.f32.mrb[24].mxu0 }
 0x7c0   :  { %v4065_v57 = vpop.f32.mrb[25].mxu0  ;;  %v2296_v8 = vsel %vm246_vm2, %v2280_v56, -inf }
 0x7c1   :  { %v4682_v58 = vpop.f32.mrb[28].mxu1 }
 0x7c2   :  { %v4040_v59 = vpop.f32.mrb[29].mxu1 }
 0x7c5   :  { %v2046_v60 = vpop.f32.mrb[30].mxu1 }
 0x7c6   :  { %v4050_v61 = vpop.f32.mrb[31].mxu1  ;;  %v2287_v63 = vsel %vm246_vm2, %v2046_v60, -inf }
 0x7c7   :  { %2288 = vmax.xlane.f32.xlu0 %v2287_v63 }
 0x7c9   :  { %v2202_v1 = vpop.f32.mrb[32].mxu1 }
 0x7ca   :  { %v4060_v3 = vpop.f32.mrb[33].mxu1  ;;  %v2293_v7 = vsel %vm246_vm2, %v2202_v1, -inf }
 0x7cb   :  { %2291 = vmax.xlane.f32.xlu0 %v2290_v5 }
 0x7cf   :  { %2294 = vmax.xlane.f32.xlu0 %v2293_v7 }
 0x7d5   :  { %2297 = vmax.xlane.f32.xlu1 %v2296_v8 }
 0x7e5   :  { %2339 = vrot.lane.b32.xlu0 %v4440_v18, %s4297_s27 }
 0x7e6   :  { %2643 = vrot.lane.b32.xlu1 %v4451_v30, %s4297_s27 }
 0x7e9   :  { %2721 = vrot.lane.b32.xlu0 %v4440_v18, %s4298_s28 }
 0x825   :  { %v2286_v9 = vpop.xlane.xlu1 %2285 }
 0x826   :  { %v2299_v10 = vsub.f32 %v1968_v51, %v2286_v9 }
 0x828   :  { %v2304_v11 = vmul.f32 1.442695, %v2299_v10 }
 0x829   :  { %v2416_v12 = vpop.permute.xlu1 %2415 }
 0x82a   :  { %4247 = vpow2.f32 %v2304_v11  ;;  %4072 = vmatpush3.msra.mxu0 %v2416_v12 }
 0x82b   :  { %4081 = vmatprep.subr.mxu0 %v4289_v41 }
 0x82d   :  { %v2568_v19 = vpop.permute.xlu1 %2567 }
 0x831   :  { %v2492_v26 = vpop.permute.xlu1 %2491 }
 0x834   :  { %v4248_v13 = vpop.eup %4247 }
 0x835   :  { %v2314_v14 = vsel %vm246_vm2, %v4248_v13, 0.0 }
 0x836   :  { %2315 = vadd.xlane.f32.xlu0 %v2314_v14 }
 0x854   :  { %v2289_v15 = vpop.xlane.xlu0 %2288 }
 0x855   :  { %v2300_v16 = vsub.f32 %v2046_v60, %v2289_v15 }
 0x857   :  { %v2306_v17 = vmul.f32 1.442695, %v2300_v16 }
 0x858   :  { %v2292_v20 = vpop.xlane.xlu0 %2291 }
 0x859   :  { %4249 = vpow2.f32 %v2306_v17  ;;  %v2301_v22 = vsub.f32 %v2124_v54, %v2292_v20 }
 0x85b   :  { %v2308_v23 = vmul.f32 1.442695, %v2301_v22 }
 0x85c   :  { %v2295_v24 = vpop.xlane.xlu0 %2294 }
 0x85d   :  { %4251 = vpow2.f32 %v2308_v23  ;;  %v2302_v50 = vsub.f32 %v2202_v1, %v2295_v24 }
 0x85f   :  { %v2310_v51 = vmul.f32 1.442695, %v2302_v50 }
 0x860   :  { %v2340_v27 = vpop.permute.xlu0 %2339 }
 0x861   :  { %4067 = vmatpush3.msra.mxu1 %v2340_v27 }
 0x862   :  { %v2298_v28 = vpop.xlane.xlu1 %2297  ;;  %4076 = vmatprep.subr.mxu1 %v4289_v41 }
 0x863   :  { %v4250_v31 = vpop.eup %4249  ;;  %v2303_v32 = vsub.f32 %v2280_v56, %v2298_v28 }
 0x864   :  { %v2317_v34 = vsel %vm246_vm2, %v4250_v31, 0.0 }
 0x865   :  { %v2312_v36 = vmul.f32 1.442695, %v2303_v32  ;;  %2318 = vadd.xlane.f32.xlu1 %v2317_v34 }
 0x867   :  { %v4252_v38 = vpop.eup %4251  ;;  %4253 = vpow2.f32 %v2312_v36 }
 0x868   :  { %v2320_v44 = vsel %vm246_vm2, %v4252_v38, 0.0  ;;  %4255 = vpow2.f32 %v2310_v51 }
 0x869   :  { %2321 = vadd.xlane.f32.xlu0 %v2320_v44 }
 0x871   :  { %v4254_v47 = vpop.eup %4253 }
 0x872   :  { %v2326_v48 = vsel %vm246_vm2, %v4254_v47, 0.0  ;;  %v4256_v52 = vpop.eup %4255 }
 0x873   :  { %2327 = vadd.xlane.f32.xlu0 %v2326_v48  ;;  %v2323_v53 = vsel %vm246_vm2, %v4256_v52, 0.0 }
 0x876   :  { %2719 = vrot.lane.b32.xlu1 %v4457_v33, %s4299_s29  ;;  %v2722_v33 = vpop.permute.xlu0 %2721 }
 0x889   :  { %2799 = vrot.lane.b32.xlu0 %v4443_v21, %s4298_s28 }
 0x88d   :  { %2877 = vrot.lane.b32.xlu0 %v4446_v25, %s4298_s28 }
 0x891   :  { %2955 = vrot.lane.b32.xlu0 %v4449_v29, %s4298_s28 }
 0x895   :  { %3033 = vrot.lane.b32.xlu0 %v4451_v30, %s4298_s28 }
 0x89a   :  { %2324 = vadd.xlane.f32.xlu1 %v2323_v53 }
 0x8ab   :  { %2797 = vrot.lane.b32.xlu1 %v4466_v35, %s4299_s29  ;;  %v2644_v35 = vpop.permute.xlu1 %2643 }
 0x8af   :  { %2875 = vrot.lane.b32.xlu1 %v4475_v37, %s4299_s29 }
 0x8b3   :  { %2953 = vrot.lane.b32.xlu1 %v4484_v39, %s4299_s29 }
 0x8b7   :  { %3031 = vrot.lane.b32.xlu1 %v4493_v43, %s4299_s29 }
 0x8c3   :  { %v2316_v54 = vpop.xlane.xlu0 %2315 }
 0x8c4   :  { %4257 = vrcp.f32 %v2316_v54 }
 0x8ce   :  { %v4258_v55 = vpop.eup %4257 }
 0x8cf   :  { %v2330_v56 = vmul.f32 %v4258_v55, %v4248_v13 }
 0x8d1   :  { %4069 = vmatmul.mubr.msk.f32.vlgmr.msra.gmra.mrb[34].mxu1 %vm246_vm2, %v2330_v56 }
 0x8d2   :  { %4077 = vmatpush3.msra.mxu1 %v2492_v26  ;;  %4078 = vmatprep.mubr.msk.f32.mxu1 %vm4288_vm1, %v4289_v41 }
 0x8d3   :  { %4086 = vmatprep.subr.mxu1 %v4289_v41 }
 0x8f2   :  { %v2319_v57 = vpop.xlane.xlu1 %2318 }
 0x8f3   :  { %4259 = vrcp.f32 %v2319_v57 }
 0x8f6   :  { %v2322_v37 = vpop.xlane.xlu0 %2321  ;;  %v2720_v5 = vpop.permute.xlu1 %2719 }
 0x8f7   :  { %4261 = vrcp.f32 %v2322_v37 }
 0x8fd   :  { %v4260_v39 = vpop.eup %4259 }
 0x8fe   :  { %v2332_v43 = vmul.f32 %v4260_v39, %v4250_v31 }
 0x900   :  { %4074 = vmatmul.mubr.msk.f32.vlgmr.msra.gmra.mrb[26].mxu0 %vm246_vm2, %v2332_v43  ;;  %v2328_v59 = vpop.xlane.xlu0 %2327 }
 0x901   :  { %v4262_v60 = vpop.eup %4261  ;;  %4082 = vmatpush3.msra.mxu0 %v2568_v19  ;;  %4263 = vrcp.f32 %v2328_v59  ;;  %4083 = vmatprep.mubr.msk.f32.mxu0 %vm4288_vm1, %v4289_v41 }
 0x902   :  { %v2334_v61 = vmul.f32 %v4262_v60, %v4252_v38  ;;  %4091 = vmatprep.subr.mxu0 %v4289_v41 }
 0x904   :  { %4079 = vmatmul.mubr.msk.f32.vlgmr.msra.gmra.mrb[36].mxu1 %vm246_vm2, %v2334_v61  ;;  %v2800_v3 = vpop.permute.xlu0 %2799 }
 0x905   :  { %4087 = vmatpush3.msra.mxu1 %v2644_v35  ;;  %4088 = vmatprep.mubr.msk.f32.mxu1 %vm4288_vm1, %v4289_v41 }
 0x906   :  { %4096 = vmatprep.subr.mxu1 %v4289_v41 }
 0x908   :  { %v2878_v7 = vpop.permute.xlu0 %2877 }
 0x90b   :  { %v4264_v63 = vpop.eup %4263 }
 0x90c   :  { %v2338_v1 = vmul.f32 %v4264_v63, %v4254_v47  ;;  %v2956_v10 = vpop.permute.xlu0 %2955 }
 0x90e   :  { %4089 = vmatmul.mubr.msk.f32.vlgmr.msra.gmra.mrb[38].mxu1 %vm246_vm2, %v2338_v1 }
 0x90f   :  { %4097 = vmatpush3.xpose.msk.msra.mxu1 %vm246_vm2, %v2800_v3  ;;  %4098 = vmatprep.mubr.msk.f32.mxu1 %vm4288_vm1, %v4289_v41 }
 0x910   :  { %4106 = vmatprep.subr.mxu1 %v4289_v41  ;;  %v3034_v15 = vpop.permute.xlu0 %3033 }
 0x927   :  { %v2325_v8 = vpop.xlane.xlu1 %2324 }
 0x928   :  { %4265 = vrcp.f32 %v2325_v8 }
 0x92b   :  { %v2798_v9 = vpop.permute.xlu1 %2797 }
 0x92c   :  { %4099 = vmatmul.mubr.msk.f32.vlgmr.msra.gmra.mrb[40].mxu1 %vm246_vm2, %v2798_v9 }
 0x92d   :  { %4107 = vmatpush3.xpose.msk.msra.mxu1 %vm246_vm2, %v2956_v10  ;;  %4108 = vmatprep.mubr.msk.f32.mxu1 %vm4288_vm1, %v4289_v41 }
 0x92e   :  { %4116 = vmatprep.subr.mxu1 %v4289_v41 }
 0x92f   :  { %v2876_v11 = vpop.permute.xlu1 %2875 }
 0x932   :  { %v4266_v12 = vpop.eup %4265 }
 0x933   :  { %v2336_v13 = vmul.f32 %v4266_v12, %v4256_v52  ;;  %v2954_v14 = vpop.permute.xlu1 %2953 }
 0x934   :  { %4109 = vmatmul.mubr.msk.f32.vlgmr.msra.gmra.mrb[42].mxu1 %vm246_vm2, %v2954_v14 }
 0x935   :  { %4084 = vmatmul.mubr.msk.f32.vlgmr.msra.gmra.mrb[28].mxu0 %vm246_vm2, %v2336_v13  ;;  %4118 = vmatprep.mubr.msk.f32.mxu1 %vm4288_vm1, %v4289_v41 }
 0x936   :  { %4092 = vmatpush3.xpose.msk.msra.mxu0 %vm246_vm2, %v2722_v33  ;;  %4093 = vmatprep.mubr.msk.f32.mxu0 %vm4288_vm1, %v4289_v41 }
 0x937   :  { %4101 = vmatprep.subr.mxu0 %v4289_v41  ;;  %v3032_v16 = vpop.permute.xlu1 %3031 }
 0x939   :  { %4094 = vmatmul.mubr.msk.f32.vlgmr.msra.gmra.mrb[30].mxu0 %vm246_vm2, %v2720_v5 }
 0x93a   :  { %4102 = vmatpush3.xpose.msk.msra.mxu0 %vm246_vm2, %v2878_v7  ;;  %4103 = vmatprep.mubr.msk.f32.mxu0 %vm4288_vm1, %v4289_v41 }
 0x93b   :  { %4111 = vmatprep.subr.mxu0 %v4289_v41 }
 0x93d   :  { %4104 = vmatmul.mubr.msk.f32.vlgmr.msra.gmra.mrb[32].mxu0 %vm246_vm2, %v2876_v11 }
 0x93e   :  { %4112 = vmatpush3.xpose.msk.msra.mxu0 %vm246_vm2, %v3034_v15  ;;  %4113 = vmatprep.mubr.msk.f32.mxu0 %vm4288_vm1, %v4289_v41 }
 0x93f   :  { %4121 = vmatprep.subr.mxu0 %v4289_v41 }
 0x941   :  { %4114 = vmatmul.mubr.msk.f32.vlgmr.msra.gmra.mrb[34].mxu0 %vm246_vm2, %v3032_v16 }
 0x942   :  { %4123 = vmatprep.mubr.msk.f32.mxu0 %vm4288_vm1, %v4289_v41 }
 0x9a4   :  { %v4755_v17 = vpop.f32.mrb[34].mxu1 }
 0x9a5   :  { %v4070_v19 = vpop.f32.mrb[35].mxu1 }
 0x9d3   :  { %v4757_v20 = vpop.f32.mrb[26].mxu0 }
 0x9d4   :  { %v4075_v22 = vpop.f32.mrb[27].mxu0 }
 0x9d7   :  { %v4759_v23 = vpop.f32.mrb[36].mxu1 }
 0x9d8   :  { %v4080_v24 = vpop.f32.mrb[37].mxu1 }
 0x9e1   :  { %v4761_v26 = vpop.f32.mrb[38].mxu1 }
 0x9e2   :  { %v4090_v27 = vpop.f32.mrb[39].mxu1 }
 0x9ff   :  { %v2871_v28 = vpop.f32.mrb[40].mxu1 }
 0xa00   :  { %v4100_v31 = vpop.f32.mrb[41].mxu1  ;;  %v3112_v32 = vsel %vm246_vm2, %v2871_v28, -inf }
 0xa01   :  { %3113 = vmax.xlane.f32.xlu1 %v3112_v32 }
 0xa07   :  { %v3027_v34 = vpop.f32.mrb[42].mxu1 }
 0xa08   :  { %v4764_v36 = vpop.f32.mrb[28].mxu0  ;;  %v4110_v38 = vpop.f32.mrb[43].mxu1  ;;  %v3118_v55 = vsel %vm246_vm2, %v3027_v34, -inf }
 0xa09   :  { %v4085_v44 = vpop.f32.mrb[29].mxu0 }
 0xa0c   :  { %v2793_v47 = vpop.f32.mrb[30].mxu0 }
 0xa0d   :  { %v4095_v48 = vpop.f32.mrb[31].mxu0  ;;  %v3109_v50 = vsel %vm246_vm2, %v2793_v47, -inf }
 0xa0e   :  { %3110 = vmax.xlane.f32.xlu0 %v3109_v50  ;;  %v3621_v50 = vld [vmem:[%s4896_s5] sm:$0xff] }
 0xa10   :  { %v2949_v51 = vpop.f32.mrb[32].mxu0 }
 0xa11   :  { %v4105_v52 = vpop.f32.mrb[33].mxu0  ;;  %v3115_v53 = vsel %vm246_vm2, %v2949_v51, -inf }
 0xa12   :  { %3116 = vmax.xlane.f32.xlu0 %v3115_v53  ;;  %v3623_v53 = vld [vmem:[%s4896_s5 + $0x10] sm:$0xff] }
 0xa14   :  { %v3105_v33 = vpop.f32.mrb[34].mxu0 }
 0xa15   :  { %v4115_v54 = vpop.f32.mrb[35].mxu0  ;;  %v3121_v56 = vsel %vm246_vm2, %v3105_v33, -inf }
 0xa16   :  { %3119 = vmax.xlane.f32.xlu0 %v3118_v55 }
 0xa1a   :  { %3122 = vmax.xlane.f32.xlu0 %v3121_v56 }
 0xa8e   :  { %v3114_v35 = vpop.xlane.xlu1 %3113 }
 0xa8f   :  { %v3125_v57 = vsub.f32 %v2871_v28, %v3114_v35 }
 0xa91   :  { %v3131_v37 = vmul.f32 1.442695, %v3125_v57 }
 0xa93   :  { %4267 = vpow2.f32 %v3131_v37 }
 0xa9b   :  { %v3111_v39 = vpop.xlane.xlu0 %3110 }
 0xa9c   :  { %v3124_v43 = vsub.f32 %v2793_v47, %v3111_v39 }
 0xa9d   :  { %v4268_v59 = vpop.eup %4267 }
 0xa9e   :  { %v3129_v60 = vmul.f32 1.442695, %v3124_v43  ;;  %v3142_v61 = vsel %vm246_vm2, %v4268_v59, 0.0 }
 0xa9f   :  { %3143 = vadd.xlane.f32.xlu0 %v3142_v61  ;;  %v3117_v3 = vpop.xlane.xlu0 %3116 }
 0xaa0   :  { %4269 = vpow2.f32 %v3129_v60  ;;  %v3126_v9 = vsub.f32 %v2949_v51, %v3117_v3  ;;  %v3622_v51 = vld [vmem:[%s4896_s5 + $0x8] sm:$0xff] }
 0xaa1   :  { %v4171_v52 = vpack.c.bf16 %v3622_v51, %v3621_v50 }
 0xaa2   :  { %v3133_v12 = vmul.f32 1.442695, %v3126_v9 }
 0xaa3   :  { %v3120_v5 = vpop.xlane.xlu0 %3119 }
 0xaa4   :  { %v3127_v7 = vsub.f32 %v3027_v34, %v3120_v5 }
 0xaa6   :  { %v3135_v8 = vmul.f32 1.442695, %v3127_v7 }
 0xaa7   :  { %v3123_v11 = vpop.xlane.xlu0 %3122 }
 0xaa8   :  { %4271 = vpow2.f32 %v3135_v8  ;;  %v3128_v13 = vsub.f32 %v3105_v33, %v3123_v11  ;;  %v3624_v33 = vld [vmem:[%s4896_s5 + $0x18] sm:$0xff] }
 0xaa9   :  { %4273 = vpow2.f32 %v3133_v12  ;;  %v4174_v54 = vpack.c.bf16 %v3624_v33, %v3623_v53 }
 0xaaa   :  { %v4270_v63 = vpop.eup %4269 }
 0xaab   :  { %v3139_v1 = vsel %vm246_vm2, %v4270_v63, 0.0 }
 0xaac   :  { %3140 = vadd.xlane.f32.xlu1 %v3139_v1 }
 0xab2   :  { %v4272_v10 = vpop.eup %4271 }
 0xab3   :  { %v3148_v14 = vsel %vm246_vm2, %v4272_v10, 0.0  ;;  %v4274_v15 = vpop.eup %4273 }
 0xab5   :  { %3164 = vrot.lane.b32.xlu0 %v4440_v18, %s4300_s30  ;;  %v3137_v18 = vmul.f32 1.442695, %v3128_v13 }
 0xab7   :  { %4275 = vpow2.f32 %v3137_v18 }
 0xabd   :  { %3240 = vrot.lane.b32.xlu1 %v4443_v21, %s4300_s30  ;;  %v3145_v21 = vsel %vm246_vm2, %v4274_v15, 0.0 }
 0xac1   :  { %3316 = vrot.lane.b32.xlu1 %v4446_v25, %s4300_s30  ;;  %v4276_v16 = vpop.eup %4275 }
 0xac2   :  { %v3151_v25 = vsel %vm246_vm2, %v4276_v16, 0.0 }
 0xad4   :  { %3149 = vadd.xlane.f32.xlu0 %v3148_v14 }
 0xae5   :  { %3146 = vadd.xlane.f32.xlu1 %v3145_v21 }
 0xae9   :  { %3152 = vadd.xlane.f32.xlu1 %v3151_v25 }
 0xaea   :  { %3468 = vrot.lane.b32.xlu0 %v4451_v30, %s4300_s30 }
 0xaee   :  { %3569 = vrot.lane.b32.xlu0 %v4755_v17, %s4301_s8 }
 0xaf2   :  { %3551 = vrot.lane.b32.xlu0 %v4672_v45, %s4302_s9 }
 0xaf6   :  { %3573 = vrot.lane.b32.xlu0 %v4759_v23, %s4301_s8 }
 0xafa   :  { %3392 = vrot.lane.b32.xlu1 %v4449_v29, %s4300_s30 }
 0xafe   :  { %3549 = vrot.lane.b32.xlu1 %v4670_v42, %s4302_s9 }
 0xb02   :  { %3571 = vrot.lane.b32.xlu1 %v4757_v20, %s4301_s8 }
 0xb06   :  { %3553 = vrot.lane.b32.xlu1 %v4674_v46, %s4302_s9 }
 0xb2c   :  { %v3144_v30 = vpop.xlane.xlu0 %3143 }
 0xb2d   :  { %4277 = vrcp.f32 %v3144_v30 }
 0xb30   :  { %v3165_v17 = vpop.permute.xlu0 %3164 }
 0xb31   :  { %4117 = vmatpush3.msra.mxu1 %v3165_v17 }
 0xb32   :  { %4126 = vmatprep.subr.mxu1 %v4289_v41 }
 0xb37   :  { %v4278_v19 = vpop.eup %4277 }
 0xb38   :  { %v3157_v22 = vmul.f32 %v4278_v19, %v4268_v59 }
 0xb39   :  { %v3141_v45 = vpop.xlane.xlu1 %3140 }
 0xb3a   :  { %4279 = vrcp.f32 %v3141_v45 }
 0xb3d   :  { %v3241_v29 = vpop.permute.xlu1 %3240 }
 0xb3e   :  { %4122 = vmatpush3.msra.mxu0 %v3241_v29 }
 0xb3f   :  { %4124 = vmatmul.mubr.msk.f32.vlgmr.msra.gmra.mrb[36].mxu0 %vm246_vm2, %v3157_v22  ;;  %4131 = vmatprep.subr.mxu0 %v4289_v41  ;;  %v3814_v22 = vld [vmem:[%s4897_s6] ss:$0 sm:$0xff] }
 0xb40   :  { %4133 = vmatprep.mubr.msk.f32.mxu0 %vm4288_vm1, %v4289_v41 }
 0xb41   :  { %v3317_v20 = vpop.permute.xlu1 %3316 }
 0xb44   :  { %v4280_v42 = vpop.eup %4279 }
 0xb45   :  { %v3155_v46 = vmul.f32 %v4280_v42, %v4270_v63 }
 0xb47   :  { %4119 = vmatmul.mubr.msk.f32.vlgmr.msra.gmra.mrb[44].mxu1 %vm246_vm2, %v3155_v46 }
 0xb48   :  { %4127 = vmatpush3.msra.mxu1 %v3317_v20  ;;  %4128 = vmatprep.mubr.msk.f32.mxu1 %vm4288_vm1, %v4289_v41 }
 0xb49   :  { %4136 = vmatprep.subr.mxu1 %v4289_v41 }
 0xb61   :  { %v3150_v23 = vpop.xlane.xlu0 %3149 }
 0xb62   :  { %4281 = vrcp.f32 %v3150_v23 }
 0xb65   :  { %v3469_v44 = vpop.permute.xlu0 %3468 }
 0xb69   :  { %v3570_v61 = vpop.permute.xlu0 %3569 }
 0xb6c   :  { %v4282_v28 = vpop.eup %4281 }
 0xb6d   :  { %v3161_v31 = vmul.f32 %v4282_v28, %v4272_v10  ;;  %v3552_v1 = vpop.permute.xlu0 %3551 }
 0xb71   :  { %v3574_v5 = vpop.permute.xlu0 %3573 }
 0xb72   :  { %v3147_v24 = vpop.xlane.xlu1 %3146 }
 0xb73   :  { %4283 = vrcp.f32 %v3147_v24 }
 0xb76   :  { %v3153_v27 = vpop.xlane.xlu1 %3152 }
 0xb77   :  { %4285 = vrcp.f32 %v3153_v27 }
 0xb7a   :  { %v3393_v32 = vpop.permute.xlu1 %3392 }
 0xb7b   :  { %4132 = vmatpush3.msra.mxu0 %v3393_v32 }
 0xb7c   :  { %4134 = vmatmul.mubr.msk.f32.vlgmr.msra.gmra.mrb[38].mxu0 %vm246_vm2, %v3161_v31  ;;  %4170 = vmatprep.subr.bf16.mxu0 %v4287_v40 }
 0xb7d   :  { %v4284_v34 = vpop.eup %4283  ;;  %4149 = vmatprep.mubr.msk.f32.mxu0 %vm4288_vm1, %v4289_v41  ;;  %4172 = vmatpush3.bf16.msra.mxu0 %v4171_v52 }
 0xb7e   :  { %v3159_v38 = vmul.f32 %v4284_v34, %v4274_v15  ;;  %4173 = vmatprep.subr.bf16.mxu0 %v4287_v40  ;;  %v3550_v60 = vpop.permute.xlu1 %3549 }
 0xb7f   :  { %v3604_v3 = vsel %vm246_vm2, %v4580_v62, %v3550_v60 }
 0xb80   :  { %4129 = vmatmul.mubr.msk.f32.vlgmr.msra.gmra.mrb[46].mxu1 %vm246_vm2, %v3159_v38 }
 0xb81   :  { %v4286_v47 = vpop.eup %4285  ;;  %4137 = vmatpush3.msra.mxu1 %v3469_v44  ;;  %4138 = vmatprep.mubr.msk.f32.mxu1 %vm4288_vm1, %v4289_v41 }
 0xb82   :  { %v3163_v48 = vmul.f32 %v4286_v47, %v4276_v16  ;;  %4175 = vmatpush3.bf16.msra.mxu0 %v4174_v54  ;;  %v3572_v63 = vpop.permute.xlu1 %3571 }
 0xb84   :  { %4139 = vmatmul.mubr.msk.f32.vlgmr.msra.gmra.mrb[48].mxu1 %vm246_vm2, %v3163_v48 }
 0xc12   :  { %v3312_v55 = vpop.f32.mrb[36].mxu0 }
 0xc13   :  { %3591 = vrot.lane.b32.xlu0 %v3312_v55, %s4303_s17  ;;  %v4125_v56 = vpop.f32.mrb[37].mxu0 }
 0xc17   :  { %3555 = vrot.lane.b32.xlu0 %v4676_v49, %s4302_s9 }
 0xc1a   :  { %v3236_v35 = vpop.f32.mrb[44].mxu1 }
 0xc1b   :  { %3589 = vrot.lane.b32.xlu1 %v3236_v35, %s4303_s17  ;;  %v4120_v40 = vpop.f32.mrb[45].mxu1 }
 0xc1f   :  { %3575 = vrot.lane.b32.xlu1 %v4764_v36, %s4301_s8  ;;  %v3554_v36 = vpop.permute.xlu1 %3553 }
 0xc20   :  { %v3606_v12 = vsel %vm246_vm2, %v4584_v2, %v3554_v36 }
 0xc4f   :  { %v3464_v57 = vpop.f32.mrb[38].mxu0 }
 0xc50   :  { %3595 = vrot.lane.b32.xlu0 %v3464_v57, %s4303_s17  ;;  %v4135_v37 = vpop.f32.mrb[39].mxu0 }
 0xc53   :  { %v3388_v39 = vpop.f32.mrb[46].mxu1 }
 0xc54   :  { %3593 = vrot.lane.b32.xlu1 %v3388_v39, %s4303_s17  ;;  %v4130_v43 = vpop.f32.mrb[47].mxu1  ;;  %3577 = vrot.lane.b32.xlu0 %v4761_v26, %s4301_s8  ;;  %v3610_v26 = vsel %vm3609_vm3, %v3604_v3, %v3570_v61 }
 0xc57   :  { %v3540_v59 = vpop.f32.mrb[48].mxu1 }
 0xc58   :  { %3557 = vrot.lane.b32.xlu1 %v4682_v58, %s4302_s9  ;;  %v4140_v49 = vpop.f32.mrb[49].mxu1  ;;  %v3605_v58 = vsel %vm246_vm2, %v4582_v0, %v3552_v1  ;;  %v3612_v0 = vsel %vm3609_vm3, %v3606_v12, %v3574_v5 }
 0xc59   :  { %v3611_v10 = vsel %vm3609_vm3, %v3605_v58, %v3572_v63 }
 0xc5c   :  { %3597 = vrot.lane.b32.xlu1 %v3540_v59, %s4303_s17 }
 0xc85   :  { %v3592_v9 = vpop.permute.xlu0 %3591 }
 0xc86   :  { %v3617_v62 = vsel %vm3615_vm4, %v3611_v10, %v3592_v9 }
 0xc89   :  { %v3556_v13 = vpop.permute.xlu0 %3555 }
 0xc8a   :  { %v3607_v21 = vsel %vm246_vm2, %v4586_v4, %v3556_v13 }
 0xc8d   :  { %v3590_v7 = vpop.permute.xlu1 %3589 }
 0xc8e   :  { %v3616_v8 = vsel %vm3615_vm4, %v3610_v26, %v3590_v7 }
 0xc8f   :  { %4150 = vmatmul.mubr.msk.f32.vlgmr.msra.gmra.mrb[40].mxu0 %vm33_vm0, %v3616_v8 }
 0xc90   :  { %4152 = vmatprep.mubr.msk.f32.mxu0 %vm4288_vm1, %v4289_v41 }
 0xc91   :  { %v3576_v11 = vpop.permute.xlu1 %3575 }
 0xc92   :  { %v3613_v16 = vsel %vm3609_vm3, %v3607_v21, %v3576_v11 }
 0xc93   :  { %4153 = vmatmul.mubr.msk.f32.gmra.mrb[42].mxu0 %vm33_vm0, %v3617_v62 }
 0xc94   :  { %4155 = vmatprep.mubr.msk.f32.mxu0 %vm4288_vm1, %v4289_v41 }
 0xcc2   :  { %v3596_v18 = vpop.permute.xlu0 %3595 }
 0xcc3   :  { %v3619_v2 = vsel %vm3615_vm4, %v3613_v16, %v3596_v18 }
 0xcc6   :  { %v3594_v14 = vpop.permute.xlu1 %3593  ;;  %v3578_v17 = vpop.permute.xlu0 %3577 }
 0xcc7   :  { %v3618_v15 = vsel %vm3615_vm4, %v3612_v0, %v3594_v14 }
 0xcc8   :  { %4156 = vmatmul.mubr.msk.f32.gmra.mrb[44].mxu0 %vm33_vm0, %v3618_v15 }
 0xcc9   :  { %4158 = vmatprep.mubr.msk.f32.mxu0 %vm4288_vm1, %v4289_v41 }
 0xcca   :  { %v3558_v25 = vpop.permute.xlu1 %3557 }
 0xccb   :  { %v3608_v30 = vsel %vm246_vm2, %v4588_v6, %v3558_v25 }
 0xccc   :  { %4159 = vmatmul.mubr.msk.f32.gmra.mrb[46].mxu0 %vm33_vm0, %v3619_v2  ;;  %v3614_v4 = vsel %vm3609_vm3, %v3608_v30, %v3578_v17 }
 0xccd   :  { %4161 = vmatprep.mubr.msk.f32.mxu0 %vm4288_vm1, %v4289_v41 }
 0xcce   :  { %v3598_v45 = vpop.permute.xlu1 %3597 }
 0xccf   :  { %v3620_v19 = vsel %vm3615_vm4, %v3614_v4, %v3598_v45 }
 0xcd0   :  { %4162 = vmatmul.mubr.msk.f32.gmra.mrb[48].mxu0 %vm33_vm0, %v3620_v19 }
 0xd62   :  { %v3713_v29 = vpop.f32.mrb[40].mxu0 }
 0xd63   :  { %v3714_v42 = vadd.f32 %v3814_v22, %v3713_v29  ;;  %v4151_v6 = vpop.f32.mrb[41].mxu0 }
 0xd65   :  { %3737 = vst.msk [vmem:[%s4898_s7] sm:$0xff] %vm33_vm0, %v3714_v42 }
 0xd66   :  { %v3718_v41 = vpop.f32.mrb[42].mxu0 }
 0xd67   :  { %v3719_v46 = vadd.f32 %v3814_v22, %v3718_v41  ;;  %v4154_v20 = vpop.f32.mrb[43].mxu0 }
 0xd69   :  { %3738 = vst.msk [vmem:[%s4898_s7 + $0x8] sm:$0xff] %vm33_vm0, %v3719_v46 }
 0xd9b   :  { %v3723_v23 = vpop.f32.mrb[44].mxu0 }
 0xd9c   :  { %v3724_v24 = vadd.f32 %v3814_v22, %v3723_v23  ;;  %v4157_v27 = vpop.f32.mrb[45].mxu0 }
 0xd9e   :  { %3739 = vst.msk [vmem:[%s4898_s7 + $0x10] sm:$0xff] %vm33_vm0, %v3724_v24 }
 0xd9f   :  { %v3728_v28 = vpop.f32.mrb[46].mxu0 }
 0xda0   :  { %v3729_v31 = vadd.f32 %v3814_v22, %v3728_v28  ;;  %v4160_v32 = vpop.f32.mrb[47].mxu0 }
 0xda2   :  { %3740 = vst.msk [vmem:[%s4898_s7 + $0x18] sm:$0xff] %vm33_vm0, %v3729_v31 }
 0xda3   :  { %v3733_v34 = vpop.f32.mrb[48].mxu0 }
 0xda4   :  { %v3734_v38 = vadd.f32 %v3814_v22, %v3733_v34  ;;  %v4163_v44 = vpop.f32.mrb[49].mxu0 }
 0xda6   :  { %3741 = vst.msk [vmem:[%s4898_s7 + $0x20] sm:$0xff] %vm33_vm0, %v3734_v38 }

// kernel: space_time_block_forward.3
= control target key start
LH: loop header
LB: loop body
LE: loop exit
PB: predicated region body
PF: predicated region fallthrough
CT: control target
= control target key end

     0   :  { %s11048_s0 = inlined_call_operand.vmem [shape: f32[8,4,32], index: 0, kind: input, shape index: {}]   ;;  %s11049_s1 = inlined_call_operand.vmem [shape: f32[1,32], index: 1, kind: input, shape index: {}]   ;;  %s11050_s2 = inlined_call_operand.vmem [shape: f32[1,32], index: 2, kind: input, shape index: {}]   ;;  %s11051_s3 = inlined_call_operand.vmem [shape: f32[32,64], index: 3, kind: input, shape index: {}]   ;;  %s11052_s4 = inlined_call_operand.vmem [shape: f32[4,32], index: 4, kind: input, shape index: {}]   ;;  %s11053_s5 = inlined_call_operand.hbm [shape: f32[1,32], index: 5, kind: input, shape index: {}]   ;;  %s11054_s6 = inlined_call_operand.vmem [shape: f32[32,34], index: 6, kind: input, shape index: {}]   ;;  %s11055_s7 = inlined_call_operand.vmem [shape: f32[2,32], index: 7, kind: input, shape index: {}]   ;;  %s11056_s8 = inlined_call_operand.hbm [shape: f32[1,32], index: 8, kind: input, shape index: {}]   ;;  %s11057_s9 = inlined_call_operand.vmem [shape: f32[16,32], index: 9, kind: input, shape index: {}]   ;;  %s11058_s10 = inlined_call_operand.hbm [shape: f32[1,32], index: 10, kind: input, shape index: {}]   ;;  %s11059_s11 = inlined_call_operand.hbm [shape: f32[4,32], index: 11, kind: input, shape index: {}]   ;;  %s11060_s12 = inlined_call_operand.hbm [shape: f32[1,32], index: 12, kind: input, shape index: {}]   ;;  %s11061_s13 = inlined_call_operand.vmem [shape: f32[32,34], index: 13, kind: input, shape index: {}]   ;;  %s11062_s14 = inlined_call_operand.vmem [shape: f32[2,32], index: 14, kind: input, shape index: {}]   ;;  %s11063_s15 = inlined_call_operand.hbm [shape: f32[1,32], index: 15, kind: input, shape index: {}]   ;;  %s11064_s16 = inlined_call_operand.hbm [shape: f32[16,32], index: 16, kind: input, shape index: {}]   ;;  %s11065_s17 = inlined_call_operand.hbm [shape: f32[1,32], index: 17, kind: input, shape index: {}]   ;;  %s11066_s18 = inlined_call_operand.vmem [shape: f32[32,32], index: 18, kind: input, shape index: {}]   ;;  %s11067_s19 = inlined_call_operand.vmem [shape: f32[8,4,32], index: 19, kind: output, shape index: {}]  }
   0x1   :  { %11174 = sst [smem:[#allocation153_spill]] %s11048_s0 }
   0x2   :  { %11175 = sst [smem:[#allocation154_spill]] %s11049_s1 }
   0x3   :  { %11176 = sst [smem:[#allocation155_spill]] %s11050_s2 }
   0x4   :  { %11177 = sst [smem:[#allocation156_spill]] %s11051_s3 }
   0x5   :  { %24 = vsyncpa [#allocation5], 0 }
   0x6   :  { %25 = vsyncpa [#allocation7], 0 }
   0x7   :  { %26 = vsyncpa [#allocation10], 0 }
   0x8   :  { %27 = vsyncpa [#allocation13], 0 }
   0x9   :  { %28 = vsyncpa [#allocation16], 0  ;;  %s7167_s0 = smov [#allocation6]   ;;  %s7168_s20 = smov [#allocation9]  }
   0xa   :  { %s59_s30 = sshll.u32 %s7167_s0, 4  ;;  %s81_s21 = sshll.u32 %s7168_s20, 4  ;;  %s60_s30 = int_to_ptr.vmem [resolvable:$true] %s59_s30  ;;  %s82_s21 = int_to_ptr.vmem [resolvable:$true] %s81_s21 }
   0xb   :  { %s6981_s2 = scalar_lea.hbm %s11056_s8, 16 }
   0xc   :  { %p6982_p0 = scmp.ne.s32.totalorder %s11056_s8, %s6981_s2  ;;  %p6985_p1 = scmp.lt.u32.totalorder %s6981_s2, %s11056_s8 }
   0xe   :  { %p6987_p2 = pnand %p6985_p1, %p6982_p0 }
  0x10   :  { %6990 = shalt.err (!%p6987_p2)
}
  0x11   :  { %s6991_s26 = scalar_lea.vmem %s60_s30, 16  ;;  %s6995_s27 = scalar_lea.vmem %s60_s30, 32 }
  0x12   :  { %p6992_p3 = scmp.ne.s32.totalorder %s60_s30, %s6991_s26  ;;  %p6996_p4 = scmp.lt.s32.totalorder %s60_s30, %s60_s30 }
  0x13   :  { %p6997_p5 = scmp.lt.s32.totalorder %s6995_s27, %s6991_s26 }
  0x15   :  { %p6998_p6 = por %p6997_p5, %p6996_p4 }
  0x17   :  { %p6999_p7 = pnand %p6998_p6, %p6992_p3 }
  0x19   :  { %7002 = shalt.err (!%p6999_p7)
}
  0x1a   :  { %62 = dma.hbm_to_vmem [thread:$0]  %s11056_s8, 16, %s60_s30, [#allocation7]  }
  0x1b   :  { %s7003_s1 = scalar_lea.hbm %s11059_s11, 64 }
  0x1c   :  { %p7004_p8 = scmp.ne.s32.totalorder %s11059_s11, %s7003_s1  ;;  %p7007_p9 = scmp.lt.u32.totalorder %s7003_s1, %s11059_s11 }
  0x1e   :  { %p7009_p10 = pnand %p7007_p9, %p7004_p8 }
  0x20   :  { %7012 = shalt.err (!%p7009_p10)
}
  0x21   :  { %s7013_s25 = scalar_lea.vmem %s82_s21, 64  ;;  %p7018_p12 = scmp.lt.s32.totalorder %s82_s21, %s82_s21 }
  0x22   :  { %p7014_p11 = scmp.ne.s32.totalorder %s82_s21, %s7013_s25  ;;  %p7019_p13 = scmp.lt.s32.totalorder %s7013_s25, %s7013_s25 }
  0x24   :  { %p7020_p0 = por %p7019_p13, %p7018_p12 }
  0x26   :  { %p7021_p1 = pnand %p7020_p0, %p7014_p11 }
  0x28   :  { %7024 = shalt.err (!%p7021_p1)
}
  0x29   :  { %84 = dma.hbm_to_vmem [thread:$0]  %s11059_s11, 64, %s82_s21, [#allocation10]  }
  0x2a   :  { %s7169_s3 = smov [#allocation12]   ;;  %s7170_s27 = smov [#allocation4]  }
  0x2b   :  { %s105_s26 = sshll.u32 %s7169_s3, 4  ;;  %s45_s28 = sshll.u32 %s7170_s27, 4  ;;  %s106_s26 = int_to_ptr.vmem [resolvable:$true] %s105_s26  ;;  %s46_s28 = int_to_ptr.vmem [resolvable:$true] %s45_s28 }
  0x2c   :  { %s7025_s20 = scalar_lea.hbm %s11063_s15, 16 }
  0x2d   :  { %p7026_p2 = scmp.ne.s32.totalorder %s11063_s15, %s7025_s20  ;;  %p7029_p3 = scmp.lt.u32.totalorder %s7025_s20, %s11063_s15 }
  0x2f   :  { %p7031_p4 = pnand %p7029_p3, %p7026_p2 }
  0x31   :  { %7034 = shalt.err (!%p7031_p4)
}
  0x32   :  { %s7035_s11 = scalar_lea.vmem %s106_s26, 16  ;;  %s7039_s21 = scalar_lea.vmem %s106_s26, 32 }
  0x33   :  { %p7036_p5 = scmp.ne.s32.totalorder %s106_s26, %s7035_s11  ;;  %p7040_p6 = scmp.lt.s32.totalorder %s106_s26, %s106_s26 }
  0x34   :  { %p7041_p7 = scmp.lt.s32.totalorder %s7039_s21, %s7035_s11 }
  0x36   :  { %p7042_p8 = por %p7041_p7, %p7040_p6 }
  0x38   :  { %p7043_p9 = pnand %p7042_p8, %p7036_p5 }
  0x3a   :  { %7046 = shalt.err (!%p7043_p9)
}
  0x3b   :  { %108 = dma.hbm_to_vmem [thread:$0]  %s11063_s15, 16, %s106_s26, [#allocation13]  }
  0x3c   :  { %s7047_s3 = scalar_lea.hbm %s11053_s5, 16 }
  0x3d   :  { %p7048_p10 = scmp.ne.s32.totalorder %s11053_s5, %s7047_s3  ;;  %p7051_p11 = scmp.lt.u32.totalorder %s7047_s3, %s11053_s5 }
  0x3f   :  { %p7053_p12 = pnand %p7051_p11, %p7048_p10 }
  0x41   :  { %7056 = shalt.err (!%p7053_p12)
}
  0x42   :  { %s7057_s1 = scalar_lea.vmem %s46_s28, 16  ;;  %s7061_s22 = scalar_lea.vmem %s46_s28, 32 }
  0x43   :  { %p7058_p13 = scmp.ne.s32.totalorder %s46_s28, %s7057_s1  ;;  %p7062_p0 = scmp.lt.s32.totalorder %s46_s28, %s46_s28 }
  0x44   :  { %p7063_p1 = scmp.lt.s32.totalorder %s7061_s22, %s7057_s1 }
  0x46   :  { %p7064_p2 = por %p7063_p1, %p7062_p0 }
  0x48   :  { %p7065_p3 = pnand %p7064_p2, %p7058_p13 }
  0x4a   :  { %7068 = shalt.err (!%p7065_p3)
}
  0x4b   :  { %48 = dma.hbm_to_vmem [thread:$0]  %s11053_s5, 16, %s46_s28, [#allocation5]  }
  0x4c   :  { %s7171_s2 = smov [#allocation8]   ;;  %s7172_s11 = smov [#allocation11]  }
  0x4d   :  { %s71_s23 = sshll.u32 %s7171_s2, 4  ;;  %s91_s21 = sshll.u32 %s7172_s11, 4  ;;  %s72_s23 = int_to_ptr.vmem [resolvable:$true] %s71_s23  ;;  %s92_s21 = int_to_ptr.vmem [resolvable:$true] %s91_s21 }
  0x4e   :  { %s7069_s8 = scalar_lea.hbm %s11058_s10, 16 }
  0x4f   :  { %p7070_p4 = scmp.ne.s32.totalorder %s11058_s10, %s7069_s8  ;;  %p7073_p5 = scmp.lt.u32.totalorder %s7069_s8, %s11058_s10 }
  0x51   :  { %p7075_p6 = pnand %p7073_p5, %p7070_p4 }
  0x53   :  { %7078 = shalt.err (!%p7075_p6)
}
  0x54   :  { %s7079_s5 = scalar_lea.vmem %s72_s23, 16  ;;  %s7083_s28 = scalar_lea.vmem %s72_s23, 32 }
  0x55   :  { %p7080_p7 = scmp.ne.s32.totalorder %s72_s23, %s7079_s5  ;;  %p7084_p8 = scmp.lt.s32.totalorder %s72_s23, %s72_s23 }
  0x56   :  { %p7085_p9 = scmp.lt.s32.totalorder %s7083_s28, %s7079_s5 }
  0x58   :  { %p7086_p10 = por %p7085_p9, %p7084_p8 }
  0x5a   :  { %p7087_p11 = pnand %p7086_p10, %p7080_p7 }
  0x5c   :  { %7090 = shalt.err (!%p7087_p11)
}
  0x5d   :  { %74 = dma.hbm_to_vmem [thread:$0]  %s11058_s10, 16, %s72_s23, [#allocation7]  }
  0x5e   :  { %s7091_s15 = scalar_lea.hbm %s11060_s12, 16 }
  0x5f   :  { %p7092_p12 = scmp.ne.s32.totalorder %s11060_s12, %s7091_s15  ;;  %p7095_p13 = scmp.lt.u32.totalorder %s7091_s15, %s11060_s12 }
  0x61   :  { %p7097_p0 = pnand %p7095_p13, %p7092_p12 }
  0x63   :  { %7100 = shalt.err (!%p7097_p0)
}
  0x64   :  { %s7101_s25 = scalar_lea.vmem %s92_s21, 16  ;;  %s7105_s8 = scalar_lea.vmem %s92_s21, 32 }
  0x65   :  { %p7102_p1 = scmp.ne.s32.totalorder %s92_s21, %s7101_s25  ;;  %p7106_p2 = scmp.lt.s32.totalorder %s92_s21, %s92_s21 }
  0x66   :  { %p7107_p3 = scmp.lt.s32.totalorder %s7105_s8, %s7101_s25 }
  0x68   :  { %p7108_p4 = por %p7107_p3, %p7106_p2 }
  0x6a   :  { %p7109_p5 = pnand %p7108_p4, %p7102_p1 }
  0x6c   :  { %7112 = shalt.err (!%p7109_p5)
}
  0x6d   :  { %94 = dma.hbm_to_vmem [thread:$0]  %s11060_s12, 16, %s92_s21, [#allocation10]  }
  0x6e   :  { %s7173_s30 = smov [#allocation14]   ;;  %s7113_s5 = scalar_lea.hbm %s11064_s16, 256 }
  0x6f   :  { %s114_s3 = sshll.u32 %s7173_s30, 4  ;;  %p7114_p6 = scmp.ne.s32.totalorder %s11064_s16, %s7113_s5  ;;  %s115_s3 = int_to_ptr.vmem [resolvable:$true] %s114_s3 }
  0x70   :  { %p7117_p7 = scmp.lt.u32.totalorder %s7113_s5, %s11064_s16 }
  0x72   :  { %p7119_p8 = pnand %p7117_p7, %p7114_p6 }
  0x74   :  { %7122 = shalt.err (!%p7119_p8)
}
  0x75   :  { %s7123_s22 = scalar_lea.vmem %s115_s3, 256  ;;  %p7128_p10 = scmp.lt.s32.totalorder %s115_s3, %s115_s3 }
  0x76   :  { %p7124_p9 = scmp.ne.s32.totalorder %s115_s3, %s7123_s22  ;;  %p7129_p11 = scmp.lt.s32.totalorder %s7123_s22, %s7123_s22 }
  0x78   :  { %p7130_p12 = por %p7129_p11, %p7128_p10 }
  0x7a   :  { %p7131_p13 = pnand %p7130_p12, %p7124_p9 }
  0x7c   :  { %7134 = shalt.err (!%p7131_p13)
}
  0x7d   :  { %s7174_s12 = smov 128   ;;  %s7175_s21 = smov 8  }
  0x7e   :  { %120 = dma.hbm_to_vmem [thread:$0]  %s11064_s16, 256, %s115_s3, [#allocation13], %s7174_s12, %s7174_s12, %s7175_s21  }
  0x7f   :  { %s7176_s2 = smov [#allocation15]   ;;  %s7135_s8 = scalar_lea.hbm %s11065_s17, 16 }
  0x80   :  { %s127_s11 = sshll.u32 %s7176_s2, 4  ;;  %p7136_p0 = scmp.ne.s32.totalorder %s11065_s17, %s7135_s8  ;;  %s128_s11 = int_to_ptr.vmem [resolvable:$true] %s127_s11 }
  0x81   :  { %p7139_p1 = scmp.lt.u32.totalorder %s7135_s8, %s11065_s17 }
  0x83   :  { %p7141_p2 = pnand %p7139_p1, %p7136_p0 }
  0x85   :  { %7144 = shalt.err (!%p7141_p2)
}
  0x86   :  { %s7145_s29 = scalar_lea.vmem %s128_s11, 16  ;;  %s7149_s16 = scalar_lea.vmem %s128_s11, 32 }
  0x87   :  { %p7146_p3 = scmp.ne.s32.totalorder %s128_s11, %s7145_s29  ;;  %p7150_p4 = scmp.lt.s32.totalorder %s128_s11, %s128_s11 }
  0x88   :  { %p7151_p5 = scmp.lt.s32.totalorder %s7149_s16, %s7145_s29 }
  0x8a   :  { %p7152_p6 = por %p7151_p5, %p7150_p4 }
  0x8c   :  { %p7153_p7 = pnand %p7152_p6, %p7146_p3 }
  0x8e   :  { %7156 = shalt.err (!%p7153_p7)
}
  0x8f   :  { %130 = dma.hbm_to_vmem [thread:$0]  %s11065_s17, 16, %s128_s11, [#allocation16]  }
  0x90   :  { %7157 = dma.done.wait [#allocation5], 16  }
  0x91   :  { %7158 = vsyncadd [#allocation5], 4294967280 }
  0x92   :  { %7159 = dma.done.wait [#allocation7], 32  }
  0x93   :  { %7160 = vsyncadd [#allocation7], 4294967264 }
  0x94   :  { %7161 = dma.done.wait [#allocation10], 80  }
  0x95   :  { %7162 = vsyncadd [#allocation10], 4294967216 }
  0x96   :  { %7163 = dma.done.wait [#allocation13], 272  }
  0x97   :  { %7164 = vsyncadd [#allocation13], 4294967024 }
  0x98   :  { %7165 = dma.done.wait [#allocation16], 16  }
  0x99   :  { %7166 = vsyncadd [#allocation16], 4294967280  ;;  %vm183_vm0 = vcmask 261120   ;;  %s11178_s20 = sld [smem:[#allocation153_spill]]  ;;  %v7177_v16 = vmov 839922192   ;;  %v208_v18 = vlaneseq }
  0x9a   :  { %v206_v17 = vunpack.c.l.s4 %v7177_v16  ;;  %v7178_v19 = vmov 1985246804   ;;  %s11179_s29 = sld [smem:[#allocation156_spill]]  ;;  %s11180_s12 = sld [smem:[#allocation154_spill]]  ;;  %vm610_vm1 = vcmask 257024   ;;  %vm643_vm2 = vcmask 253952  }
  0x9b   :  { %v213_v20 = vunpack.c.l.s4 %v7178_v19  ;;  %v7405_v22 = vshrl.u32 %v208_v18, 7  ;;  %s11181_s26 = sld [smem:[#allocation155_spill]]  ;;  %vm680_vm3 = vcmask 254976   ;;  %vm717_vm4 = vcmask 256000  }
  0x9c   :  { %v207_v21 = vunpack.c.0.s8 %v206_v17  ;;  %vm920_vm5 = vcmask 1041408   ;;  %vm907_vm6 = vcmask 15360  }
  0x9d   :  { %v214_v23 = vunpack.c.0.s8 %v213_v20 }
  0x9e   :  { %v7408_v24 = vsub.s32 %v207_v21, %v7405_v22 }
  0x9f   :  { %v157_v0 = vld [vmem:[%s11178_s20] sm:$0xf]  ;;  %v158_v1 = vld [vmem:[%s11178_s20 + $0x4] sm:$0xf]  ;;  %v161_v2 = vld [vmem:[%s11178_s20 + $0x10] sm:$0xf]  ;;  %v7411_v25 = vsub.s32 %v214_v23, %v7405_v22 }
  0xa0   :  { %v175_v3 = vcombine.low %v157_v0, %v158_v1  ;;  %v162_v4 = vld [vmem:[%s11178_s20 + $0x14] sm:$0xf]  ;;  %v159_v5 = vld [vmem:[%s11178_s20 + $0x8] sm:$0xf]  ;;  %v160_v6 = vld [vmem:[%s11178_s20 + $0xc] sm:$0xf] }
  0xa1   :  { %v177_v7 = vcombine.low %v161_v2, %v162_v4  ;;  %v176_v8 = vcombine.low %v159_v5, %v160_v6  ;;  %v163_v9 = vld [vmem:[%s11178_s20 + $0x18] sm:$0xf]  ;;  %v164_v10 = vld [vmem:[%s11178_s20 + $0x1c] sm:$0xf]  ;;  %v6390_v20 = vld [vmem:[%s11180_s12] ss:$0 sm:$0xff] }
  0xa2   :  { %v184_v11 = vsel %vm183_vm0, %v175_v3, 0.0  ;;  %v178_v12 = vcombine.low %v163_v9, %v164_v10  ;;  %v434_v3 = vld [vmem:[%s11179_s29 + $0x8] sm:$0xff]  ;;  %v6391_v23 = vld [vmem:[%s11181_s26] ss:$0 sm:$0xff] }
  0xa3   :  { %185 = vadd.xlane.f32.xlu0 %v184_v11  ;;  %v190_v13 = vsel %vm183_vm0, %v177_v7, 0.0  ;;  %v187_v14 = vsel %vm183_vm0, %v176_v8, 0.0 }
  0xa4   :  { %191 = vadd.xlane.f32.xlu1 %v190_v13  ;;  %v193_v15 = vsel %vm183_vm0, %v178_v12, 0.0 }
  0xa7   :  { %188 = vadd.xlane.f32.xlu0 %v187_v14 }
  0xa8   :  { %194 = vadd.xlane.f32.xlu1 %v193_v15 }
 0x130   :  { %v186_v26 = vpop.xlane.xlu0 %185 }
 0x131   :  { %v197_v27 = vmul.f32 0.03125, %v186_v26  ;;  %v192_v28 = vpop.xlane.xlu1 %191 }
 0x132   :  { %v199_v29 = vmul.f32 0.03125, %v192_v28  ;;  %v407_v28 = vcombine.high %v6390_v20, %v6390_v20 }
 0x133   :  { %v211_v30 = vrot.slane %v197_v27, %v7408_v24  ;;  %v218_v31 = vrot.slane %v197_v27, %v7411_v25 }
 0x134   :  { %v239_v32 = vrot.slane %v199_v29, %v7408_v24  ;;  %v246_v33 = vrot.slane %v199_v29, %v7411_v25  ;;  %v189_v34 = vpop.xlane.xlu0 %188 }
 0x135   :  { %v7417_v35 = vsub.f32 %v157_v0, %v211_v30  ;;  %v7419_v36 = vsub.f32 %v158_v1, %v218_v31  ;;  %v198_v37 = vmul.f32 0.03125, %v189_v34  ;;  %v195_v38 = vpop.xlane.xlu1 %194  ;;  %v423_v31 = vcombine.high %v6391_v23, %v6391_v23 }
 0x136   :  { %v7421_v39 = vsub.f32 %v161_v2, %v239_v32  ;;  %v7423_v40 = vsub.f32 %v162_v4, %v246_v33  ;;  %v200_v41 = vmul.f32 0.03125, %v195_v38  ;;  %v433_v2 = vld [vmem:[%s11179_s29] sm:$0xff] }
 0x137   :  { %v225_v42 = vrot.slane %v198_v37, %v7408_v24  ;;  %v232_v43 = vrot.slane %v198_v37, %v7411_v25  ;;  %v277_v44 = vmul.f32 %v7417_v35, %v7417_v35  ;;  %v278_v45 = vmul.f32 %v7419_v36, %v7419_v36 }
 0x138   :  { %v253_v46 = vrot.slane %v200_v41, %v7408_v24  ;;  %v260_v47 = vrot.slane %v200_v41, %v7411_v25  ;;  %v281_v48 = vmul.f32 %v7421_v39, %v7421_v39  ;;  %v282_v49 = vmul.f32 %v7423_v40, %v7423_v40 }
 0x139   :  { %v7437_v50 = vsub.f32 %v159_v5, %v225_v42  ;;  %v7439_v51 = vsub.f32 %v160_v6, %v232_v43  ;;  %v293_v52 = vcombine.low %v277_v44, %v278_v45  ;;  %v6538_v4 = vpack.c.bf16 %v434_v3, %v433_v2  ;;  %v435_v5 = vld [vmem:[%s11179_s29 + $0x10] sm:$0xff]  ;;  %v436_v6 = vld [vmem:[%s11179_s29 + $0x18] sm:$0xff] }
 0x13a   :  { %v7441_v53 = vsub.f32 %v163_v9, %v253_v46  ;;  %v7443_v54 = vsub.f32 %v164_v10, %v260_v47  ;;  %v295_v55 = vcombine.low %v281_v48, %v282_v49  ;;  %v6542_v7 = vpack.c.bf16 %v436_v6, %v435_v5  ;;  %v792_v3 = vld [vmem:[%s11054_s6 + $0x10] sm:$0xff]  ;;  %v793_v5 = vld [vmem:[%s11054_s6 + $0x18] sm:$0xff] }
 0x13b   :  { %v301_v56 = vsel %vm183_vm0, %v293_v52, 0.0  ;;  %v279_v57 = vmul.f32 %v7437_v50, %v7437_v50  ;;  %v280_v58 = vmul.f32 %v7439_v51, %v7439_v51  ;;  %6539 = vmatprep.subr.bf16.mxu0 %v6538_v4  ;;  %v6550_v6 = vpack.c.bf16 %v793_v5, %v792_v3 }
 0x13c   :  { %302 = vadd.xlane.f32.xlu0 %v301_v56  ;;  %v283_v59 = vmul.f32 %v7441_v53, %v7441_v53  ;;  %v284_v60 = vmul.f32 %v7443_v54, %v7443_v54  ;;  %v307_v61 = vsel %vm183_vm0, %v295_v55, 0.0  ;;  %6541 = vmatpush3.bf16.msra.mxu0 %v6538_v4 }
 0x13d   :  { %v294_v62 = vcombine.low %v279_v57, %v280_v58  ;;  %6543 = vmatprep.subr.bf16.mxu0 %v6542_v7 }
 0x13e   :  { %v296_v63 = vcombine.low %v283_v59, %v284_v60 }
 0x13f   :  { %v304_v0 = vsel %vm183_vm0, %v294_v62, 0.0 }
 0x140   :  { %308 = vadd.xlane.f32.xlu0 %v307_v61  ;;  %305 = vadd.xlane.f32.xlu1 %v304_v0  ;;  %v310_v1 = vsel %vm183_vm0, %v296_v63, 0.0 }
 0x141   :  { %6545 = vmatpush3.bf16.msra.mxu0 %v6542_v7  ;;  %v3600_v7 = vld [vmem:[%s11061_s13] sm:$0xff] }
 0x144   :  { %311 = vadd.xlane.f32.xlu1 %v310_v1 }
 0x1c9   :  { %v303_v8 = vpop.xlane.xlu0 %302 }
 0x1ca   :  { %v313_v9 = vmul.f32 0.03125, %v303_v8  ;;  %v3601_v8 = vld [vmem:[%s11061_s13 + $0x8] sm:$0xff] }
 0x1cc   :  { %v317_v10 = vadd.f32 1e-05, %v313_v9  ;;  %v7513_v9 = vpack.c.bf16 %v3601_v8, %v3600_v7 }
 0x1cd   :  { %v306_v11 = vpop.xlane.xlu1 %305  ;;  %v309_v12 = vpop.xlane.xlu0 %308 }
 0x1ce   :  { %6588 = vrsqrt.f32 %v317_v10  ;;  %v314_v13 = vmul.f32 0.03125, %v306_v11  ;;  %v315_v14 = vmul.f32 0.03125, %v309_v12  ;;  %v7517_v10 = vsub.s32 3, %v7405_v22  ;;  %v7522_v11 = vld [vmem:[%s11052_s4] sm:$0xf] }
 0x1d0   :  { %v318_v15 = vadd.f32 1e-05, %v314_v13  ;;  %v319_v16 = vadd.f32 1e-05, %v315_v14  ;;  %v587_v12 = vrot.slane %v7522_v11, %v7517_v10  ;;  %v6396_v14 = vld [vmem:[#allocation4] ss:$0 sm:$0xff] }
 0x1d1   :  { %v312_v17 = vpop.xlane.xlu1 %311 }
 0x1d2   :  { %6590 = vrsqrt.f32 %v318_v15  ;;  %v316_v18 = vmul.f32 0.03125, %v312_v17 }
 0x1d3   :  { %6592 = vrsqrt.f32 %v319_v16 }
 0x1d4   :  { %v320_v19 = vadd.f32 1e-05, %v316_v18 }
 0x1d6   :  { %6594 = vrsqrt.f32 %v320_v19 }
 0x1d8   :  { %v6589_v21 = vpop.eup %6588 }
 0x1d9   :  { %v335_v26 = vrot.slane %v6589_v21, %v7408_v24  ;;  %v342_v27 = vrot.slane %v6589_v21, %v7411_v25 }
 0x1db   :  { %v393_v29 = vmul.f32 %v335_v26, %v7417_v35  ;;  %v394_v30 = vmul.f32 %v342_v27, %v7419_v36 }
 0x1dc   :  { %v6591_v32 = vpop.eup %6590 }
 0x1dd   :  { %v6593_v33 = vpop.eup %6592  ;;  %v349_v34 = vrot.slane %v6591_v32, %v7408_v24  ;;  %v356_v37 = vrot.slane %v6591_v32, %v7411_v25  ;;  %v409_v38 = vmul.f32 %v6390_v20, %v393_v29  ;;  %v410_v41 = vmul.f32 %v407_v28, %v394_v30 }
 0x1de   :  { %v363_v42 = vrot.slane %v6593_v33, %v7408_v24  ;;  %v370_v43 = vrot.slane %v6593_v33, %v7411_v25  ;;  %v7542_v29 = vsub.s32 1, %v7405_v22 }
 0x1df   :  { %v425_v44 = vadd.f32 %v6391_v23, %v409_v38  ;;  %v426_v45 = vadd.f32 %v423_v31, %v410_v41  ;;  %v395_v46 = vmul.f32 %v349_v34, %v7437_v50  ;;  %v396_v35 = vmul.f32 %v356_v37, %v7439_v51 }
 0x1e0   :  { %v6595_v36 = vpop.eup %6594  ;;  %v397_v47 = vmul.f32 %v363_v42, %v7421_v39  ;;  %v398_v48 = vmul.f32 %v370_v43, %v7423_v40  ;;  %v7559_v41 = vrot.slane %v7522_v11, %v7542_v29 }
 0x1e1   :  { %v377_v49 = vrot.slane %v6595_v36, %v7408_v24  ;;  %v384_v52 = vrot.slane %v6595_v36, %v7411_v25  ;;  %v445_v55 = vcombine.low %v425_v44, %v426_v45  ;;  %v411_v56 = vmul.f32 %v6390_v20, %v395_v46 }
 0x1e2   :  { %v412_v57 = vmul.f32 %v407_v28, %v396_v35  ;;  %v413_v58 = vmul.f32 %v6390_v20, %v397_v47  ;;  %v414_v59 = vmul.f32 %v407_v28, %v398_v48 }
 0x1e3   :  { %6474 = vmatprep.mubr.msk.f32.mxu0 %vm183_vm0, %v445_v55  ;;  %v427_v60 = vadd.f32 %v6391_v23, %v411_v56  ;;  %v399_v50 = vmul.f32 %v377_v49, %v7441_v53  ;;  %v400_v51 = vmul.f32 %v384_v52, %v7443_v54  ;;  %v790_v53 = vld [vmem:[%s11054_s6] sm:$0xff]  ;;  %v791_v54 = vld [vmem:[%s11054_s6 + $0x8] sm:$0xff]  ;;  %v7579_v55 = vsub.s32 2, %v7405_v22 }
 0x1e4   :  { %v428_v61 = vadd.f32 %v423_v31, %v412_v57  ;;  %v429_v39 = vadd.f32 %v6391_v23, %v413_v58  ;;  %v430_v62 = vadd.f32 %v423_v31, %v414_v59  ;;  %v6546_v4 = vpack.c.bf16 %v791_v54, %v790_v53 }
 0x1e5   :  { %v415_v40 = vmul.f32 %v6390_v20, %v399_v50  ;;  %v416_v63 = vmul.f32 %v407_v28, %v400_v51 }
 0x1e6   :  { %v446_v24 = vcombine.low %v427_v60, %v428_v61  ;;  %v447_v0 = vcombine.low %v429_v39, %v430_v62  ;;  %6547 = vmatprep.subr.bf16.mxu1 %v6546_v4 }
 0x1e7   :  { %v431_v25 = vadd.f32 %v6391_v23, %v415_v40  ;;  %v432_v1 = vadd.f32 %v423_v31, %v416_v63  ;;  %6549 = vmatpush3.bf16.msra.mxu1 %v6546_v4  ;;  %v7592_v40 = vrot.slane %v7522_v11, %v7579_v55 }
 0x1e8   :  { %6475 = vmatmul.mubr.msk.f32.vlgmr.msra.gmra.mrb[0].mxu0 %vm183_vm0, %v446_v24  ;;  %6551 = vmatprep.subr.bf16.mxu1 %v6550_v6 }
 0x1e9   :  { %6477 = vmatprep.mubr.msk.f32.mxu0 %vm183_vm0, %v447_v0  ;;  %v448_v2 = vcombine.low %v431_v25, %v432_v1 }
 0x1eb   :  { %6553 = vmatpush3.bf16.msra.mxu1 %v6550_v6 }
 0x1ec   :  { %6478 = vmatmul.mubr.msk.f32.gmra.mrb[2].mxu0 %vm183_vm0, %v448_v2  ;;  %6555 = vmatprep.subr.bf16.mxu1 %v7513_v9  ;;  %v7601_v2 = vld [vmem:[#allocation9] sm:$0xf] }
 0x2bb   :  { %v7526_v13 = vpop.f32.mrb[0].mxu0 }
 0x2bc   :  { %v590_v15 = vmul.f32 %v7526_v13, %v587_v12  ;;  %v7529_v16 = vpop.f32.mrb[1].mxu0  ;;  %v629_v26 = vmul.f32 %v7526_v13, %v7522_v11  ;;  %v7555_v38 = vcombine.high %v7526_v13, %v7526_v13  ;;  %v666_v36 = vmul.f32 %v7526_v13, %v7559_v41 }
 0x2bd   :  { %v588_v19 = vmul.f32 %v587_v12, %v7529_v16  ;;  %v7547_v31 = vcombine.high %v7529_v16, %v7529_v16  ;;  %v627_v33 = vmul.f32 %v7522_v11, %v7529_v16  ;;  %v664_v60 = vmul.f32 %v7559_v41, %v7529_v16 }
 0x2be   :  { %v604_v17 = vadd.f32 %v6396_v14, %v590_v15  ;;  %v591_v48 = vmul.f32 %v587_v12, %v7555_v38  ;;  %v703_v3 = vmul.f32 %v7526_v13, %v7592_v40  ;;  %v630_v5 = vmul.f32 %v7522_v11, %v7555_v38 }
 0x2bf   :  { %v7531_v18 = vpop.f32.mrb[2].mxu0  ;;  %v602_v21 = vadd.f32 %v6396_v14, %v588_v19  ;;  %v589_v43 = vmul.f32 %v587_v12, %v7547_v31  ;;  %v628_v24 = vmul.f32 %v7522_v11, %v7547_v31  ;;  %v701_v19 = vmul.f32 %v7592_v40, %v7529_v16 }
 0x2c0   :  { %613 = vst.msk [vmem:[#allocation2 + $0x8] sm:$0xf] %vm610_vm1, %v604_v17  ;;  %v7535_v20 = vpop.f32.mrb[3].mxu0  ;;  %v594_v23 = vmul.f32 %v7531_v18, %v587_v12  ;;  %v633_v44 = vmul.f32 %v7531_v18, %v7522_v11  ;;  %v7575_v52 = vcombine.high %v7531_v18, %v7531_v18  ;;  %v605_v57 = vadd.f32 %v6396_v14, %v591_v48 }
 0x2c1   :  { %611 = vst.msk [vmem:[#allocation2] sm:$0xf] %vm610_vm1, %v602_v21  ;;  %v592_v32 = vmul.f32 %v587_v12, %v7535_v20  ;;  %v7568_v46 = vcombine.high %v7535_v20, %v7535_v20  ;;  %v603_v35 = vadd.f32 %v6396_v14, %v589_v43  ;;  %v631_v58 = vmul.f32 %v7522_v11, %v7535_v20 }
 0x2c2   :  { %v608_v27 = vadd.f32 %v6396_v14, %v594_v23  ;;  %614 = vst.msk [vmem:[#allocation2 + $0xc] sm:$0xf] %vm610_vm1, %v605_v57  ;;  %v595_v62 = vmul.f32 %v587_v12, %v7575_v52  ;;  %v670_v25 = vmul.f32 %v7531_v18, %v7559_v41  ;;  %v668_v15 = vmul.f32 %v7559_v41, %v7535_v20 }
 0x2c3   :  { %v606_v37 = vadd.f32 %v6396_v14, %v592_v32  ;;  %612 = vst.msk [vmem:[#allocation2 + $0x4] sm:$0xf] %vm610_vm1, %v603_v35  ;;  %v593_v59 = vmul.f32 %v587_v12, %v7568_v46  ;;  %v7611_v12 = vrot.slane %v7601_v2, %v7517_v10  ;;  %v632_v17 = vmul.f32 %v7522_v11, %v7568_v46 }
 0x2c4   :  { %617 = vst.msk [vmem:[#allocation2 + $0x18] sm:$0xf] %vm610_vm1, %v608_v27  ;;  %v609_v0 = vadd.f32 %v6396_v14, %v595_v62 }
 0x2c5   :  { %615 = vst.msk [vmem:[#allocation2 + $0x10] sm:$0xf] %vm610_vm1, %v606_v37  ;;  %v607_v39 = vadd.f32 %v6396_v14, %v593_v59  ;;  %v3332_v32 = vmul.f32 %v7526_v13, %v7611_v12  ;;  %v7626_v37 = vld [vmem:[#allocation11] ss:$0 sm:$0xff] }
 0x2c6   :  { %618 = vst.msk [vmem:[#allocation2 + $0x1c] sm:$0xf] %vm610_vm1, %v609_v0 }
 0x2c7   :  { %v621_v28 = vld [vmem:[#allocation2 + $0xb] sm:$0x1]  ;;  %616 = vst.msk [vmem:[#allocation2 + $0x14] sm:$0xf] %vm610_vm1, %v607_v39  ;;  %v3336_v39 = vmul.f32 %v7531_v18, %v7611_v12 }
 0x2c8   :  { %v637_v30 = vadd.f32 %v629_v26, %v621_v28  ;;  %v619_v34 = vld [vmem:[#allocation2 + $0x3] sm:$0x1] }
 0x2c9   :  { %v635_v42 = vadd.f32 %v627_v33, %v619_v34  ;;  %v622_v7 = vld [vmem:[#allocation2 + $0xf] sm:$0x1] }
 0x2ca   :  { %646 = vst.msk [vmem:[#allocation2 + $0xb] sm:$0x1] %vm643_vm2, %v637_v30  ;;  %v620_v1 = vld [vmem:[#allocation2 + $0x7] sm:$0x1]  ;;  %v638_v14 = vadd.f32 %v630_v5, %v622_v7  ;;  %v634_v30 = vmul.f32 %v7522_v11, %v7575_v52  ;;  %v3371_v7 = vrot.slane %v7529_v16, %v7517_v10 }
 0x2cb   :  { %644 = vst.msk [vmem:[#allocation2 + $0x3] sm:$0x1] %vm643_vm2, %v635_v42  ;;  %v625_v45 = vld [vmem:[#allocation2 + $0x1b] sm:$0x1]  ;;  %v636_v54 = vadd.f32 %v628_v24, %v620_v1  ;;  %v665_v42 = vmul.f32 %v7559_v41, %v7547_v31 }
 0x2cc   :  { %v641_v47 = vadd.f32 %v633_v44, %v625_v45  ;;  %v623_v50 = vld [vmem:[#allocation2 + $0x13] sm:$0x1]  ;;  %647 = vst.msk [vmem:[#allocation2 + $0xf] sm:$0x1] %vm643_vm2, %v638_v14  ;;  %v707_v44 = vmul.f32 %v7531_v18, %v7592_v40 }
 0x2cd   :  { %v639_v61 = vadd.f32 %v631_v58, %v623_v50  ;;  %645 = vst.msk [vmem:[#allocation2 + $0x7] sm:$0x1] %vm643_vm2, %v636_v54  ;;  %v626_v34 = vld [vmem:[#allocation2 + $0x1f] sm:$0x1]  ;;  %v669_v50 = vmul.f32 %v7559_v41, %v7568_v46 }
 0x2ce   :  { %650 = vst.msk [vmem:[#allocation2 + $0x1b] sm:$0x1] %vm643_vm2, %v641_v47  ;;  %v624_v23 = vld [vmem:[#allocation2 + $0x17] sm:$0x1]  ;;  %v642_v43 = vadd.f32 %v634_v30, %v626_v34  ;;  %v3330_v47 = vmul.f32 %v7611_v12, %v7529_v16 }
 0x2cf   :  { %648 = vst.msk [vmem:[#allocation2 + $0x13] sm:$0x1] %vm643_vm2, %v639_v61  ;;  %v640_v28 = vadd.f32 %v632_v17, %v624_v23  ;;  %v704_v23 = vmul.f32 %v7592_v40, %v7555_v38 }
 0x2d0   :  { %651 = vst.msk [vmem:[#allocation2 + $0x1f] sm:$0x1] %vm643_vm2, %v642_v43  ;;  %v3344_v61 = vadd.f32 %v7626_v37, %v3330_v47 }
 0x2d1   :  { %v654_v49 = vld [vmem:[#allocation2 + $0xa] sm:$0x3]  ;;  %649 = vst.msk [vmem:[#allocation2 + $0x17] sm:$0x1] %vm643_vm2, %v640_v28  ;;  %v3331_v28 = vmul.f32 %v7611_v12, %v7547_v31 }
 0x2d2   :  { %v674_v56 = vadd.f32 %v666_v36, %v654_v49  ;;  %v652_v51 = vld [vmem:[#allocation2 + $0x2] sm:$0x3]  ;;  %v3346_v36 = vadd.f32 %v7626_v37, %v3332_v32  ;;  %v667_v49 = vmul.f32 %v7559_v41, %v7555_v38  ;;  %v3395_v32 = vrot.slane %v7531_v18, %v7517_v10 }
 0x2d3   :  { %v672_v63 = vadd.f32 %v664_v60, %v652_v51  ;;  %v705_v60 = vmul.f32 %v7592_v40, %v7535_v20  ;;  %v3379_v51 = vrot.slane %v7526_v13, %v7517_v10 }
 0x2d4   :  { %683 = vst.msk [vmem:[#allocation2 + $0xa] sm:$0x3] %vm680_vm3, %v674_v56  ;;  %v653_v45 = vld [vmem:[#allocation2 + $0x6] sm:$0x3]  ;;  %v655_v56 = vld [vmem:[#allocation2 + $0xe] sm:$0x3] }
 0x2d5   :  { %681 = vst.msk [vmem:[#allocation2 + $0x2] sm:$0x3] %vm680_vm3, %v672_v63  ;;  %v658_v53 = vld [vmem:[#allocation2 + $0x1a] sm:$0x3]  ;;  %v673_v35 = vadd.f32 %v665_v42, %v653_v45  ;;  %v675_v58 = vadd.f32 %v667_v49, %v655_v56  ;;  %v706_v45 = vmul.f32 %v7592_v40, %v7568_v46 }
 0x2d6   :  { %v678_v4 = vadd.f32 %v670_v25, %v658_v53  ;;  %v656_v21 = vld [vmem:[#allocation2 + $0x12] sm:$0x3]  ;;  %v671_v53 = vmul.f32 %v7559_v41, %v7575_v52  ;;  %v3350_v41 = vadd.f32 %v7626_v37, %v3336_v39  ;;  %v3387_v39 = vrot.slane %v7535_v20, %v7517_v10 }
 0x2d7   :  { %v676_v27 = vadd.f32 %v668_v15, %v656_v21  ;;  %682 = vst.msk [vmem:[#allocation2 + $0x6] sm:$0x3] %vm680_vm3, %v673_v35  ;;  %684 = vst.msk [vmem:[#allocation2 + $0xe] sm:$0x3] %vm680_vm3, %v675_v58  ;;  %v3334_v15 = vmul.f32 %v7611_v12, %v7535_v20  ;;  %v3446_v35 = vrot.slane %v7526_v13, 2  ;;  %v708_v58 = vmul.f32 %v7592_v40, %v7575_v52 }
 0x2d8   :  { %687 = vst.msk [vmem:[#allocation2 + $0x1a] sm:$0x3] %vm680_vm3, %v678_v4  ;;  %v657_v24 = vld [vmem:[#allocation2 + $0x16] sm:$0x3]  ;;  %v702_v4 = vmul.f32 %v7592_v40, %v7547_v31 }
 0x2d9   :  { %685 = vst.msk [vmem:[#allocation2 + $0x12] sm:$0x3] %vm680_vm3, %v676_v27  ;;  %v677_v1 = vadd.f32 %v669_v50, %v657_v24  ;;  %v3348_v43 = vadd.f32 %v7626_v37, %v3334_v15  ;;  %v3345_v50 = vadd.f32 %v7626_v37, %v3331_v28 }
 0x2db   :  { %v691_v6 = vld [vmem:[#allocation2 + $0x9] sm:$0x7]  ;;  %686 = vst.msk [vmem:[#allocation2 + $0x16] sm:$0x3] %vm680_vm3, %v677_v1  ;;  %v3444_v1 = vrot.slane %v7529_v16, 2 }
 0x2dc   :  { %v711_v8 = vadd.f32 %v703_v3, %v691_v6  ;;  %v689_v26 = vld [vmem:[#allocation2 + $0x1] sm:$0x7]  ;;  %v659_v3 = vld [vmem:[#allocation2 + $0x1e] sm:$0x3]  ;;  %v3410_v6 = vmul.f32 %v3379_v51, %v7601_v2  ;;  %v3414_v51 = vmul.f32 %v3395_v32, %v7601_v2  ;;  %v3498_v32 = vrot.slane %v7526_v13, 1 }
 0x2dd   :  { %v709_v33 = vadd.f32 %v701_v19, %v689_v26  ;;  %v679_v5 = vadd.f32 %v671_v53, %v659_v3  ;;  %v3335_v3 = vmul.f32 %v7611_v12, %v7568_v46 }
 0x2de   :  { %720 = vst.msk [vmem:[#allocation2 + $0x9] sm:$0x7] %vm717_vm4, %v711_v8  ;;  %v690_v8 = vld [vmem:[#allocation2 + $0x5] sm:$0x7]  ;;  %v692_v30 = vld [vmem:[#allocation2 + $0xd] sm:$0x7] }
 0x2df   :  { %718 = vst.msk [vmem:[#allocation2 + $0x1] sm:$0x7] %vm717_vm4, %v709_v33  ;;  %v695_v11 = vld [vmem:[#allocation2 + $0x19] sm:$0x7]  ;;  %v710_v17 = vadd.f32 %v702_v4, %v690_v8  ;;  %v3408_v33 = vmul.f32 %v3371_v7, %v7601_v2  ;;  %v712_v34 = vadd.f32 %v704_v23, %v692_v30 }
 0x2e0   :  { %v715_v48 = vadd.f32 %v707_v44, %v695_v11  ;;  %v693_v62 = vld [vmem:[#allocation2 + $0x11] sm:$0x7]  ;;  %688 = vst.msk [vmem:[#allocation2 + $0x1e] sm:$0x3] %vm680_vm3, %v679_v5  ;;  %v7692_v11 = vrot.slane %v7601_v2, %v7542_v29 }
 0x2e1   :  { %v713_v0 = vadd.f32 %v705_v60, %v693_v62  ;;  %719 = vst.msk [vmem:[#allocation2 + $0x5] sm:$0x7] %vm717_vm4, %v710_v17  ;;  %721 = vst.msk [vmem:[#allocation2 + $0xd] sm:$0x7] %vm717_vm4, %v712_v34  ;;  %v3333_v60 = vmul.f32 %v7611_v12, %v7555_v38 }
 0x2e2   :  { %724 = vst.msk [vmem:[#allocation2 + $0x19] sm:$0x7] %vm717_vm4, %v715_v48  ;;  %v694_v47 = vld [vmem:[#allocation2 + $0x15] sm:$0x7] }
 0x2e3   :  { %722 = vst.msk [vmem:[#allocation2 + $0x11] sm:$0x7] %vm717_vm4, %v713_v0  ;;  %v714_v49 = vadd.f32 %v706_v45, %v694_v47  ;;  %v3462_v0 = vmul.f32 %v3446_v35, %v7692_v11  ;;  %v3347_v7 = vadd.f32 %v7626_v37, %v3333_v60  ;;  %v3383_v35 = vrot.slane %v7555_v38, %v7517_v10 }
 0x2e4   :  { %v3448_v60 = vrot.slane %v7535_v20, 2 }
 0x2e5   :  { %v7642_v57 = vld [vmem:[#allocation2 + $0x8] sm:$0xf]  ;;  %723 = vst.msk [vmem:[#allocation2 + $0x15] sm:$0x7] %vm717_vm4, %v714_v49 }
 0x2e6   :  { %v736_v59 = vsub.f32 0.0, %v7642_v57  ;;  %3354 = vst.msk [vmem:[#allocation2 + $0x8] sm:$0xf] %vm610_vm1, %v3346_v36  ;;  %v7657_v25 = vld [vmem:[#allocation2] sm:$0xf] }
 0x2e7   :  { %v734_v54 = vsub.f32 0.0, %v7657_v25  ;;  %3352 = vst.msk [vmem:[#allocation2] sm:$0xf] %vm610_vm1, %v3344_v61  ;;  %v696_v61 = vld [vmem:[#allocation2 + $0x1d] sm:$0x7] }
 0x2e8   :  { %v746_v63 = vmul.f32 1.442695, %v736_v59  ;;  %v716_v24 = vadd.f32 %v708_v58, %v696_v61  ;;  %v7712_v53 = vld [vmem:[#allocation2 + $0x4] sm:$0xf]  ;;  %v7726_v23 = vld [vmem:[#allocation2 + $0xc] sm:$0xf] }
 0x2e9   :  { %v742_v14 = vmul.f32 1.442695, %v734_v54  ;;  %v7674_v21 = vld [vmem:[#allocation2 + $0x18] sm:$0xf]  ;;  %v735_v4 = vsub.f32 0.0, %v7712_v53  ;;  %v737_v28 = vsub.f32 0.0, %v7726_v23 }
 0x2ea   :  { %6596 = vpow2.f32 %v746_v63  ;;  %v740_v27 = vsub.f32 0.0, %v7674_v21  ;;  %3358 = vst.msk [vmem:[#allocation2 + $0x18] sm:$0xf] %vm610_vm1, %v3350_v41  ;;  %v7696_v48 = vld [vmem:[#allocation2 + $0x10] sm:$0xf]  ;;  %v3337_v41 = vmul.f32 %v7611_v12, %v7575_v52  ;;  %v3450_v12 = vrot.slane %v7531_v18, 2 }
 0x2eb   :  { %6598 = vpow2.f32 %v742_v14  ;;  %v738_v56 = vsub.f32 0.0, %v7696_v48  ;;  %3356 = vst.msk [vmem:[#allocation2 + $0x10] sm:$0xf] %vm610_vm1, %v3348_v43  ;;  %3353 = vst.msk [vmem:[#allocation2 + $0x4] sm:$0xf] %vm610_vm1, %v3345_v50  ;;  %v3412_v14 = vmul.f32 %v3387_v39, %v7601_v2 }
 0x2ec   :  { %v754_v42 = vmul.f32 1.442695, %v740_v27  ;;  %725 = vst.msk [vmem:[#allocation2 + $0x1d] sm:$0x7] %vm717_vm4, %v716_v24  ;;  %v744_v15 = vmul.f32 1.442695, %v735_v4  ;;  %v3460_v27 = vmul.f32 %v3444_v1, %v7692_v11  ;;  %v3351_v47 = vadd.f32 %v7626_v37, %v3337_v41 }
 0x2ed   :  { %v3362_v19 = vld [vmem:[#allocation2 + $0x8] sm:$0x1]  ;;  %v750_v63 = vmul.f32 1.442695, %v738_v56  ;;  %3355 = vst.msk [vmem:[#allocation2 + $0xc] sm:$0xf] %vm610_vm1, %v3347_v7  ;;  %v3411_v1 = vmul.f32 %v3383_v35, %v7601_v2  ;;  %v3399_v7 = vrot.slane %v7575_v52, %v7517_v10 }
 0x2ee   :  { %v3418_v26 = vadd.f32 %v3410_v6, %v3362_v19  ;;  %v3360_v44 = vld [vmem:[#allocation2] sm:$0x1]  ;;  %6600 = vpow2.f32 %v754_v42  ;;  %v3375_v19 = vrot.slane %v7547_v31, %v7517_v10  ;;  %v748_v45 = vmul.f32 1.442695, %v737_v28 }
 0x2ef   :  { %v3416_v36 = vadd.f32 %v3408_v33, %v3360_v44  ;;  %v3349_v33 = vadd.f32 %v7626_v37, %v3335_v3  ;;  %v3391_v37 = vrot.slane %v7568_v46, %v7517_v10 }
 0x2f0   :  { %3426 = vst.msk [vmem:[#allocation2 + $0x8] sm:$0x1] %vm643_vm2, %v3418_v26  ;;  %v7730_v26 = vrot.slane %v7601_v2, %v7579_v55  ;;  %v3409_v49 = vmul.f32 %v3375_v19, %v7601_v2  ;;  %v3445_v19 = vrot.slane %v7547_v31, 2 }
 0x2f1   :  { %3424 = vst.msk [vmem:[#allocation2] sm:$0x1] %vm643_vm2, %v3416_v36  ;;  %v3366_v40 = vld [vmem:[#allocation2 + $0x18] sm:$0x1]  ;;  %v7741_v36 = vld [vmem:[#allocation2 + $0x14] sm:$0xf] }
 0x2f2   :  { %v3422_v54 = vadd.f32 %v3414_v51, %v3366_v40  ;;  %v3364_v30 = vld [vmem:[#allocation2 + $0x10] sm:$0x1]  ;;  %v739_v56 = vsub.f32 0.0, %v7741_v36  ;;  %3357 = vst.msk [vmem:[#allocation2 + $0x14] sm:$0xf] %vm610_vm1, %v3349_v33  ;;  %v3514_v24 = vmul.f32 %v3498_v32, %v7730_v26  ;;  %v3496_v40 = vrot.slane %v7529_v16, 1 }
 0x2f3   :  { %v3420_v42 = vadd.f32 %v3412_v14, %v3364_v30  ;;  %v3361_v50 = vld [vmem:[#allocation2 + $0x4] sm:$0x1]  ;;  %v7753_v51 = vld [vmem:[#allocation2 + $0x1c] sm:$0xf]  ;;  %v3502_v30 = vrot.slane %v7531_v18, 1 }
 0x2f4   :  { %v6597_v59 = vpop.eup %6596  ;;  %3430 = vst.msk [vmem:[#allocation2 + $0x18] sm:$0x1] %vm643_vm2, %v3422_v54  ;;  %v3417_v61 = vadd.f32 %v3409_v49, %v3361_v50  ;;  %v752_v39 = vmul.f32 1.442695, %v739_v56  ;;  %v3363_v4 = vld [vmem:[#allocation2 + $0xc] sm:$0x1]  ;;  %v3512_v28 = vmul.f32 %v3496_v40, %v7730_v26 }
 0x2f5   :  { %v760_v62 = vadd.f32 1.0, %v6597_v59  ;;  %v6599_v6 = vpop.eup %6598  ;;  %3428 = vst.msk [vmem:[#allocation2 + $0x10] sm:$0x1] %vm643_vm2, %v3420_v42  ;;  %v3466_v59 = vmul.f32 %v3450_v12, %v7692_v11  ;;  %v3413_v12 = vmul.f32 %v3391_v37, %v7601_v2  ;;  %v3447_v56 = vrot.slane %v7555_v38, 2 }
 0x2f6   :  { %v758_v17 = vadd.f32 1.0, %v6599_v6  ;;  %3359 = vst.msk [vmem:[#allocation2 + $0x1c] sm:$0xf] %vm610_vm1, %v3351_v47  ;;  %v3449_v40 = vrot.slane %v7568_v46, 2 }
 0x2f7   :  { %6602 = vrcp.f32 %v760_v62  ;;  %v3434_v5 = vld [vmem:[#allocation2 + $0x8] sm:$0x3]  ;;  %v741_v62 = vsub.f32 0.0, %v7753_v51  ;;  %3425 = vst.msk [vmem:[#allocation2 + $0x4] sm:$0x1] %vm643_vm2, %v3417_v61  ;;  %v3518_v61 = vmul.f32 %v3502_v30, %v7730_v26 }
 0x2f8   :  { %v3470_v8 = vadd.f32 %v3462_v0, %v3434_v5  ;;  %6604 = vpow2.f32 %v750_v63  ;;  %v3432_v34 = vld [vmem:[#allocation2] sm:$0x3]  ;;  %v6601_v43 = vpop.eup %6600  ;;  %v7759_v0 = vld [vmem:[#allocation8] ss:$0 sm:$0xff] }
 0x2f9   :  { %6606 = vpow2.f32 %v744_v15  ;;  %v3468_v44 = vadd.f32 %v3460_v27, %v3432_v34  ;;  %v764_v58 = vadd.f32 1.0, %v6601_v43  ;;  %v756_v6 = vmul.f32 1.442695, %v741_v62 }
 0x2fa   :  { %3478 = vst.msk [vmem:[#allocation2 + $0x8] sm:$0x3] %vm680_vm3, %v3470_v8  ;;  %6608 = vrcp.f32 %v758_v17  ;;  %v3464_v8 = vmul.f32 %v3448_v60, %v7692_v11  ;;  %v3419_v15 = vadd.f32 %v3411_v1, %v3363_v4  ;;  %v3461_v60 = vmul.f32 %v3445_v19, %v7692_v11 }
 0x2fb   :  { %3476 = vst.msk [vmem:[#allocation2] sm:$0x3] %vm680_vm3, %v3468_v44  ;;  %6610 = vpow2.f32 %v748_v45  ;;  %v3438_v63 = vld [vmem:[#allocation2 + $0x18] sm:$0x3]  ;;  %v3415_v45 = vmul.f32 %v3399_v7, %v7601_v2  ;;  %v3500_v2 = vrot.slane %v7535_v20, 1  ;;  %v3451_v7 = vrot.slane %v7575_v52, 2 }
 0x2fc   :  { %6612 = vrcp.f32 %v764_v58  ;;  %v3474_v54 = vadd.f32 %v3466_v59, %v3438_v63  ;;  %3427 = vst.msk [vmem:[#allocation2 + $0xc] sm:$0x1] %vm643_vm2, %v3419_v15  ;;  %v3436_v33 = vld [vmem:[#allocation2 + $0x10] sm:$0x3] }
 0x2fd   :  { %6614 = vpow2.f32 %v752_v39  ;;  %v3472_v44 = vadd.f32 %v3464_v8, %v3436_v33  ;;  %v3367_v58 = vld [vmem:[#allocation2 + $0x1c] sm:$0x1]  ;;  %v3516_v19 = vmul.f32 %v3500_v2, %v7730_v26 }
 0x2fe   :  { %3482 = vst.msk [vmem:[#allocation2 + $0x18] sm:$0x3] %vm680_vm3, %v3474_v54  ;;  %6616 = vpow2.f32 %v756_v6  ;;  %v3423_v50 = vadd.f32 %v3415_v45, %v3367_v58  ;;  %v3433_v39 = vld [vmem:[#allocation2 + $0x4] sm:$0x3]  ;;  %v3463_v54 = vmul.f32 %v3447_v56, %v7692_v11 }
 0x2ff   :  { %3480 = vst.msk [vmem:[#allocation2 + $0x10] sm:$0x3] %vm680_vm3, %v3472_v44  ;;  %v3469_v63 = vadd.f32 %v3461_v60, %v3433_v39  ;;  %v3499_v44 = vrot.slane %v7555_v38, 1  ;;  %v3501_v38 = vrot.slane %v7568_v46, 1 }
 0x300   :  { %3431 = vst.msk [vmem:[#allocation2 + $0x1c] sm:$0x1] %vm643_vm2, %v3423_v50 }
 0x301   :  { %v6603_v3 = vpop.eup %6602  ;;  %v3486_v5 = vld [vmem:[#allocation2 + $0x8] sm:$0x7]  ;;  %3477 = vst.msk [vmem:[#allocation2 + $0x4] sm:$0x3] %vm680_vm3, %v3469_v63 }
 0x302   :  { %v6605_v41 = vpop.eup %6604  ;;  %v7767_v14 = vmul.f32 %v6603_v3, %v7642_v57  ;;  %v3522_v17 = vadd.f32 %v3514_v24, %v3486_v5  ;;  %v3365_v57 = vld [vmem:[#allocation2 + $0x14] sm:$0x1]  ;;  %v3484_v42 = vld [vmem:[#allocation2] sm:$0x7] }
 0x303   :  { %v762_v27 = vadd.f32 1.0, %v6605_v41  ;;  %v6607_v34 = vpop.eup %6606  ;;  %v3421_v43 = vadd.f32 %v3413_v12, %v3365_v57  ;;  %v3520_v49 = vadd.f32 %v3512_v28, %v3484_v42  ;;  %v3435_v6 = vld [vmem:[#allocation2 + $0xc] sm:$0x3]  ;;  %v3467_v42 = vmul.f32 %v3451_v7, %v7692_v11 }
 0x304   :  { %v7776_v32 = vmul.f32 %v7759_v0, %v7767_v14  ;;  %3530 = vst.msk [vmem:[#allocation2 + $0x8] sm:$0x7] %vm717_vm4, %v3522_v17  ;;  %v6609_v35 = vpop.eup %6608  ;;  %v759_v47 = vadd.f32 1.0, %v6607_v34  ;;  %v3471_v41 = vadd.f32 %v3463_v54, %v3435_v6 }
 0x305   :  { %6618 = vrcp.f32 %v762_v27  ;;  %v7783_v59 = vmul.f32 %v6609_v35, %v7657_v25  ;;  %3429 = vst.msk [vmem:[#allocation2 + $0x14] sm:$0x1] %vm643_vm2, %v3421_v43  ;;  %v6611_v37 = vpop.eup %6610  ;;  %v3490_v1 = vld [vmem:[#allocation2 + $0x18] sm:$0x7]  ;;  %v3465_v27 = vmul.f32 %v3449_v40, %v7692_v11 }
 0x306   :  { %11182 = vst [vmem:[#allocation22_spill] sm:$0xff] %v7776_v32  ;;  %6620 = vrcp.f32 %v759_v47  ;;  %3528 = vst.msk [vmem:[#allocation2] sm:$0x7] %vm717_vm4, %v3520_v49  ;;  %v6613_v62 = vpop.eup %6612  ;;  %v761_v24 = vadd.f32 1.0, %v6611_v37  ;;  %v3526_v4 = vadd.f32 %v3518_v61, %v3490_v1  ;;  %v3488_v28 = vld [vmem:[#allocation2 + $0x10] sm:$0x7]  ;;  %v3515_v61 = vmul.f32 %v3499_v44, %v7730_v26 }
 0x307   :  { %v7793_v25 = vmul.f32 %v7759_v0, %v7783_v59  ;;  %v7799_v3 = vmul.f32 %v6613_v62, %v7674_v21  ;;  %v6615_v5 = vpop.eup %6614  ;;  %v3497_v21 = vrot.slane %v7547_v31, 1  ;;  %3479 = vst.msk [vmem:[#allocation2 + $0xc] sm:$0x3] %vm680_vm3, %v3471_v41  ;;  %v3524_v34 = vadd.f32 %v3516_v19, %v3488_v28  ;;  %v3439_v45 = vld [vmem:[#allocation2 + $0x1c] sm:$0x3] }
 0x308   :  { %6622 = vrcp.f32 %v761_v24  ;;  %v763_v8 = vadd.f32 1.0, %v6615_v5  ;;  %3534 = vst.msk [vmem:[#allocation2 + $0x18] sm:$0x7] %vm717_vm4, %v3526_v4  ;;  %v6617_v17 = vpop.eup %6616  ;;  %v3475_v47 = vadd.f32 %v3467_v42, %v3439_v45  ;;  %v3485_v56 = vld [vmem:[#allocation2 + $0x4] sm:$0x7]  ;;  %v3503_v62 = vrot.slane %v7575_v52, 1 }
 0x309   :  { %11183 = vst [vmem:[#allocation23_spill] sm:$0xff] %v7793_v25  ;;  %v7805_v15 = vmul.f32 %v7759_v0, %v7799_v3  ;;  %v765_v30 = vadd.f32 1.0, %v6617_v17  ;;  %v3513_v35 = vmul.f32 %v3497_v21, %v7730_v26  ;;  %3532 = vst.msk [vmem:[#allocation2 + $0x10] sm:$0x7] %vm717_vm4, %v3524_v34  ;;  %v3603_v24 = vld [vmem:[%s11061_s13 + $0x18] sm:$0xff]  ;;  %v3517_v4 = vmul.f32 %v3501_v38, %v7730_v26 }
 0x30a   :  { %6624 = vrcp.f32 %v763_v8  ;;  %3483 = vst.msk [vmem:[#allocation2 + $0x1c] sm:$0x3] %vm680_vm3, %v3475_v47 }
 0x30b   :  { %11184 = vst [vmem:[#allocation24_spill] sm:$0xff] %v7805_v15  ;;  %6626 = vrcp.f32 %v765_v30  ;;  %v7824_v60 = vld [vmem:[#allocation2 + $0x8] sm:$0xf]  ;;  %v3521_v50 = vadd.f32 %v3513_v35, %v3485_v56 }
 0x30c   :  { %v3437_v12 = vld [vmem:[#allocation2 + $0x14] sm:$0x3]  ;;  %v3546_v40 = vsub.f32 0.0, %v7824_v60 }
 0x30d   :  { %v3473_v33 = vadd.f32 %v3465_v27, %v3437_v12  ;;  %v7813_v43 = vld [vmem:[#allocation2] sm:$0xf]  ;;  %3529 = vst.msk [vmem:[#allocation2 + $0x4] sm:$0x7] %vm717_vm4, %v3521_v50 }
 0x30e   :  { %v3544_v11 = vsub.f32 0.0, %v7813_v43  ;;  %v3487_v46 = vld [vmem:[#allocation2 + $0xc] sm:$0x7]  ;;  %v3556_v12 = vmul.f32 1.442695, %v3546_v40 }
 0x30f   :  { %v6619_v57 = vpop.eup %6618  ;;  %3481 = vst.msk [vmem:[#allocation2 + $0x14] sm:$0x3] %vm680_vm3, %v3473_v33  ;;  %v7831_v37 = vld [vmem:[#allocation2 + $0x18] sm:$0xf]  ;;  %v3523_v52 = vadd.f32 %v3515_v61, %v3487_v46 }
 0x310   :  { %v786_v31 = vmul.f32 %v6619_v57, %v7696_v48  ;;  %v6621_v49 = vpop.eup %6620  ;;  %v3550_v2 = vsub.f32 0.0, %v7831_v37  ;;  %v3552_v54 = vmul.f32 1.442695, %v3544_v11  ;;  %v7859_v8 = vld [vmem:[#allocation2 + $0x10] sm:$0xf] }
 0x311   :  { %v7828_v48 = vmul.f32 %v6621_v49, %v7712_v53  ;;  %v3602_v53 = vld [vmem:[%s11061_s13 + $0x10] sm:$0xff]  ;;  %3531 = vst.msk [vmem:[#allocation2 + $0xc] sm:$0x7] %vm717_vm4, %v3523_v52  ;;  %v3548_v19 = vsub.f32 0.0, %v7859_v8 }
 0x312   :  { %v7821_v58 = vmul.f32 %v7759_v0, %v786_v31  ;;  %v6623_v39 = vpop.eup %6622  ;;  %v6558_v41 = vpack.c.bf16 %v3603_v24, %v3602_v53 }
 0x313   :  { %v7838_v63 = vcombine.low %v7783_v59, %v7828_v48  ;;  %v7849_v1 = vmul.f32 %v6623_v39, %v7726_v23  ;;  %v3564_v59 = vmul.f32 1.442695, %v3550_v2  ;;  %v3519_v23 = vmul.f32 %v3503_v62, %v7730_v26 }
 0x314   :  { %11185 = vst [vmem:[#allocation25_spill] sm:$0xff] %v7821_v58  ;;  %v6625_v5 = vpop.eup %6624  ;;  %v3537_v57 = vld [vmem:[#allocation2 + $0x4] sm:$0xf]  ;;  %v3560_v33 = vmul.f32 1.442695, %v3548_v19 }
 0x315   :  { %6488 = vmatprep.mubr.msk.f32.mxu1 %vm183_vm0, %v7838_v63  ;;  %v7856_v6 = vcombine.low %v7767_v14, %v7849_v1  ;;  %6628 = vpow2.f32 %v3564_v59  ;;  %v787_v17 = vmul.f32 %v6625_v5, %v7741_v36  ;;  %v6627_v27 = vpop.eup %6626  ;;  %v3491_v14 = vld [vmem:[#allocation2 + $0x1c] sm:$0x7]  ;;  %v3545_v44 = vsub.f32 0.0, %v3537_v57 }
 0x316   :  { %v3489_v7 = vld [vmem:[#allocation2 + $0x14] sm:$0x7]  ;;  %6630 = vpow2.f32 %v3552_v54  ;;  %v789_v26 = vmul.f32 %v6627_v27, %v7753_v51  ;;  %v3527_v36 = vadd.f32 %v3519_v23, %v3491_v14  ;;  %v7886_v5 = vld [vmem:[#allocation15] ss:$0 sm:$0xff] }
 0x317   :  { %v3525_v21 = vadd.f32 %v3517_v4, %v3489_v7  ;;  %6489 = vmatmul.mubr.msk.f32.vlgmr.msra.gmra.mrb[0].mxu1 %vm183_vm0, %v7856_v6  ;;  %v7866_v28 = vcombine.low %v786_v31, %v787_v17  ;;  %v7869_v30 = vmul.f32 %v7759_v0, %v787_v17  ;;  %6632 = vpow2.f32 %v3556_v12 }
 0x318   :  { %6557 = vmatpush3.bf16.msra.mxu1 %v7513_v9  ;;  %v7877_v34 = vcombine.low %v7799_v3, %v789_v26  ;;  %v7880_v42 = vmul.f32 %v7759_v0, %v789_v26  ;;  %3535 = vst.msk [vmem:[#allocation2 + $0x1c] sm:$0x7] %vm717_vm4, %v3527_v36  ;;  %v3554_v9 = vmul.f32 1.442695, %v3545_v44  ;;  %v3539_v51 = vld [vmem:[#allocation2 + $0xc] sm:$0xf]  ;;  %6634 = vpow2.f32 %v3560_v33 }
 0x319   :  { %11186 = vst [vmem:[#allocation26_spill] sm:$0xff] %v7866_v28  ;;  %11187 = vst [vmem:[#allocation27_spill] sm:$0xff] %v7869_v30  ;;  %6559 = vmatprep.subr.bf16.mxu1 %v6558_v41  ;;  %6491 = vmatprep.mubr.msk.f32.mxu1 %vm183_vm0, %v7866_v28  ;;  %v3547_v31 = vsub.f32 0.0, %v3539_v51 }
 0x31a   :  { %3533 = vst.msk [vmem:[#allocation2 + $0x14] sm:$0x7] %vm717_vm4, %v3525_v21  ;;  %11188 = vst [vmem:[#allocation28_spill] sm:$0xff] %v7877_v34  ;;  %6636 = vpow2.f32 %v3554_v9 }
 0x31b   :  { %11189 = vst [vmem:[#allocation29_spill] sm:$0xff] %v7880_v42  ;;  %6492 = vmatmul.mubr.msk.f32.gmra.mrb[2].mxu1 %vm183_vm0, %v7877_v34  ;;  %v3558_v35 = vmul.f32 1.442695, %v3547_v31 }
 0x31c   :  { %6561 = vmatpush3.bf16.msra.mxu1 %v6558_v41 }
 0x31d   :  { %6638 = vpow2.f32 %v3558_v35 }
 0x31f   :  { %v6629_v45 = vpop.eup %6628  ;;  %v3543_v56 = vld [vmem:[#allocation2 + $0x1c] sm:$0xf] }
 0x320   :  { %v3574_v49 = vadd.f32 1.0, %v6629_v45  ;;  %v6631_v0 = vpop.eup %6630  ;;  %v3551_v38 = vsub.f32 0.0, %v3543_v56 }
 0x321   :  { %v3541_v3 = vld [vmem:[#allocation2 + $0x14] sm:$0xf]  ;;  %v3568_v50 = vadd.f32 1.0, %v6631_v0  ;;  %v6633_v2 = vpop.eup %6632  ;;  %v3709_v0 = vld [vmem:[%s11062_s14] sm:$0x3] }
 0x322   :  { %v3549_v47 = vsub.f32 0.0, %v3541_v3  ;;  %6640 = vrcp.f32 %v3574_v49  ;;  %v3566_v61 = vmul.f32 1.442695, %v3551_v38  ;;  %v6635_v39 = vpop.eup %6634  ;;  %v3570_v53 = vadd.f32 1.0, %v6633_v2 }
 0x323   :  { %v3572_v62 = vadd.f32 1.0, %v6635_v39 }
 0x324   :  { %v3562_v11 = vmul.f32 1.442695, %v3549_v47  ;;  %v6637_v46 = vpop.eup %6636 }
 0x325   :  { %v3569_v24 = vadd.f32 1.0, %v6637_v46 }
 0x326   :  { %6642 = vpow2.f32 %v3562_v11 }
 0x327   :  { %6644 = vpow2.f32 %v3566_v61  ;;  %v6639_v40 = vpop.eup %6638 }
 0x328   :  { %6646 = vrcp.f32 %v3568_v50  ;;  %v3571_v54 = vadd.f32 1.0, %v6639_v40  ;;  %v7974_v40 = vsub.s32 5, %v7405_v22 }
 0x329   :  { %6648 = vrcp.f32 %v3572_v62 }
 0x32a   :  { %6650 = vrcp.f32 %v3569_v24 }
 0x32b   :  { %6652 = vrcp.f32 %v3570_v53  ;;  %v7969_v53 = vsub.s32 4, %v7405_v22 }
 0x32c   :  { %v6641_v52 = vpop.eup %6640  ;;  %6654 = vrcp.f32 %v3571_v54  ;;  %v7979_v54 = vsub.s32 6, %v7405_v22 }
 0x32d   :  { %v3598_v59 = vmul.f32 %v6641_v52, %v7831_v37 }
 0x32f   :  { %v7889_v41 = vmul.f32 %v7886_v5, %v3598_v59 }
 0x330   :  { %v6643_v4 = vpop.eup %6642 }
 0x331   :  { %v3573_v7 = vadd.f32 1.0, %v6643_v4  ;;  %11190 = vst [vmem:[#allocation30_spill] sm:$0xff] %v7889_v41  ;;  %v6645_v23 = vpop.eup %6644  ;;  %v7984_v4 = vsub.s32 7, %v7405_v22 }
 0x332   :  { %v3575_v17 = vadd.f32 1.0, %v6645_v23  ;;  %v6647_v21 = vpop.eup %6646 }
 0x333   :  { %6656 = vrcp.f32 %v3573_v7  ;;  %v6649_v19 = vpop.eup %6648  ;;  %v7893_v37 = vmul.f32 %v6647_v21, %v7813_v43 }
 0x334   :  { %6658 = vrcp.f32 %v3575_v17  ;;  %v3596_v27 = vmul.f32 %v6649_v19, %v7859_v8  ;;  %v6651_v14 = vpop.eup %6650 }
 0x335   :  { %v6653_v12 = vpop.eup %6652  ;;  %v7895_v26 = vmul.f32 %v6651_v14, %v3537_v57 }
 0x336   :  { %v7898_v36 = vmul.f32 %v7886_v5, %v3596_v27  ;;  %v6655_v33 = vpop.eup %6654  ;;  %v7905_v9 = vmul.f32 %v6653_v12, %v7824_v60 }
 0x337   :  { %v7902_v44 = vcombine.low %v7893_v37, %v7895_v26  ;;  %v7907_v31 = vmul.f32 %v6655_v33, %v3539_v51 }
 0x338   :  { %11191 = vst [vmem:[#allocation31_spill] sm:$0xff] %v7898_v36 }
 0x339   :  { %11192 = vst [vmem:[#allocation32_spill] sm:$0xff] %v7902_v44  ;;  %6510 = vmatprep.mubr.msk.f32.mxu1 %vm183_vm0, %v7902_v44  ;;  %v7913_v8 = vcombine.low %v7905_v9, %v7907_v31 }
 0x33b   :  { %11193 = vst [vmem:[#allocation33_spill] sm:$0xff] %v7913_v8  ;;  %6511 = vmatmul.mubr.msk.f32.vlgmr.msra.gmra.mrb[4].mxu1 %vm183_vm0, %v7913_v8 }
 0x33d   :  { %v6657_v43 = vpop.eup %6656 }
 0x33e   :  { %v3597_v57 = vmul.f32 %v6657_v43, %v3541_v3  ;;  %v6659_v45 = vpop.eup %6658  ;;  %v899_v3 = vld [vmem:[%s11055_s7] sm:$0x3] }
 0x33f   :  { %v3599_v51 = vmul.f32 %v6659_v45, %v3543_v56  ;;  %6494 = vmatprep.subr.msk.mxu0 %vm920_vm5, %v899_v3  ;;  %v7941_v56 = vsub.s32 0, %v7405_v22 }
 0x340   :  { %v7917_v35 = vcombine.low %v3596_v27, %v3597_v57  ;;  %v7920_v60 = vmul.f32 %v7886_v5, %v3597_v57  ;;  %6495 = vmatpush3.msk.msra.mxu0 %vm920_vm5, %v899_v3 }
 0x341   :  { %v7924_v47 = vcombine.low %v3598_v59, %v3599_v51  ;;  %v7927_v49 = vmul.f32 %v7886_v5, %v3599_v51  ;;  %6516 = vmatprep.subr.msk.mxu0 %vm920_vm5, %v3709_v0 }
 0x342   :  { %11194 = vst [vmem:[#allocation34_spill] sm:$0xff] %v7917_v35  ;;  %11195 = vst [vmem:[#allocation35_spill] sm:$0xff] %v7920_v60  ;;  %6513 = vmatprep.mubr.msk.f32.mxu1 %vm183_vm0, %v7917_v35 }
 0x343   :  { %11196 = vst [vmem:[#allocation36_spill] sm:$0xff] %v7924_v47  ;;  %11197 = vst [vmem:[#allocation37_spill] sm:$0xff] %v7927_v49  ;;  %6514 = vmatmul.mubr.msk.f32.gmra.mrb[6].mxu1 %vm183_vm0, %v7924_v47 }
 0x3ea   :  { %v7943_v11 = vpop.f32.mrb[0].mxu1 }
 0x3eb   :  { %v7945_v38 = vpop.f32.mrb[1].mxu1  ;;  %v1736_v50 = vrot.slane %v7943_v11, %v7941_v56  ;;  %v1748_v2 = vrot.slane %v7943_v11, %v7542_v29  ;;  %v1760_v62 = vrot.slane %v7943_v11, %v7579_v55  ;;  %v1772_v46 = vrot.slane %v7943_v11, %v7517_v10 }
 0x3ec   :  { %6496 = vmatprep.mubr.msk.f32.mxu0 %vm907_vm6, %v7945_v38  ;;  %v1784_v24 = vrot.slane %v7943_v11, %v7969_v53  ;;  %v1796_v52 = vrot.slane %v7943_v11, %v7974_v40  ;;  %v1808_v59 = vrot.slane %v7943_v11, %v7979_v54  ;;  %v1820_v7 = vrot.slane %v7943_v11, %v7984_v4 }
 0x3ed   :  { %1743 = vbcast.lane.b32.xlu1 %v1736_v50, 266  ;;  %1739 = vbcast.lane.b32.xlu0 %v1736_v50, 258  ;;  %v1640_v27 = vrot.slane %v7945_v38, %v7941_v56  ;;  %v1652_v14 = vrot.slane %v7945_v38, %v7542_v29  ;;  %v1664_v12 = vrot.slane %v7945_v38, %v7579_v55 }
 0x3ee   :  { %6497 = vmatmul.mubr.msk.f32.vlgmr.msra.gmra.mrb[4].mxu0 %vm907_vm6, %v7943_v11  ;;  %v7953_v61 = vpop.f32.mrb[2].mxu1  ;;  %v1676_v33 = vrot.slane %v7945_v38, %v7517_v10  ;;  %v1688_v43 = vrot.slane %v7945_v38, %v7969_v53  ;;  %v1700_v57 = vrot.slane %v7945_v38, %v7974_v40  ;;  %v1712_v45 = vrot.slane %v7945_v38, %v7979_v54 }
 0x3ef   :  { %6517 = vmatpush3.msk.msra.mxu0 %vm920_vm5, %v3709_v0  ;;  %v7958_v39 = vpop.f32.mrb[3].mxu1  ;;  %v1724_v51 = vrot.slane %v7945_v38, %v7984_v4  ;;  %v1070_v3 = vcombine.high %v7943_v11, %v7943_v11  ;;  %v1988_v60 = vrot.slane %v7953_v61, %v7974_v40  ;;  %v2000_v30 = vrot.slane %v7953_v61, %v7979_v54 }
 0x3f0   :  { %6499 = vmatprep.mubr.msk.f32.mxu0 %vm907_vm6, %v7958_v39  ;;  %v2012_v32 = vrot.slane %v7953_v61, %v7984_v4 }
 0x3f1   :  { %1755 = vbcast.lane.b32.xlu1 %v1748_v2, 266  ;;  %1751 = vbcast.lane.b32.xlu0 %v1748_v2, 258  ;;  %v2516_v0 = vrot.slane %v1070_v3, %v7941_v56 }
 0x3f2   :  { %6500 = vmatmul.mubr.msk.f32.gmra.mrb[6].mxu0 %vm907_vm6, %v7953_v61 }
 0x3f5   :  { %1767 = vbcast.lane.b32.xlu1 %v1760_v62, 266  ;;  %1763 = vbcast.lane.b32.xlu0 %v1760_v62, 258 }
 0x3f9   :  { %1779 = vbcast.lane.b32.xlu1 %v1772_v46, 266  ;;  %1775 = vbcast.lane.b32.xlu0 %v1772_v46, 258 }
 0x3fd   :  { %1791 = vbcast.lane.b32.xlu1 %v1784_v24, 266  ;;  %1787 = vbcast.lane.b32.xlu0 %v1784_v24, 258 }
 0x401   :  { %1803 = vbcast.lane.b32.xlu1 %v1796_v52, 266  ;;  %1799 = vbcast.lane.b32.xlu0 %v1796_v52, 258 }
 0x405   :  { %1815 = vbcast.lane.b32.xlu1 %v1808_v59, 266  ;;  %1811 = vbcast.lane.b32.xlu0 %v1808_v59, 258 }
 0x409   :  { %1827 = vbcast.lane.b32.xlu1 %v1820_v7, 266  ;;  %1823 = vbcast.lane.b32.xlu0 %v1820_v7, 258 }
 0x40d   :  { %2511 = vbcast.lane.b32.xlu1 %v1736_v50, 282  ;;  %2507 = vbcast.lane.b32.xlu0 %v1736_v50, 274  ;;  %v2724_v50 = vrot.slane %v1070_v3, %v7542_v29 }
 0x40e   :  { %v7988_v23 = vpop.f32.mrb[4].mxu1 }
 0x40f   :  { %v7990_v17 = vpop.f32.mrb[5].mxu1 }
 0x410   :  { %6518 = vmatprep.mubr.msk.f32.mxu0 %vm907_vm6, %v7990_v17 }
 0x411   :  { %2719 = vbcast.lane.b32.xlu1 %v1748_v2, 282  ;;  %2715 = vbcast.lane.b32.xlu0 %v1748_v2, 274  ;;  %v2932_v2 = vrot.slane %v1070_v3, %v7579_v55 }
 0x412   :  { %6519 = vmatmul.mubr.msk.f32.vlgmr.msra.gmra.mrb[8].mxu0 %vm907_vm6, %v7988_v23 }
 0x415   :  { %2923 = vbcast.lane.b32.xlu1 %v1760_v62, 274  ;;  %2927 = vbcast.lane.b32.xlu0 %v1760_v62, 282  ;;  %v3140_v62 = vrot.slane %v1070_v3, %v7517_v10 }
 0x416   :  { %v7996_v21 = vpop.f32.mrb[6].mxu1 }
 0x417   :  { %v7998_v19 = vpop.f32.mrb[7].mxu1 }
 0x418   :  { %6521 = vmatprep.mubr.msk.f32.mxu0 %vm907_vm6, %v7998_v19 }
 0x419   :  { %6522 = vmatmul.mubr.msk.f32.gmra.mrb[10].mxu0 %vm907_vm6, %v7996_v21  ;;  %3131 = vbcast.lane.b32.xlu1 %v1772_v46, 274 }
 0x41a   :  { %3135 = vbcast.lane.b32.xlu0 %v1772_v46, 282  ;;  %v1069_v46 = vcombine.high %v7945_v38, %v7945_v38 }
 0x41c   :  { %v2496_v11 = vrot.slane %v1069_v46, %v7941_v56  ;;  %v2704_v24 = vrot.slane %v1069_v46, %v7542_v29  ;;  %v2912_v7 = vrot.slane %v1069_v46, %v7579_v55 }
 0x41d   :  { %1647 = vbcast.lane.b32.xlu1 %v1640_v27, 266 }
 0x41e   :  { %1643 = vbcast.lane.b32.xlu0 %v1640_v27, 258 }
 0x421   :  { %1655 = vbcast.lane.b32.xlu1 %v1652_v14, 258 }
 0x422   :  { %1667 = vbcast.lane.b32.xlu0 %v1664_v12, 258 }
 0x425   :  { %1659 = vbcast.lane.b32.xlu1 %v1652_v14, 266 }
 0x426   :  { %1679 = vbcast.lane.b32.xlu0 %v1676_v33, 258 }
 0x429   :  { %1671 = vbcast.lane.b32.xlu1 %v1664_v12, 266 }
 0x42a   :  { %1691 = vbcast.lane.b32.xlu0 %v1688_v43, 258 }
 0x42d   :  { %1683 = vbcast.lane.b32.xlu1 %v1676_v33, 266 }
 0x42e   :  { %1703 = vbcast.lane.b32.xlu0 %v1700_v57, 258 }
 0x431   :  { %1695 = vbcast.lane.b32.xlu1 %v1688_v43, 266  ;;  %v1928_v43 = vrot.slane %v7953_v61, %v7941_v56 }
 0x432   :  { %1715 = vbcast.lane.b32.xlu0 %v1712_v45, 258 }
 0x435   :  { %1707 = vbcast.lane.b32.xlu1 %v1700_v57, 266 }
 0x436   :  { %1727 = vbcast.lane.b32.xlu0 %v1724_v51, 258 }
 0x439   :  { %1719 = vbcast.lane.b32.xlu1 %v1712_v45, 266 }
 0x43a   :  { %2487 = vbcast.lane.b32.xlu0 %v1640_v27, 274 }
 0x43d   :  { %1731 = vbcast.lane.b32.xlu1 %v1724_v51, 266  ;;  %v1940_v51 = vrot.slane %v7953_v61, %v7542_v29 }
 0x43e   :  { %2695 = vbcast.lane.b32.xlu0 %v1652_v14, 274 }
 0x441   :  { %2491 = vbcast.lane.b32.xlu1 %v1640_v27, 282 }
 0x442   :  { %2907 = vbcast.lane.b32.xlu0 %v1664_v12, 282 }
 0x445   :  { %2699 = vbcast.lane.b32.xlu1 %v1652_v14, 282  ;;  %v3120_v14 = vrot.slane %v1069_v46, %v7517_v10  ;;  %v1964_v46 = vrot.slane %v7953_v61, %v7517_v10 }
 0x446   :  { %3115 = vbcast.lane.b32.xlu0 %v1676_v33, 282 }
 0x449   :  { %2903 = vbcast.lane.b32.xlu1 %v1664_v12, 274 }
 0x44a   :  { %2519 = vbcast.lane.b32.xlu0 %v2516_v0, 274 }
 0x44d   :  { %3111 = vbcast.lane.b32.xlu1 %v1676_v33, 274 }
 0x44e   :  { %2727 = vbcast.lane.b32.xlu0 %v2724_v50, 274 }
 0x451   :  { %2523 = vbcast.lane.b32.xlu1 %v2516_v0, 282 }
 0x452   :  { %2939 = vbcast.lane.b32.xlu0 %v2932_v2, 282 }
 0x455   :  { %2731 = vbcast.lane.b32.xlu1 %v2724_v50, 282  ;;  %v1952_v50 = vrot.slane %v7953_v61, %v7579_v55 }
 0x456   :  { %3147 = vbcast.lane.b32.xlu0 %v3140_v62, 282 }
 0x459   :  { %2935 = vbcast.lane.b32.xlu1 %v2932_v2, 274 }
 0x45a   :  { %2499 = vbcast.lane.b32.xlu0 %v2496_v11, 274 }
 0x45d   :  { %3143 = vbcast.lane.b32.xlu1 %v3140_v62, 274 }
 0x45e   :  { %2707 = vbcast.lane.b32.xlu0 %v2704_v24, 274 }
 0x45f   :  { %v8030_v52 = vpop.permute.xlu1 %1743  ;;  %v8032_v59 = vpop.permute.xlu0 %1739 }
 0x461   :  { %2503 = vbcast.lane.b32.xlu1 %v2496_v11, 282 }
 0x462   :  { %2919 = vbcast.lane.b32.xlu0 %v2912_v7, 282 }
 0x463   :  { %v8035_v27 = vpop.permute.xlu1 %1755  ;;  %v8037_v38 = vpop.permute.xlu0 %1751 }
 0x465   :  { %2711 = vbcast.lane.b32.xlu1 %v2704_v24, 282 }
 0x466   :  { %3127 = vbcast.lane.b32.xlu0 %v3120_v14, 282 }
 0x467   :  { %v8040_v12 = vpop.permute.xlu1 %1767  ;;  %v8042_v33 = vpop.permute.xlu0 %1763 }
 0x469   :  { %2915 = vbcast.lane.b32.xlu1 %v2912_v7, 274  ;;  %v1976_v7 = vrot.slane %v7953_v61, %v7969_v53 }
 0x46a   :  { %1931 = vbcast.lane.b32.xlu0 %v1928_v43, 258 }
 0x46b   :  { %v8046_v57 = vpop.permute.xlu1 %1779  ;;  %v8048_v45 = vpop.permute.xlu0 %1775 }
 0x46d   :  { %3123 = vbcast.lane.b32.xlu1 %v3120_v14, 274 }
 0x46e   :  { %1943 = vbcast.lane.b32.xlu0 %v1940_v51, 258 }
 0x46f   :  { %v8052_v3 = vpop.permute.xlu1 %1791  ;;  %v8054_v0 = vpop.permute.xlu0 %1787 }
 0x470   :  { %11198 = vst [vmem:[#allocation38_spill] sm:$0xff] %v8052_v3  ;;  %11199 = vst [vmem:[#allocation39_spill] sm:$0xff] %v8054_v0 }
 0x471   :  { %1935 = vbcast.lane.b32.xlu1 %v1928_v43, 266 }
 0x472   :  { %1955 = vbcast.lane.b32.xlu0 %v1952_v50, 258 }
 0x473   :  { %v8058_v2 = vpop.permute.xlu1 %1803  ;;  %v8060_v62 = vpop.permute.xlu0 %1799 }
 0x474   :  { %11200 = vst [vmem:[#allocation40_spill] sm:$0xff] %v8058_v2  ;;  %11201 = vst [vmem:[#allocation41_spill] sm:$0xff] %v8060_v62  ;;  %v545_v2 = vsub.f32 0.0, %v7531_v18 }
 0x475   :  { %1947 = vbcast.lane.b32.xlu1 %v1940_v51, 266 }
 0x476   :  { %1967 = vbcast.lane.b32.xlu0 %v1964_v46, 258 }
 0x477   :  { %v8064_v11 = vpop.permute.xlu1 %1815  ;;  %v8066_v24 = vpop.permute.xlu0 %1811 }
 0x478   :  { %11202 = vst [vmem:[#allocation42_spill] sm:$0xff] %v8064_v11  ;;  %11203 = vst [vmem:[#allocation43_spill] sm:$0xff] %v8066_v24  ;;  %v8119_v24 = vrot.slane %v7958_v39, %v7542_v29  ;;  %v8140_v11 = vrot.slane %v7958_v39, %v7517_v10 }
 0x479   :  { %1959 = vbcast.lane.b32.xlu1 %v1952_v50, 266 }
 0x47a   :  { %1979 = vbcast.lane.b32.xlu0 %v1976_v7, 258 }
 0x47b   :  { %v8070_v14 = vpop.permute.xlu1 %1827  ;;  %v8072_v49 = vpop.permute.xlu0 %1823 }
 0x47c   :  { %11204 = vst [vmem:[#allocation44_spill] sm:$0xff] %v8070_v14  ;;  %11205 = vst [vmem:[#allocation45_spill] sm:$0xff] %v8072_v49 }
 0x47d   :  { %1971 = vbcast.lane.b32.xlu1 %v1964_v46, 266 }
 0x47e   :  { %1991 = vbcast.lane.b32.xlu0 %v1988_v60, 258 }
 0x47f   :  { %v8076_v36 = vpop.permute.xlu1 %2511  ;;  %v8078_v41 = vpop.permute.xlu0 %2507 }
 0x481   :  { %1983 = vbcast.lane.b32.xlu1 %v1976_v7, 266 }
 0x482   :  { %2003 = vbcast.lane.b32.xlu0 %v2000_v30, 258 }
 0x483   :  { %v8082_v25 = vpop.permute.xlu1 %2719  ;;  %v8084_v42 = vpop.permute.xlu0 %2715 }
 0x484   :  { %11206 = vst [vmem:[#allocation46_spill] sm:$0xff] %v8082_v25 }
 0x485   :  { %1995 = vbcast.lane.b32.xlu1 %v1988_v60, 266 }
 0x486   :  { %2015 = vbcast.lane.b32.xlu0 %v2012_v32, 258 }
 0x487   :  { %v8088_v58 = vpop.permute.xlu1 %2923  ;;  %v8090_v15 = vpop.permute.xlu0 %2927 }
 0x488   :  { %11207 = vst [vmem:[#allocation47_spill] sm:$0xff] %v8088_v58  ;;  %11208 = vst [vmem:[#allocation48_spill] sm:$0xff] %v8090_v15 }
 0x489   :  { %2007 = vbcast.lane.b32.xlu1 %v2000_v30, 266 }
 0x48a   :  { %2547 = vbcast.lane.b32.xlu0 %v1928_v43, 274 }
 0x48b   :  { %v8092_v35 = vpop.permute.xlu1 %3131 }
 0x48c   :  { %11209 = vst [vmem:[#allocation49_spill] sm:$0xff] %v8092_v35  ;;  %v8094_v47 = vpop.permute.xlu0 %3135 }
 0x48d   :  { %11210 = vst [vmem:[#allocation50_spill] sm:$0xff] %v8094_v47  ;;  %2019 = vbcast.lane.b32.xlu1 %v2012_v32, 266  ;;  %v8110_v32 = vrot.slane %v7958_v39, %v7941_v56 }
 0x48e   :  { %2755 = vbcast.lane.b32.xlu0 %v1940_v51, 274 }
 0x48f   :  { %v8096_v7 = vpop.permute.xlu1 %1647 }
 0x490   :  { %11211 = vst [vmem:[#allocation51_spill] sm:$0xff] %v8096_v7  ;;  %v8098_v44 = vpop.permute.xlu0 %1643 }
 0x491   :  { %11212 = vst [vmem:[#allocation52_spill] sm:$0xff] %v8098_v44  ;;  %2551 = vbcast.lane.b32.xlu1 %v1928_v43, 282 }
 0x492   :  { %2963 = vbcast.lane.b32.xlu0 %v1952_v50, 274 }
 0x493   :  { %v8100_v60 = vpop.permute.xlu1 %1655 }
 0x494   :  { %11213 = vst [vmem:[#allocation53_spill] sm:$0xff] %v8100_v60  ;;  %v8102_v8 = vpop.permute.xlu0 %1667 }
 0x495   :  { %11214 = vst [vmem:[#allocation54_spill] sm:$0xff] %v8102_v8  ;;  %2759 = vbcast.lane.b32.xlu1 %v1940_v51, 282 }
 0x496   :  { %3171 = vbcast.lane.b32.xlu0 %v1964_v46, 274 }
 0x497   :  { %v8104_v30 = vpop.permute.xlu1 %1659 }
 0x498   :  { %11215 = vst [vmem:[#allocation55_spill] sm:$0xff] %v8104_v30  ;;  %v8106_v49 = vpop.permute.xlu0 %1679 }
 0x499   :  { %11216 = vst [vmem:[#allocation56_spill] sm:$0xff] %v8106_v49  ;;  %2967 = vbcast.lane.b32.xlu1 %v1952_v50, 282  ;;  %v8128_v50 = vrot.slane %v7958_v39, %v7579_v55 }
 0x49a   :  { %1835 = vbcast.lane.b32.xlu0 %v8110_v32, 258 }
 0x49b   :  { %v8113_v14 = vpop.permute.xlu1 %1671 }
 0x49c   :  { %11217 = vst [vmem:[#allocation57_spill] sm:$0xff] %v8113_v14  ;;  %v8115_v43 = vpop.permute.xlu0 %1691  ;;  %v552_v14 = vmul.f32 1.442695, %v545_v2 }
 0x49d   :  { %11218 = vst [vmem:[#allocation58_spill] sm:$0xff] %v8115_v43  ;;  %3175 = vbcast.lane.b32.xlu1 %v1964_v46, 282  ;;  %v543_v43 = vsub.f32 0.0, %v7526_v13  ;;  %v542_v46 = vsub.f32 0.0, %v7529_v16 }
 0x49e   :  { %1847 = vbcast.lane.b32.xlu0 %v8119_v24, 258 }
 0x49f   :  { %v8122_v51 = vpop.permute.xlu1 %1683  ;;  %v548_v3 = vmul.f32 1.442695, %v543_v43  ;;  %v1892_v43 = vrot.slane %v7958_v39, %v7974_v40 }
 0x4a0   :  { %11219 = vst [vmem:[#allocation59_spill] sm:$0xff] %v8122_v51  ;;  %v8124_v28 = vpop.permute.xlu0 %1703 }
 0x4a1   :  { %11220 = vst [vmem:[#allocation60_spill] sm:$0xff] %v8124_v28  ;;  %1839 = vbcast.lane.b32.xlu1 %v8110_v32, 266  ;;  %v544_v28 = vsub.f32 0.0, %v7535_v20  ;;  %6660 = vpow2.f32 %v548_v3 }
 0x4a2   :  { %1859 = vbcast.lane.b32.xlu0 %v8128_v50, 258 }
 0x4a3   :  { %v8133_v62 = vpop.permute.xlu1 %1695  ;;  %v550_v49 = vmul.f32 1.442695, %v544_v28  ;;  %v1904_v28 = vrot.slane %v7958_v39, %v7979_v54 }
 0x4a4   :  { %11221 = vst [vmem:[#allocation61_spill] sm:$0xff] %v8133_v62  ;;  %v8136_v34 = vpop.permute.xlu0 %1715  ;;  %v546_v62 = vmul.f32 1.442695, %v542_v46 }
 0x4a5   :  { %11222 = vst [vmem:[#allocation62_spill] sm:$0xff] %v8136_v34  ;;  %1851 = vbcast.lane.b32.xlu1 %v8119_v24, 266  ;;  %v1880_v34 = vrot.slane %v7958_v39, %v7969_v53 }
 0x4a6   :  { %1871 = vbcast.lane.b32.xlu0 %v8140_v11, 258  ;;  %6662 = vpow2.f32 %v546_v62 }
 0x4a7   :  { %v8146_v0 = vpop.permute.xlu1 %1707  ;;  %6664 = vpow2.f32 %v550_v49 }
 0x4a8   :  { %11223 = vst [vmem:[#allocation63_spill] sm:$0xff] %v8146_v0  ;;  %v8148_v51 = vpop.permute.xlu0 %1727  ;;  %6666 = vpow2.f32 %v552_v14 }
 0x4a9   :  { %11224 = vst [vmem:[#allocation64_spill] sm:$0xff] %v8148_v51  ;;  %1863 = vbcast.lane.b32.xlu1 %v8128_v50, 266  ;;  %v1916_v51 = vrot.slane %v7958_v39, %v7984_v4 }
 0x4aa   :  { %1883 = vbcast.lane.b32.xlu0 %v1880_v34, 258 }
 0x4ab   :  { %v8153_v8 = vpop.permute.xlu1 %1719  ;;  %v6661_v62 = vpop.eup %6660 }
 0x4ac   :  { %11225 = vst [vmem:[#allocation65_spill] sm:$0xff] %v8153_v8  ;;  %v8155_v30 = vpop.permute.xlu0 %2487  ;;  %v555_v0 = vadd.f32 1.0, %v6661_v62  ;;  %v6401_v62 = vld [vmem:[#allocation6] ss:$0 sm:$0xff] }
 0x4ad   :  { %11226 = vst [vmem:[#allocation66_spill] sm:$0xff] %v8155_v30  ;;  %1875 = vbcast.lane.b32.xlu1 %v8140_v11, 266 }
 0x4ae   :  { %1895 = vbcast.lane.b32.xlu0 %v1892_v43, 258  ;;  %6668 = vrcp.f32 %v555_v0 }
 0x4af   :  { %v8160_v46 = vpop.permute.xlu1 %1731 }
 0x4b0   :  { %11227 = vst [vmem:[#allocation67_spill] sm:$0xff] %v8160_v46  ;;  %v8164_v3 = vpop.permute.xlu0 %2695  ;;  %v6663_v49 = vpop.eup %6662 }
 0x4b1   :  { %1887 = vbcast.lane.b32.xlu1 %v1880_v34, 266  ;;  %11228 = vst [vmem:[#allocation68_spill] sm:$0xff] %v8164_v3  ;;  %v6665_v8 = vpop.eup %6664  ;;  %v554_v34 = vadd.f32 1.0, %v6663_v49 }
 0x4b2   :  { %1907 = vbcast.lane.b32.xlu0 %v1904_v28, 258  ;;  %v6667_v14 = vpop.eup %6666  ;;  %v556_v3 = vadd.f32 1.0, %v6665_v8  ;;  %v1077_v8 = vld [vmem:[%s11057_s9] sm:$0xff] }
 0x4b3   :  { %v8166_v2 = vpop.permute.xlu1 %2491  ;;  %6670 = vrcp.f32 %v554_v34  ;;  %v1079_v34 = vmul.f32 1.442695, %v1077_v8 }
 0x4b4   :  { %11229 = vst [vmem:[#allocation69_spill] sm:$0xff] %v8166_v2  ;;  %v8170_v46 = vpop.permute.xlu0 %2907  ;;  %v557_v2 = vadd.f32 1.0, %v6667_v14  ;;  %6672 = vrcp.f32 %v556_v3 }
 0x4b5   :  { %1899 = vbcast.lane.b32.xlu1 %v1892_v43, 266  ;;  %11230 = vst [vmem:[#allocation70_spill] sm:$0xff] %v8170_v46  ;;  %v7179_v46 = vmov 1966171168  }
 0x4b6   :  { %1919 = vbcast.lane.b32.xlu0 %v1916_v51, 258  ;;  %6674 = vrcp.f32 %v557_v2 }
 0x4b7   :  { %v8172_v30 = vpop.permute.xlu1 %2699  ;;  %6676 = vpow2.f32 %v1079_v34 }
 0x4b8   :  { %11231 = vst [vmem:[#allocation71_spill] sm:$0xff] %v8172_v30  ;;  %v8175_v60 = vpop.permute.xlu0 %3115  ;;  %v1091_v30 = vunpack.c.l.s4 %v7179_v46 }
 0x4b9   :  { %1911 = vbcast.lane.b32.xlu1 %v1904_v28, 266  ;;  %11232 = vst [vmem:[#allocation72_spill] sm:$0xff] %v8175_v60 }
 0x4ba   :  { %2527 = vbcast.lane.b32.xlu0 %v8110_v32, 274  ;;  %v1092_v60 = vunpack.c.0.s8 %v1091_v30 }
 0x4bb   :  { %v8177_v43 = vpop.permute.xlu1 %2903 }
 0x4bc   :  { %11233 = vst [vmem:[#allocation73_spill] sm:$0xff] %v8177_v43  ;;  %v8192_v2 = vpop.permute.xlu0 %2519 }
 0x4bd   :  { %1923 = vbcast.lane.b32.xlu1 %v1916_v51, 266  ;;  %v1078_v51 = vld [vmem:[%s11057_s9 + $0x8] sm:$0xff]  ;;  %11234 = vst [vmem:[#allocation74_spill] sm:$0xff] %v8192_v2  ;;  %s7180_s9 = smov 96  }
 0x4be   :  { %2735 = vbcast.lane.b32.xlu0 %v8119_v24, 274  ;;  %v1081_v43 = vmul.f32 1.442695, %v1078_v51 }
 0x4bf   :  { %v8194_v46 = vpop.permute.xlu1 %3111 }
 0x4c0   :  { %11235 = vst [vmem:[#allocation75_spill] sm:$0xff] %v8194_v46  ;;  %6678 = vpow2.f32 %v1081_v43  ;;  %v8213_v25 = vpop.permute.xlu0 %2727  ;;  %v6972_v43 = vld [vmem:[#allocation8] ss:$0 sm:$0xff] }
 0x4c1   :  { %v6498_v49 = vpop.f32.mrb[4].mxu0  ;;  %2531 = vbcast.lane.b32.xlu1 %v8110_v32, 282  ;;  %v1072_v32 = vcombine.high %v7953_v61, %v7953_v61  ;;  %11237 = vst [vmem:[#allocation77_spill] sm:$0xff] %v8213_v25 }
 0x4c2   :  { %v8184_v0 = vadd.f32 %v6498_v49, %v6401_v62  ;;  %v990_v28 = vpop.f32.mrb[5].mxu0  ;;  %2947 = vbcast.lane.b32.xlu0 %v8128_v50, 282  ;;  %v6669_v49 = vpop.eup %6668 }
 0x4c3   :  { %v8190_v3 = vadd.f32 %v6401_v62, %v990_v28  ;;  %v6671_v28 = vpop.eup %6670  ;;  %v2556_v51 = vrot.slane %v1072_v32, %v7941_v56 }
 0x4c4   :  { %v1014_v14 = vand.u32 2147483647, %v8184_v0  ;;  %v6673_v46 = vpop.eup %6672 }
 0x4c5   :  { %v1013_v7 = vand.u32 2147483647, %v8190_v3  ;;  %v6501_v44 = vpop.f32.mrb[6].mxu0  ;;  %2739 = vbcast.lane.b32.xlu1 %v8119_v24, 282  ;;  %v6675_v61 = vpop.eup %6674  ;;  %v8209_v24 = vsub.s32 %v1092_v60, %v7405_v22  ;;  %v8224_v60 = vmul.f32 %v6673_v46, %v7535_v20  ;;  %v8240_v20 = vmul.f32 %v7886_v5, %v7893_v37 }
 0x4c6   :  { %v1018_v47 = vsub.f32 0.0, %v1014_v14  ;;  %v8201_v35 = vadd.f32 %v6501_v44, %v6401_v62  ;;  %v1000_v2 = vpop.f32.mrb[7].mxu0  ;;  %3155 = vbcast.lane.b32.xlu0 %v8140_v11, 282  ;;  %v3877_v37 = vcombine.high %v7990_v17, %v7990_v17 }
 0x4c7   :  { %v1017_v8 = vsub.f32 0.0, %v1013_v7  ;;  %v8204_v15 = vadd.f32 %v6401_v62, %v1000_v2  ;;  %v8215_v7 = vpop.permute.xlu1 %2523  ;;  %v8218_v62 = vmul.f32 %v6671_v28, %v7529_v16  ;;  %v8221_v2 = vmul.f32 %v6669_v49, %v7526_v13  ;;  %11240 = vst [vmem:[#allocation80_spill] sm:$0xff] %v8224_v60  ;;  %11244 = vst [vmem:[#allocation84_spill] sm:$0xff] %v8240_v20 }
 0x4c8   :  { %v1023_v58 = vmul.f32 1.442695, %v1018_v47  ;;  %v1016_v30 = vand.u32 2147483647, %v8201_v35  ;;  %v1071_v16 = vcombine.high %v7958_v39, %v7958_v39  ;;  %v8236_v13 = vmul.f32 %v6972_v43, %v7849_v1 }
 0x4c9   :  { %11236 = vst [vmem:[#allocation76_spill] sm:$0xff] %v8204_v15  ;;  %v1021_v44 = vmul.f32 1.442695, %v1017_v8  ;;  %v1015_v14 = vand.u32 2147483647, %v8204_v15  ;;  %2943 = vbcast.lane.b32.xlu1 %v8128_v50, 274  ;;  %v8227_v50 = vmul.f32 %v6675_v61, %v7531_v18  ;;  %v2764_v8 = vrot.slane %v1072_v32, %v7542_v29 }
 0x4ca   :  { %6680 = vpow2.f32 %v1023_v58  ;;  %v1020_v47 = vsub.f32 0.0, %v1016_v30  ;;  %2559 = vbcast.lane.b32.xlu0 %v2556_v51, 274  ;;  %11238 = vst [vmem:[#allocation78_spill] sm:$0xff] %v8218_v62  ;;  %11239 = vst [vmem:[#allocation79_spill] sm:$0xff] %v8221_v2  ;;  %v8230_v58 = vmul.f32 %v6972_v43, %v7828_v48  ;;  %v8244_v18 = vmul.f32 %v7886_v5, %v7905_v9 }
 0x4cb   :  { %6682 = vpow2.f32 %v1021_v44  ;;  %v1019_v22 = vsub.f32 0.0, %v1015_v14  ;;  %11241 = vst [vmem:[#allocation81_spill] sm:$0xff] %v8227_v50  ;;  %11243 = vst [vmem:[#allocation83_spill] sm:$0xff] %v8236_v13  ;;  %v8249_v48 = vmul.f32 %v7886_v5, %v7895_v26  ;;  %v8253_v39 = vmul.f32 %v7886_v5, %v7907_v31  ;;  %v8265_v49 = vpop.permute.xlu1 %2731 }
 0x4cc   :  { %11242 = vst [vmem:[#allocation82_spill] sm:$0xff] %v8230_v58  ;;  %v1027_v34 = vmul.f32 1.442695, %v1020_v47  ;;  %11245 = vst [vmem:[#allocation85_spill] sm:$0xff] %v8244_v18  ;;  %v2972_v5 = vrot.slane %v1072_v32, %v7579_v55  ;;  %v8269_v31 = vrot.slane %v1072_v32, %v7517_v10  ;;  %v8272_v28 = vrot.slane %v1071_v16, %v7941_v56  ;;  %v6677_v47 = vpop.eup %6676 }
 0x4cd   :  { %v1025_v46 = vmul.f32 1.442695, %v1019_v22  ;;  %3151 = vbcast.lane.b32.xlu1 %v8140_v11, 274  ;;  %11246 = vst [vmem:[#allocation86_spill] sm:$0xff] %v8249_v48  ;;  %11247 = vst [vmem:[#allocation87_spill] sm:$0xff] %v8253_v39  ;;  %v8263_v11 = vpop.permute.xlu0 %2939  ;;  %v8275_v61 = vrot.slane %v1071_v16, %v7542_v29  ;;  %v8278_v30 = vrot.slane %v1071_v16, %v7579_v55 }
 0x4ce   :  { %6684 = vpow2.f32 %v1027_v34  ;;  %2767 = vbcast.lane.b32.xlu0 %v2764_v8, 274  ;;  %11248 = vst [vmem:[#allocation88_spill] sm:$0xff] %v8263_v11  ;;  %11249 = vst [vmem:[#allocation89_spill] sm:$0xff] %v8265_v49  ;;  %v8281_v44 = vrot.slane %v1071_v16, %v7517_v10  ;;  %v8285_v14 = vrot.slane %v7988_v23, %v7517_v10  ;;  %v6679_v16 = vpop.eup %6678 }
 0x4cf   :  { %6686 = vpow2.f32 %v1025_v46  ;;  %v8289_v32 = vrot.slane %v7988_v23, %v7984_v4  ;;  %v8293_v22 = vrot.slane %v7988_v23, %v7579_v55  ;;  %v8301_v43 = vrot.slane %v7988_v23, %v7542_v29  ;;  %v8355_v25 = vpop.permute.xlu1 %2935 }
 0x4d0   :  { %v3878_v34 = vcombine.high %v7988_v23, %v7988_v23  ;;  %v8307_v46 = vrot.slane %v7988_v23, %v7974_v40  ;;  %v8311_v26 = vrot.slane %v7988_v23, %v7941_v56  ;;  %v8315_v9 = vrot.slane %v7988_v23, %v7969_v53  ;;  %11254 = vst [vmem:[#allocation94_spill] sm:$0xff] %v8355_v25 }
 0x4d1   :  { %2563 = vbcast.lane.b32.xlu1 %v2556_v51, 282  ;;  %v8297_v51 = vrot.slane %v7988_v23, %v7979_v54  ;;  %v8323_v48 = vrot.slane %v7990_v17, %v7517_v10  ;;  %v8327_v39 = vrot.slane %v7990_v17, %v7984_v4  ;;  %v8331_v20 = vrot.slane %v7990_v17, %v7579_v55  ;;  %v8353_v13 = vpop.permute.xlu0 %3147 }
 0x4d2   :  { %2975 = vbcast.lane.b32.xlu0 %v2972_v5, 274  ;;  %v8335_v23 = vrot.slane %v7990_v17, %v7979_v54  ;;  %v8342_v60 = vrot.slane %v7990_v17, %v7542_v29  ;;  %v8346_v2 = vrot.slane %v7990_v17, %v7974_v40  ;;  %v8350_v62 = vrot.slane %v7990_v17, %v7941_v56 }
 0x4d3   :  { %11253 = vst [vmem:[#allocation93_spill] sm:$0xff] %v8353_v13  ;;  %v8363_v49 = vrot.slane %v3878_v34, %v7517_v10  ;;  %v8366_v11 = vrot.slane %v3878_v34, %v7579_v55  ;;  %v8372_v13 = vrot.slane %v3878_v34, %v7941_v56  ;;  %v8375_v25 = vrot.slane %v3877_v37, %v7517_v10 }
 0x4d4   :  { %v8319_v1 = vpop.eup %6680  ;;  %11250 = vst [vmem:[#allocation90_spill] sm:$0xff] %v8342_v60  ;;  %11251 = vst [vmem:[#allocation91_spill] sm:$0xff] %v8346_v2 }
 0x4d5   :  { %v8337_v18 = vpop.eup %6682  ;;  %v1038_v50 = vadd.f32 1.0, %v8319_v1  ;;  %2771 = vbcast.lane.b32.xlu1 %v2764_v8, 282  ;;  %11252 = vst [vmem:[#allocation92_spill] sm:$0xff] %v8350_v62  ;;  %v8360_v8 = vrot.slane %v7990_v17, %v7969_v53  ;;  %11256 = vst [vmem:[#allocation96_spill] sm:$0xff] %v8363_v49  ;;  %v8369_v62 = vrot.slane %v3878_v34, %v7542_v29  ;;  %v8379_v17 = vsub.f32 0.0, %v6677_v47 }
 0x4d6   :  { %v1029_v58 = vadd.f32 1.0, %v8337_v18  ;;  %3183 = vbcast.lane.b32.xlu0 %v8269_v31, 274  ;;  %11257 = vst [vmem:[#allocation97_spill] sm:$0xff] %v8366_v11  ;;  %11259 = vst [vmem:[#allocation99_spill] sm:$0xff] %v8372_v13  ;;  %v8384_v49 = vrot.slane %v3877_v37, %v7579_v55  ;;  %v8390_v34 = vrot.slane %v3877_v37, %v7542_v29  ;;  %v8421_v13 = vpop.permute.xlu1 %3143 }
 0x4d7   :  { %11255 = vst [vmem:[#allocation95_spill] sm:$0xff] %v8360_v8  ;;  %6688 = vlog2.f32 %v1038_v50  ;;  %11258 = vst [vmem:[#allocation98_spill] sm:$0xff] %v8369_v62  ;;  %v8381_v8 = vsub.f32 0.0, %v6679_v16  ;;  %v8397_v47 = vrot.slane %v7996_v21, %v7517_v10 }
 0x4d8   :  { %11260 = vst [vmem:[#allocation100_spill] sm:$0xff] %v8375_v25  ;;  %v8377_v2 = vpop.eup %6684  ;;  %6690 = vlog2.f32 %v1029_v58  ;;  %11261 = vst [vmem:[#allocation101_spill] sm:$0xff] %v8384_v49  ;;  %v8393_v25 = vrot.slane %v3877_v37, %v7941_v56  ;;  %v1041_v58 = vmul.f32 -0.5, %v8319_v1  ;;  %v8404_v49 = vrot.slane %v7996_v21, %v7984_v4 }
 0x4d9   :  { %v8386_v50 = vpop.eup %6686  ;;  %v1056_v62 = vadd.f32 1.0, %v8377_v2  ;;  %2979 = vbcast.lane.b32.xlu1 %v2972_v5, 282  ;;  %11262 = vst [vmem:[#allocation102_spill] sm:$0xff] %v8390_v34  ;;  %11264 = vst [vmem:[#allocation104_spill] sm:$0xff] %v8397_v47  ;;  %v8408_v5 = vrot.slane %v7996_v21, %v7579_v55  ;;  %v1032_v37 = vmul.f32 -0.5, %v8337_v18  ;;  %v8413_v47 = vrot.slane %v7996_v21, %v7979_v54  ;;  %v8419_v34 = vpop.permute.xlu0 %2499 }
 0x4da   :  { %11263 = vst [vmem:[#allocation103_spill] sm:$0xff] %v8393_v25  ;;  %v1047_v16 = vadd.f32 1.0, %v8386_v50  ;;  %2539 = vbcast.lane.b32.xlu0 %v8272_v28, 274  ;;  %11265 = vst [vmem:[#allocation105_spill] sm:$0xff] %v8404_v49  ;;  %v8417_v25 = vrot.slane %v7996_v21, %v7542_v29  ;;  %v8425_v49 = vrot.slane %v7996_v21, %v7974_v40  ;;  %v8500_v11 = vpop.permute.xlu1 %2503 }
 0x4db   :  { %11266 = vst [vmem:[#allocation106_spill] sm:$0xff] %v8408_v5  ;;  %6692 = vlog2.f32 %v1056_v62  ;;  %11267 = vst [vmem:[#allocation107_spill] sm:$0xff] %v8413_v47  ;;  %v8429_v5 = vrot.slane %v7996_v21, %v7941_v56  ;;  %v8433_v62 = vrot.slane %v7996_v21, %v7969_v53  ;;  %v8437_v47 = vrot.slane %v7998_v19, %v7517_v10 }
 0x4dc   :  { %11268 = vst [vmem:[#allocation108_spill] sm:$0xff] %v8417_v25  ;;  %11269 = vst [vmem:[#allocation109_spill] sm:$0xff] %v8419_v34  ;;  %6694 = vlog2.f32 %v1047_v16  ;;  %v8442_v25 = vrot.slane %v7998_v19, %v7984_v4  ;;  %v8461_v4 = vrot.slane %v7998_v19, %v7542_v29  ;;  %v1033_v16 = vadd.f32 1.0, %v1032_v37 }
 0x4dd   :  { %11270 = vst [vmem:[#allocation110_spill] sm:$0xff] %v8421_v13  ;;  %11271 = vst [vmem:[#allocation111_spill] sm:$0xff] %v8425_v49  ;;  %3187 = vbcast.lane.b32.xlu1 %v8269_v31, 282  ;;  %v8446_v49 = vcombine.high %v7996_v21, %v7996_v21  ;;  %v1042_v13 = vadd.f32 1.0, %v1041_v58  ;;  %v8457_v31 = vrot.slane %v7998_v19, %v7979_v54  ;;  %v1044_v21 = vand.u32 2147483647, %v8319_v1 }
 0x4de   :  { %11272 = vst [vmem:[#allocation112_spill] sm:$0xff] %v8429_v5  ;;  %11273 = vst [vmem:[#allocation113_spill] sm:$0xff] %v8433_v62  ;;  %v3879_v5 = vcombine.high %v7998_v19, %v7998_v19  ;;  %2747 = vbcast.lane.b32.xlu0 %v8275_v61, 274  ;;  %v8467_v58 = vrot.slane %v7998_v19, %v7974_v40  ;;  %v1059_v62 = vmul.f32 -0.5, %v8377_v2  ;;  %v1009_v34 = vmax.f32 %v8190_v3, 0.0 }
 0x4df   :  { %11274 = vst [vmem:[#allocation114_spill] sm:$0xff] %v8437_v47  ;;  %11275 = vst [vmem:[#allocation115_spill] sm:$0xff] %v8442_v25  ;;  %v8453_v47 = vrot.slane %v7998_v19, %v7579_v55  ;;  %v1035_v25 = vand.u32 2147483647, %v8337_v18  ;;  %v8473_v54 = vrot.slane %v7998_v19, %v7941_v56  ;;  %v8482_v37 = vrot.slane %v8446_v49, %v7517_v10 }
 0x4e0   :  { %11277 = vst [vmem:[#allocation117_spill] sm:$0xff] %v8457_v31  ;;  %11278 = vst [vmem:[#allocation118_spill] sm:$0xff] %v8461_v4  ;;  %v8477_v4 = vrot.slane %v7998_v19, %v7969_v53  ;;  %v8486_v40 = vrot.slane %v8446_v49, %v7579_v55  ;;  %v1010_v19 = vmax.f32 %v8184_v0, 0.0  ;;  %vm1045_vm7 = vcmp.lt.f32.partialorder %v1044_v21, 0.0004427343 }
 0x4e1   :  { %11276 = vst [vmem:[#allocation116_spill] sm:$0xff] %v8453_v47  ;;  %11279 = vst [vmem:[#allocation119_spill] sm:$0xff] %v8467_v58  ;;  %v1050_v47 = vmul.f32 -0.5, %v8386_v50  ;;  %v6689_v31 = vpop.eup %6688  ;;  %2543 = vbcast.lane.b32.xlu1 %v8272_v28, 282  ;;  %v8490_v58 = vrot.slane %v8446_v49, %v7542_v29  ;;  %v1043_v28 = vmul.f32 %v8319_v1, %v1042_v13  ;;  %vm1036_vm8 = vcmp.lt.f32.partialorder %v1035_v25, 0.0004427343 }
 0x4e2   :  { %11280 = vst [vmem:[#allocation120_spill] sm:$0xff] %v8473_v54  ;;  %11281 = vst [vmem:[#allocation121_spill] sm:$0xff] %v8477_v4  ;;  %v8493_v54 = vrot.slane %v3879_v5, %v7517_v10  ;;  %v6691_v53 = vpop.eup %6690  ;;  %v1040_v4 = vmul.f32 0.6931472, %v6689_v31  ;;  %2959 = vbcast.lane.b32.xlu0 %v8278_v30, 282  ;;  %v8507_v3 = vrot.slane %v3879_v5, %v7579_v55 }
 0x4e3   :  { %11282 = vst [vmem:[#allocation122_spill] sm:$0xff] %v8482_v37  ;;  %11283 = vst [vmem:[#allocation123_spill] sm:$0xff] %v8486_v40  ;;  %v8498_v37 = vpop.permute.xlu0 %2707  ;;  %v1031_v40 = vmul.f32 0.6931472, %v6691_v53  ;;  %v1062_v0 = vand.u32 2147483647, %v8377_v2 }
 0x4e4   :  { %11284 = vst [vmem:[#allocation124_spill] sm:$0xff] %v8490_v58  ;;  %11285 = vst [vmem:[#allocation125_spill] sm:$0xff] %v8493_v54  ;;  %v1034_v58 = vmul.f32 %v8337_v18, %v1033_v16  ;;  %v1046_v10 = vsel %vm1045_vm7, %v1043_v28, %v1040_v4  ;;  %v1060_v54 = vadd.f32 1.0, %v1059_v62  ;;  %v1051_v31 = vadd.f32 1.0, %v1050_v47 }
 0x4e5   :  { %11286 = vst [vmem:[#allocation126_spill] sm:$0xff] %v8498_v37  ;;  %11287 = vst [vmem:[#allocation127_spill] sm:$0xff] %v8500_v11  ;;  %v6693_v60 = vpop.eup %6692  ;;  %v1066_v13 = vadd.f32 %v1046_v10, %v1010_v19  ;;  %2751 = vbcast.lane.b32.xlu1 %v8275_v61, 282  ;;  %v8510_v37 = vrot.slane %v3879_v5, %v7542_v29  ;;  %v8515_v62 = vpop.f32.mrb[8].mxu0  ;;  %v8518_v47 = vrot.slane %v3879_v5, %v7941_v56 }
 0x4e6   :  { %v1037_v1 = vsel %vm1036_vm8, %v1034_v58, %v1031_v40  ;;  %11288 = vst [vmem:[#allocation128_spill] sm:$0xff] %v8507_v3  ;;  %3167 = vbcast.lane.b32.xlu0 %v8281_v44, 282  ;;  %11290 = vst [vmem:[#allocation130_spill] sm:$0xff] %v8515_v62  ;;  %v6695_v4 = vpop.eup %6694  ;;  %v8527_v58 = vmul.f32 0.6931472, %v6693_v60  ;;  %v8530_v40 = vmul.f32 %v8377_v2, %v1060_v54 }
 0x4e7   :  { %11289 = vst [vmem:[#allocation129_spill] sm:$0xff] %v8510_v37  ;;  %v1065_v21 = vadd.f32 %v1037_v1, %v1009_v34  ;;  %11291 = vst [vmem:[#allocation131_spill] sm:$0xff] %v8518_v47  ;;  %v1138_v61 = vcombine.high %v1066_v13, %v1066_v13  ;;  %v1145_v55 = vrot.slane %v1066_v13, %v8209_v24  ;;  %v8525_v34 = vpop.f32.mrb[9].mxu0  ;;  %vm8532_vm9 = vcmp.lt.f32.partialorder %v1062_v0, 0.0004427343  ;;  %v8539_v19 = vpop.permute.xlu0 %2919 }
 0x4e8   :  { %v8522_v16 = vmul.f32 %v1066_v13, %v7856_v6  ;;  %11292 = vst [vmem:[#allocation132_spill] sm:$0xff] %v8525_v34  ;;  %v8537_v5 = vmul.f32 %v8386_v50, %v1051_v31  ;;  %11296 = vst [vmem:[#allocation134_spill] sm:$0xff] %v8539_v19  ;;  %v8541_v6 = vpop.permute.xlu1 %2711  ;;  %v8551_v0 = vmul.f32 0.6931472, %v6695_v4  ;;  %v8556_v31 = vrot.slane %v8446_v49, %v7941_v56 }
 0x4e9   :  { %11297 = vst [vmem:[#allocation135_spill] sm:$0xff] %v8541_v6  ;;  %v1152_v28 = vrot.slane %v1138_v61, %v8209_v24  ;;  %v1153_v10 = vcombine.high %v1145_v55, %v1145_v55  ;;  %v1161_v60 = vrot.slane %v1145_v55, %v8209_v24  ;;  %v1089_v13 = vcombine.high %v1065_v21, %v1065_v21 }
 0x4ea   :  { %11295 = vst [vmem:[#allocation133_spill] sm:$0xff] %v8537_v5  ;;  %2955 = vbcast.lane.b32.xlu1 %v8278_v30, 274  ;;  %v2089_v2 = vrot.slane %v8522_v16, %v8209_v24  ;;  %v8549_v54 = vrot.slane %v1065_v21, %v8209_v24  ;;  %11298 = vst [vmem:[#allocation136_spill] sm:$0xff] %v8551_v0  ;;  %4587 = vbcast.lane.b32.xlu0 %v8285_v14, 266 }
 0x4eb   :  { %11299 = vst [vmem:[#allocation137_spill] sm:$0xff] %v8556_v31  ;;  %v1154_v1 = vcombine.high %v1152_v28, %v1152_v28  ;;  %v1175_v61 = vrot.slane %v1153_v10, %v8209_v24  ;;  %v1183_v55 = vcombine.high %v1161_v60, %v1161_v60  ;;  %v8560_v30 = vmul.f32 %v1065_v21, %v7838_v63  ;;  %v8582_v37 = vpop.permute.xlu0 %3127 }
 0x4ec   :  { %v8563_v25 = vrot.slane %v1152_v28, %v8209_v24  ;;  %v1320_v18 = vrot.slane %v1161_v60, %v7941_v56  ;;  %v2097_v4 = vcombine.high %v2089_v2, %v2089_v2  ;;  %v8573_v47 = vrot.slane %v1089_v13, %v8209_v24  ;;  %v8575_v63 = vpop.f32.mrb[10].mxu0  ;;  %11301 = vst [vmem:[#allocation139_spill] sm:$0xff] %v8582_v37 }
 0x4ed   :  { %v1182_v49 = vrot.slane %v1154_v1, %v8209_v24  ;;  %v1185_v31 = vcombine.high %v1175_v61, %v1175_v61  ;;  %v1324_v10 = vrot.slane %v1175_v61, %v7941_v56  ;;  %11300 = vst [vmem:[#allocation138_spill] sm:$0xff] %v8575_v63  ;;  %v1328_v21 = vrot.slane %v1183_v55, %v7941_v56  ;;  %v8584_v1 = vpop.permute.xlu1 %2915 }
 0x4ee   :  { %3163 = vbcast.lane.b32.xlu1 %v8281_v44, 274  ;;  %v1461_v28 = vmul.f32 %v1320_v18, %v8379_v17  ;;  %v1462_v60 = vmul.f32 %v1320_v18, %v8381_v8  ;;  %v2105_v29 = vrot.slane %v2089_v2, %v8209_v24  ;;  %11302 = vst [vmem:[#allocation140_spill] sm:$0xff] %v8584_v1 }
 0x4ef   :  { %4635 = vbcast.lane.b32.xlu0 %v8289_v32, 266  ;;  %v1332_v13 = vrot.slane %v1185_v31, %v7941_v56  ;;  %v2119_v44 = vrot.slane %v2097_v4, %v8209_v24  ;;  %v1104_v55 = vcombine.high %v8549_v54, %v8549_v54  ;;  %v1184_v18 = vcombine.high %v8563_v25, %v8563_v25  ;;  %v8614_v0 = vpop.permute.xlu0 %1931 }
 0x4f0   :  { %v8596_v2 = vrot.slane %v1182_v49, %v7941_v56  ;;  %v1463_v3 = vmul.f32 %v1324_v10, %v8379_v17  ;;  %v1464_v63 = vmul.f32 %v1324_v10, %v8381_v8  ;;  %v1186_v34 = vcombine.high %v1182_v49, %v1182_v49  ;;  %11303 = vst [vmem:[#allocation141_spill] sm:$0xff] %v8614_v0 }
 0x4f1   :  { %v1465_v31 = vmul.f32 %v1328_v21, %v8379_v17  ;;  %v1105_v61 = vcombine.high %v8573_v47, %v8573_v47  ;;  %v1112_v4 = vrot.slane %v8549_v54, %v8209_v24  ;;  %v1466_v37 = vmul.f32 %v1328_v21, %v8381_v8  ;;  %v8616_v21 = vpop.permute.xlu1 %3123 }
 0x4f2   :  { %4583 = vbcast.lane.b32.xlu1 %v8285_v14, 258  ;;  %v1541_v19 = vmul.f32 1.442695, %v1461_v28  ;;  %v1543_v1 = vmul.f32 1.442695, %v1462_v60  ;;  %v2127_v6 = vcombine.high %v2105_v29, %v2105_v29  ;;  %v1467_v11 = vmul.f32 %v1332_v13, %v8379_v17  ;;  %11304 = vst [vmem:[#allocation142_spill] sm:$0xff] %v8616_v21 }
 0x4f3   :  { %v1468_v10 = vmul.f32 %v1332_v13, %v8381_v8  ;;  %v1545_v49 = vmul.f32 1.442695, %v1463_v3  ;;  %v2129_v62 = vcombine.high %v2119_v44, %v2119_v44  ;;  %v8610_v15 = vrot.slane %v1184_v18, %v7941_v56  ;;  %v8620_v3 = vpop.f32.mrb[11].mxu0  ;;  %4571 = vbcast.lane.b32.xlu0 %v8293_v22, 258 }
 0x4f4   :  { %v1471_v5 = vmul.f32 %v8596_v2, %v8379_v17  ;;  %6696 = vpow2.f32 %v1541_v19  ;;  %v1547_v54 = vmul.f32 1.442695, %v1464_v63  ;;  %v1549_v28 = vmul.f32 1.442695, %v1465_v31  ;;  %11305 = vst [vmem:[#allocation143_spill] sm:$0xff] %v8620_v3 }
 0x4f5   :  { %6698 = vpow2.f32 %v1543_v1  ;;  %v2264_v60 = vrot.slane %v2105_v29, %v7941_v56  ;;  %v2268_v13 = vrot.slane %v2119_v44, %v7941_v56  ;;  %v8625_v18 = vrot.slane %v1186_v34, %v7941_v56 }
 0x4f6   :  { %4631 = vbcast.lane.b32.xlu1 %v8289_v32, 258  ;;  %v1551_v19 = vmul.f32 1.442695, %v1466_v37  ;;  %v2272_v63 = vrot.slane %v2127_v6, %v7941_v56  ;;  %v1126_v21 = vrot.slane %v1104_v55, %v8209_v24  ;;  %6700 = vpow2.f32 %v1545_v49  ;;  %v8652_v6 = vpop.permute.xlu0 %1943 }
 0x4f7   :  { %11306 = vst [vmem:[#allocation144_spill] sm:$0xff] %v8625_v18  ;;  %v1553_v1 = vmul.f32 1.442695, %v1467_v11  ;;  %v1555_v31 = vmul.f32 1.442695, %v1468_v10  ;;  %v2276_v29 = vrot.slane %v2129_v62, %v7941_v56  ;;  %6702 = vpow2.f32 %v1547_v54  ;;  %4619 = vbcast.lane.b32.xlu0 %v8297_v51, 258 }
 0x4f8   :  { %v8630_v44 = vmul.f32 1.442695, %v1471_v5  ;;  %v2405_v3 = vmul.f32 %v2264_v60, %v8032_v59  ;;  %v8635_v32 = vrot.slane %v8573_v47, %v8209_v24  ;;  %6704 = vpow2.f32 %v1549_v28  ;;  %11307 = vst [vmem:[#allocation145_spill] sm:$0xff] %v8652_v6 }
 0x4f9   :  { %v2406_v37 = vmul.f32 %v2264_v60, %v8030_v52  ;;  %v8639_v34 = vmul.f32 %v2268_v13, %v8037_v38  ;;  %v8642_v11 = vmul.f32 %v2268_v13, %v8035_v27  ;;  %v8647_v62 = vmul.f32 %v2272_v63, %v8042_v33  ;;  %v8654_v52 = vpop.permute.xlu1 %1935 }
 0x4fa   :  { %4575 = vbcast.lane.b32.xlu1 %v8293_v22, 266  ;;  %v8650_v59 = vmul.f32 %v2272_v63, %v8040_v12  ;;  %v1134_v47 = vcombine.high %v1112_v4, %v1112_v4  ;;  %v1136_v5 = vcombine.high %v1126_v21, %v1126_v21  ;;  %11308 = vst [vmem:[#allocation146_spill] sm:$0xff] %v8654_v52  ;;  %6706 = vpow2.f32 %v1551_v19  ;;  %v8681_v54 = vpop.permute.xlu0 %1955 }
 0x4fb   :  { %v8657_v27 = vmul.f32 %v2276_v29, %v8048_v45  ;;  %v1288_v38 = vrot.slane %v1112_v4, %v7941_v56  ;;  %v1292_v55 = vrot.slane %v1126_v21, %v7941_v56  ;;  %v8662_v33 = vmul.f32 %v2276_v29, %v8046_v57  ;;  %4559 = vbcast.lane.b32.xlu0 %v8301_v43, 258 }
 0x4fc   :  { %v8665_v12 = vrot.slane %v1105_v61, %v8209_v24  ;;  %v1296_v10 = vrot.slane %v1134_v47, %v7941_v56  ;;  %v1300_v49 = vrot.slane %v1136_v5, %v7941_v56  ;;  %6708 = vpow2.f32 %v1553_v1  ;;  %11309 = vst [vmem:[#allocation147_spill] sm:$0xff] %v8681_v54 }
 0x4fd   :  { %v1445_v45 = vmul.f32 %v1288_v38, %v8379_v17  ;;  %v1446_v4 = vmul.f32 %v1288_v38, %v8381_v8  ;;  %v1447_v57 = vmul.f32 %v1292_v55, %v8379_v17  ;;  %v1448_v61 = vmul.f32 %v1292_v55, %v8381_v8  ;;  %v8683_v55 = vpop.permute.xlu1 %1947 }
 0x4fe   :  { %v6697_v21 = vpop.eup %6696  ;;  %v1449_v28 = vmul.f32 %v1296_v10, %v8379_v17  ;;  %v1450_v60 = vmul.f32 %v1296_v10, %v8381_v8  ;;  %4623 = vbcast.lane.b32.xlu1 %v8297_v51, 266  ;;  %v1451_v63 = vmul.f32 %v1300_v49, %v8379_v17  ;;  %v1452_v1 = vmul.f32 %v1300_v49, %v8381_v8 }
 0x4ff   :  { %v6699_v13 = vpop.eup %6698  ;;  %v2457_v19 = vmul.f32 0.0, %v6697_v21  ;;  %v1509_v29 = vmul.f32 1.442695, %v1445_v45  ;;  %6710 = vpow2.f32 %v1555_v31  ;;  %v1511_v5 = vmul.f32 1.442695, %v1446_v4  ;;  %11310 = vst [vmem:[#allocation148_spill] sm:$0xff] %v8683_v55 }
 0x500   :  { %v2458_v47 = vmul.f32 0.0, %v6699_v13  ;;  %v1513_v38 = vmul.f32 1.442695, %v1447_v57  ;;  %v6701_v6 = vpop.eup %6700  ;;  %v1515_v10 = vmul.f32 1.442695, %v1448_v61  ;;  %4607 = vbcast.lane.b32.xlu0 %v8307_v46, 258  ;;  %v2040_v61 = vrot.slane %v8560_v30, %v8209_v24 }
 0x501   :  { %v2473_v52 = vadd.f32 %v2457_v19, %v2405_v3  ;;  %6712 = vpow2.f32 %v1509_v29  ;;  %v1517_v51 = vmul.f32 1.442695, %v1449_v28  ;;  %v6703_v21 = vpop.eup %6702  ;;  %v1519_v49 = vmul.f32 1.442695, %v1450_v60  ;;  %v11326_v55 = vld [vmem:[#allocation56_spill] sm:$0xff] }
 0x502   :  { %v2474_v0 = vadd.f32 %v2458_v47, %v2406_v37  ;;  %6714 = vpow2.f32 %v1511_v5  ;;  %v1521_v45 = vmul.f32 1.442695, %v1451_v63  ;;  %4563 = vbcast.lane.b32.xlu1 %v8301_v43, 266  ;;  %v6705_v31 = vpop.eup %6704  ;;  %v1523_v13 = vmul.f32 1.442695, %v1452_v1  ;;  %v11313_v47 = vld [vmem:[#allocation46_spill] sm:$0xff] }
 0x503   :  { %v2569_v4 = vmul.f32 %v8078_v41, %v2473_v52  ;;  %v2665_v57 = vmul.f32 %v6701_v6, %v2473_v52  ;;  %6716 = vpow2.f32 %v1513_v38  ;;  %v8695_v63 = vrot.slane %v8563_v25, %v7941_v56  ;;  %v8700_v6 = vpop.permute.xlu0 %1967  ;;  %v8702_v52 = vpop.permute.xlu1 %1959 }
 0x504   :  { %v2570_v3 = vmul.f32 %v8076_v36, %v2474_v0  ;;  %v2666_v19 = vmul.f32 %v6703_v21, %v2474_v0  ;;  %6718 = vpow2.f32 %v1515_v10  ;;  %v6707_v28 = vpop.eup %6706  ;;  %4547 = vbcast.lane.b32.xlu0 %v8311_v26, 258  ;;  %v2048_v0 = vcombine.high %v2040_v61, %v2040_v61  ;;  %11311 = vst [vmem:[#allocation149_spill] sm:$0xff] %v8700_v6 }
 0x505   :  { %v2599_v37 = vsel %vm183_vm0, %v2569_v4, 0.0  ;;  %v2681_v60 = vadd.f32 %v2665_v57, %v8639_v34  ;;  %6720 = vpow2.f32 %v1517_v51  ;;  %11312 = vst [vmem:[#allocation150_spill] sm:$0xff] %v8702_v52 }
 0x506   :  { %v2600_v41 = vsel %vm183_vm0, %v2570_v3, 0.0  ;;  %v2682_v36 = vadd.f32 %v2666_v19, %v8642_v11  ;;  %6722 = vpow2.f32 %v1519_v49  ;;  %4611 = vbcast.lane.b32.xlu1 %v8307_v46, 266  ;;  %v6709_v34 = vpop.eup %6708  ;;  %v2056_v11 = vrot.slane %v2040_v61, %v8209_v24  ;;  %v11314_v19 = vld [vmem:[#allocation47_spill] sm:$0xff] }
 0x507   :  { %v2601_v1 = vadd.f32 %v2600_v41, %v2599_v37  ;;  %v2777_v29 = vmul.f32 %v8084_v42, %v2681_v60  ;;  %v2873_v25 = vmul.f32 %v6705_v31, %v2681_v60  ;;  %6724 = vpow2.f32 %v1521_v45  ;;  %v11315_v37 = vld [vmem:[#allocation48_spill] sm:$0xff] }
 0x508   :  { %v2778_v5 = vmul.f32 %v11313_v47, %v2682_v36  ;;  %v2874_v38 = vmul.f32 %v6707_v28, %v2682_v36  ;;  %6726 = vpow2.f32 %v1523_v13  ;;  %v2070_v49 = vrot.slane %v2048_v0, %v8209_v24  ;;  %4595 = vbcast.lane.b32.xlu0 %v8315_v9, 258 }
 0x509   :  { %v2602_v10 = vrot.slane %v2601_v1, 4  ;;  %v2807_v51 = vsel %vm183_vm0, %v2777_v29, 0.0  ;;  %v2889_v21 = vadd.f32 %v2873_v25, %v8647_v62  ;;  %v6711_v46 = vpop.eup %6710  ;;  %v2078_v31 = vcombine.high %v2056_v11, %v2056_v11  ;;  %v8719_v29 = vpop.permute.xlu0 %1979 }
 0x50a   :  { %v2808_v42 = vsel %vm183_vm0, %v2778_v5, 0.0  ;;  %v2890_v45 = vadd.f32 %v2874_v38, %v8650_v59  ;;  %v2232_v4 = vrot.slane %v2056_v11, %v7941_v56  ;;  %4551 = vbcast.lane.b32.xlu1 %v8311_v26, 266  ;;  %v2080_v36 = vcombine.high %v2070_v49, %v2070_v49  ;;  %11316 = vst [vmem:[#allocation46_spill] sm:$0xff] %v8719_v29  ;;  %v8721_v59 = vpop.permute.xlu1 %1971 }
 0x50b   :  { %v6713_v57 = vpop.eup %6712  ;;  %v2603_v13 = vadd.f32 %v2602_v10, %v2601_v1  ;;  %v2809_v3 = vadd.f32 %v2808_v42, %v2807_v51  ;;  %v2985_v61 = vmul.f32 %v11314_v19, %v2889_v21  ;;  %v3081_v62 = vmul.f32 %v6709_v34, %v2889_v21  ;;  %11317 = vst [vmem:[#allocation47_spill] sm:$0xff] %v8721_v59  ;;  %v11318_v19 = vld [vmem:[#allocation49_spill] sm:$0xff] }
 0x50c   :  { %v6715_v28 = vpop.eup %6714  ;;  %v2986_v60 = vmul.f32 %v11315_v37, %v2890_v45  ;;  %v3082_v41 = vmul.f32 %v6711_v46, %v2890_v45  ;;  %v2236_v0 = vrot.slane %v2070_v49, %v7941_v56  ;;  %5315 = vbcast.lane.b32.xlu0 %v8285_v14, 274  ;;  %v2240_v51 = vrot.slane %v2078_v31, %v7941_v56  ;;  %v11322_v31 = vld [vmem:[#allocation53_spill] sm:$0xff] }
 0x50d   :  { %v6717_v25 = vpop.eup %6716  ;;  %v2604_v47 = vrot.slane %v2603_v13, 2  ;;  %v2810_v5 = vrot.slane %v2809_v3, 4  ;;  %v3015_v1 = vsel %vm183_vm0, %v2985_v61, 0.0  ;;  %v3097_v38 = vadd.f32 %v3081_v62, %v8657_v27  ;;  %v11319_v62 = vld [vmem:[#allocation50_spill] sm:$0xff] }
 0x50e   :  { %v6719_v34 = vpop.eup %6718  ;;  %v3016_v11 = vsel %vm183_vm0, %v2986_v60, 0.0  ;;  %v3098_v10 = vadd.f32 %v3082_v41, %v8662_v33  ;;  %v2244_v21 = vrot.slane %v2080_v36, %v7941_v56  ;;  %4599 = vbcast.lane.b32.xlu1 %v8315_v9, 266  ;;  %v11320_v60 = vld [vmem:[#allocation52_spill] sm:$0xff]  ;;  %v11321_v33 = vld [vmem:[#allocation51_spill] sm:$0xff]  ;;  %v2391_v59 = vmul.f32 %v2236_v0, %v11322_v31 }
 0x50f   :  { %v8731_v49 = vpop.eup %6720  ;;  %v2605_v46 = vadd.f32 %v2604_v47, %v2603_v13  ;;  %v2811_v42 = vadd.f32 %v2810_v5, %v2809_v3  ;;  %v3017_v45 = vadd.f32 %v3016_v11, %v3015_v1  ;;  %v3193_v27 = vmul.f32 %v11318_v19, %v3097_v38  ;;  %v11323_v5 = vld [vmem:[#allocation55_spill] sm:$0xff]  ;;  %v11324_v38 = vld [vmem:[#allocation54_spill] sm:$0xff]  ;;  %v8750_v19 = vpop.permute.xlu0 %1991 }
 0x510   :  { %v8734_v61 = vpop.eup %6722  ;;  %v3194_v37 = vmul.f32 %v11319_v62, %v3098_v10  ;;  %v2389_v29 = vmul.f32 %v2232_v4, %v11320_v60  ;;  %v2390_v41 = vmul.f32 %v2232_v4, %v11321_v33  ;;  %5539 = vbcast.lane.b32.xlu0 %v8293_v22, 274  ;;  %v2392_v1 = vmul.f32 %v2236_v0, %v11323_v5  ;;  %v11325_v4 = vld [vmem:[#allocation57_spill] sm:$0xff]  ;;  %v8752_v62 = vpop.permute.xlu1 %1983 }
 0x511   :  { %v8740_v36 = vpop.eup %6724  ;;  %v2606_v9 = vrot.slane %v2605_v46, 1  ;;  %v2812_v52 = vrot.slane %v2811_v42, 2  ;;  %v3018_v6 = vrot.slane %v3017_v45, 4  ;;  %v3223_v13 = vsel %vm183_vm0, %v3193_v27, 0.0 }
 0x512   :  { %v8744_v3 = vpop.eup %6726  ;;  %v3224_v47 = vsel %vm183_vm0, %v3194_v37, 0.0  ;;  %v2393_v11 = vmul.f32 %v2240_v51, %v11324_v38  ;;  %v2394_v10 = vmul.f32 %v2240_v51, %v11325_v4  ;;  %5319 = vbcast.lane.b32.xlu1 %v8285_v14, 282  ;;  %v8756_v54 = vmul.f32 %v2244_v21, %v11326_v55  ;;  %v11327_v37 = vld [vmem:[#allocation59_spill] sm:$0xff] }
 0x513   :  { %v2607_v60 = vadd.f32 %v2606_v9, %v2605_v46  ;;  %v2813_v27 = vadd.f32 %v2812_v52, %v2811_v42  ;;  %v3019_v33 = vadd.f32 %v3018_v6, %v3017_v45  ;;  %v3225_v31 = vadd.f32 %v3224_v47, %v3223_v13  ;;  %v11328_v45 = vld [vmem:[#allocation66_spill] sm:$0xff]  ;;  %v11329_v13 = vld [vmem:[#allocation69_spill] sm:$0xff] }
 0x514   :  { %v8759_v18 = vmul.f32 %v2244_v21, %v11327_v37  ;;  %v2453_v0 = vmul.f32 0.0, %v6713_v57  ;;  %v2454_v5 = vmul.f32 0.0, %v6715_v28  ;;  %v1469_v14 = vmul.f32 %v8695_v63, %v8379_v17  ;;  %5763 = vbcast.lane.b32.xlu0 %v8301_v43, 274 }
 0x515   :  { %2655 = vst.msk [vmem:[#allocation3 + $0x8] sm:$0x1] %vm643_vm2, %v2607_v60  ;;  %v2814_v51 = vrot.slane %v2813_v27, 1  ;;  %v3020_v38 = vrot.slane %v3019_v33, 2  ;;  %v3226_v4 = vrot.slane %v3225_v31, 4  ;;  %v1470_v55 = vmul.f32 %v8695_v63, %v8381_v8 }
 0x516   :  { %v2469_v6 = vadd.f32 %v2453_v0, %v2389_v29  ;;  %v2470_v52 = vadd.f32 %v2454_v5, %v2390_v41  ;;  %v1472_v21 = vmul.f32 %v8596_v2, %v8381_v8  ;;  %5543 = vbcast.lane.b32.xlu1 %v8293_v22, 282  ;;  %v1557_v42 = vmul.f32 1.442695, %v1469_v14  ;;  %v8772_v29 = vpop.permute.xlu0 %2003  ;;  %v8774_v41 = vpop.permute.xlu1 %1995 }
 0x517   :  { %v2815_v57 = vadd.f32 %v2814_v51, %v2813_v27  ;;  %v3021_v28 = vadd.f32 %v3020_v38, %v3019_v33  ;;  %v3227_v46 = vadd.f32 %v3226_v4, %v3225_v31  ;;  %v1559_v22 = vmul.f32 1.442695, %v1470_v55  ;;  %v11330_v51 = vld [vmem:[#allocation68_spill] sm:$0xff]  ;;  %v11331_v4 = vld [vmem:[#allocation71_spill] sm:$0xff] }
 0x518   :  { %v2565_v9 = vmul.f32 %v11328_v45, %v2469_v6  ;;  %v2566_v47 = vmul.f32 %v11329_v13, %v2470_v52  ;;  %v2661_v60 = vmul.f32 %v6717_v25, %v2469_v6  ;;  %v2662_v37 = vmul.f32 %v6719_v34, %v2470_v52  ;;  %5987 = vbcast.lane.b32.xlu0 %v8311_v26, 274 }
 0x519   :  { %2863 = vst.msk [vmem:[#allocation3 + $0x9] sm:$0x1] %vm643_vm2, %v2815_v57  ;;  %v3022_v63 = vrot.slane %v3021_v28, 1  ;;  %v3228_v2 = vrot.slane %v3227_v46, 2  ;;  %6728 = vpow2.f32 %v1557_v42 }
 0x51a   :  { %v2581_v27 = vsel %vm183_vm0, %v2565_v9, 0.0  ;;  %v2582_v33 = vsel %vm183_vm0, %v2566_v47, 0.0  ;;  %v2677_v31 = vadd.f32 %v2661_v60, %v2391_v59  ;;  %v2678_v0 = vadd.f32 %v2662_v37, %v2392_v1  ;;  %5767 = vbcast.lane.b32.xlu1 %v8301_v43, 282  ;;  %v8793_v45 = vpop.permute.xlu0 %2015  ;;  %v11334_v60 = vld [vmem:[#allocation70_spill] sm:$0xff] }
 0x51b   :  { %v3023_v25 = vadd.f32 %v3022_v63, %v3021_v28  ;;  %v3229_v34 = vadd.f32 %v3228_v2, %v3227_v46  ;;  %v2583_v5 = vadd.f32 %v2582_v33, %v2581_v27  ;;  %6730 = vpow2.f32 %v1559_v22 }
 0x51c   :  { %v2773_v38 = vmul.f32 %v11330_v51, %v2677_v31  ;;  %v2774_v14 = vmul.f32 %v11331_v4, %v2678_v0  ;;  %v2869_v6 = vmul.f32 %v8731_v49, %v2677_v31  ;;  %v2870_v52 = vmul.f32 %v8734_v61, %v2678_v0  ;;  %4491 = vbcast.lane.b32.xlu0 %v8323_v48, 266  ;;  %v8795_v61 = vpop.permute.xlu1 %2007  ;;  %v11335_v51 = vld [vmem:[#allocation75_spill] sm:$0xff]  ;;  %v11336_v4 = vld [vmem:[#allocation72_spill] sm:$0xff] }
 0x51d   :  { %3071 = vst.msk [vmem:[#allocation3 + $0xa] sm:$0x1] %vm643_vm2, %v3023_v25  ;;  %v3230_v55 = vrot.slane %v3229_v34, 1  ;;  %v2584_v57 = vrot.slane %v2583_v5, 4  ;;  %v1563_v59 = vmul.f32 1.442695, %v1472_v21  ;;  %v11332_v43 = vcombine.high %v8522_v16, %v8522_v16 }
 0x51e   :  { %v2789_v28 = vsel %vm183_vm0, %v2773_v38, 0.0  ;;  %v2790_v46 = vsel %vm183_vm0, %v2774_v14, 0.0  ;;  %v2885_v42 = vadd.f32 %v2869_v6, %v2393_v11  ;;  %v2886_v49 = vadd.f32 %v2870_v52, %v2394_v10  ;;  %5991 = vbcast.lane.b32.xlu1 %v8311_v26, 282  ;;  %v11333_v16 = vld [vmem:[#allocation73_spill] sm:$0xff] }
 0x51f   :  { %v2096_v1 = vrot.slane %v11332_v43, %v8209_v24  ;;  %v3231_v21 = vadd.f32 %v3230_v55, %v3229_v34  ;;  %v2585_v9 = vadd.f32 %v2584_v57, %v2583_v5  ;;  %v2791_v13 = vadd.f32 %v2790_v46, %v2789_v28 }
 0x520   :  { %6732 = vpow2.f32 %v1563_v59  ;;  %v2981_v47 = vmul.f32 %v11333_v16, %v2885_v42  ;;  %v2982_v37 = vmul.f32 %v11334_v60, %v2886_v49  ;;  %v3077_v63 = vmul.f32 %v8740_v36, %v2885_v42  ;;  %4539 = vbcast.lane.b32.xlu0 %v8327_v39, 266 }
 0x521   :  { %v3078_v2 = vmul.f32 %v8744_v3, %v2886_v49  ;;  %3279 = vst.msk [vmem:[#allocation3 + $0xb] sm:$0x1] %vm643_vm2, %v3231_v21  ;;  %v2586_v11 = vrot.slane %v2585_v9, 2  ;;  %v2792_v10 = vrot.slane %v2791_v13, 4  ;;  %v2098_v22 = vcombine.high %v2096_v1, %v2096_v1  ;;  %v11338_v49 = vld [vmem:[#allocation38_spill] sm:$0xff] }
 0x522   :  { %v8804_v27 = vrot.slane %v2096_v1, %v8209_v24  ;;  %v2997_v26 = vsel %vm183_vm0, %v2981_v47, 0.0  ;;  %v2998_v33 = vsel %vm183_vm0, %v2982_v37, 0.0  ;;  %v3093_v31 = vadd.f32 %v3077_v63, %v8756_v54  ;;  %4487 = vbcast.lane.b32.xlu1 %v8323_v48, 258  ;;  %v8818_v54 = vpop.permute.xlu0 %2547  ;;  %v11337_v1 = vld [vmem:[#allocation39_spill] sm:$0xff] }
 0x523   :  { %v3094_v36 = vadd.f32 %v3078_v2, %v8759_v18  ;;  %v6729_v3 = vpop.eup %6728  ;;  %v2587_v0 = vadd.f32 %v2586_v11, %v2585_v9  ;;  %v2793_v25 = vadd.f32 %v2792_v10, %v2791_v13  ;;  %v2999_v34 = vadd.f32 %v2998_v33, %v2997_v26  ;;  %v8820_v18 = vpop.permute.xlu1 %2019 }
 0x524   :  { %v2280_v5 = vrot.slane %v8804_v27, %v7941_v56  ;;  %v3189_v38 = vmul.f32 %v11335_v51, %v3093_v31  ;;  %v2459_v6 = vmul.f32 0.0, %v6729_v3  ;;  %v1474_v52 = vmul.f32 %v8610_v15, %v8381_v8  ;;  %4475 = vbcast.lane.b32.xlu0 %v8331_v20, 258  ;;  %v11342_v3 = vld [vmem:[#allocation74_spill] sm:$0xff] }
 0x525   :  { %v3190_v14 = vmul.f32 %v11336_v4, %v3094_v36  ;;  %v6731_v55 = vpop.eup %6730  ;;  %v2588_v57 = vrot.slane %v2587_v0, 1  ;;  %v2794_v59 = vrot.slane %v2793_v25, 2  ;;  %v3000_v43 = vrot.slane %v2999_v34, 4 }
 0x526   :  { %v2413_v28 = vmul.f32 %v2280_v5, %v11337_v1  ;;  %v3205_v46 = vsel %vm183_vm0, %v3189_v38, 0.0  ;;  %v2414_v21 = vmul.f32 %v2280_v5, %v11338_v49  ;;  %v2460_v9 = vmul.f32 0.0, %v6731_v55  ;;  %4535 = vbcast.lane.b32.xlu1 %v8327_v39, 258  ;;  %v11346_v49 = vld [vmem:[#allocation40_spill] sm:$0xff] }
 0x527   :  { %v3206_v42 = vsel %vm183_vm0, %v3190_v14, 0.0  ;;  %v2589_v13 = vadd.f32 %v2588_v57, %v2587_v0  ;;  %v2795_v16 = vadd.f32 %v2794_v59, %v2793_v25  ;;  %v3001_v47 = vadd.f32 %v3000_v43, %v2999_v34  ;;  %v8848_v34 = vpop.permute.xlu0 %2755  ;;  %v8850_v5 = vpop.permute.xlu1 %2551 }
 0x528   :  { %v3207_v60 = vadd.f32 %v3206_v42, %v3205_v46  ;;  %v11339_v37 = vand.u32 2147483647, %v8386_v50  ;;  %v8834_v2 = vadd.f32 %v2459_v6, %v2413_v28  ;;  %v2476_v11 = vadd.f32 %v2460_v9, %v2414_v21  ;;  %4523 = vbcast.lane.b32.xlu0 %v8335_v23, 258  ;;  %v11345_v28 = vld [vmem:[#allocation90_spill] sm:$0xff] }
 0x529   :  { %v1567_v10 = vmul.f32 1.442695, %v1474_v52  ;;  %v8837_v26 = vrot.slane %v2098_v22, %v8209_v24  ;;  %v1137_v39 = vcombine.high %v8665_v12, %v8665_v12  ;;  %2653 = vst.msk [vmem:[#allocation3] sm:$0x1] %vm643_vm2, %v2589_v13  ;;  %v2796_v31 = vrot.slane %v2795_v16, 1 }
 0x52a   :  { %vm8830_vm10 = vcmp.lt.f32.partialorder %v11339_v37, 0.0004427343  ;;  %v6733_v33 = vpop.eup %6732  ;;  %v3002_v36 = vrot.slane %v3001_v47, 2  ;;  %v3208_v50 = vrot.slane %v3207_v60, 4  ;;  %v2571_v0 = vmul.f32 %v11342_v3, %v8834_v2  ;;  %4479 = vbcast.lane.b32.xlu1 %v8331_v20, 266 }
 0x52b   :  { %v2572_v25 = vmul.f32 %v8215_v7, %v2476_v11  ;;  %6734 = vpow2.f32 %v1567_v10  ;;  %v2128_v22 = vcombine.high %v8804_v27, %v8804_v27  ;;  %v2797_v51 = vadd.f32 %v2796_v31, %v2795_v16  ;;  %v8887_v10 = vpop.permute.xlu1 %2759 }
 0x52c   :  { %v3003_v38 = vadd.f32 %v3002_v36, %v3001_v47  ;;  %v3209_v4 = vadd.f32 %v3208_v50, %v3207_v60  ;;  %v2284_v14 = vrot.slane %v8837_v26, %v7941_v56  ;;  %6736 = vpow2.f32 %v8630_v44  ;;  %4463 = vbcast.lane.b32.xlu0 %v11345_v28, 258  ;;  %v11347_v47 = vld [vmem:[#allocation136_spill] sm:$0xff]  ;;  %v11348_v60 = vld [vmem:[#allocation133_spill] sm:$0xff]  ;;  %11349 = vst [vmem:[#allocation48_spill] sm:$0xff] %v8887_v10  ;;  %v11415_v10 = vld [vmem:[#allocation135_spill] sm:$0xff] }
 0x52d   :  { %v2608_v7 = vsel %vm183_vm0, %v2571_v0, 0.0  ;;  %v2609_v6 = vsel %vm183_vm0, %v2572_v25, 0.0  ;;  %v11343_v27 = vmax.f32 %v8201_v35, 0.0  ;;  %v11344_v52 = vsel %vm8532_vm9, %v8530_v40, %v8527_v58  ;;  %2861 = vst.msk [vmem:[#allocation3 + $0x1] sm:$0x1] %vm643_vm2, %v2797_v51  ;;  %v11350_v36 = vld [vmem:[#allocation76_spill] sm:$0xff] }
 0x52e   :  { %v3004_v57 = vrot.slane %v3003_v38, 1  ;;  %v3210_v59 = vrot.slane %v3209_v4, 2  ;;  %v2610_v43 = vadd.f32 %v2609_v6, %v2608_v7  ;;  %v2668_v1 = vmul.f32 %v6733_v33, %v2476_v11  ;;  %4527 = vbcast.lane.b32.xlu1 %v8335_v23, 266  ;;  %v8885_v11 = vpop.permute.xlu0 %2963  ;;  %v11352_v0 = vld [vmem:[#allocation91_spill] sm:$0xff] }
 0x52f   :  { %v1068_v55 = vadd.f32 %v11344_v52, %v11343_v27  ;;  %v8869_v44 = vrot.slane %v8665_v12, %v7941_v56  ;;  %v8872_v35 = vrot.slane %v2128_v22, %v7941_v56  ;;  %v2416_v21 = vmul.f32 %v2284_v14, %v11346_v49  ;;  %v11356_v49 = vld [vmem:[#allocation92_spill] sm:$0xff] }
 0x530   :  { %v3005_v58 = vadd.f32 %v3004_v57, %v3003_v38  ;;  %v3211_v40 = vadd.f32 %v3210_v59, %v3209_v4  ;;  %v2611_v42 = vrot.slane %v2610_v43, 4  ;;  %v1055_v37 = vsel %vm8830_vm10, %v11348_v60, %v11347_v47  ;;  %4511 = vbcast.lane.b32.xlu0 %v11352_v0, 258  ;;  %v11355_v57 = vld [vmem:[#allocation42_spill] sm:$0xff]  ;;  %v11357_v47 = vld [vmem:[#allocation28_spill] sm:$0xff] }
 0x531   :  { %v1236_v53 = vcombine.high %v1068_v55, %v1068_v55  ;;  %v1243_v46 = vrot.slane %v1068_v55, %v8209_v24  ;;  %v2684_v31 = vadd.f32 %v2668_v1, %v2416_v21  ;;  %v11351_v50 = vmax.f32 %v11350_v36, 0.0  ;;  %v8934_v36 = vpop.permute.xlu1 %2967 }
 0x532   :  { %3069 = vst.msk [vmem:[#allocation3 + $0x2] sm:$0x1] %vm643_vm2, %v3005_v58  ;;  %v3212_v23 = vrot.slane %v3211_v40, 1  ;;  %v2612_v33 = vadd.f32 %v2611_v42, %v2610_v43  ;;  %v11353_v63 = vcombine.high %v8635_v32, %v8635_v32  ;;  %4467 = vbcast.lane.b32.xlu1 %v11345_v28, 266  ;;  %v2418_v59 = vmul.f32 %v8872_v35, %v11355_v57 }
 0x533   :  { %v1250_v9 = vrot.slane %v1236_v53, %v8209_v24  ;;  %v1251_v13 = vcombine.high %v1243_v46, %v1243_v46  ;;  %v8879_v16 = vrot.slane %v1243_v46, %v8209_v24  ;;  %v8892_v3 = vadd.f32 %v1055_v37, %v11351_v50  ;;  %v11358_v37 = vld [vmem:[#allocation41_spill] sm:$0xff]  ;;  %11360 = vst [vmem:[#allocation52_spill] sm:$0xff] %v8934_v36 }
 0x534   :  { %v8899_v25 = vrot.slane %v11353_v63, %v7941_v56  ;;  %v3213_v4 = vadd.f32 %v3212_v23, %v3211_v40  ;;  %v2613_v7 = vrot.slane %v2612_v33, 2  ;;  %4451 = vbcast.lane.b32.xlu0 %v11356_v49, 258  ;;  %v8929_v60 = vmul.f32 %v1068_v55, %v11357_v47 }
 0x535   :  { %v1252_v22 = vcombine.high %v1250_v9, %v1250_v9  ;;  %v8902_v51 = vrot.slane %v1250_v9, %v8209_v24  ;;  %v1273_v38 = vrot.slane %v1251_v13, %v8209_v24  ;;  %v1281_v6 = vcombine.high %v8879_v16, %v8879_v16  ;;  %v6735_v52 = vpop.eup %6734 }
 0x536   :  { %v1187_v27 = vcombine.high %v8892_v3, %v8892_v3  ;;  %v1194_v53 = vrot.slane %v8892_v3, %v8209_v24  ;;  %3277 = vst.msk [vmem:[#allocation3 + $0x3] sm:$0x1] %vm643_vm2, %v3213_v4  ;;  %v2614_v46 = vadd.f32 %v2613_v7, %v2612_v33  ;;  %v2876_v58 = vmul.f32 %v6735_v52, %v2684_v31  ;;  %v6737_v21 = vpop.eup %6736  ;;  %v8932_v33 = vpop.permute.xlu0 %3171  ;;  %v11363_v52 = vld [vmem:[#allocation95_spill] sm:$0xff] }
 0x537   :  { %11354 = vst [vmem:[#allocation49_spill] sm:$0xff] %v8902_v51  ;;  %v1280_v43 = vrot.slane %v1252_v22, %v8209_v24  ;;  %v1283_v1 = vcombine.high %v1273_v38, %v1273_v38  ;;  %v1282_v40 = vcombine.high %v8902_v51, %v8902_v51  ;;  %v8924_v9 = vrot.slane %v1137_v39, %v7941_v56 }
 0x538   :  { %v1201_v42 = vrot.slane %v1187_v27, %v8209_v24  ;;  %v2033_v13 = vcombine.high %v8560_v30, %v8560_v30  ;;  %v2415_v23 = vmul.f32 %v2284_v14, %v11358_v37  ;;  %11359 = vst [vmem:[#allocation50_spill] sm:$0xff] %v8932_v33  ;;  %4515 = vbcast.lane.b32.xlu1 %v11352_v0, 266  ;;  %v2615_v50 = vrot.slane %v2614_v46, 1 }
 0x539   :  { %v8937_v63 = vadd.f32 %v2876_v58, %v2418_v59  ;;  %v1388_v12 = vrot.slane %v1273_v38, %v7941_v56  ;;  %v1392_v39 = vrot.slane %v1281_v6, %v7941_v56  ;;  %v1284_v22 = vcombine.high %v1280_v43, %v1280_v43  ;;  %4499 = vbcast.lane.b32.xlu0 %v11363_v52, 258  ;;  %v11364_v38 = vld [vmem:[#allocation88_spill] sm:$0xff]  ;;  %v11366_v58 = vld [vmem:[#allocation89_spill] sm:$0xff] }
 0x53a   :  { %v8942_v30 = vrot.slane %v1283_v1, %v7941_v56  ;;  %v8945_v55 = vrot.slane %v1280_v43, %v7941_v56  ;;  %v1202_v14 = vcombine.high %v1194_v53, %v1194_v53  ;;  %v2616_v4 = vadd.f32 %v2615_v50, %v2614_v46  ;;  %v8975_v37 = vpop.permute.xlu0 %1835  ;;  %v8977_v50 = vpop.permute.xlu1 %3175 }
 0x53b   :  { %v8948_v7 = vrot.slane %v1282_v40, %v7941_v56  ;;  %v1203_v0 = vcombine.high %v1201_v42, %v1201_v42  ;;  %v8951_v27 = vrot.slane %v1194_v53, %v8209_v24  ;;  %v2988_v6 = vmul.f32 %v11364_v38, %v8937_v63  ;;  %11367 = vst [vmem:[#allocation54_spill] sm:$0xff] %v8977_v50  ;;  %v11386_v50 = vld [vmem:[#allocation58_spill] sm:$0xff] }
 0x53c   :  { %11361 = vst [vmem:[#allocation51_spill] sm:$0xff] %v8945_v55  ;;  %v8957_v57 = vrot.slane %v1201_v42, %v8209_v24  ;;  %v1224_v59 = vrot.slane %v1202_v14, %v8209_v24  ;;  %v2667_v43 = vmul.f32 %v6737_v21, %v8834_v2  ;;  %4455 = vbcast.lane.b32.xlu1 %v11356_v49, 266  ;;  %2656 = vst.msk [vmem:[#allocation3 + $0xc] sm:$0x1] %vm643_vm2, %v2616_v4 }
 0x53d   :  { %11362 = vst [vmem:[#allocation53_spill] sm:$0xff] %v8948_v7  ;;  %v8964_v1 = vmul.f32 %v1388_v12, %v8379_v17  ;;  %v1231_v53 = vrot.slane %v1203_v0, %v8209_v24  ;;  %v1232_v46 = vcombine.high %v8951_v27, %v8951_v27  ;;  %v2780_v40 = vmul.f32 %v11366_v58, %v2684_v31  ;;  %v11372_v58 = vld [vmem:[#allocation77_spill] sm:$0xff] }
 0x53e   :  { %11365 = vst [vmem:[#allocation55_spill] sm:$0xff] %v8957_v57  ;;  %v1233_v42 = vcombine.high %v8957_v57, %v8957_v57  ;;  %v1234_v47 = vcombine.high %v1224_v59, %v1224_v59  ;;  %v1356_v2 = vrot.slane %v1224_v59, %v7941_v56  ;;  %v8973_v21 = vadd.f32 %v2667_v43, %v2415_v23  ;;  %v11369_v43 = vld [vmem:[#allocation26_spill] sm:$0xff] }
 0x53f   :  { %v8980_v14 = vrot.slane %v1284_v22, %v7941_v56  ;;  %v8983_v4 = vmul.f32 %v1388_v12, %v8381_v8  ;;  %v8986_v31 = vmul.f32 %v1392_v39, %v8379_v17  ;;  %v8989_v0 = vmul.f32 %v1392_v39, %v8381_v8  ;;  %5295 = vbcast.lane.b32.xlu0 %v8323_v48, 274 }
 0x540   :  { %v8993_v23 = vsel %vm183_vm0, %v2988_v6, 0.0  ;;  %v1235_v38 = vcombine.high %v1231_v53, %v1231_v53  ;;  %v1360_v59 = vrot.slane %v1232_v46, %v7941_v56  ;;  %v8998_v22 = vmul.f32 %v8892_v3, %v11369_v43  ;;  %4503 = vbcast.lane.b32.xlu1 %v11363_v52, 266  ;;  %v11375_v3 = vld [vmem:[#allocation144_spill] sm:$0xff] }
 0x541   :  { %11368 = vst [vmem:[#allocation57_spill] sm:$0xff] %v8980_v14  ;;  %v9002_v12 = vrot.slane %v1234_v47, %v7941_v56  ;;  %v9005_v39 = vrot.slane %v1231_v53, %v7941_v56  ;;  %v2779_v14 = vmul.f32 %v11372_v58, %v8973_v21  ;;  %v2817_v6 = vsel %vm183_vm0, %v2780_v40, 0.0 }
 0x542   :  { %v9011_v7 = vrot.slane %v1233_v42, %v7941_v56  ;;  %v9014_v46 = vmul.f32 %v1356_v2, %v8379_v17  ;;  %v1476_v52 = vmul.f32 %v11375_v3, %v8381_v8  ;;  %v1473_v47 = vmul.f32 %v8610_v15, %v8379_v17  ;;  %v9031_v15 = vpop.permute.xlu1 %1839 }
 0x543   :  { %11370 = vst [vmem:[#allocation56_spill] sm:$0xff] %v9002_v12  ;;  %11371 = vst [vmem:[#allocation59_spill] sm:$0xff] %v9005_v39  ;;  %v2816_v53 = vsel %vm183_vm0, %v2779_v14, 0.0  ;;  %v1304_v43 = vrot.slane %v8635_v32, %v7941_v56  ;;  %v2047_v58 = vrot.slane %v2033_v13, %v8209_v24  ;;  %v1475_v40 = vmul.f32 %v11375_v3, %v8379_v17  ;;  %v9029_v12 = vpop.permute.xlu0 %1847 }
 0x544   :  { %11373 = vst [vmem:[#allocation66_spill] sm:$0xff] %v9011_v7  ;;  %11374 = vst [vmem:[#allocation69_spill] sm:$0xff] %v9014_v46  ;;  %5519 = vbcast.lane.b32.xlu0 %v8331_v20, 274  ;;  %v2818_v42 = vadd.f32 %v2817_v6, %v2816_v53  ;;  %v1571_v7 = vmul.f32 1.442695, %v1476_v52  ;;  %v2130_v55 = vcombine.high %v8837_v26, %v8837_v26  ;;  %5299 = vbcast.lane.b32.xlu1 %v8323_v48, 282 }
 0x545   :  { %v1565_v51 = vmul.f32 1.442695, %v1473_v47  ;;  %11376 = vst [vmem:[#allocation68_spill] sm:$0xff] %v9031_v15  ;;  %v9035_v32 = vmul.f32 %v1356_v2, %v8381_v8  ;;  %v1453_v13 = vmul.f32 %v1304_v43, %v8379_v17  ;;  %v2063_v14 = vrot.slane %v2047_v58, %v8209_v24 }
 0x546   :  { %v1455_v6 = vmul.f32 %v8869_v44, %v8379_v17  ;;  %v9042_v3 = vrot.slane %v1235_v38, %v7941_v56  ;;  %v2819_v26 = vrot.slane %v2818_v42, 4  ;;  %6738 = vpow2.f32 %v1571_v7 }
 0x547   :  { %11377 = vst [vmem:[#allocation71_spill] sm:$0xff] %v9035_v32  ;;  %v1569_v52 = vmul.f32 1.442695, %v1475_v40  ;;  %v9045_v47 = vmul.f32 %v1360_v59, %v8379_v17  ;;  %v9048_v48 = vmul.f32 %v1360_v59, %v8381_v8  ;;  %6740 = vpow2.f32 %v1565_v51 }
 0x548   :  { %11378 = vst [vmem:[#allocation73_spill] sm:$0xff] %v9042_v3  ;;  %v1525_v2 = vmul.f32 1.442695, %v1453_v13  ;;  %5743 = vbcast.lane.b32.xlu0 %v11345_v28, 274  ;;  %v2820_v53 = vadd.f32 %v2819_v26, %v2818_v42  ;;  %v2292_v46 = vrot.slane %v2130_v55, %v7941_v56  ;;  %v2049_v39 = vcombine.high %v2047_v58, %v2047_v58  ;;  %v9058_v42 = vpop.permute.xlu0 %1859  ;;  %v9060_v55 = vpop.permute.xlu1 %1851  ;;  %v11383_v26 = vld [vmem:[#allocation43_spill] sm:$0xff] }
 0x549   :  { %11379 = vst [vmem:[#allocation70_spill] sm:$0xff] %v9045_v47  ;;  %11380 = vst [vmem:[#allocation75_spill] sm:$0xff] %v9048_v48  ;;  %v1454_v38 = vmul.f32 %v1304_v43, %v8381_v8  ;;  %5523 = vbcast.lane.b32.xlu1 %v8331_v20, 282  ;;  %v2248_v7 = vrot.slane %v2063_v14, %v7941_v56  ;;  %v1529_v40 = vmul.f32 1.442695, %v1455_v6 }
 0x54a   :  { %6742 = vpow2.f32 %v1525_v2  ;;  %v1456_v59 = vmul.f32 %v8869_v44, %v8381_v8  ;;  %v2821_v3 = vrot.slane %v2820_v53, 2  ;;  %v2077_v51 = vrot.slane %v2049_v39, %v8209_v24  ;;  %11381 = vst [vmem:[#allocation72_spill] sm:$0xff] %v9058_v42  ;;  %11382 = vst [vmem:[#allocation39_spill] sm:$0xff] %v9060_v55  ;;  %v11384_v2 = vld [vmem:[#allocation44_spill] sm:$0xff]  ;;  %v11398_v55 = vld [vmem:[#allocation67_spill] sm:$0xff] }
 0x54b   :  { %6744 = vpow2.f32 %v1569_v52  ;;  %v1527_v13 = vmul.f32 1.442695, %v1454_v38  ;;  %v1458_v20 = vmul.f32 %v8899_v25, %v8381_v8  ;;  %v2079_v43 = vcombine.high %v2063_v14, %v2063_v14 }
 0x54c   :  { %v1531_v58 = vmul.f32 1.442695, %v1456_v59  ;;  %v1460_v6 = vmul.f32 %v8924_v9, %v8381_v8  ;;  %5967 = vbcast.lane.b32.xlu0 %v11356_v49, 274  ;;  %v2822_v44 = vadd.f32 %v2821_v3, %v2820_v53  ;;  %v2417_v52 = vmul.f32 %v8872_v35, %v11383_v26  ;;  %v11385_v59 = vld [vmem:[#allocation45_spill] sm:$0xff]  ;;  %v9077_v53 = vpop.permute.xlu0 %1871  ;;  %v9079_v35 = vpop.permute.xlu1 %1863 }
 0x54d   :  { %v2252_v39 = vrot.slane %v2077_v51, %v7941_v56  ;;  %6746 = vpow2.f32 %v1527_v13  ;;  %5747 = vbcast.lane.b32.xlu1 %v11345_v28, 282  ;;  %v2420_v38 = vmul.f32 %v2292_v46, %v11384_v2  ;;  %v9073_v47 = vmul.f32 %v2292_v46, %v11385_v59  ;;  %11387 = vst [vmem:[#allocation38_spill] sm:$0xff] %v9077_v53  ;;  %v11389_v13 = vld [vmem:[#allocation61_spill] sm:$0xff]  ;;  %v11390_v2 = vld [vmem:[#allocation96_spill] sm:$0xff]  ;;  %v11397_v53 = vld [vmem:[#allocation62_spill] sm:$0xff] }
 0x54e   :  { %6748 = vpow2.f32 %v1529_v40  ;;  %v2081_v14 = vcombine.high %v2077_v51, %v2077_v51  ;;  %v2823_v48 = vrot.slane %v2822_v44, 1  ;;  %v2397_v57 = vmul.f32 %v2248_v7, %v11386_v50  ;;  %11388 = vst [vmem:[#allocation74_spill] sm:$0xff] %v9079_v35  ;;  %v11391_v59 = vld [vmem:[#allocation60_spill] sm:$0xff] }
 0x54f   :  { %v1535_v42 = vmul.f32 1.442695, %v1458_v20  ;;  %v2256_v3 = vrot.slane %v2079_v43, %v7941_v56  ;;  %6750 = vpow2.f32 %v1531_v58  ;;  %v2398_v28 = vmul.f32 %v2248_v7, %v11389_v13  ;;  %v11392_v20 = vld [vmem:[#allocation63_spill] sm:$0xff] }
 0x550   :  { %v1539_v26 = vmul.f32 1.442695, %v1460_v6  ;;  %v1457_v46 = vmul.f32 %v8899_v25, %v8379_v17  ;;  %5327 = vbcast.lane.b32.xlu0 %v11390_v2, 274  ;;  %v6739_v40 = vpop.eup %6738  ;;  %v2824_v51 = vadd.f32 %v2823_v48, %v2822_v44  ;;  %v2399_v50 = vmul.f32 %v2252_v39, %v11391_v59  ;;  %v11393_v44 = vld [vmem:[#allocation65_spill] sm:$0xff] }
 0x551   :  { %v9087_v36 = vmul.f32 %v2252_v39, %v11392_v20  ;;  %v2187_v43 = vrot.slane %v8929_v60, %v8209_v24  ;;  %5971 = vbcast.lane.b32.xlu1 %v11356_v49, 282  ;;  %v6741_v58 = vpop.eup %6740  ;;  %v3084_v7 = vmul.f32 %v6739_v40, %v8937_v63  ;;  %v2260_v6 = vrot.slane %v2081_v14, %v7941_v56  ;;  %v9104_v49 = vld [vmem:[#allocation12] ss:$0 sm:$0xff]  ;;  %v3885_v63 = vld [vmem:[#allocation14] sm:$0xff]  ;;  %v9106_v40 = vpop.permute.xlu0 %1883 }
 0x552   :  { %v1533_v25 = vmul.f32 1.442695, %v1457_v46  ;;  %v1459_v13 = vmul.f32 %v8924_v9, %v8379_v17  ;;  %2864 = vst.msk [vmem:[#allocation3 + $0xd] sm:$0x1] %vm643_vm2, %v2824_v51  ;;  %v2875_v48 = vmul.f32 %v6741_v58, %v8973_v21  ;;  %6752 = vpow2.f32 %v1535_v42  ;;  %11394 = vst [vmem:[#allocation90_spill] sm:$0xff] %v9106_v40  ;;  %v9108_v14 = vpop.permute.xlu1 %1875  ;;  %v11396_v21 = vld [vmem:[#allocation97_spill] sm:$0xff] }
 0x553   :  { %v9099_v39 = vmul.f32 %v2256_v3, %v11393_v44  ;;  %v9102_v59 = vrot.slane %v2187_v43, %v8209_v24  ;;  %11395 = vst [vmem:[#allocation40_spill] sm:$0xff] %v9108_v14  ;;  %v3100_v9 = vadd.f32 %v3084_v7, %v2420_v38  ;;  %v2195_v20 = vcombine.high %v2187_v43, %v2187_v43  ;;  %v11399_v14 = vld [vmem:[#allocation64_spill] sm:$0xff]  ;;  %v11400_v38 = vld [vmem:[#allocation130_spill] sm:$0xff] }
 0x554   :  { %v6743_v46 = vpop.eup %6742  ;;  %6754 = vpow2.f32 %v1533_v25  ;;  %v1537_v51 = vmul.f32 1.442695, %v1459_v13  ;;  %5551 = vbcast.lane.b32.xlu0 %v11396_v21, 274  ;;  %v2891_v58 = vadd.f32 %v2875_v48, %v2417_v52  ;;  %v9112_v35 = vmul.f32 %v2256_v3, %v11397_v53  ;;  %v11401_v52 = vld [vmem:[#allocation93_spill] sm:$0xff] }
 0x555   :  { %v6745_v42 = vpop.eup %6744  ;;  %v2455_v44 = vmul.f32 0.0, %v6743_v46  ;;  %6756 = vpow2.f32 %v1539_v26  ;;  %5331 = vbcast.lane.b32.xlu1 %v11390_v2, 282  ;;  %v9116_v40 = vmul.f32 %v2260_v6, %v11398_v55  ;;  %v9119_v33 = vmul.f32 %v2260_v6, %v11399_v14  ;;  %v11402_v26 = vld [vmem:[#allocation94_spill] sm:$0xff]  ;;  %v9127_v46 = vpop.permute.xlu0 %1895 }
 0x556   :  { %v9123_v43 = vadd.f32 %v11400_v38, %v9104_v49  ;;  %v3887_v7 = vmul.f32 1.442695, %v3885_v63  ;;  %v3196_v13 = vmul.f32 %v11401_v52, %v3100_v9  ;;  %v2987_v48 = vmul.f32 %v11402_v26, %v2891_v58  ;;  %11403 = vst [vmem:[#allocation136_spill] sm:$0xff] %v9127_v46  ;;  %v9129_v2 = vpop.permute.xlu1 %1887  ;;  %v11405_v14 = vld [vmem:[#allocation98_spill] sm:$0xff] }
 0x557   :  { %v6747_v25 = vpop.eup %6746  ;;  %v2471_v3 = vadd.f32 %v2455_v44, %v2397_v57  ;;  %v3083_v53 = vmul.f32 %v6745_v42, %v2891_v58  ;;  %11404 = vst [vmem:[#allocation133_spill] sm:$0xff] %v9129_v2  ;;  %v9133_v6 = vrot.slane %v9102_v59, %v7941_v56  ;;  %6758 = vpow2.f32 %v1537_v51  ;;  %v11406_v57 = vld [vmem:[#allocation109_spill] sm:$0xff]  ;;  %v11407_v46 = vld [vmem:[#allocation110_spill] sm:$0xff] }
 0x558   :  { %v6749_v55 = vpop.eup %6748  ;;  %v2456_v32 = vmul.f32 0.0, %v6747_v25  ;;  %v9136_v63 = vrot.slane %v2195_v20, %v8209_v24  ;;  %5775 = vbcast.lane.b32.xlu0 %v11405_v14, 274  ;;  %v3024_v9 = vsel %vm183_vm0, %v2987_v48, 0.0  ;;  %v3233_v26 = vsel %vm183_vm0, %v3196_v13, 0.0  ;;  %v11412_v20 = vld [vmem:[#allocation126_spill] sm:$0xff] }
 0x559   :  { %v2567_v42 = vmul.f32 %v11406_v57, %v2471_v3  ;;  %v3099_v58 = vadd.f32 %v3083_v53, %v9073_v47  ;;  %v2663_v44 = vmul.f32 %v6749_v55, %v2471_v3  ;;  %5555 = vbcast.lane.b32.xlu1 %v11396_v21, 282  ;;  %v6751_v38 = vpop.eup %6750  ;;  %v3026_v25 = vadd.f32 %v8993_v23, %v3024_v9  ;;  %v9150_v47 = vpop.permute.xlu0 %1907  ;;  %v11411_v55 = vld [vmem:[#allocation99_spill] sm:$0xff] }
 0x55a   :  { %v2472_v52 = vadd.f32 %v2456_v32, %v2398_v28  ;;  %v3822_v57 = vand.u32 2147483647, %v9123_v43  ;;  %11408 = vst [vmem:[#allocation76_spill] sm:$0xff] %v9150_v47  ;;  %v9152_v3 = vpop.permute.xlu1 %1899  ;;  %v11410_v32 = vld [vmem:[#allocation127_spill] sm:$0xff]  ;;  %6760 = vpow2.f32 %v3887_v7 }
 0x55b   :  { %v3195_v48 = vmul.f32 %v11407_v46, %v3099_v58  ;;  %v2679_v2 = vadd.f32 %v2663_v44, %v2399_v50  ;;  %11409 = vst [vmem:[#allocation91_spill] sm:$0xff] %v9152_v3  ;;  %v3027_v21 = vrot.slane %v3026_v25, 4  ;;  %v2590_v23 = vsel %vm183_vm0, %v2567_v42, 0.0 }
 0x55c   :  { %v2568_v28 = vmul.f32 %v11410_v32, %v2472_v52  ;;  %v2664_v53 = vmul.f32 %v6751_v38, %v2472_v52  ;;  %5999 = vbcast.lane.b32.xlu0 %v11411_v55, 274  ;;  %v6753_v9 = vpop.eup %6752  ;;  %v3826_v50 = vsub.f32 0.0, %v3822_v57 }
 0x55d   :  { %v3232_v13 = vsel %vm183_vm0, %v3195_v48, 0.0  ;;  %v2775_v46 = vmul.f32 %v11412_v20, %v2679_v2  ;;  %5779 = vbcast.lane.b32.xlu1 %v11405_v14, 282  ;;  %v3028_v44 = vadd.f32 %v3027_v21, %v3026_v25  ;;  %v9163_v48 = vpop.permute.xlu0 %1919 }
 0x55e   :  { %v6755_v58 = vpop.eup %6754  ;;  %v3234_v51 = vadd.f32 %v3233_v26, %v3232_v13  ;;  %v2591_v47 = vsel %vm183_vm0, %v2568_v28, 0.0  ;;  %v2680_v42 = vadd.f32 %v2664_v53, %v9087_v36  ;;  %v3831_v15 = vmul.f32 1.442695, %v3826_v50  ;;  %11413 = vst [vmem:[#allocation42_spill] sm:$0xff] %v9163_v48  ;;  %v9165_v20 = vpop.permute.xlu1 %1911  ;;  %v11416_v26 = vld [vmem:[#allocation100_spill] sm:$0xff]  ;;  %v11417_v28 = vld [vmem:[#allocation141_spill] sm:$0xff] }
 0x55f   :  { %v6757_v32 = vpop.eup %6756  ;;  %v2798_v38 = vsel %vm183_vm0, %v2775_v46, 0.0  ;;  %v2592_v52 = vadd.f32 %v2591_v47, %v2590_v23  ;;  %v2871_v3 = vmul.f32 %v6755_v58, %v2679_v2  ;;  %11414 = vst [vmem:[#allocation92_spill] sm:$0xff] %v9165_v20  ;;  %v3029_v7 = vrot.slane %v3028_v44, 2  ;;  %v11418_v50 = vld [vmem:[#allocation140_spill] sm:$0xff]  ;;  %v11421_v48 = vld [vmem:[#allocation134_spill] sm:$0xff] }
 0x560   :  { %v3235_v57 = vrot.slane %v3234_v51, 4  ;;  %v2872_v14 = vmul.f32 %v6753_v9, %v2680_v42  ;;  %v2776_v25 = vmul.f32 %v11415_v10, %v2680_v42  ;;  %5307 = vbcast.lane.b32.xlu0 %v11416_v26, 274  ;;  %v9172_v53 = vmul.f32 %v9133_v6, %v11417_v28 }
 0x561   :  { %v2593_v21 = vrot.slane %v2592_v52, 4  ;;  %v2887_v36 = vadd.f32 %v2871_v3, %v9112_v35  ;;  %6762 = vpow2.f32 %v3831_v15  ;;  %6003 = vbcast.lane.b32.xlu1 %v11411_v55, 282  ;;  %v6759_v2 = vpop.eup %6758  ;;  %v3030_v47 = vadd.f32 %v3029_v7, %v3028_v44  ;;  %v9178_v35 = vpop.permute.xlu0 %2527  ;;  %v11422_v44 = vld [vmem:[#allocation101_spill] sm:$0xff] }
 0x562   :  { %v3236_v23 = vadd.f32 %v3235_v57, %v3234_v51  ;;  %v2888_v13 = vadd.f32 %v2872_v14, %v9099_v39  ;;  %v2799_v9 = vsel %vm183_vm0, %v2776_v25, 0.0  ;;  %11419 = vst [vmem:[#allocation28_spill] sm:$0xff] %v9178_v35  ;;  %v9180_v3 = vpop.permute.xlu1 %1923 }
 0x563   :  { %v2594_v10 = vadd.f32 %v2593_v21, %v2592_v52  ;;  %v2800_v46 = vadd.f32 %v2799_v9, %v2798_v38  ;;  %v2983_v58 = vmul.f32 %v11418_v50, %v2887_v36  ;;  %v3079_v42 = vmul.f32 %v6759_v2, %v2887_v36  ;;  %11420 = vst [vmem:[#allocation41_spill] sm:$0xff] %v9180_v3  ;;  %v3886_v52 = vld [vmem:[#allocation14 + $0x8] sm:$0xff] }
 0x564   :  { %v3031_v28 = vrot.slane %v3030_v47, 1  ;;  %v3237_v15 = vrot.slane %v3236_v23, 2  ;;  %v2984_v55 = vmul.f32 %v11421_v48, %v2888_v13  ;;  %v3080_v20 = vmul.f32 %v6757_v32, %v2888_v13  ;;  %5531 = vbcast.lane.b32.xlu0 %v11422_v44, 274  ;;  %v6761_v36 = vpop.eup %6760  ;;  %v11423_v13 = vld [vmem:[#allocation142_spill] sm:$0xff] }
 0x565   :  { %v2595_v51 = vrot.slane %v2594_v10, 2  ;;  %v2801_v39 = vrot.slane %v2800_v46, 4  ;;  %v3006_v7 = vsel %vm183_vm0, %v2983_v58, 0.0  ;;  %v3095_v38 = vadd.f32 %v3079_v42, %v9119_v33  ;;  %5311 = vbcast.lane.b32.xlu1 %v11416_v26, 282  ;;  %v9190_v50 = vpop.permute.xlu0 %2735  ;;  %v11426_v26 = vld [vmem:[#allocation139_spill] sm:$0xff] }
 0x566   :  { %v3032_v57 = vadd.f32 %v3031_v28, %v3030_v47  ;;  %v3238_v14 = vadd.f32 %v3237_v15, %v3236_v23  ;;  %v3007_v25 = vsel %vm183_vm0, %v2984_v55, 0.0  ;;  %v3096_v21 = vadd.f32 %v3080_v20, %v9116_v40  ;;  %11424 = vst [vmem:[#allocation95_spill] sm:$0xff] %v9190_v50  ;;  %v9192_v58 = vpop.permute.xlu1 %2531  ;;  %v11427_v40 = vld [vmem:[#allocation102_spill] sm:$0xff] }
 0x567   :  { %v2596_v48 = vadd.f32 %v2595_v51, %v2594_v10  ;;  %v2802_v32 = vadd.f32 %v2801_v39, %v2800_v46  ;;  %v3008_v2 = vadd.f32 %v3007_v25, %v3006_v7  ;;  %v3191_v9 = vmul.f32 %v11423_v13, %v3095_v38  ;;  %11425 = vst [vmem:[#allocation88_spill] sm:$0xff] %v9192_v58  ;;  %v11429_v7 = vld [vmem:[#allocation132_spill] sm:$0xff] }
 0x568   :  { %3072 = vst.msk [vmem:[#allocation3 + $0xe] sm:$0x1] %vm643_vm2, %v3032_v57  ;;  %v3239_v33 = vrot.slane %v3238_v14, 1  ;;  %v3192_v47 = vmul.f32 %v11426_v26, %v3096_v21  ;;  %v2332_v23 = vrot.slane %v9136_v63, %v7941_v56  ;;  %v3889_v42 = vmul.f32 1.442695, %v3886_v52  ;;  %5755 = vbcast.lane.b32.xlu0 %v11427_v40, 274 }
 0x569   :  { %v2597_v20 = vrot.slane %v2596_v48, 1  ;;  %v2803_v10 = vrot.slane %v2802_v32, 2  ;;  %v3009_v46 = vrot.slane %v3008_v2, 4  ;;  %v3214_v28 = vsel %vm183_vm0, %v3191_v9, 0.0  ;;  %5535 = vbcast.lane.b32.xlu1 %v11422_v44, 282  ;;  %v9212_v9 = vpop.permute.xlu0 %2947 }
 0x56a   :  { %v3240_v15 = vadd.f32 %v3239_v33, %v3238_v14  ;;  %v3215_v55 = vsel %vm183_vm0, %v3192_v47, 0.0  ;;  %v11428_v51 = vcombine.high %v9102_v59, %v9102_v59  ;;  %v9210_v38 = vadd.f32 %v9104_v49, %v11429_v7  ;;  %11430 = vst [vmem:[#allocation89_spill] sm:$0xff] %v9212_v9  ;;  %v9214_v44 = vpop.permute.xlu1 %2739  ;;  %v11432_v14 = vld [vmem:[#allocation146_spill] sm:$0xff]  ;;  %v11433_v47 = vld [vmem:[#allocation103_spill] sm:$0xff] }
 0x56b   :  { %v6763_v52 = vpop.eup %6762  ;;  %v2598_v57 = vadd.f32 %v2597_v20, %v2596_v48  ;;  %v2804_v25 = vadd.f32 %v2803_v10, %v2802_v32  ;;  %v3010_v21 = vadd.f32 %v3009_v46, %v3008_v2  ;;  %v3216_v13 = vadd.f32 %v3215_v55, %v3214_v28  ;;  %11431 = vst [vmem:[#allocation26_spill] sm:$0xff] %v9214_v44  ;;  %v11434_v10 = vld [vmem:[#allocation145_spill] sm:$0xff]  ;;  %v11435_v28 = vld [vmem:[#allocation147_spill] sm:$0xff]  ;;  %v11439_v9 = vld [vmem:[#allocation138_spill] sm:$0xff] }
 0x56c   :  { %v9206_v39 = vrot.slane %v11428_v51, %v7941_v56  ;;  %3280 = vst.msk [vmem:[#allocation3 + $0xf] sm:$0x1] %vm643_vm2, %v3240_v15  ;;  %v9219_v59 = vmul.f32 %v9133_v6, %v11432_v14  ;;  %v3846_v33 = vadd.f32 1.0, %v6763_v52  ;;  %v3849_v26 = vmul.f32 -0.5, %v6763_v52  ;;  %5979 = vbcast.lane.b32.xlu0 %v11433_v47, 274 }
 0x56d   :  { %6764 = vpow2.f32 %v3889_v42  ;;  %2654 = vst.msk [vmem:[#allocation3 + $0x4] sm:$0x1] %vm643_vm2, %v2598_v57  ;;  %v2805_v48 = vrot.slane %v2804_v25, 1  ;;  %v3011_v32 = vrot.slane %v3010_v21, 2  ;;  %v3217_v2 = vrot.slane %v3216_v13, 4  ;;  %5759 = vbcast.lane.b32.xlu1 %v11427_v40, 282  ;;  %v9234_v57 = vpop.permute.xlu0 %3155 }
 0x56e   :  { %v3821_v20 = vand.u32 2147483647, %v9210_v38  ;;  %v9226_v46 = vmul.f32 %v2332_v23, %v11434_v10  ;;  %v9230_v6 = vmul.f32 %v9206_v39, %v11435_v28  ;;  %6766 = vlog2.f32 %v3846_v33  ;;  %11436 = vst [vmem:[#allocation77_spill] sm:$0xff] %v9234_v57  ;;  %v9236_v14 = vpop.permute.xlu1 %2943  ;;  %v11440_v33 = vld [vmem:[#allocation104_spill] sm:$0xff] }
 0x56f   :  { %v2227_v42 = vcombine.high %v9136_v63, %v9136_v63  ;;  %v2806_v15 = vadd.f32 %v2805_v48, %v2804_v25  ;;  %v3012_v55 = vadd.f32 %v3011_v32, %v3010_v21  ;;  %v3218_v51 = vadd.f32 %v3217_v2, %v3216_v13  ;;  %11437 = vst [vmem:[#allocation144_spill] sm:$0xff] %v9236_v14  ;;  %v11441_v13 = vld [vmem:[#allocation143_spill] sm:$0xff] }
 0x570   :  { %v3825_v7 = vsub.f32 0.0, %v3821_v20  ;;  %v3850_v40 = vadd.f32 1.0, %v3849_v26  ;;  %v3852_v50 = vand.u32 2147483647, %v6763_v52  ;;  %v9238_v10 = vsub.f32 0.0, %v6761_v36  ;;  %4775 = vbcast.lane.b32.xlu0 %v11440_v33, 258 }
 0x571   :  { %v9242_v28 = vadd.f32 %v11439_v9, %v9104_v49  ;;  %2862 = vst.msk [vmem:[#allocation3 + $0x5] sm:$0x1] %vm643_vm2, %v2806_v15  ;;  %v3013_v63 = vrot.slane %v3012_v55, 1  ;;  %v3219_v25 = vrot.slane %v3218_v51, 2  ;;  %v9248_v48 = vadd.f32 %v9104_v49, %v11441_v13  ;;  %5983 = vbcast.lane.b32.xlu1 %v11433_v47, 282  ;;  %v11442_v26 = vld [vmem:[#allocation148_spill] sm:$0xff]  ;;  %v9259_v49 = vpop.permute.xlu0 %2559 }
 0x572   :  { %11438 = vst [vmem:[#allocation43_spill] sm:$0xff] %v9238_v10  ;;  %v3829_v21 = vmul.f32 1.442695, %v3825_v7  ;;  %v9252_v36 = vmul.f32 %v2332_v23, %v11442_v26  ;;  %v2340_v32 = vrot.slane %v2227_v42, %v7941_v56  ;;  %v2180_v2 = vcombine.high %v8929_v60, %v8929_v60  ;;  %11443 = vst [vmem:[#allocation44_spill] sm:$0xff] %v9259_v49  ;;  %v9261_v13 = vpop.permute.xlu1 %3151  ;;  %v11445_v47 = vld [vmem:[#allocation83_spill] sm:$0xff]  ;;  %v11448_v60 = vld [vmem:[#allocation105_spill] sm:$0xff] }
 0x573   :  { %v3824_v9 = vand.u32 2147483647, %v9242_v28  ;;  %v3288_v20 = vld [vmem:[#allocation3 + $0xc] sm:$0xf]  ;;  %v3014_v15 = vadd.f32 %v3013_v63, %v3012_v55  ;;  %v3220_v14 = vadd.f32 %v3219_v25, %v3218_v51  ;;  %11444 = vst [vmem:[#allocation45_spill] sm:$0xff] %v9261_v13  ;;  %v3851_v51 = vmul.f32 %v6763_v52, %v3850_v40 }
 0x574   :  { %6768 = vpow2.f32 %v3829_v21  ;;  %v3311_v23 = vadd.f32 %v11445_v47, %v3288_v20  ;;  %vm9264_vm11 = vcmp.lt.f32.partialorder %v3852_v50, 0.0004427343  ;;  %v3823_v57 = vand.u32 2147483647, %v9248_v48  ;;  %4823 = vbcast.lane.b32.xlu0 %v11448_v60, 258  ;;  %v11449_v21 = vld [vmem:[#allocation149_spill] sm:$0xff] }
 0x575   :  { %v3828_v42 = vsub.f32 0.0, %v3824_v9  ;;  %3070 = vst.msk [vmem:[#allocation3 + $0x6] sm:$0x1] %vm643_vm2, %v3014_v15  ;;  %v3221_v55 = vrot.slane %v3220_v14, 1  ;;  %v2194_v63 = vrot.slane %v2180_v2, %v8209_v24  ;;  %v1384_v25 = vrot.slane %v8879_v16, %v7941_v56  ;;  %4779 = vbcast.lane.b32.xlu1 %v11440_v33, 266  ;;  %v11450_v47 = vld [vmem:[#allocation150_spill] sm:$0xff]  ;;  %v9285_v13 = vpop.permute.xlu0 %2767 }
 0x576   :  { %3319 = vst.msk [vmem:[#allocation3 + $0xc] sm:$0xf] %vm610_vm1, %v3311_v23  ;;  %v9277_v9 = vmul.f32 %v2340_v32, %v11449_v21  ;;  %v9281_v7 = vmul.f32 %v9206_v39, %v11450_v47  ;;  %v3827_v15 = vsub.f32 0.0, %v3823_v57  ;;  %11451 = vst [vmem:[#allocation58_spill] sm:$0xff] %v9285_v13  ;;  %v9287_v49 = vpop.permute.xlu1 %2563  ;;  %v11453_v39 = vld [vmem:[#allocation106_spill] sm:$0xff]  ;;  %v1499_v26 = vmul.f32 %v8942_v30, %v8379_v17 }
 0x577   :  { %v6765_v50 = vpop.eup %6764  ;;  %v3835_v20 = vmul.f32 1.442695, %v3828_v42  ;;  %v3222_v52 = vadd.f32 %v3221_v55, %v3220_v14  ;;  %v2210_v40 = vrot.slane %v2194_v63, %v8209_v24  ;;  %v2196_v2 = vcombine.high %v2194_v63, %v2194_v63  ;;  %11452 = vst [vmem:[#allocation61_spill] sm:$0xff] %v9287_v49 }
 0x578   :  { %v1493_v16 = vmul.f32 %v1384_v25, %v8379_v17  ;;  %v6767_v23 = vpop.eup %6766  ;;  %v3833_v42 = vmul.f32 1.442695, %v3827_v15  ;;  %v1494_v35 = vmul.f32 %v1384_v25, %v8381_v8  ;;  %4763 = vbcast.lane.b32.xlu0 %v11453_v39, 258  ;;  %v9296_v47 = vsub.f32 0.0, %v6765_v50 }
 0x579   :  { %6770 = vpow2.f32 %v3835_v20  ;;  %3278 = vst.msk [vmem:[#allocation3 + $0x7] sm:$0x1] %vm643_vm2, %v3222_v52  ;;  %v3848_v57 = vmul.f32 0.6931472, %v6767_v23  ;;  %v2344_v14 = vrot.slane %v2210_v40, %v7941_v56  ;;  %v2224_v55 = vrot.slane %v2196_v2, %v8209_v24  ;;  %4827 = vbcast.lane.b32.xlu1 %v11448_v60, 266  ;;  %v11455_v20 = vld [vmem:[#allocation47_spill] sm:$0xff]  ;;  %v9306_v2 = vpop.permute.xlu0 %2975 }
 0x57a   :  { %v2226_v63 = vcombine.high %v2210_v40, %v2210_v40  ;;  %11454 = vst [vmem:[#allocation96_spill] sm:$0xff] %v9296_v47  ;;  %v9300_v15 = vmul.f32 %v2340_v32, %v11455_v20  ;;  %v1605_v25 = vmul.f32 1.442695, %v1493_v16  ;;  %6772 = vpow2.f32 %v3833_v42  ;;  %11456 = vst [vmem:[#allocation60_spill] sm:$0xff] %v9306_v2  ;;  %v9308_v40 = vpop.permute.xlu1 %2771  ;;  %v11460_v42 = vld [vmem:[#allocation46_spill] sm:$0xff] }
 0x57b   :  { %v3854_v13 = vsel %vm9264_vm11, %v3851_v51, %v3848_v57  ;;  %v2348_v52 = vrot.slane %v2224_v55, %v7941_v56  ;;  %v1609_v23 = vmul.f32 1.442695, %v8964_v1  ;;  %11457 = vst [vmem:[#allocation63_spill] sm:$0xff] %v9308_v40  ;;  %v11458_v60 = vmax.f32 %v9123_v43, 0.0  ;;  %v11459_v51 = vld [vmem:[#allocation107_spill] sm:$0xff] }
 0x57c   :  { %v9312_v21 = vmul.f32 1.442695, %v1494_v35  ;;  %v9315_v32 = vmul.f32 1.442695, %v8986_v31  ;;  %4811 = vbcast.lane.b32.xlu0 %v11459_v51, 258  ;;  %v9321_v1 = vmul.f32 %v2344_v14, %v11460_v42  ;;  %v9324_v57 = vmul.f32 %v2344_v14, %v8752_v62 }
 0x57d   :  { %v3874_v50 = vadd.f32 %v3854_v13, %v11458_v60  ;;  %v9327_v43 = vrot.slane %v2226_v63, %v7941_v56  ;;  %v9330_v35 = vmul.f32 1.442695, %v8983_v4  ;;  %4767 = vbcast.lane.b32.xlu1 %v11453_v39, 266  ;;  %6774 = vpow2.f32 %v1605_v25  ;;  %v9340_v63 = vpop.permute.xlu0 %3183  ;;  %v11468_v25 = vld [vmem:[#allocation108_spill] sm:$0xff] }
 0x57e   :  { %v6769_v16 = vpop.eup %6768  ;;  %11461 = vst [vmem:[#allocation65_spill] sm:$0xff] %v9321_v1  ;;  %11462 = vst [vmem:[#allocation97_spill] sm:$0xff] %v9324_v57  ;;  %v9335_v42 = vmul.f32 %v2348_v52, %v8750_v19  ;;  %v9338_v62 = vmul.f32 %v2348_v52, %v8774_v41  ;;  %v2228_v14 = vcombine.high %v2224_v55, %v2224_v55  ;;  %v9342_v40 = vpop.permute.xlu1 %2979  ;;  %6776 = vpow2.f32 %v1609_v23  ;;  %v11469_v19 = vld [vmem:[#allocation82_spill] sm:$0xff]  ;;  %v11470_v1 = vld [vmem:[#allocation33_spill] sm:$0xff] }
 0x57f   :  { %v3946_v31 = vcombine.high %v3874_v50, %v3874_v50  ;;  %v3953_v13 = vrot.slane %v3874_v50, %v8209_v24  ;;  %v3837_v20 = vadd.f32 1.0, %v6769_v16  ;;  %v3840_v60 = vmul.f32 -0.5, %v6769_v16  ;;  %11465 = vst [vmem:[#allocation64_spill] sm:$0xff] %v9340_v63  ;;  %11466 = vst [vmem:[#allocation130_spill] sm:$0xff] %v9342_v40 }
 0x580   :  { %11463 = vst [vmem:[#allocation62_spill] sm:$0xff] %v9335_v42  ;;  %11464 = vst [vmem:[#allocation67_spill] sm:$0xff] %v9338_v62  ;;  %v3286_v4 = vld [vmem:[#allocation3 + $0x4] sm:$0xf]  ;;  %4751 = vbcast.lane.b32.xlu0 %v11468_v25, 258  ;;  %v9351_v41 = vmul.f32 %v3874_v50, %v11470_v1  ;;  %v11476_v62 = vld [vmem:[#allocation111_spill] sm:$0xff] }
 0x581   :  { %v9345_v2 = vrot.slane %v3946_v31, %v8209_v24  ;;  %v3961_v49 = vcombine.high %v3953_v13, %v3953_v13  ;;  %v3969_v57 = vrot.slane %v3953_v13, %v8209_v24  ;;  %v3309_v42 = vadd.f32 %v11469_v19, %v3286_v4  ;;  %4815 = vbcast.lane.b32.xlu1 %v11459_v51, 266  ;;  %v9367_v51 = vpop.permute.xlu0 %2539 }
 0x582   :  { %11471 = vst [vmem:[#allocation94_spill] sm:$0xff] %v9351_v41  ;;  %6778 = vlog2.f32 %v3837_v20  ;;  %v9353_v55 = vmul.f32 1.442695, %v1499_v26  ;;  %v3843_v13 = vand.u32 2147483647, %v6769_v16  ;;  %v3841_v50 = vadd.f32 1.0, %v3840_v60  ;;  %v9369_v20 = vpop.permute.xlu1 %3187 }
 0x583   :  { %11467 = vst [vmem:[#allocation93_spill] sm:$0xff] %v9345_v2  ;;  %v6771_v52 = vpop.eup %6770  ;;  %v3976_v31 = vrot.slane %v9345_v2, %v8209_v24  ;;  %v9359_v40 = vrot.slane %v3961_v49, %v8209_v24  ;;  %v3991_v23 = vcombine.high %v3969_v57, %v3969_v57  ;;  %3317 = vst.msk [vmem:[#allocation3 + $0x4] sm:$0xf] %vm610_vm1, %v3309_v42 }
 0x584   :  { %v4128_v4 = vrot.slane %v3969_v57, %v7941_v56  ;;  %v3864_v1 = vadd.f32 1.0, %v6771_v52  ;;  %v9365_v26 = vmul.f32 %v9327_v43, %v8772_v29  ;;  %11474 = vst [vmem:[#allocation110_spill] sm:$0xff] %v9367_v51  ;;  %11475 = vst [vmem:[#allocation127_spill] sm:$0xff] %v9369_v20  ;;  %v2356_v42 = vrot.slane %v2228_v14, %v7941_v56  ;;  %v9376_v57 = vpop.eup %6772 }
 0x585   :  { %11472 = vst [vmem:[#allocation98_spill] sm:$0xff] %v9359_v40  ;;  %v3992_v19 = vcombine.high %v3976_v31, %v3976_v31  ;;  %v4132_v49 = vrot.slane %v9359_v40, %v7941_v56  ;;  %v4136_v63 = vrot.slane %v3991_v23, %v7941_v56  ;;  %4799 = vbcast.lane.b32.xlu0 %v11476_v62, 258  ;;  %v3867_v51 = vmul.f32 -0.5, %v6771_v52  ;;  %v9393_v44 = vpop.permute.xlu0 %2747 }
 0x586   :  { %11473 = vst [vmem:[#allocation109_spill] sm:$0xff] %v9365_v26  ;;  %v4269_v60 = vmul.f32 %v4128_v4, %v9238_v10  ;;  %v4270_v29 = vmul.f32 %v4128_v4, %v9296_v47  ;;  %6780 = vlog2.f32 %v3864_v1  ;;  %4755 = vbcast.lane.b32.xlu1 %v11468_v25, 266  ;;  %v9387_v14 = vrot.slane %v9351_v41, %v8209_v24  ;;  %v9395_v58 = vpop.permute.xlu1 %2543 }
 0x587   :  { %vm9389_vm12 = vcmp.lt.f32.partialorder %v3843_v13, 0.0004427343  ;;  %v3842_v1 = vmul.f32 %v6769_v16, %v3841_v50  ;;  %v3868_v3 = vadd.f32 1.0, %v3867_v51  ;;  %11480 = vst [vmem:[#allocation126_spill] sm:$0xff] %v9393_v44  ;;  %v6775_v20 = vpop.eup %6774  ;;  %v9398_v2 = vrot.slane %v3976_v31, %v7941_v56 }
 0x588   :  { %11477 = vst [vmem:[#allocation99_spill] sm:$0xff] %v9387_v14  ;;  %v4349_v26 = vmul.f32 1.442695, %v4269_v60  ;;  %v4351_v4 = vmul.f32 1.442695, %v4270_v29  ;;  %v9401_v23 = vrot.slane %v3992_v19, %v7941_v56  ;;  %v3855_v13 = vadd.f32 1.0, %v9376_v57  ;;  %v6777_v31 = vpop.eup %6776 }
 0x589   :  { %11481 = vst [vmem:[#allocation135_spill] sm:$0xff] %v9398_v2  ;;  %v3858_v41 = vmul.f32 -0.5, %v9376_v57  ;;  %v9406_v60 = vmul.f32 %v4132_v49, %v9238_v10  ;;  %v9409_v16 = vmul.f32 %v4132_v49, %v9296_v47  ;;  %v9412_v50 = vmul.f32 %v4136_v63, %v9238_v10  ;;  %v11486_v29 = vld [vmem:[#allocation112_spill] sm:$0xff]  ;;  %v9423_v44 = vpop.permute.xlu0 %2959 }
 0x58a   :  { %11482 = vst [vmem:[#allocation100_spill] sm:$0xff] %v9401_v23  ;;  %v3870_v51 = vand.u32 2147483647, %v6771_v52  ;;  %4739 = vbcast.lane.b32.xlu0 %v11486_v29, 258  ;;  %4803 = vbcast.lane.b32.xlu1 %v11476_v62, 266  ;;  %v9417_v19 = vmul.f32 %v4136_v63, %v9296_v47  ;;  %6782 = vpow2.f32 %v4349_v26  ;;  %v3869_v2 = vmul.f32 %v6771_v52, %v3868_v3  ;;  %v9425_v14 = vpop.permute.xlu1 %2751 }
 0x58b   :  { %11483 = vst [vmem:[#allocation141_spill] sm:$0xff] %v9406_v60  ;;  %11484 = vst [vmem:[#allocation140_spill] sm:$0xff] %v9409_v16  ;;  %v3861_v23 = vand.u32 2147483647, %v9376_v57  ;;  %6784 = vpow2.f32 %v4351_v4  ;;  %v3859_v49 = vadd.f32 1.0, %v3858_v41  ;;  %v9421_v16 = vmul.f32 %v2356_v42, %v8793_v45 }
 0x58c   :  { %11485 = vst [vmem:[#allocation134_spill] sm:$0xff] %v9412_v50  ;;  %11487 = vst [vmem:[#allocation101_spill] sm:$0xff] %v9417_v19  ;;  %v6779_v60 = vpop.eup %6778  ;;  %v2465_v50 = vmul.f32 0.0, %v6775_v20  ;;  %6786 = vlog2.f32 %v3855_v13  ;;  %v9429_v63 = vmul.f32 %v9327_v43, %v8795_v61  ;;  %v9433_v3 = vrot.slane %v8998_v22, %v8209_v24  ;;  %v11490_v20 = vld [vmem:[#allocation113_spill] sm:$0xff] }
 0x58d   :  { %v3839_v62 = vmul.f32 0.6931472, %v6779_v60  ;;  %vm9435_vm13 = vcmp.lt.f32.partialorder %v3870_v51, 0.0004427343  ;;  %v9441_v52 = vmul.f32 %v2356_v42, %v8820_v18  ;;  %v1500_v26 = vmul.f32 %v8942_v30, %v8381_v8  ;;  %v9461_v40 = vpop.permute.xlu0 %3167 }
 0x58e   :  { %v2481_v45 = vadd.f32 %v2465_v50, %v9172_v53  ;;  %4787 = vbcast.lane.b32.xlu0 %v11490_v20, 258  ;;  %4743 = vbcast.lane.b32.xlu1 %v11486_v29, 266  ;;  %6788 = vpow2.f32 %v9312_v21  ;;  %v1615_v43 = vmul.f32 1.442695, %v8989_v0  ;;  %v9453_v53 = vrot.slane %v9433_v3, %v8209_v24  ;;  %v11492_v50 = vld [vmem:[#allocation32_spill] sm:$0xff] }
 0x58f   :  { %v3845_v61 = vsel %vm9389_vm12, %v3842_v1, %v3839_v62  ;;  %v11491_v42 = vmax.f32 %v9210_v38, 0.0  ;;  %v9458_v30 = vmul.f32 %v9376_v57, %v3859_v49  ;;  %6790 = vpow2.f32 %v9315_v32  ;;  %v9463_v1 = vpop.permute.xlu1 %2955 }
 0x590   :  { %v6781_v18 = vpop.eup %6780  ;;  %v2673_v13 = vmul.f32 %v6777_v31, %v2481_v45  ;;  %v2577_v0 = vmul.f32 %v8818_v54, %v2481_v45  ;;  %6792 = vpow2.f32 %v9330_v35  ;;  %v9469_v60 = vrot.slane %v8951_v27, %v7941_v56 }
 0x591   :  { %v3873_v4 = vadd.f32 %v3845_v61, %v11491_v42  ;;  %v3866_v21 = vmul.f32 0.6931472, %v6781_v18  ;;  %v1619_v32 = vmul.f32 1.442695, %v1500_v26  ;;  %vm9479_vm14 = vcmp.lt.f32.partialorder %v3861_v23, 0.0004427343  ;;  %v9497_v23 = vpop.permute.xlu0 %4587 }
 0x592   :  { %5355 = vbcast.lane.b32.xlu0 %v11440_v33, 274  ;;  %4791 = vbcast.lane.b32.xlu1 %v11490_v20, 266  ;;  %6794 = vpow2.f32 %v9353_v55  ;;  %v9486_v27 = vrot.slane %v9453_v53, %v7941_v56  ;;  %v2146_v31 = vcombine.high %v9433_v3, %v9433_v3  ;;  %v11499_v26 = vmax.f32 %v9242_v28, 0.0 }
 0x593   :  { %v3897_v38 = vcombine.high %v3873_v4, %v3873_v4  ;;  %v3904_v57 = vrot.slane %v3873_v4, %v8209_v24  ;;  %v9473_v51 = vmul.f32 %v3873_v4, %v11492_v50  ;;  %v3872_v54 = vsel %vm9435_vm13, %v3869_v2, %v3866_v21  ;;  %v9499_v45 = vpop.permute.xlu1 %3163 }
 0x594   :  { %v9495_v2 = vadd.f32 %v2673_v13, %v9226_v46  ;;  %11497 = vst [vmem:[#allocation102_spill] sm:$0xff] %v9499_v45  ;;  %v9501_v55 = vpop.eup %6782  ;;  %v3876_v20 = vadd.f32 %v3872_v54, %v11499_v26  ;;  %v9506_v3 = vsel %vm183_vm0, %v2577_v0, 0.0  ;;  %6796 = vpow2.f32 %v1615_v43 }
 0x595   :  { %11493 = vst [vmem:[#allocation142_spill] sm:$0xff] %v9473_v51  ;;  %v9491_v49 = vrot.slane %v3897_v38, %v8209_v24  ;;  %v3912_v62 = vcombine.high %v3904_v57, %v3904_v57  ;;  %v3920_v41 = vrot.slane %v3904_v57, %v8209_v24  ;;  %11498 = vst [vmem:[#allocation132_spill] sm:$0xff] %v9501_v55  ;;  %v9512_v18 = vpop.eup %6784  ;;  %6798 = vpow2.f32 %v1619_v32  ;;  %v11503_v57 = vld [vmem:[#allocation36_spill] sm:$0xff] }
 0x596   :  { %v9510_v61 = vmul.f32 %v9486_v27, %v8975_v37  ;;  %11500 = vst [vmem:[#allocation146_spill] sm:$0xff] %v9512_v18  ;;  %5579 = vbcast.lane.b32.xlu0 %v11453_v39, 274  ;;  %v6787_v4 = vpop.eup %6786  ;;  %v4044_v37 = vcombine.high %v3876_v20, %v3876_v20  ;;  %v4051_v21 = vrot.slane %v3876_v20, %v8209_v24 }
 0x597   :  { %11496 = vst [vmem:[#allocation139_spill] sm:$0xff] %v9491_v49  ;;  %v3927_v46 = vrot.slane %v9491_v49, %v8209_v24  ;;  %v9517_v42 = vrot.slane %v3912_v62, %v8209_v24  ;;  %v3942_v43 = vcombine.high %v3920_v41, %v3920_v41  ;;  %v4096_v13 = vrot.slane %v3920_v41, %v7941_v56 }
 0x598   :  { %5359 = vbcast.lane.b32.xlu1 %v11440_v33, 282  ;;  %v9527_v38 = vrot.slane %v9473_v51, %v8209_v24  ;;  %v9530_v50 = vmul.f32 %v3876_v20, %v11503_v57  ;;  %v2785_v32 = vmul.f32 %v8848_v34, %v9495_v2  ;;  %v6789_v54 = vpop.eup %6788  ;;  %v9537_v26 = vrot.slane %v4044_v37, %v8209_v24  ;;  %v9545_v34 = vpop.permute.xlu0 %4635 }
 0x599   :  { %11501 = vst [vmem:[#allocation103_spill] sm:$0xff] %v9517_v42  ;;  %v3943_v0 = vcombine.high %v3927_v46, %v3927_v46  ;;  %v4253_v62 = vmul.f32 %v4096_v13, %v9238_v10  ;;  %v4254_v41 = vmul.f32 %v4096_v13, %v9296_v47  ;;  %v4059_v33 = vcombine.high %v4051_v21, %v4051_v21  ;;  %v6791_v28 = vpop.eup %6790  ;;  %v9547_v51 = vpop.permute.xlu1 %4583 }
 0x59a   :  { %11502 = vst [vmem:[#allocation145_spill] sm:$0xff] %v9527_v38  ;;  %11504 = vst [vmem:[#allocation147_spill] sm:$0xff] %v9530_v50  ;;  %v4067_v55 = vrot.slane %v4051_v21, %v8209_v24  ;;  %v3857_v20 = vmul.f32 0.6931472, %v6787_v4  ;;  %v9543_v57 = vrot.slane %v2146_v31, %v8209_v24  ;;  %5803 = vbcast.lane.b32.xlu0 %v11468_v25, 274  ;;  %v6793_v13 = vpop.eup %6792 }
 0x59b   :  { %11505 = vst [vmem:[#allocation138_spill] sm:$0xff] %v9537_v26  ;;  %v9552_v37 = vrot.slane %v9517_v42, %v7941_v56  ;;  %v9555_v38 = vrot.slane %v3942_v43, %v7941_v56  ;;  %v9558_v21 = vrot.slane %v3927_v46, %v7941_v56  ;;  %v4074_v31 = vrot.slane %v9537_v26, %v8209_v24 }
 0x59c   :  { %5583 = vbcast.lane.b32.xlu1 %v11453_v39, 282  ;;  %v9564_v4 = vrot.slane %v3943_v0, %v7941_v56  ;;  %v9567_v18 = vrot.slane %v4059_v33, %v8209_v24  ;;  %v4192_v49 = vrot.slane %v4067_v55, %v7941_v56  ;;  %v3863_v43 = vsel %vm9479_vm14, %v9458_v30, %v3857_v20  ;;  %v9586_v30 = vpop.permute.xlu0 %4571 }
 0x59d   :  { %11506 = vst [vmem:[#allocation104_spill] sm:$0xff] %v9552_v37  ;;  %11507 = vst [vmem:[#allocation143_spill] sm:$0xff] %v9555_v38  ;;  %v6795_v37 = vpop.eup %6794  ;;  %v9573_v46 = vmul.f32 1.442695, %v4253_v62  ;;  %v11513_v0 = vmax.f32 %v9248_v48, 0.0  ;;  %v4089_v38 = vcombine.high %v4067_v55, %v4067_v55  ;;  %v4090_v42 = vcombine.high %v4074_v31, %v4074_v31  ;;  %v9588_v35 = vpop.permute.xlu1 %4631 }
 0x59e   :  { %11508 = vst [vmem:[#allocation148_spill] sm:$0xff] %v9558_v21  ;;  %11509 = vst [vmem:[#allocation83_spill] sm:$0xff] %v9564_v4  ;;  %v9575_v21 = vmul.f32 1.442695, %v4254_v41  ;;  %v9584_v19 = vrot.slane %v4074_v31, %v7941_v56  ;;  %6027 = vbcast.lane.b32.xlu0 %v11486_v29, 274  ;;  %v6797_v62 = vpop.eup %6796  ;;  %v9593_v41 = vrot.slane %v9567_v18, %v7941_v56  ;;  %v9597_v55 = vsel %vm183_vm0, %v2785_v32, 0.0 }
 0x59f   :  { %11510 = vst [vmem:[#allocation105_spill] sm:$0xff] %v9567_v18  ;;  %11511 = vst [vmem:[#allocation149_spill] sm:$0xff] %v9573_v46  ;;  %v3875_v4 = vadd.f32 %v3863_v43, %v11513_v0  ;;  %v9600_v31 = vpop.eup %6798  ;;  %v4301_v43 = vmul.f32 %v4192_v49, %v9238_v10  ;;  %v4302_v0 = vmul.f32 %v4192_v49, %v9296_v47  ;;  %v2466_v33 = vmul.f32 0.0, %v6789_v54  ;;  %v11518_v18 = vld [vmem:[#allocation34_spill] sm:$0xff] }
 0x5a0   :  { %11512 = vst [vmem:[#allocation150_spill] sm:$0xff] %v9575_v21  ;;  %11514 = vst [vmem:[#allocation106_spill] sm:$0xff] %v9584_v19  ;;  %5807 = vbcast.lane.b32.xlu1 %v11468_v25, 282  ;;  %v2881_v39 = vmul.f32 %v6791_v28, %v9495_v2  ;;  %v9613_v25 = vrot.slane %v4089_v38, %v7941_v56  ;;  %v9616_v50 = vrot.slane %v4090_v42, %v7941_v56  ;;  %v9620_v2 = vpop.permute.xlu0 %4619 }
 0x5a1   :  { %11515 = vst [vmem:[#allocation47_spill] sm:$0xff] %v9588_v35  ;;  %11516 = vst [vmem:[#allocation107_spill] sm:$0xff] %v9593_v41  ;;  %v3995_v48 = vcombine.high %v3875_v4, %v3875_v4  ;;  %v4002_v20 = vrot.slane %v3875_v4, %v8209_v24  ;;  %v9610_v32 = vmul.f32 %v3875_v4, %v11518_v18  ;;  %v9622_v28 = vpop.permute.xlu1 %4575 }
 0x5a2   :  { %11520 = vst [vmem:[#allocation82_spill] sm:$0xff] %v9613_v25  ;;  %11521 = vst [vmem:[#allocation33_spill] sm:$0xff] %v9616_v50  ;;  %v2482_v49 = vadd.f32 %v2466_v33, %v9219_v59  ;;  %v2897_v54 = vadd.f32 %v2881_v39, %v9230_v6  ;;  %v1478_v42 = vmul.f32 %v9469_v60, %v8381_v8  ;;  %v9642_v50 = vmul.f32 1.442695, %v4302_v0  ;;  %v11531_v0 = vld [vmem:[#allocation115_spill] sm:$0xff] }
 0x5a3   :  { %v9606_v19 = vrot.slane %v3995_v48, %v8209_v24  ;;  %v4010_v26 = vcombine.high %v4002_v20, %v4002_v20  ;;  %v4018_v41 = vrot.slane %v4002_v20, %v8209_v24  ;;  %11519 = vst [vmem:[#allocation108_spill] sm:$0xff] %v9610_v32  ;;  %11522 = vst [vmem:[#allocation111_spill] sm:$0xff] %v9620_v2  ;;  %v11523_v48 = vld [vmem:[#allocation114_spill] sm:$0xff]  ;;  %v9640_v20 = vmul.f32 1.442695, %v4301_v43 }
 0x5a4   :  { %4679 = vbcast.lane.b32.xlu0 %v11523_v48, 258  ;;  %6031 = vbcast.lane.b32.xlu1 %v11486_v29, 282  ;;  %v2578_v6 = vmul.f32 %v8850_v5, %v2482_v49  ;;  %v2993_v39 = vmul.f32 %v8885_v11, %v2897_v54  ;;  %v2674_v33 = vmul.f32 %v6793_v13, %v2482_v49  ;;  %v9657_v13 = vpop.permute.xlu0 %4559 }
 0x5a5   :  { %11517 = vst [vmem:[#allocation46_spill] sm:$0xff] %v9606_v19  ;;  %v9627_v18 = vrot.slane %v9606_v19, %v8209_v24  ;;  %v9630_v38 = vrot.slane %v4010_v26, %v8209_v24  ;;  %v4040_v4 = vcombine.high %v4018_v41, %v4018_v41  ;;  %v9636_v59 = vrot.slane %v4018_v41, %v7941_v56  ;;  %v9659_v43 = vpop.permute.xlu1 %4623 }
 0x5a6   :  { %11527 = vst [vmem:[#allocation36_spill] sm:$0xff] %v9640_v20  ;;  %11528 = vst [vmem:[#allocation34_spill] sm:$0xff] %v9642_v50  ;;  %v2300_v25 = vrot.slane %v9543_v57, %v7941_v56  ;;  %v2636_v11 = vsel %vm183_vm0, %v2578_v6, 0.0  ;;  %v2690_v26 = vadd.f32 %v2674_v33, %v9252_v36  ;;  %v3089_v41 = vmul.f32 %v6795_v37, %v2897_v54  ;;  %v11535_v36 = vld [vmem:[#allocation68_spill] sm:$0xff]  ;;  %v11536_v33 = vld [vmem:[#allocation71_spill] sm:$0xff] }
 0x5a7   :  { %11524 = vst [vmem:[#allocation112_spill] sm:$0xff] %v9627_v18  ;;  %11525 = vst [vmem:[#allocation113_spill] sm:$0xff] %v9630_v38  ;;  %v9654_v5 = vrot.slane %v9630_v38, %v7941_v56  ;;  %v9663_v49 = vrot.slane %v4040_v4, %v7941_v56  ;;  %v2637_v29 = vadd.f32 %v2636_v11, %v9506_v3  ;;  %v3051_v6 = vsel %vm183_vm0, %v2993_v39, 0.0  ;;  %v11534_v4 = vld [vmem:[#allocation48_spill] sm:$0xff]  ;;  %v11549_v18 = vld [vmem:[#allocation38_spill] sm:$0xff] }
 0x5a8   :  { %11526 = vst [vmem:[#allocation32_spill] sm:$0xff] %v9636_v59  ;;  %11530 = vst [vmem:[#allocation151_spill] sm:$0xff] %v9659_v43  ;;  %4727 = vbcast.lane.b32.xlu0 %v11531_v0, 258  ;;  %4683 = vbcast.lane.b32.xlu1 %v11523_v48, 266  ;;  %v9670_v19 = vmul.f32 %v9636_v59, %v9238_v10  ;;  %v1575_v50 = vmul.f32 1.442695, %v1478_v42  ;;  %v3105_v3 = vadd.f32 %v3089_v41, %v9277_v9  ;;  %v9685_v20 = vpop.permute.xlu0 %4607 }
 0x5a9   :  { %11529 = vst [vmem:[#allocation114_spill] sm:$0xff] %v9654_v5  ;;  %11532 = vst [vmem:[#allocation115_spill] sm:$0xff] %v9663_v49  ;;  %v9674_v5 = vmul.f32 %v2300_v25, %v9029_v12  ;;  %v2638_v38 = vrot.slane %v2637_v29, 4  ;;  %v2786_v49 = vmul.f32 %v11534_v4, %v2690_v26  ;;  %v2882_v11 = vmul.f32 %v6797_v62, %v2690_v26  ;;  %v9687_v12 = vpop.permute.xlu1 %4563  ;;  %v11537_v42 = vld [vmem:[#allocation116_spill] sm:$0xff]  ;;  %v11538_v62 = vld [vmem:[#allocation50_spill] sm:$0xff] }
 0x5aa   :  { %11533 = vst [vmem:[#allocation152_spill] sm:$0xff] %v9670_v19  ;;  %6800 = vpow2.f32 %v1575_v50  ;;  %v9680_v37 = vmul.f32 %v9486_v27, %v11535_v36  ;;  %v2176_v54 = vcombine.high %v9453_v53, %v9453_v53  ;;  %v1579_v39 = vmul.f32 1.442695, %v11536_v33  ;;  %v11539_v41 = vld [vmem:[#allocation39_spill] sm:$0xff]  ;;  %v11547_v19 = vld [vmem:[#allocation54_spill] sm:$0xff] }
 0x5ab   :  { %v2639_v4 = vadd.f32 %v2638_v38, %v2637_v29  ;;  %v2844_v9 = vsel %vm183_vm0, %v2786_v49, 0.0  ;;  %v3201_v50 = vmul.f32 %v11538_v62, %v3105_v3  ;;  %v2898_v26 = vadd.f32 %v2882_v11, %v9281_v7  ;;  %v11540_v38 = vld [vmem:[#allocation52_spill] sm:$0xff]  ;;  %v11560_v43 = vld [vmem:[#allocation91_spill] sm:$0xff] }
 0x5ac   :  { %4667 = vbcast.lane.b32.xlu0 %v11537_v42, 258  ;;  %4731 = vbcast.lane.b32.xlu1 %v11531_v0, 266  ;;  %v2845_v27 = vadd.f32 %v2844_v9, %v9597_v55  ;;  %v2304_v53 = vrot.slane %v2176_v54, %v7941_v56  ;;  %6802 = vpow2.f32 %v1579_v39  ;;  %v9697_v36 = vmul.f32 %v2300_v25, %v11539_v41  ;;  %v11541_v62 = vld [vmem:[#allocation72_spill] sm:$0xff]  ;;  %v11542_v0 = vld [vmem:[#allocation74_spill] sm:$0xff]  ;;  %v9710_v54 = vpop.permute.xlu0 %4547  ;;  %v11545_v39 = vld [vmem:[#allocation117_spill] sm:$0xff] }
 0x5ad   :  { %v2640_v33 = vrot.slane %v2639_v4, 2  ;;  %v3259_v32 = vsel %vm183_vm0, %v3201_v50, 0.0  ;;  %v2994_v29 = vmul.f32 %v11540_v38, %v2898_v26  ;;  %v3090_v49 = vmul.f32 %v9600_v31, %v2898_v26  ;;  %11543 = vst [vmem:[#allocation48_spill] sm:$0xff] %v9710_v54  ;;  %v9712_v25 = vpop.permute.xlu1 %4611  ;;  %v11546_v38 = vld [vmem:[#allocation55_spill] sm:$0xff] }
 0x5ae   :  { %v2846_v3 = vrot.slane %v2845_v27, 4  ;;  %v9703_v7 = vmul.f32 %v2304_v53, %v11541_v62  ;;  %v2178_v55 = vcombine.high %v9543_v57, %v9543_v57  ;;  %v9708_v11 = vmul.f32 %v2304_v53, %v11542_v0  ;;  %11544 = vst [vmem:[#allocation68_spill] sm:$0xff] %v9712_v25 }
 0x5af   :  { %v2641_v9 = vadd.f32 %v2640_v33, %v2639_v4  ;;  %v3052_v50 = vsel %vm183_vm0, %v2994_v29, 0.0  ;;  %v3106_v31 = vadd.f32 %v3090_v49, %v9300_v15  ;;  %v2131_v26 = vcombine.high %v8998_v22, %v8998_v22  ;;  %v11548_v15 = vld [vmem:[#allocation59_spill] sm:$0xff] }
 0x5b0   :  { %4715 = vbcast.lane.b32.xlu0 %v11545_v39, 258  ;;  %4671 = vbcast.lane.b32.xlu1 %v11537_v42, 266  ;;  %v2847_v57 = vadd.f32 %v2846_v3, %v2845_v27  ;;  %v3053_v41 = vadd.f32 %v3052_v50, %v3051_v6  ;;  %v2308_v53 = vrot.slane %v2178_v55, %v7941_v56  ;;  %v11550_v6 = vld [vmem:[#allocation40_spill] sm:$0xff]  ;;  %v9735_v3 = vpop.permute.xlu0 %4595  ;;  %v11553_v50 = vld [vmem:[#allocation118_spill] sm:$0xff] }
 0x5b1   :  { %v9723_v62 = vrot.slane %v11546_v38, %v7941_v56  ;;  %v2642_v0 = vrot.slane %v2641_v9, 1  ;;  %v3202_v4 = vmul.f32 %v11547_v19, %v3106_v31  ;;  %v2145_v33 = vrot.slane %v2131_v26, %v8209_v24  ;;  %11551 = vst [vmem:[#allocation71_spill] sm:$0xff] %v9735_v3  ;;  %v9737_v55 = vpop.permute.xlu1 %4551 }
 0x5b2   :  { %v1488_v29 = vmul.f32 %v11548_v15, %v8381_v8  ;;  %v2848_v49 = vrot.slane %v2847_v57, 2  ;;  %v3054_v22 = vrot.slane %v3053_v41, 4  ;;  %v9730_v59 = vmul.f32 %v2308_v53, %v11549_v18  ;;  %11552 = vst [vmem:[#allocation116_spill] sm:$0xff] %v9737_v55 }
 0x5b3   :  { %v9733_v27 = vmul.f32 %v2308_v53, %v11550_v6  ;;  %v2643_v19 = vadd.f32 %v2642_v0, %v2641_v9  ;;  %v3260_v31 = vsel %vm183_vm0, %v3202_v4, 0.0  ;;  %v2161_v26 = vrot.slane %v2145_v33, %v8209_v24 }
 0x5b4   :  { %4655 = vbcast.lane.b32.xlu0 %v11553_v50, 258  ;;  %v2147_v38 = vcombine.high %v2145_v33, %v2145_v33  ;;  %4719 = vbcast.lane.b32.xlu1 %v11545_v39, 266  ;;  %v6801_v21 = vpop.eup %6800  ;;  %v2849_v18 = vadd.f32 %v2848_v49, %v2847_v57  ;;  %v3055_v46 = vadd.f32 %v3054_v22, %v3053_v41  ;;  %v9748_v55 = vpop.permute.xlu0 %5315  ;;  %v11557_v49 = vld [vmem:[#allocation90_spill] sm:$0xff] }
 0x5b5   :  { %v3261_v47 = vadd.f32 %v3260_v31, %v3259_v32  ;;  %v1486_v53 = vmul.f32 %v9723_v62, %v8381_v8  ;;  %2659 = vst.msk [vmem:[#allocation3 + $0x18] sm:$0x1] %vm643_vm2, %v2643_v19  ;;  %v2462_v6 = vmul.f32 0.0, %v6801_v21  ;;  %v2312_v10 = vrot.slane %v2161_v26, %v7941_v56  ;;  %11554 = vst [vmem:[#allocation50_spill] sm:$0xff] %v9748_v55  ;;  %v9750_v57 = vpop.permute.xlu1 %4599  ;;  %v11556_v32 = vld [vmem:[#allocation119_spill] sm:$0xff]  ;;  %v11558_v19 = vld [vmem:[#allocation133_spill] sm:$0xff] }
 0x5b6   :  { %v2175_v9 = vrot.slane %v2147_v38, %v8209_v24  ;;  %v2177_v0 = vcombine.high %v2161_v26, %v2161_v26  ;;  %v6803_v4 = vpop.eup %6802  ;;  %v2850_v3 = vrot.slane %v2849_v18, 1  ;;  %v3056_v33 = vrot.slane %v3055_v46, 2  ;;  %11555 = vst [vmem:[#allocation39_spill] sm:$0xff] %v9750_v57  ;;  %v11559_v57 = vld [vmem:[#allocation136_spill] sm:$0xff] }
 0x5b7   :  { %v3262_v45 = vrot.slane %v3261_v47, 4  ;;  %v1591_v39 = vmul.f32 1.442695, %v1486_v53  ;;  %v2478_v41 = vadd.f32 %v2462_v6, %v9680_v37  ;;  %v9755_v21 = vmul.f32 %v2312_v10, %v11557_v49 }
 0x5b8   :  { %4703 = vbcast.lane.b32.xlu0 %v11556_v32, 258  ;;  %v2316_v22 = vrot.slane %v2175_v9, %v7941_v56  ;;  %v9759_v31 = vmul.f32 %v2312_v10, %v11558_v19  ;;  %4659 = vbcast.lane.b32.xlu1 %v11553_v50, 266  ;;  %v2851_v26 = vadd.f32 %v2850_v3, %v2849_v18  ;;  %v1595_v6 = vmul.f32 1.442695, %v1488_v29  ;;  %v9770_v2 = vpop.permute.xlu0 %5539  ;;  %v11564_v3 = vld [vmem:[#allocation76_spill] sm:$0xff] }
 0x5b9   :  { %v3057_v38 = vadd.f32 %v3056_v33, %v3055_v46  ;;  %v3263_v53 = vadd.f32 %v3262_v45, %v3261_v47  ;;  %6804 = vpow2.f32 %v1591_v39  ;;  %v2670_v55 = vmul.f32 %v6803_v4, %v2478_v41  ;;  %11561 = vst [vmem:[#allocation52_spill] sm:$0xff] %v9770_v2  ;;  %v9772_v46 = vpop.permute.xlu1 %5319  ;;  %v11563_v47 = vld [vmem:[#allocation120_spill] sm:$0xff]  ;;  %v11566_v39 = vld [vmem:[#allocation69_spill] sm:$0xff] }
 0x5ba   :  { %v9763_v54 = vmul.f32 %v2316_v22, %v11559_v57  ;;  %v2320_v37 = vrot.slane %v2177_v0, %v7941_v56  ;;  %2867 = vst.msk [vmem:[#allocation3 + $0x19] sm:$0x1] %vm643_vm2, %v2851_v26  ;;  %v9768_v10 = vmul.f32 %v2316_v22, %v11560_v43  ;;  %v2179_v19 = vcombine.high %v2175_v9, %v2175_v9  ;;  %v11565_v29 = vld [vmem:[#allocation92_spill] sm:$0xff]  ;;  %v11568_v22 = vld [vmem:[#allocation75_spill] sm:$0xff] }
 0x5bb   :  { %v3058_v49 = vrot.slane %v3057_v38, 1  ;;  %v3264_v25 = vrot.slane %v3263_v53, 2  ;;  %11562 = vst [vmem:[#allocation72_spill] sm:$0xff] %v9772_v46  ;;  %v9776_v45 = vadd.f32 %v2670_v55, %v9697_v36  ;;  %6806 = vpow2.f32 %v1595_v6  ;;  %v11567_v36 = vld [vmem:[#allocation88_spill] sm:$0xff]  ;;  %v11569_v6 = vld [vmem:[#allocation26_spill] sm:$0xff] }
 0x5bc   :  { %4643 = vbcast.lane.b32.xlu0 %v11563_v47, 258  ;;  %v9779_v18 = vmul.f32 %v2320_v37, %v11564_v3  ;;  %v9782_v0 = vmul.f32 %v2320_v37, %v11565_v29  ;;  %4707 = vbcast.lane.b32.xlu1 %v11556_v32, 266  ;;  %v2324_v4 = vrot.slane %v2179_v19, %v7941_v56  ;;  %v1577_v57 = vmul.f32 1.442695, %v11566_v39  ;;  %v11570_v32 = vld [vmem:[#allocation42_spill] sm:$0xff]  ;;  %v11576_v39 = vld [vmem:[#allocation56_spill] sm:$0xff] }
 0x5bd   :  { %v3059_v43 = vadd.f32 %v3058_v49, %v3057_v38  ;;  %v3265_v9 = vadd.f32 %v3264_v25, %v3263_v53  ;;  %v1477_v33 = vmul.f32 %v9469_v60, %v8379_v17  ;;  %v2574_v55 = vmul.f32 %v11567_v36, %v2478_v41  ;;  %v11572_v53 = vld [vmem:[#allocation41_spill] sm:$0xff]  ;;  %v9800_v60 = vpop.permute.xlu0 %5763  ;;  %v9802_v19 = vpop.permute.xlu1 %5543 }
 0x5be   :  { %v1583_v26 = vmul.f32 1.442695, %v11568_v22  ;;  %v2782_v3 = vmul.f32 %v11569_v6, %v9776_v45  ;;  %v9795_v38 = vmul.f32 %v2324_v4, %v11570_v32  ;;  %v9798_v49 = vmul.f32 %v2324_v4, %v11572_v53  ;;  %11573 = vst [vmem:[#allocation117_spill] sm:$0xff] %v9800_v60  ;;  %11574 = vst [vmem:[#allocation55_spill] sm:$0xff] %v9802_v19  ;;  %v11575_v41 = vld [vmem:[#allocation121_spill] sm:$0xff] }
 0x5bf   :  { %3075 = vst.msk [vmem:[#allocation3 + $0x1a] sm:$0x1] %vm643_vm2, %v3059_v43  ;;  %v3266_v37 = vrot.slane %v3265_v9, 1  ;;  %v1573_v25 = vmul.f32 1.442695, %v1477_v33  ;;  %6808 = vpow2.f32 %v1577_v57  ;;  %v9806_v29 = vsel %vm183_vm0, %v2574_v55, 0.0 }
 0x5c0   :  { %11571 = vst [vmem:[#allocation74_spill] sm:$0xff] %v9795_v38  ;;  %4691 = vbcast.lane.b32.xlu0 %v11575_v41, 258  ;;  %v9809_v43 = vsel %vm183_vm0, %v2782_v3, 0.0  ;;  %v1484_v36 = vmul.f32 %v11576_v39, %v8381_v8  ;;  %4647 = vbcast.lane.b32.xlu1 %v11563_v47, 266  ;;  %v11577_v33 = vld [vmem:[#allocation70_spill] sm:$0xff]  ;;  %v11578_v6 = vld [vmem:[#allocation49_spill] sm:$0xff]  ;;  %v1483_v55 = vmul.f32 %v11576_v39, %v8379_v17 }
 0x5c1   :  { %v3267_v4 = vadd.f32 %v3266_v37, %v3265_v9  ;;  %6810 = vpow2.f32 %v1573_v25  ;;  %v1581_v22 = vmul.f32 1.442695, %v11577_v33  ;;  %v1400_v32 = vrot.slane %v11578_v6, %v7941_v56  ;;  %v11579_v3 = vld [vmem:[#allocation51_spill] sm:$0xff]  ;;  %v11580_v25 = vld [vmem:[#allocation53_spill] sm:$0xff]  ;;  %v9826_v6 = vpop.permute.xlu0 %5987 }
 0x5c2   :  { %6812 = vpow2.f32 %v1583_v26  ;;  %v1587_v57 = vmul.f32 1.442695, %v1484_v36  ;;  %v1503_v53 = vmul.f32 %v11579_v3, %v8379_v17  ;;  %v1505_v33 = vmul.f32 %v11580_v25, %v8379_v17  ;;  %11581 = vst [vmem:[#allocation54_spill] sm:$0xff] %v9826_v6  ;;  %v9828_v26 = vpop.permute.xlu1 %5767  ;;  %v11583_v6 = vld [vmem:[#allocation57_spill] sm:$0xff] }
 0x5c3   :  { %v6805_v60 = vpop.eup %6804  ;;  %3283 = vst.msk [vmem:[#allocation3 + $0x1b] sm:$0x1] %vm643_vm2, %v3267_v4  ;;  %6814 = vpow2.f32 %v1581_v22  ;;  %v1501_v9 = vmul.f32 %v1400_v32, %v8379_v17  ;;  %v1502_v37 = vmul.f32 %v1400_v32, %v8381_v8  ;;  %11582 = vst [vmem:[#allocation59_spill] sm:$0xff] %v9828_v26  ;;  %v1585_v36 = vmul.f32 1.442695, %v1483_v55 }
 0x5c4   :  { %5335 = vbcast.lane.b32.xlu0 %v11523_v48, 274  ;;  %v2464_v39 = vmul.f32 0.0, %v6805_v60  ;;  %6816 = vpow2.f32 %v1587_v57  ;;  %v1625_v19 = vmul.f32 1.442695, %v1503_v53  ;;  %4695 = vbcast.lane.b32.xlu1 %v11575_v41, 266  ;;  %v1504_v32 = vmul.f32 %v11579_v3, %v8381_v8 }
 0x5c5   :  { %v1621_v4 = vmul.f32 1.442695, %v1501_v9  ;;  %v1623_v22 = vmul.f32 1.442695, %v1502_v37  ;;  %v1629_v2 = vmul.f32 1.442695, %v1505_v33  ;;  %v6807_v46 = vpop.eup %6806  ;;  %6818 = vpow2.f32 %v1585_v36  ;;  %v9843_v53 = vpop.permute.xlu0 %4491 }
 0x5c6   :  { %v2480_v38 = vadd.f32 %v2464_v39, %v9759_v31  ;;  %v1507_v26 = vmul.f32 %v11583_v6, %v8379_v17  ;;  %v1506_v60 = vmul.f32 %v11580_v25, %v8381_v8  ;;  %v1627_v57 = vmul.f32 1.442695, %v1504_v32  ;;  %11584 = vst [vmem:[#allocation38_spill] sm:$0xff] %v9843_v53  ;;  %v9845_v3 = vpop.permute.xlu1 %5991  ;;  %v11587_v32 = vld [vmem:[#allocation24_spill] sm:$0xff] }
 0x5c7   :  { %6820 = vpow2.f32 %v1621_v4  ;;  %v1485_v41 = vmul.f32 %v9723_v62, %v8379_v17  ;;  %v1508_v55 = vmul.f32 %v11583_v6, %v8381_v8  ;;  %11585 = vst [vmem:[#allocation40_spill] sm:$0xff] %v9845_v3  ;;  %v1487_v62 = vmul.f32 %v11548_v15, %v8379_v17 }
 0x5c8   :  { %5559 = vbcast.lane.b32.xlu0 %v11537_v42, 274  ;;  %v2672_v31 = vmul.f32 %v6807_v46, %v2480_v38  ;;  %6822 = vpow2.f32 %v1625_v19  ;;  %v1633_v9 = vmul.f32 1.442695, %v1507_v26  ;;  %v1631_v37 = vmul.f32 1.442695, %v1506_v60  ;;  %5339 = vbcast.lane.b32.xlu1 %v11523_v48, 282 }
 0x5c9   :  { %6824 = vpow2.f32 %v1623_v22  ;;  %v1589_v25 = vmul.f32 1.442695, %v1485_v41  ;;  %v1635_v33 = vmul.f32 1.442695, %v1508_v55  ;;  %v6809_v39 = vpop.eup %6808  ;;  %v2576_v4 = vmul.f32 %v9395_v58, %v2480_v38  ;;  %v11586_v46 = vld [vmem:[#allocation66_spill] sm:$0xff]  ;;  %v11588_v60 = vld [vmem:[#allocation73_spill] sm:$0xff]  ;;  %v9860_v15 = vpop.permute.xlu0 %4539 }
 0x5ca   :  { %v3291_v6 = vld [vmem:[#allocation3 + $0x18] sm:$0xf]  ;;  %v9852_v36 = vadd.f32 %v2672_v31, %v9768_v10  ;;  %6826 = vpow2.f32 %v1629_v2  ;;  %v1490_v19 = vmul.f32 %v11586_v46, %v8381_v8  ;;  %v1593_v22 = vmul.f32 1.442695, %v1487_v62  ;;  %11589 = vst [vmem:[#allocation118_spill] sm:$0xff] %v9860_v15  ;;  %v9862_v55 = vpop.permute.xlu1 %4487  ;;  %v11606_v15 = vld [vmem:[#allocation123_spill] sm:$0xff] }
 0x5cb   :  { %v6811_v26 = vpop.eup %6810  ;;  %v3314_v48 = vadd.f32 %v11587_v32, %v3291_v6  ;;  %6828 = vpow2.f32 %v1627_v57  ;;  %v1492_v41 = vmul.f32 %v11588_v60, %v8381_v8  ;;  %11590 = vst [vmem:[#allocation119_spill] sm:$0xff] %v9862_v55  ;;  %v9866_v58 = vsel %vm183_vm0, %v2576_v4, 0.0  ;;  %v11591_v4 = vld [vmem:[#allocation99_spill] sm:$0xff]  ;;  %v11610_v55 = vld [vmem:[#allocation58_spill] sm:$0xff] }
 0x5cc   :  { %5783 = vbcast.lane.b32.xlu0 %v11553_v50, 274  ;;  %v6813_v2 = vpop.eup %6812  ;;  %v2461_v10 = vmul.f32 0.0, %v6811_v26  ;;  %6830 = vpow2.f32 %v1633_v9  ;;  %v1599_v38 = vmul.f32 1.442695, %v1490_v19  ;;  %5563 = vbcast.lane.b32.xlu1 %v11537_v42, 282  ;;  %v2784_v31 = vmul.f32 %v9425_v14, %v9852_v36 }
 0x5cd   :  { %v6815_v57 = vpop.eup %6814  ;;  %3322 = vst.msk [vmem:[#allocation3 + $0x18] sm:$0xf] %vm610_vm1, %v3314_v48  ;;  %v2878_v8 = vmul.f32 %v6813_v2, %v9776_v45  ;;  %6832 = vpow2.f32 %v1631_v37  ;;  %v1603_v62 = vmul.f32 1.442695, %v1492_v41  ;;  %v1489_v9 = vmul.f32 %v11586_v46, %v8379_v17  ;;  %v9884_v37 = vpop.permute.xlu0 %4475 }
 0x5ce   :  { %v6817_v6 = vpop.eup %6816  ;;  %v2477_v26 = vadd.f32 %v2461_v10, %v9510_v61  ;;  %6834 = vpow2.f32 %v1589_v25  ;;  %v4905_v42 = vcombine.high %v11591_v4, %v11591_v4  ;;  %v9880_v45 = vsel %vm183_vm0, %v2784_v31, 0.0  ;;  %11592 = vst [vmem:[#allocation90_spill] sm:$0xff] %v9884_v37  ;;  %v9886_v32 = vpop.permute.xlu1 %4535  ;;  %v11594_v25 = vld [vmem:[#allocation28_spill] sm:$0xff] }
 0x5cf   :  { %v2894_v19 = vadd.f32 %v2878_v8, %v9708_v11  ;;  %6836 = vpow2.f32 %v1635_v33  ;;  %v1491_v14 = vmul.f32 %v11588_v60, %v8379_v17  ;;  %11593 = vst [vmem:[#allocation133_spill] sm:$0xff] %v9886_v32  ;;  %v6819_v61 = vpop.eup %6818  ;;  %v1597_v41 = vmul.f32 1.442695, %v1489_v9  ;;  %v11595_v33 = vld [vmem:[#allocation89_spill] sm:$0xff]  ;;  %v11598_v9 = vld [vmem:[#allocation122_spill] sm:$0xff] }
 0x5d0   :  { %6007 = vbcast.lane.b32.xlu0 %v11563_v47, 274  ;;  %v2573_v46 = vmul.f32 %v11594_v25, %v2477_v26  ;;  %v2669_v48 = vmul.f32 %v6809_v39, %v2477_v26  ;;  %6838 = vpow2.f32 %v1593_v22  ;;  %5787 = vbcast.lane.b32.xlu1 %v11553_v50, 282  ;;  %v9893_v17 = vrot.slane %v4905_v42, %v8209_v24 }
 0x5d1   :  { %v6821_v11 = vpop.eup %6820  ;;  %v2990_v2 = vmul.f32 %v11595_v33, %v2894_v19  ;;  %v3086_v10 = vmul.f32 %v6817_v6, %v2894_v19  ;;  %6840 = vpow2.f32 %v1599_v38  ;;  %v9900_v6 = vpop.permute.xlu0 %4523  ;;  %v11599_v19 = vld [vmem:[#allocation95_spill] sm:$0xff]  ;;  %v11601_v33 = vld [vmem:[#allocation77_spill] sm:$0xff] }
 0x5d2   :  { %v6823_v60 = vpop.eup %6822  ;;  %v2617_v8 = vsel %vm183_vm0, %v2573_v46, 0.0  ;;  %v2685_v31 = vadd.f32 %v2669_v48, %v9674_v5  ;;  %v2467_v3 = vmul.f32 0.0, %v6821_v11  ;;  %6842 = vpow2.f32 %v1603_v62  ;;  %11596 = vst [vmem:[#allocation136_spill] sm:$0xff] %v9900_v6  ;;  %v9902_v38 = vpop.permute.xlu1 %4479  ;;  %v11600_v46 = vld [vmem:[#allocation65_spill] sm:$0xff] }
 0x5d3   :  { %v6825_v39 = vpop.eup %6824  ;;  %v2619_v22 = vadd.f32 %v9806_v29, %v2617_v8  ;;  %v3034_v50 = vsel %vm183_vm0, %v2990_v2, 0.0  ;;  %v3102_v26 = vadd.f32 %v3086_v10, %v9733_v27  ;;  %6844 = vpow2.f32 %v1597_v41  ;;  %11597 = vst [vmem:[#allocation91_spill] sm:$0xff] %v9902_v38 }
 0x5d4   :  { %5367 = vbcast.lane.b32.xlu0 %v11598_v9, 274  ;;  %v6827_v42 = vpop.eup %6826  ;;  %v2781_v25 = vmul.f32 %v11599_v19, %v2685_v31  ;;  %v2877_v5 = vmul.f32 %v6815_v57, %v2685_v31  ;;  %v2483_v62 = vadd.f32 %v2467_v3, %v11600_v46  ;;  %v2468_v48 = vmul.f32 0.0, %v6825_v39  ;;  %6011 = vbcast.lane.b32.xlu1 %v11563_v47, 282  ;;  %v11602_v57 = vld [vmem:[#allocation44_spill] sm:$0xff] }
 0x5d5   :  { %v6829_v29 = vpop.eup %6828  ;;  %v2620_v11 = vrot.slane %v2619_v22, 4  ;;  %v3198_v27 = vmul.f32 %v11601_v33, %v3102_v26  ;;  %v9911_v2 = vmul.f32 1.442695, %v1491_v14  ;;  %v11603_v33 = vld [vmem:[#allocation97_spill] sm:$0xff]  ;;  %v9921_v41 = vpop.permute.xlu0 %4463 }
 0x5d6   :  { %v6831_v10 = vpop.eup %6830  ;;  %v2825_v8 = vsel %vm183_vm0, %v2781_v25, 0.0  ;;  %v2893_v19 = vadd.f32 %v2877_v5, %v9703_v7  ;;  %v2579_v31 = vmul.f32 %v11602_v57, %v2483_v62  ;;  %v2675_v3 = vmul.f32 %v6823_v60, %v2483_v62  ;;  %11604 = vst [vmem:[#allocation120_spill] sm:$0xff] %v9921_v41  ;;  %v9923_v14 = vpop.permute.xlu1 %4527  ;;  %v11607_v7 = vld [vmem:[#allocation144_spill] sm:$0xff]  ;;  %v11608_v57 = vld [vmem:[#allocation62_spill] sm:$0xff] }
 0x5d7   :  { %v9916_v39 = vpop.eup %6832  ;;  %v2621_v47 = vadd.f32 %v2620_v11, %v2619_v22  ;;  %v2827_v46 = vadd.f32 %v9809_v43, %v2825_v8  ;;  %v3242_v26 = vsel %vm183_vm0, %v3198_v27, 0.0  ;;  %v2484_v32 = vadd.f32 %v2468_v48, %v11603_v33  ;;  %11605 = vst [vmem:[#allocation76_spill] sm:$0xff] %v9923_v14  ;;  %v11609_v27 = vld [vmem:[#allocation61_spill] sm:$0xff] }
 0x5d8   :  { %5591 = vbcast.lane.b32.xlu0 %v11606_v15, 274  ;;  %v6835_v25 = vpop.eup %6834  ;;  %v2989_v5 = vmul.f32 %v11607_v7, %v2893_v19  ;;  %v2644_v60 = vsel %vm183_vm0, %v2579_v31, 0.0  ;;  %v3085_v62 = vmul.f32 %v6819_v61, %v2893_v19  ;;  %v2691_v22 = vadd.f32 %v2675_v3, %v11608_v57  ;;  %5371 = vbcast.lane.b32.xlu1 %v11598_v9, 282 }
 0x5d9   :  { %v9930_v43 = vpop.eup %6836  ;;  %v2622_v11 = vrot.slane %v2621_v47, 2  ;;  %v2828_v48 = vrot.slane %v2827_v46, 4  ;;  %v2580_v8 = vmul.f32 %v11609_v27, %v2484_v32  ;;  %v2676_v33 = vmul.f32 %v6829_v29, %v2484_v32  ;;  %v9939_v38 = vpop.permute.xlu0 %4511  ;;  %v11613_v32 = vld [vmem:[#allocation124_spill] sm:$0xff] }
 0x5da   :  { %v9933_v14 = vpop.eup %6838  ;;  %v3033_v6 = vsel %vm183_vm0, %v2989_v5, 0.0  ;;  %v3101_v7 = vadd.f32 %v3085_v62, %v9730_v59  ;;  %v2787_v31 = vmul.f32 %v11610_v55, %v2691_v22  ;;  %v2883_v61 = vmul.f32 %v6827_v42, %v2691_v22  ;;  %11611 = vst [vmem:[#allocation92_spill] sm:$0xff] %v9939_v38  ;;  %v9941_v37 = vpop.permute.xlu1 %4467  ;;  %v11614_v5 = vld [vmem:[#allocation45_spill] sm:$0xff]  ;;  %v11616_v22 = vld [vmem:[#allocation67_spill] sm:$0xff]  ;;  %v11617_v38 = vld [vmem:[#allocation60_spill] sm:$0xff] }
 0x5db   :  { %v6841_v19 = vpop.eup %6840  ;;  %v2623_v3 = vadd.f32 %v2622_v11, %v2621_v47  ;;  %v2829_v57 = vadd.f32 %v2828_v48, %v2827_v46  ;;  %v3035_v9 = vadd.f32 %v3034_v50, %v3033_v6  ;;  %v2645_v53 = vsel %vm183_vm0, %v2580_v8, 0.0  ;;  %11612 = vst [vmem:[#allocation69_spill] sm:$0xff] %v9941_v37  ;;  %v11615_v42 = vld [vmem:[#allocation109_spill] sm:$0xff] }
 0x5dc   :  { %5815 = vbcast.lane.b32.xlu0 %v11613_v32, 274  ;;  %v9944_v29 = vpop.eup %6842  ;;  %v3197_v27 = vmul.f32 %v11614_v5, %v3101_v7  ;;  %v2852_v59 = vsel %vm183_vm0, %v2787_v31, 0.0  ;;  %v2646_v55 = vadd.f32 %v2645_v53, %v2644_v60  ;;  %v2899_v62 = vadd.f32 %v2883_v61, %v11615_v42  ;;  %5595 = vbcast.lane.b32.xlu1 %v11606_v15, 282  ;;  %v11618_v42 = vld [vmem:[#allocation125_spill] sm:$0xff] }
 0x5dd   :  { %v9950_v50 = vpop.eup %6844  ;;  %v2624_v6 = vrot.slane %v2623_v3, 1  ;;  %v2830_v47 = vrot.slane %v2829_v57, 2  ;;  %v3036_v46 = vrot.slane %v3035_v9, 4  ;;  %v2692_v11 = vadd.f32 %v2676_v33, %v11616_v22  ;;  %v9955_v61 = vpop.permute.xlu0 %4451  ;;  %v11619_v33 = vld [vmem:[#allocation63_spill] sm:$0xff] }
 0x5de   :  { %v3241_v48 = vsel %vm183_vm0, %v3197_v27, 0.0  ;;  %v2647_v8 = vrot.slane %v2646_v55, 4  ;;  %v2995_v37 = vmul.f32 %v11617_v38, %v2899_v62  ;;  %v3091_v7 = vmul.f32 %v6831_v10, %v2899_v62  ;;  %v9957_v15 = vpop.permute.xlu1 %4515  ;;  %v11620_v62 = vld [vmem:[#allocation64_spill] sm:$0xff] }
 0x5df   :  { %v2625_v5 = vadd.f32 %v2624_v6, %v2623_v3  ;;  %v2831_v31 = vadd.f32 %v2830_v47, %v2829_v57  ;;  %v3037_v53 = vadd.f32 %v3036_v46, %v3035_v9  ;;  %v3243_v60 = vadd.f32 %v3242_v26, %v3241_v48 }
 0x5e0   :  { %5347 = vbcast.lane.b32.xlu0 %v11618_v42, 274  ;;  %v2648_v41 = vadd.f32 %v2647_v8, %v2646_v55  ;;  %v3060_v35 = vsel %vm183_vm0, %v2995_v37, 0.0  ;;  %v2788_v22 = vmul.f32 %v11619_v33, %v2692_v11  ;;  %v3107_v27 = vadd.f32 %v3091_v7, %v9421_v16  ;;  %5819 = vbcast.lane.b32.xlu1 %v11613_v32, 282  ;;  %v11621_v8 = vld [vmem:[#allocation128_spill] sm:$0xff]  ;;  %v11622_v33 = vld [vmem:[#allocation130_spill] sm:$0xff] }
 0x5e1   :  { %2657 = vst.msk [vmem:[#allocation3 + $0x10] sm:$0x1] %vm643_vm2, %v2625_v5  ;;  %v2832_v38 = vrot.slane %v2831_v31, 1  ;;  %v3038_v10 = vrot.slane %v3037_v53, 2  ;;  %v3244_v26 = vrot.slane %v3243_v60, 4  ;;  %v2884_v3 = vmul.f32 %v9916_v39, %v2692_v11  ;;  %v9968_v16 = vpop.permute.xlu0 %4499 }
 0x5e2   :  { %v2649_v57 = vrot.slane %v2648_v41, 2  ;;  %v2853_v9 = vsel %vm183_vm0, %v2788_v22, 0.0  ;;  %v3203_v55 = vmul.f32 %v11620_v62, %v3107_v27  ;;  %v2463_v6 = vmul.f32 0.0, %v6835_v25  ;;  %v9970_v32 = vpop.permute.xlu1 %4455  ;;  %v11623_v27 = vld [vmem:[#allocation110_spill] sm:$0xff] }
 0x5e3   :  { %v2833_v37 = vadd.f32 %v2832_v38, %v2831_v31  ;;  %v3039_v47 = vadd.f32 %v3038_v10, %v3037_v53  ;;  %v3245_v46 = vadd.f32 %v3244_v26, %v3243_v60  ;;  %v2854_v48 = vadd.f32 %v2853_v9, %v2852_v59 }
 0x5e4   :  { %5571 = vbcast.lane.b32.xlu0 %v11621_v8, 274  ;;  %v2650_v7 = vadd.f32 %v2649_v57, %v2648_v41  ;;  %v3268_v5 = vsel %vm183_vm0, %v3203_v55, 0.0  ;;  %v2900_v39 = vadd.f32 %v2884_v3, %v9429_v63  ;;  %v2479_v11 = vadd.f32 %v2463_v6, %v9755_v21  ;;  %5351 = vbcast.lane.b32.xlu1 %v11618_v42, 282  ;;  %v11624_v57 = vld [vmem:[#allocation129_spill] sm:$0xff] }
 0x5e5   :  { %2865 = vst.msk [vmem:[#allocation3 + $0x11] sm:$0x1] %vm643_vm2, %v2833_v37  ;;  %v3040_v25 = vrot.slane %v3039_v47, 1  ;;  %v3246_v31 = vrot.slane %v3245_v46, 2  ;;  %v2855_v59 = vrot.slane %v2854_v48, 4  ;;  %v2880_v53 = vmul.f32 %v6841_v19, %v9852_v36  ;;  %v9983_v42 = vpop.permute.xlu0 %5295  ;;  %v11625_v37 = vld [vmem:[#allocation127_spill] sm:$0xff] }
 0x5e6   :  { %v2651_v60 = vrot.slane %v2650_v7, 1  ;;  %v2996_v22 = vmul.f32 %v11622_v33, %v2900_v39  ;;  %v2575_v41 = vmul.f32 %v11623_v27, %v2479_v11  ;;  %v3092_v38 = vmul.f32 %v9930_v43, %v2900_v39  ;;  %v9985_v3 = vpop.permute.xlu1 %4503 }
 0x5e7   :  { %v3041_v10 = vadd.f32 %v3040_v25, %v3039_v47  ;;  %v3247_v63 = vadd.f32 %v3246_v31, %v3245_v46  ;;  %v2856_v26 = vadd.f32 %v2855_v59, %v2854_v48  ;;  %v2671_v21 = vmul.f32 %v9933_v14, %v2479_v11  ;;  %v11627_v25 = vld [vmem:[#allocation126_spill] sm:$0xff]  ;;  %v11628_v59 = vld [vmem:[#allocation131_spill] sm:$0xff] }
 0x5e8   :  { %5795 = vbcast.lane.b32.xlu0 %v11624_v57, 274  ;;  %v2652_v9 = vadd.f32 %v2651_v60, %v2650_v7  ;;  %v3061_v36 = vsel %vm183_vm0, %v2996_v22, 0.0  ;;  %v2626_v19 = vsel %vm183_vm0, %v2575_v41, 0.0  ;;  %v3108_v62 = vadd.f32 %v3092_v38, %v9441_v52  ;;  %5575 = vbcast.lane.b32.xlu1 %v11621_v8, 282 }
 0x5e9   :  { %3073 = vst.msk [vmem:[#allocation3 + $0x12] sm:$0x1] %vm643_vm2, %v3041_v10  ;;  %v3248_v43 = vrot.slane %v3247_v63, 1  ;;  %v2857_v55 = vrot.slane %v2856_v26, 2  ;;  %v3062_v14 = vadd.f32 %v3061_v36, %v3060_v35  ;;  %v2687_v6 = vadd.f32 %v2671_v21, %v9763_v54  ;;  %v10003_v31 = vpop.permute.xlu0 %5519 }
 0x5ea   :  { %2660 = vst.msk [vmem:[#allocation3 + $0x1c] sm:$0x1] %vm643_vm2, %v2652_v9  ;;  %v3204_v47 = vmul.f32 %v11625_v37, %v3108_v62  ;;  %v2628_v46 = vadd.f32 %v9866_v58, %v2626_v19  ;;  %v2896_v48 = vadd.f32 %v2880_v53, %v9782_v0  ;;  %v11626_v52 = vcombine.high %v9893_v17, %v9893_v17  ;;  %v10005_v54 = vpop.permute.xlu1 %5299  ;;  %v11629_v19 = vld [vmem:[#allocation137_spill] sm:$0xff] }
 0x5eb   :  { %v3249_v7 = vadd.f32 %v3248_v43, %v3247_v63  ;;  %v2858_v39 = vadd.f32 %v2857_v55, %v2856_v26  ;;  %v3063_v11 = vrot.slane %v3062_v14, 4  ;;  %v2783_v35 = vmul.f32 %v11627_v25, %v2687_v6 }
 0x5ec   :  { %v5084_v8 = vrot.slane %v11626_v52, %v7941_v56  ;;  %6019 = vbcast.lane.b32.xlu0 %v11628_v59, 274  ;;  %v3269_v58 = vsel %vm183_vm0, %v3204_v47, 0.0  ;;  %v2629_v60 = vrot.slane %v2628_v46, 4  ;;  %v2992_v0 = vmul.f32 %v9423_v44, %v2896_v48  ;;  %5799 = vbcast.lane.b32.xlu1 %v11624_v57, 282 }
 0x5ed   :  { %v3088_v53 = vmul.f32 %v9944_v29, %v2896_v48  ;;  %3281 = vst.msk [vmem:[#allocation3 + $0x13] sm:$0x1] %vm643_vm2, %v3249_v7  ;;  %v2859_v33 = vrot.slane %v2858_v39, 1  ;;  %v3064_v22 = vadd.f32 %v3063_v11, %v3062_v14  ;;  %v3270_v27 = vadd.f32 %v3269_v58, %v3268_v5  ;;  %v10018_v57 = vpop.permute.xlu0 %5743  ;;  %v11632_v58 = vld [vmem:[#allocation25_spill] sm:$0xff] }
 0x5ee   :  { %v2834_v41 = vsel %vm183_vm0, %v2783_v35, 0.0  ;;  %v2630_v38 = vadd.f32 %v2629_v60, %v2628_v46  ;;  %v3043_v10 = vsel %vm183_vm0, %v2992_v0, 0.0  ;;  %v2879_v29 = vmul.f32 %v9950_v50, %v2687_v6  ;;  %v10020_v36 = vpop.permute.xlu1 %5523 }
 0x5ef   :  { %v2836_v63 = vadd.f32 %v9880_v45, %v2834_v41  ;;  %v3104_v26 = vadd.f32 %v3088_v53, %v9798_v49  ;;  %v2860_v21 = vadd.f32 %v2859_v33, %v2858_v39  ;;  %v3065_v44 = vrot.slane %v3064_v22, 2 }
 0x5f0   :  { %v3271_v9 = vrot.slane %v3270_v27, 4  ;;  %6039 = vbcast.lane.b32.xlu0 %v11629_v19, 274  ;;  %v2631_v5 = vrot.slane %v2630_v38, 2  ;;  %v10025_v55 = vmul.f32 %v5084_v8, %v9497_v23  ;;  %6023 = vbcast.lane.b32.xlu1 %v11628_v59, 282  ;;  %v2895_v50 = vadd.f32 %v2879_v29, %v9779_v18 }
 0x5f1   :  { %v2837_v62 = vrot.slane %v2836_v63, 4  ;;  %v3200_v43 = vmul.f32 %v9461_v40, %v3104_v26  ;;  %2868 = vst.msk [vmem:[#allocation3 + $0x1d] sm:$0x1] %vm643_vm2, %v2860_v21  ;;  %v3066_v49 = vadd.f32 %v3065_v44, %v3064_v22  ;;  %6846 = vpow2.f32 %v9911_v2  ;;  %v11630_v40 = vld [vmem:[#allocation94_spill] sm:$0xff]  ;;  %v10042_v18 = vpop.permute.xlu0 %5967 }
 0x5f2   :  { %v3272_v45 = vadd.f32 %v3271_v9, %v3270_v27  ;;  %v2632_v14 = vadd.f32 %v2631_v5, %v2630_v38  ;;  %v11631_v23 = vcombine.high %v11630_v40, %v11630_v40  ;;  %v2991_v52 = vmul.f32 %v9463_v1, %v2895_v50  ;;  %v10044_v2 = vpop.permute.xlu1 %5747 }
 0x5f3   :  { %v2838_v6 = vadd.f32 %v2837_v62, %v2836_v63  ;;  %v10032_v37 = vsel %vm183_vm0, %v3200_v43, 0.0  ;;  %v3067_v46 = vrot.slane %v3066_v49, 1  ;;  %v10040_v7 = vmul.f32 %v5084_v8, %v9547_v51 }
 0x5f4   :  { %v4904_v47 = vrot.slane %v11631_v23, %v8209_v24  ;;  %v3273_v48 = vrot.slane %v3272_v45, 2  ;;  %v3289_v39 = vld [vmem:[#allocation3 + $0x10] sm:$0xf]  ;;  %v2633_v11 = vrot.slane %v2632_v14, 1  ;;  %v4913_v59 = vrot.slane %v11591_v4, %v8209_v24  ;;  %6043 = vbcast.lane.b32.xlu1 %v11629_v19, 282 }
 0x5f5   :  { %v2839_v25 = vrot.slane %v2838_v6, 2  ;;  %v3312_v60 = vadd.f32 %v11632_v58, %v3289_v39  ;;  %v3068_v0 = vadd.f32 %v3067_v46, %v3066_v49  ;;  %v3042_v51 = vsel %vm183_vm0, %v2991_v52, 0.0  ;;  %v10057_v63 = vpop.permute.xlu0 %5327 }
 0x5f6   :  { %v4906_v35 = vcombine.high %v4904_v47, %v4904_v47  ;;  %v3274_v1 = vadd.f32 %v3273_v48, %v3272_v45  ;;  %v2634_v8 = vadd.f32 %v2633_v11, %v2632_v14  ;;  %v3044_v33 = vadd.f32 %v3043_v10, %v3042_v51  ;;  %v10059_v26 = vpop.permute.xlu1 %5971  ;;  %v3287_v11 = vld [vmem:[#allocation3 + $0x8] sm:$0xf] }
 0x5f7   :  { %v2840_v53 = vadd.f32 %v2839_v25, %v2838_v6  ;;  %3320 = vst.msk [vmem:[#allocation3 + $0x10] sm:$0xf] %vm610_vm1, %v3312_v60  ;;  %v4935_v41 = vcombine.high %v4913_v59, %v4913_v59  ;;  %v4920_v4 = vrot.slane %v4904_v47, %v8209_v24  ;;  %v5076_v38 = vrot.slane %v9893_v17, %v7941_v56  ;;  %v11638_v60 = vld [vmem:[#allocation68_spill] sm:$0xff] }
 0x5f8   :  { %v4934_v22 = vrot.slane %v4906_v35, %v8209_v24  ;;  %3076 = vst.msk [vmem:[#allocation3 + $0x1e] sm:$0x1] %vm643_vm2, %v3068_v0  ;;  %v3275_v27 = vrot.slane %v3274_v1, 1  ;;  %2658 = vst.msk [vmem:[#allocation3 + $0x14] sm:$0x1] %vm643_vm2, %v2634_v8  ;;  %v3045_v21 = vrot.slane %v3044_v33, 4  ;;  %v5072_v58 = vrot.slane %v4913_v59, %v7941_v56 }
 0x5f9   :  { %v2841_v10 = vrot.slane %v2840_v53, 1  ;;  %v5080_v19 = vrot.slane %v4935_v41, %v7941_v56  ;;  %v4936_v5 = vcombine.high %v4920_v4, %v4920_v4  ;;  %v10065_v62 = vmul.f32 %v5076_v38, %v9657_v13  ;;  %v10082_v47 = vpop.permute.xlu0 %5551  ;;  %v11641_v8 = vld [vmem:[#allocation98_spill] sm:$0xff] }
 0x5fa   :  { %v4938_v44 = vcombine.high %v4934_v22, %v4934_v22  ;;  %v5092_v9 = vrot.slane %v4934_v22, %v7941_v56  ;;  %v3276_v29 = vadd.f32 %v3275_v27, %v3274_v1  ;;  %v3046_v17 = vadd.f32 %v3045_v21, %v3044_v33  ;;  %v10084_v46 = vpop.permute.xlu1 %5331  ;;  %v11642_v33 = vld [vmem:[#allocation48_spill] sm:$0xff]  ;;  %v11645_v59 = vld [vmem:[#allocation22_spill] sm:$0xff] }
 0x5fb   :  { %v2842_v43 = vadd.f32 %v2841_v10, %v2840_v53  ;;  %v6847_v14 = vpop.eup %6846  ;;  %v10073_v6 = vmul.f32 %v5080_v19, %v9586_v30  ;;  %v5096_v40 = vrot.slane %v4936_v5, %v7941_v56  ;;  %v10077_v23 = vmul.f32 %v5080_v19, %v9622_v28  ;;  %v11634_v30 = vld [vmem:[#allocation47_spill] sm:$0xff]  ;;  %v11643_v27 = vld [vmem:[#allocation116_spill] sm:$0xff]  ;;  %v11650_v5 = vld [vmem:[#allocation102_spill] sm:$0xff] }
 0x5fc   :  { %v5100_v49 = vrot.slane %v4938_v44, %v7941_v56  ;;  %v10069_v45 = vmul.f32 %v5092_v9, %v9685_v20  ;;  %3284 = vst.msk [vmem:[#allocation3 + $0x1f] sm:$0x1] %vm643_vm2, %v3276_v29  ;;  %v10080_v13 = vmul.f32 %v5076_v38, %v9687_v12  ;;  %v3047_v20 = vrot.slane %v3046_v17, 2  ;;  %v11635_v28 = vld [vmem:[#allocation111_spill] sm:$0xff]  ;;  %v11644_v38 = vld [vmem:[#allocation134_spill] sm:$0xff] }
 0x5fd   :  { %2866 = vst.msk [vmem:[#allocation3 + $0x15] sm:$0x1] %vm643_vm2, %v2842_v43  ;;  %v3087_v48 = vmul.f32 %v6847_v14, %v2895_v50  ;;  %v10094_v25 = vmul.f32 %v5096_v40, %v11635_v28  ;;  %v11636_v12 = vld [vmem:[#allocation151_spill] sm:$0xff]  ;;  %v10101_v0 = vmul.f32 %v5092_v9, %v11638_v60  ;;  %v11640_v50 = vld [vmem:[#allocation74_spill] sm:$0xff]  ;;  %v3993_v53 = vcombine.high %v11641_v8, %v11641_v8  ;;  %v10115_v44 = vpop.permute.xlu0 %5775  ;;  %v11658_v8 = vld [vmem:[#allocation96_spill] sm:$0xff] }
 0x5fe   :  { %11633 = vst [vmem:[#allocation88_spill] sm:$0xff] %v10069_v45  ;;  %v10088_v52 = vmul.f32 %v5100_v49, %v9545_v34  ;;  %v10091_v39 = vmul.f32 %v5100_v49, %v11634_v30  ;;  %v10097_v35 = vmul.f32 %v5096_v40, %v11636_v12  ;;  %v3048_v1 = vadd.f32 %v3047_v20, %v3046_v17  ;;  %v10117_v9 = vpop.permute.xlu1 %5555  ;;  %v11651_v17 = vld [vmem:[#allocation71_spill] sm:$0xff] }
 0x5ff   :  { %11639 = vst [vmem:[#allocation26_spill] sm:$0xff] %v10101_v0  ;;  %v3103_v51 = vadd.f32 %v3087_v48, %v11640_v50  ;;  %v5088_v34 = vrot.slane %v4920_v4, %v7941_v56  ;;  %v10108_v22 = vmul.f32 %v5072_v58, %v11642_v33  ;;  %v10111_v41 = vmul.f32 %v5072_v58, %v11643_v27  ;;  %v11648_v4 = vld [vmem:[#allocation78_spill] sm:$0xff]  ;;  %v11653_v40 = vld [vmem:[#allocation39_spill] sm:$0xff]  ;;  %v11655_v48 = vld [vmem:[#allocation141_spill] sm:$0xff] }
 0x600   :  { %11637 = vst [vmem:[#allocation75_spill] sm:$0xff] %v10097_v35  ;;  %v4357_v10 = vmul.f32 1.442695, %v11644_v38  ;;  %v3310_v21 = vadd.f32 %v11645_v59, %v3287_v11  ;;  %11646 = vst [vmem:[#allocation42_spill] sm:$0xff] %v10115_v44  ;;  %6212 = vrot.lane.b32.xlu0 %v11648_v4, %s7180_s9  ;;  %v11649_v29 = vcombine.high %v11648_v4, %v11648_v4  ;;  %v3049_v19 = vrot.slane %v3048_v1, 1  ;;  %v11656_v11 = vld [vmem:[#allocation101_spill] sm:$0xff] }
 0x601   :  { %11647 = vst [vmem:[#allocation41_spill] sm:$0xff] %v10117_v9  ;;  %v3199_v43 = vmul.f32 %v11650_v5, %v3103_v51  ;;  %v10127_v49 = vmul.f32 %v5088_v34, %v11651_v17  ;;  %v4140_v14 = vrot.slane %v3993_v53, %v7941_v56  ;;  %v10131_v20 = vmul.f32 %v5088_v34, %v11653_v40  ;;  %v11657_v50 = vld [vmem:[#allocation43_spill] sm:$0xff]  ;;  %v11659_v27 = vld [vmem:[#allocation29_spill] sm:$0xff]  ;;  %v11660_v38 = vld [vmem:[#allocation140_spill] sm:$0xff]  ;;  %v10142_v59 = vpop.permute.xlu0 %5999 }
 0x602   :  { %6214 = vrot.lane.b32.xlu1 %v11649_v29, %s7180_s9  ;;  %6848 = vpow2.f32 %v4357_v10  ;;  %3318 = vst.msk [vmem:[#allocation3 + $0x8] sm:$0xf] %vm610_vm1, %v3310_v21  ;;  %v4353_v30 = vmul.f32 1.442695, %v11655_v48  ;;  %v4359_v28 = vmul.f32 1.442695, %v11656_v11  ;;  %v3050_v58 = vadd.f32 %v3049_v19, %v3048_v1  ;;  %v10144_v21 = vpop.permute.xlu1 %5779 }
 0x603   :  { %11652 = vst [vmem:[#allocation121_spill] sm:$0xff] %v10127_v49  ;;  %11654 = vst [vmem:[#allocation56_spill] sm:$0xff] %v10131_v20  ;;  %v3292_v12 = vld [vmem:[#allocation3 + $0x1c] sm:$0xf]  ;;  %v3250_v60 = vsel %vm183_vm0, %v3199_v43, 0.0  ;;  %v4275_v51 = vmul.f32 %v4140_v14, %v11657_v50  ;;  %v4276_v33 = vmul.f32 %v4140_v14, %v11658_v8  ;;  %v11663_v4 = vld [vmem:[#allocation79_spill] sm:$0xff] }
 0x604   :  { %v3315_v53 = vadd.f32 %v11659_v27, %v3292_v12  ;;  %v3252_v34 = vadd.f32 %v10032_v37, %v3250_v60  ;;  %6850 = vpow2.f32 %v4353_v30  ;;  %v4355_v10 = vmul.f32 1.442695, %v11660_v38  ;;  %11661 = vst [vmem:[#allocation70_spill] sm:$0xff] %v10142_v59  ;;  %11662 = vst [vmem:[#allocation49_spill] sm:$0xff] %v10144_v21  ;;  %6216 = vrot.lane.b32.xlu0 %v11663_v4, %s7180_s9  ;;  %v11665_v37 = vld [vmem:[#allocation145_spill] sm:$0xff]  ;;  %v11666_v17 = vld [vmem:[#allocation142_spill] sm:$0xff] }
 0x605   :  { %v11664_v1 = vcombine.high %v11663_v4, %v11663_v4  ;;  %3074 = vst.msk [vmem:[#allocation3 + $0x16] sm:$0x1] %vm643_vm2, %v3050_v58  ;;  %v4361_v29 = vmul.f32 1.442695, %v4275_v51  ;;  %v4363_v19 = vmul.f32 1.442695, %v4276_v33  ;;  %6852 = vpow2.f32 %v4359_v28  ;;  %v10167_v27 = vpop.permute.xlu0 %5307 }
 0x606   :  { %v4856_v5 = vcombine.high %v11665_v37, %v11665_v37  ;;  %3323 = vst.msk [vmem:[#allocation3 + $0x1c] sm:$0xf] %vm610_vm1, %v3315_v53  ;;  %v3253_v43 = vrot.slane %v3252_v34, 4  ;;  %6854 = vpow2.f32 %v4355_v10  ;;  %v11667_v14 = vcombine.high %v11666_v17, %v11666_v17  ;;  %v11668_v11 = vld [vmem:[#allocation103_spill] sm:$0xff]  ;;  %11670 = vst [vmem:[#allocation51_spill] sm:$0xff] %v10167_v27  ;;  %v10169_v53 = vpop.permute.xlu1 %6003  ;;  %v11672_v38 = vld [vmem:[#allocation80_spill] sm:$0xff] }
 0x607   :  { %6218 = vrot.lane.b32.xlu1 %v11664_v1, %s7180_s9  ;;  %v4864_v48 = vrot.slane %v11665_v37, %v8209_v24  ;;  %6856 = vpow2.f32 %v4361_v29  ;;  %v3944_v28 = vcombine.high %v11668_v11, %v11668_v11  ;;  %v11669_v12 = vld [vmem:[#allocation143_spill] sm:$0xff]  ;;  %11671 = vst [vmem:[#allocation53_spill] sm:$0xff] %v10169_v53  ;;  %v11673_v10 = vcombine.high %v11672_v38, %v11672_v38  ;;  %v11674_v11 = vld [vmem:[#allocation120_spill] sm:$0xff]  ;;  %v3285_v9 = vld [vmem:[#allocation3] sm:$0xf] }
 0x608   :  { %v4855_v40 = vrot.slane %v11667_v14, %v8209_v24  ;;  %v4878_v30 = vrot.slane %v4856_v5, %v8209_v24  ;;  %v4257_v58 = vmul.f32 %v11669_v12, %v11657_v50  ;;  %v3254_v60 = vadd.f32 %v3253_v43, %v3252_v34  ;;  %6220 = vrot.lane.b32.xlu0 %v11672_v38, %s7180_s9  ;;  %v11688_v49 = vld [vmem:[#allocation92_spill] sm:$0xff] }
 0x609   :  { %6858 = vpow2.f32 %v4363_v19  ;;  %v4886_v33 = vcombine.high %v4864_v48, %v4864_v48  ;;  %v5040_v29 = vrot.slane %v4864_v48, %v7941_v56  ;;  %v4108_v43 = vrot.slane %v3944_v28, %v7941_v56  ;;  %v11676_v48 = vld [vmem:[#allocation90_spill] sm:$0xff] }
 0x60a   :  { %v4857_v51 = vcombine.high %v4855_v40, %v4855_v40  ;;  %v4888_v4 = vcombine.high %v4878_v30, %v4878_v30  ;;  %v4871_v1 = vrot.slane %v4855_v40, %v8209_v24  ;;  %v5044_v34 = vrot.slane %v4878_v30, %v7941_v56  ;;  %v10198_v28 = vpop.permute.xlu1 %5311 }
 0x60b   :  { %6222 = vrot.lane.b32.xlu1 %v11673_v10, %s7180_s9  ;;  %v3255_v19 = vrot.slane %v3254_v60, 2  ;;  %v5048_v5 = vrot.slane %v4886_v33, %v7941_v56  ;;  %v11675_v10 = vld [vmem:[#allocation69_spill] sm:$0xff]  ;;  %v10196_v33 = vpop.permute.xlu0 %5531  ;;  %11679 = vst [vmem:[#allocation66_spill] sm:$0xff] %v10198_v28  ;;  %v11684_v28 = vld [vmem:[#allocation136_spill] sm:$0xff] }
 0x60c   :  { %v4885_v37 = vrot.slane %v4857_v51, %v8209_v24  ;;  %v5052_v17 = vrot.slane %v4888_v4, %v7941_v56  ;;  %v4887_v14 = vcombine.high %v4871_v1, %v4871_v1  ;;  %v10185_v38 = vmul.f32 %v5044_v34, %v11674_v11  ;;  %v6849_v40 = vpop.eup %6848  ;;  %v11677_v51 = vld [vmem:[#allocation91_spill] sm:$0xff]  ;;  %11678 = vst [vmem:[#allocation57_spill] sm:$0xff] %v10196_v33  ;;  %v11680_v4 = vld [vmem:[#allocation81_spill] sm:$0xff]  ;;  %v11681_v11 = vld [vmem:[#allocation38_spill] sm:$0xff] }
 0x60d   :  { %v10188_v27 = vmul.f32 %v5044_v34, %v11675_v10  ;;  %v3256_v30 = vadd.f32 %v3255_v19, %v3254_v60  ;;  %v10191_v20 = vmul.f32 %v5048_v5, %v11676_v48  ;;  %v10194_v21 = vmul.f32 %v5048_v5, %v11677_v51  ;;  %6224 = vrot.lane.b32.xlu0 %v11680_v4, %s7180_s9  ;;  %v11682_v34 = vld [vmem:[#allocation119_spill] sm:$0xff] }
 0x60e   :  { %v4889_v53 = vcombine.high %v4885_v37, %v4885_v37  ;;  %v10203_v59 = vmul.f32 %v5052_v17, %v11681_v11  ;;  %v10206_v10 = vmul.f32 %v5052_v17, %v11682_v34  ;;  %v5064_v60 = vrot.slane %v4887_v14, %v7941_v56  ;;  %v10214_v48 = vpop.eup %6850 }
 0x60f   :  { %v5060_v19 = vrot.slane %v4885_v37, %v7941_v56  ;;  %v11683_v5 = vcombine.high %v11680_v4, %v11680_v4  ;;  %v3257_v51 = vrot.slane %v3256_v30, 1  ;;  %v10218_v11 = vmul.f32 %v5040_v29, %v9955_v61  ;;  %v6853_v34 = vpop.eup %6852  ;;  %v11686_v37 = vld [vmem:[#allocation76_spill] sm:$0xff]  ;;  %v11691_v61 = vld [vmem:[#allocation118_spill] sm:$0xff] }
 0x610   :  { %v5068_v33 = vrot.slane %v4889_v53, %v7941_v56  ;;  %v5056_v17 = vrot.slane %v4871_v1, %v7941_v56  ;;  %v10222_v14 = vmul.f32 %v5064_v60, %v11684_v28  ;;  %v10225_v0 = vmul.f32 %v5064_v60, %v11686_v37  ;;  %v6855_v53 = vpop.eup %6854  ;;  %v11692_v1 = vld [vmem:[#allocation133_spill] sm:$0xff]  ;;  %v10242_v60 = vpop.permute.xlu0 %5755 }
 0x611   :  { %6226 = vrot.lane.b32.xlu1 %v11683_v5, %s7180_s9  ;;  %v10228_v4 = vmul.f32 %v5060_v19, %v11688_v49  ;;  %v10231_v5 = vmul.f32 %v5060_v19, %v9957_v15  ;;  %v3258_v44 = vadd.f32 %v3257_v51, %v3256_v30  ;;  %11694 = vst [vmem:[#allocation122_spill] sm:$0xff] %v10242_v60  ;;  %v10244_v37 = vpop.permute.xlu1 %5535  ;;  %v6857_v49 = vpop.eup %6856  ;;  %v4325_v51 = vmul.f32 1.442695, %v4257_v58  ;;  %v11698_v60 = vld [vmem:[#allocation104_spill] sm:$0xff] }
 0x612   :  { %11685 = vst [vmem:[#allocation24_spill] sm:$0xff] %v10222_v14  ;;  %11687 = vst [vmem:[#allocation73_spill] sm:$0xff] %v10225_v0  ;;  %v10234_v35 = vmul.f32 %v5068_v33, %v11691_v61  ;;  %v10237_v45 = vmul.f32 %v5068_v33, %v11692_v1  ;;  %v10240_v28 = vmul.f32 %v5056_v17, %v9968_v16  ;;  %v5265_v33 = vmul.f32 0.0, %v6857_v49  ;;  %v11697_v16 = vld [vmem:[#allocation23_spill] sm:$0xff]  ;;  %v11721_v14 = vld [vmem:[#allocation40_spill] sm:$0xff] }
 0x613   :  { %11689 = vst [vmem:[#allocation99_spill] sm:$0xff] %v10228_v4  ;;  %11690 = vst [vmem:[#allocation28_spill] sm:$0xff] %v10231_v5  ;;  %v10247_v15 = vmul.f32 %v5040_v29, %v9970_v32  ;;  %v4259_v19 = vmul.f32 %v4108_v43, %v11657_v50  ;;  %v10251_v30 = vmul.f32 %v5056_v17, %v9985_v3  ;;  %v6859_v61 = vpop.eup %6858  ;;  %6860 = vpow2.f32 %v4325_v51  ;;  %v11699_v17 = vld [vmem:[#allocation149_spill] sm:$0xff] }
 0x614   :  { %11693 = vst [vmem:[#allocation89_spill] sm:$0xff] %v10240_v28  ;;  %11695 = vst [vmem:[#allocation95_spill] sm:$0xff] %v10244_v37  ;;  %v3308_v1 = vadd.f32 %v11697_v16, %v3285_v9  ;;  %v4260_v28 = vmul.f32 %v4108_v43, %v11658_v8  ;;  %v4255_v5 = vmul.f32 %v11698_v60, %v11657_v50  ;;  %v5266_v4 = vmul.f32 0.0, %v6859_v61  ;;  %v10263_v9 = vpop.permute.xlu0 %5979  ;;  %v11705_v16 = vld [vmem:[#allocation72_spill] sm:$0xff] }
 0x615   :  { %11696 = vst [vmem:[#allocation65_spill] sm:$0xff] %v10251_v30  ;;  %3282 = vst.msk [vmem:[#allocation3 + $0x17] sm:$0x1] %vm643_vm2, %v3258_v44  ;;  %v4329_v32 = vmul.f32 1.442695, %v4259_v19  ;;  %v4258_v29 = vmul.f32 %v11669_v12, %v11658_v8  ;;  %v5281_v3 = vadd.f32 %v5265_v33, %v10040_v7  ;;  %6862 = vpow2.f32 %v11699_v17  ;;  %v10265_v43 = vpop.permute.xlu1 %5759  ;;  %v11702_v12 = vld [vmem:[#allocation50_spill] sm:$0xff] }
 0x616   :  { %3316 = vst.msk [vmem:[#allocation3] sm:$0xf] %vm610_vm1, %v3308_v1  ;;  %v4331_v58 = vmul.f32 1.442695, %v4260_v28  ;;  %v4321_v44 = vmul.f32 1.442695, %v4255_v5  ;;  %v5282_v49 = vadd.f32 %v5266_v4, %v10025_v55  ;;  %v4256_v51 = vmul.f32 %v11698_v60, %v11658_v8 }
 0x617   :  { %11700 = vst [vmem:[#allocation77_spill] sm:$0xff] %v10263_v9  ;;  %11701 = vst [vmem:[#allocation44_spill] sm:$0xff] %v10265_v43  ;;  %6864 = vpow2.f32 %v4329_v32  ;;  %v4327_v19 = vmul.f32 1.442695, %v4258_v29  ;;  %v5377_v61 = vmul.f32 %v11702_v12, %v5281_v3  ;;  %v5489_v7 = vmul.f32 %v6849_v40, %v5281_v3  ;;  %v11703_v28 = vld [vmem:[#allocation93_spill] sm:$0xff] }
 0x618   :  { %6866 = vpow2.f32 %v4331_v58  ;;  %v11704_v5 = vcombine.high %v11703_v28, %v11703_v28  ;;  %v5378_v1 = vmul.f32 %v11705_v16, %v5282_v49  ;;  %v5490_v17 = vmul.f32 %v6853_v34, %v5282_v49  ;;  %v10278_v32 = vpop.permute.xlu0 %4775  ;;  %v11710_v16 = vld [vmem:[#allocation150_spill] sm:$0xff] }
 0x619   :  { %6868 = vpow2.f32 %v4321_v44  ;;  %v4323_v30 = vmul.f32 1.442695, %v4256_v51  ;;  %v5407_v55 = vsel %vm183_vm0, %v5377_v61, 0.0  ;;  %v5505_v4 = vadd.f32 %v5489_v7, %v10073_v6  ;;  %v10280_v40 = vpop.permute.xlu1 %5983  ;;  %v11707_v44 = vld [vmem:[#allocation27_spill] sm:$0xff]  ;;  %v11708_v51 = vld [vmem:[#allocation52_spill] sm:$0xff] }
 0x61a   :  { %v3990_v33 = vrot.slane %v11704_v5, %v8209_v24  ;;  %6870 = vpow2.f32 %v4327_v19  ;;  %11706 = vst [vmem:[#allocation97_spill] sm:$0xff] %v10280_v40  ;;  %v5408_v3 = vsel %vm183_vm0, %v5378_v1, 0.0  ;;  %v5506_v58 = vadd.f32 %v5490_v17, %v10077_v23  ;;  %v11709_v61 = vld [vmem:[#allocation55_spill] sm:$0xff]  ;;  %v11711_v1 = vld [vmem:[#allocation100_spill] sm:$0xff] }
 0x61b   :  { %6872 = vpow2.f32 %v4323_v30  ;;  %v5601_v12 = vmul.f32 %v11708_v51, %v5505_v4  ;;  %v5409_v6 = vadd.f32 %v5408_v3, %v5407_v55  ;;  %v5713_v19 = vmul.f32 %v10214_v48, %v5505_v4 }
 0x61c   :  { %v3994_v60 = vcombine.high %v3990_v33, %v3990_v33  ;;  %v3290_v29 = vld [vmem:[#allocation3 + $0x14] sm:$0xf]  ;;  %v10285_v34 = vrot.slane %v3990_v33, %v7941_v56  ;;  %v5602_v7 = vmul.f32 %v11709_v61, %v5506_v58  ;;  %v5714_v28 = vmul.f32 %v6855_v53, %v5506_v58  ;;  %v10298_v55 = vpop.permute.xlu0 %4823 }
 0x61d   :  { %v3313_v49 = vadd.f32 %v11707_v44, %v3290_v29  ;;  %6874 = vpow2.f32 %v11710_v16  ;;  %v5631_v23 = vsel %vm183_vm0, %v5601_v12, 0.0  ;;  %v5410_v30 = vrot.slane %v5409_v6, 4  ;;  %11712 = vst [vmem:[#allocation123_spill] sm:$0xff] %v10298_v55  ;;  %v10300_v48 = vpop.permute.xlu1 %4779  ;;  %v6861_v4 = vpop.eup %6860  ;;  %v11714_v44 = vld [vmem:[#allocation117_spill] sm:$0xff]  ;;  %v11715_v12 = vld [vmem:[#allocation132_spill] sm:$0xff]  ;;  %v11716_v16 = vld [vmem:[#allocation59_spill] sm:$0xff] }
 0x61e   :  { %v4156_v5 = vrot.slane %v3994_v60, %v7941_v56  ;;  %v5729_v33 = vadd.f32 %v5713_v19, %v10065_v62  ;;  %v4281_v17 = vmul.f32 %v11711_v1, %v11657_v50  ;;  %11713 = vst [vmem:[#allocation144_spill] sm:$0xff] %v10300_v48  ;;  %v5632_v53 = vsel %vm183_vm0, %v5602_v7, 0.0  ;;  %v11717_v55 = vld [vmem:[#allocation146_spill] sm:$0xff] }
 0x61f   :  { %3321 = vst.msk [vmem:[#allocation3 + $0x14] sm:$0xf] %vm610_vm1, %v3313_v49  ;;  %v5730_v60 = vadd.f32 %v5714_v28, %v10080_v13  ;;  %v10308_v58 = vpop.eup %6862  ;;  %v5411_v62 = vadd.f32 %v5410_v30, %v5409_v6  ;;  %v5633_v51 = vadd.f32 %v5632_v53, %v5631_v23 }
 0x620   :  { %v4283_v29 = vmul.f32 %v4156_v5, %v11657_v50  ;;  %v10306_v3 = vmul.f32 %v4156_v5, %v11658_v8  ;;  %v5825_v49 = vmul.f32 %v11714_v44, %v5729_v33  ;;  %v5937_v19 = vmul.f32 %v11715_v12, %v5729_v33  ;;  %v10316_v6 = vpop.permute.xlu0 %4763  ;;  %v11720_v12 = vld [vmem:[#allocation54_spill] sm:$0xff] }
 0x621   :  { %v6865_v61 = vpop.eup %6864  ;;  %v5826_v48 = vmul.f32 %v11716_v16, %v5730_v60  ;;  %v5938_v7 = vmul.f32 %v11717_v55, %v5730_v60  ;;  %v4373_v13 = vmul.f32 1.442695, %v4281_v17  ;;  %v5412_v9 = vrot.slane %v5411_v62, 2  ;;  %11718 = vst [vmem:[#allocation62_spill] sm:$0xff] %v10316_v6  ;;  %v10318_v30 = vpop.permute.xlu1 %4827 }
 0x622   :  { %v4377_v40 = vmul.f32 1.442695, %v4283_v29  ;;  %v6867_v28 = vpop.eup %6866  ;;  %v5855_v5 = vsel %vm183_vm0, %v5825_v49, 0.0  ;;  %v5634_v43 = vrot.slane %v5633_v51, 4  ;;  %v5953_v37 = vadd.f32 %v5937_v19, %v10108_v22  ;;  %11719 = vst [vmem:[#allocation61_spill] sm:$0xff] %v10318_v30 }
 0x623   :  { %v6869_v23 = vpop.eup %6868  ;;  %v5856_v33 = vsel %vm183_vm0, %v5826_v48, 0.0  ;;  %v5954_v53 = vadd.f32 %v5938_v7, %v10111_v41  ;;  %v5261_v44 = vmul.f32 0.0, %v6865_v61  ;;  %v5262_v55 = vmul.f32 0.0, %v6867_v28 }
 0x624   :  { %v6871_v60 = vpop.eup %6870  ;;  %v5413_v17 = vadd.f32 %v5412_v9, %v5411_v62  ;;  %v5635_v29 = vadd.f32 %v5634_v43, %v5633_v51  ;;  %v6049_v16 = vmul.f32 %v11720_v12, %v5953_v37  ;;  %v5857_v49 = vadd.f32 %v5856_v33, %v5855_v5  ;;  %v10327_v7 = vpop.permute.xlu0 %4811  ;;  %v5463_v5 = vld [vmem:[#allocation3 + $0xb] sm:$0x1] }
 0x625   :  { %v6873_v0 = vpop.eup %6872  ;;  %v6050_v22 = vmul.f32 %v11721_v14, %v5954_v53  ;;  %v5277_v19 = vadd.f32 %v5261_v44, %v10206_v10  ;;  %v5278_v6 = vadd.f32 %v5262_v55, %v10203_v59  ;;  %6876 = vpow2.f32 %v4377_v40  ;;  %11722 = vst [vmem:[#allocation58_spill] sm:$0xff] %v10327_v7  ;;  %v10329_v9 = vpop.permute.xlu1 %4767 }
 0x626   :  { %v5414_v30 = vrot.slane %v5413_v17, 1  ;;  %v5636_v48 = vrot.slane %v5635_v29, 2  ;;  %v6079_v41 = vsel %vm183_vm0, %v6049_v16, 0.0  ;;  %v5858_v61 = vrot.slane %v5857_v49, 4 }
 0x627   :  { %v10331_v43 = vpop.eup %6874  ;;  %v6080_v37 = vsel %vm183_vm0, %v6050_v22, 0.0  ;;  %v5373_v14 = vmul.f32 %v9983_v42, %v5277_v19  ;;  %v5485_v62 = vmul.f32 %v6861_v4, %v5277_v19  ;;  %v5374_v10 = vmul.f32 %v10005_v54, %v5278_v6 }
 0x628   :  { %v5415_v59 = vadd.f32 %v5414_v30, %v5413_v17  ;;  %v5637_v40 = vadd.f32 %v5636_v48, %v5635_v29  ;;  %v5859_v51 = vadd.f32 %v5858_v61, %v5857_v49  ;;  %v6081_v28 = vadd.f32 %v6080_v37, %v6079_v41  ;;  %v10339_v42 = vpop.permute.xlu0 %4751 }
 0x629   :  { %v5389_v33 = vsel %vm183_vm0, %v5373_v14, 0.0  ;;  %v5501_v53 = vadd.f32 %v5485_v62, %v10191_v20  ;;  %v5390_v44 = vsel %vm183_vm0, %v5374_v10, 0.0  ;;  %v5486_v55 = vmul.f32 %v6871_v60, %v5278_v6  ;;  %v10341_v4 = vpop.permute.xlu1 %4815  ;;  %v5687_v6 = vld [vmem:[#allocation3 + $0xa] sm:$0x1] }
 0x62a   :  { %v5471_v12 = vadd.f32 %v5463_v5, %v5415_v59  ;;  %v5638_v16 = vrot.slane %v5637_v40, 1  ;;  %v5860_v22 = vrot.slane %v5859_v51, 2  ;;  %v6082_v7 = vrot.slane %v6081_v28, 4 }
 0x62b   :  { %v5597_v54 = vmul.f32 %v10003_v31, %v5501_v53  ;;  %v5391_v30 = vadd.f32 %v5390_v44, %v5389_v33  ;;  %v5709_v17 = vmul.f32 %v6869_v23, %v5501_v53  ;;  %v5502_v29 = vadd.f32 %v5486_v55, %v10194_v21 }
 0x62c   :  { %5479 = vst.msk [vmem:[#allocation3 + $0xb] sm:$0x1] %vm643_vm2, %v5471_v12  ;;  %v5639_v20 = vadd.f32 %v5638_v16, %v5637_v40  ;;  %v5861_v49 = vadd.f32 %v5860_v22, %v5859_v51  ;;  %v6083_v19 = vadd.f32 %v6082_v7, %v6081_v28  ;;  %6878 = vpow2.f32 %v4373_v13  ;;  %v10349_v62 = vpop.permute.xlu0 %4799 }
 0x62d   :  { %v5613_v60 = vsel %vm183_vm0, %v5597_v54, 0.0  ;;  %v5392_v48 = vrot.slane %v5391_v30, 4  ;;  %v5725_v41 = vadd.f32 %v5709_v17, %v10185_v38  ;;  %v5598_v61 = vmul.f32 %v10020_v36, %v5502_v29  ;;  %v10351_v21 = vpop.permute.xlu1 %4755 }
 0x62e   :  { %v5695_v37 = vadd.f32 %v5687_v6, %v5639_v20  ;;  %v5862_v31 = vrot.slane %v5861_v49, 1  ;;  %v6084_v14 = vrot.slane %v6083_v19, 2  ;;  %v5710_v23 = vmul.f32 %v6873_v0, %v5502_v29  ;;  %v5911_v0 = vld [vmem:[#allocation3 + $0x9] sm:$0x1] }
 0x62f   :  { %v6877_v10 = vpop.eup %6876  ;;  %v5393_v59 = vadd.f32 %v5392_v48, %v5391_v30  ;;  %v5821_v13 = vmul.f32 %v10018_v57, %v5725_v41  ;;  %v5614_v7 = vsel %vm183_vm0, %v5598_v61, 0.0  ;;  %v5933_v40 = vmul.f32 %v10308_v58, %v5725_v41 }
 0x630   :  { %5703 = vst.msk [vmem:[#allocation3 + $0xa] sm:$0x1] %vm643_vm2, %v5695_v37  ;;  %v5863_v38 = vadd.f32 %v5862_v31, %v5861_v49  ;;  %v6085_v36 = vadd.f32 %v6084_v14, %v6083_v19  ;;  %v5615_v51 = vadd.f32 %v5614_v7, %v5613_v60  ;;  %v5726_v28 = vadd.f32 %v5710_v23, %v10188_v27  ;;  %v10361_v58 = vpop.permute.xlu0 %4739 }
 0x631   :  { %v5394_v5 = vrot.slane %v5393_v59, 2  ;;  %v5837_v33 = vsel %vm183_vm0, %v5821_v13, 0.0  ;;  %v5949_v53 = vadd.f32 %v5933_v40, %v10218_v11  ;;  %v5267_v44 = vmul.f32 0.0, %v6877_v10  ;;  %v10363_v22 = vpop.permute.xlu1 %4803  ;;  %v5461_v10 = vld [vmem:[#allocation3 + $0x3] sm:$0x1] }
 0x632   :  { %v5919_v55 = vadd.f32 %v5911_v0, %v5863_v38  ;;  %v6086_v57 = vrot.slane %v6085_v36, 1  ;;  %v5616_v12 = vrot.slane %v5615_v51, 4  ;;  %v5822_v16 = vmul.f32 %v10044_v2, %v5726_v28  ;;  %v6135_v2 = vld [vmem:[#allocation3 + $0x8] sm:$0x1] }
 0x633   :  { %v5395_v54 = vadd.f32 %v5394_v5, %v5393_v59  ;;  %v6045_v30 = vmul.f32 %v10042_v18, %v5949_v53  ;;  %v5283_v27 = vadd.f32 %v5267_v44, %v10091_v39  ;;  %v5934_v17 = vmul.f32 %v10331_v43, %v5726_v28 }
 0x634   :  { %5927 = vst.msk [vmem:[#allocation3 + $0x9] sm:$0x1] %vm643_vm2, %v5919_v55  ;;  %v6087_v11 = vadd.f32 %v6086_v57, %v6085_v36  ;;  %v5617_v29 = vadd.f32 %v5616_v12, %v5615_v51  ;;  %v5838_v20 = vsel %vm183_vm0, %v5822_v16, 0.0  ;;  %v4379_v49 = vmul.f32 1.442695, %v10306_v3  ;;  %v10374_v61 = vpop.permute.xlu0 %4787  ;;  %v11723_v36 = vld [vmem:[#allocation135_spill] sm:$0xff] }
 0x635   :  { %v5396_v19 = vrot.slane %v5395_v54, 1  ;;  %v6061_v6 = vsel %vm183_vm0, %v6045_v30, 0.0  ;;  %v5839_v60 = vadd.f32 %v5838_v20, %v5837_v33  ;;  %v5379_v48 = vmul.f32 %v10057_v63, %v5283_v27  ;;  %v10376_v37 = vpop.permute.xlu1 %4743  ;;  %v11724_v16 = vld [vmem:[#allocation139_spill] sm:$0xff] }
 0x636   :  { %v6879_v18 = vpop.eup %6878  ;;  %v6143_v41 = vadd.f32 %v6135_v2, %v6087_v11  ;;  %v5618_v39 = vrot.slane %v5617_v29, 2  ;;  %v5950_v43 = vadd.f32 %v5934_v17, %v10247_v15  ;;  %6880 = vpow2.f32 %v4379_v49 }
 0x637   :  { %v5397_v31 = vadd.f32 %v5396_v19, %v5395_v54  ;;  %v5840_v14 = vrot.slane %v5839_v60, 4  ;;  %v10379_v3 = vsel %vm183_vm0, %v5379_v48, 0.0  ;;  %v5491_v23 = vmul.f32 %v6879_v18, %v5283_v27  ;;  %v5685_v27 = vld [vmem:[#allocation3 + $0x2] sm:$0x1] }
 0x638   :  { %6151 = vst.msk [vmem:[#allocation3 + $0x8] sm:$0x1] %vm643_vm2, %v6143_v41  ;;  %v5619_v63 = vadd.f32 %v5618_v39, %v5617_v29  ;;  %v6046_v59 = vmul.f32 %v10059_v26, %v5950_v43  ;;  %v4279_v15 = vmul.f32 %v10285_v34, %v11657_v50  ;;  %v4282_v13 = vmul.f32 %v11711_v1, %v11658_v8  ;;  %v10393_v26 = vpop.permute.xlu0 %5355  ;;  %v11726_v39 = vld [vmem:[#allocation85_spill] sm:$0xff] }
 0x639   :  { %v5469_v7 = vadd.f32 %v5461_v10, %v5397_v31  ;;  %v5841_v40 = vadd.f32 %v5840_v14, %v5839_v60  ;;  %v10388_v38 = vadd.f32 %v5491_v23, %v10094_v25  ;;  %v4277_v51 = vmul.f32 %v11723_v36, %v11657_v50  ;;  %v10395_v53 = vpop.permute.xlu1 %4791  ;;  %v11727_v14 = vld [vmem:[#allocation83_spill] sm:$0xff] }
 0x63a   :  { %v5620_v28 = vrot.slane %v5619_v63, 1  ;;  %v6062_v0 = vsel %vm183_vm0, %v6046_v59, 0.0  ;;  %v4369_v5 = vmul.f32 1.442695, %v4279_v15  ;;  %v4375_v33 = vmul.f32 1.442695, %v4282_v13 }
 0x63b   :  { %5477 = vst.msk [vmem:[#allocation3 + $0x3] sm:$0x1] %vm643_vm2, %v5469_v7  ;;  %v5842_v1 = vrot.slane %v5841_v40, 2  ;;  %v6063_v44 = vadd.f32 %v6062_v0, %v6061_v6  ;;  %v5603_v25 = vmul.f32 %v10082_v47, %v10388_v38  ;;  %v4365_v55 = vmul.f32 1.442695, %v4277_v51 }
 0x63c   :  { %v5621_v57 = vadd.f32 %v5620_v28, %v5619_v63  ;;  %6882 = vpow2.f32 %v4369_v5  ;;  %v4280_v12 = vmul.f32 %v10285_v34, %v11658_v8  ;;  %v11725_v54 = vcombine.high %v11724_v16, %v11724_v16  ;;  %v10409_v2 = vpop.permute.xlu0 %5579  ;;  %v5909_v13 = vld [vmem:[#allocation3 + $0x1] sm:$0x1] }
 0x63d   :  { %v5843_v17 = vadd.f32 %v5842_v1, %v5841_v40  ;;  %v6064_v11 = vrot.slane %v6063_v44, 4  ;;  %v10407_v29 = vsel %vm183_vm0, %v5603_v25, 0.0  ;;  %6884 = vpow2.f32 %v4375_v33  ;;  %v10411_v19 = vpop.permute.xlu1 %5359 }
 0x63e   :  { %v3941_v30 = vrot.slane %v11725_v54, %v8209_v24  ;;  %v5693_v20 = vadd.f32 %v5685_v27, %v5621_v57  ;;  %6886 = vpow2.f32 %v4365_v55  ;;  %v4371_v47 = vmul.f32 1.442695, %v4280_v12  ;;  %v11729_v54 = vld [vmem:[#allocation148_spill] sm:$0xff] }
 0x63f   :  { %v6159_v34 = vld [vmem:[#allocation3 + $0x8] sm:$0xf]  ;;  %v5844_v6 = vrot.slane %v5843_v17, 1  ;;  %v6065_v60 = vadd.f32 %v6064_v11, %v6063_v44  ;;  %v4278_v18 = vmul.f32 %v11723_v36, %v11658_v8  ;;  %v4265_v23 = vmul.f32 %v11727_v14, %v11657_v50 }
 0x640   :  { %v3945_v49 = vcombine.high %v3941_v30, %v3941_v30  ;;  %v4116_v48 = vrot.slane %v3941_v30, %v7941_v56  ;;  %v6881_v41 = vpop.eup %6880  ;;  %v6182_v43 = vadd.f32 %v11726_v39, %v6159_v34  ;;  %5701 = vst.msk [vmem:[#allocation3 + $0x2] sm:$0x1] %vm643_vm2, %v5693_v20  ;;  %6888 = vpow2.f32 %v4371_v47  ;;  %v10425_v28 = vpop.permute.xlu0 %5803 }
 0x641   :  { %v5845_v10 = vadd.f32 %v5844_v6, %v5843_v17  ;;  %v6066_v63 = vrot.slane %v6065_v60, 2  ;;  %v5268_v59 = vmul.f32 0.0, %v6881_v41  ;;  %v4367_v15 = vmul.f32 1.442695, %v4278_v18  ;;  %11728 = vst [vmem:[#allocation124_spill] sm:$0xff] %v10425_v28  ;;  %v10427_v0 = vpop.permute.xlu1 %5583  ;;  %v11730_v17 = vld [vmem:[#allocation147_spill] sm:$0xff] }
 0x642   :  { %v4124_v31 = vrot.slane %v3945_v49, %v7941_v56  ;;  %6190 = vst.msk [vmem:[#allocation3 + $0x8] sm:$0xf] %vm610_vm1, %v6182_v43  ;;  %v4341_v40 = vmul.f32 1.442695, %v4265_v23  ;;  %v4263_v51 = vmul.f32 %v4116_v48, %v11657_v50  ;;  %v4266_v16 = vmul.f32 %v11727_v14, %v11658_v8  ;;  %v6133_v41 = vld [vmem:[#allocation3] sm:$0x1] }
 0x643   :  { %v5917_v5 = vadd.f32 %v5909_v13, %v5845_v10  ;;  %v6067_v33 = vadd.f32 %v6066_v63, %v6065_v60  ;;  %v5284_v1 = vadd.f32 %v5268_v59, %v10088_v52  ;;  %6890 = vpow2.f32 %v4367_v15  ;;  %v11733_v14 = vld [vmem:[#allocation88_spill] sm:$0xff]  ;;  %v11734_v13 = vld [vmem:[#allocation75_spill] sm:$0xff] }
 0x644   :  { %v4267_v7 = vmul.f32 %v4124_v31, %v11657_v50  ;;  %v4268_v36 = vmul.f32 %v4124_v31, %v11658_v8  ;;  %6892 = vpow2.f32 %v4341_v40  ;;  %v4337_v55 = vmul.f32 1.442695, %v4263_v51  ;;  %v10441_v47 = vpop.permute.xlu0 %6027 }
 0x645   :  { %5925 = vst.msk [vmem:[#allocation3 + $0x1] sm:$0x1] %vm643_vm2, %v5917_v5  ;;  %v6068_v57 = vrot.slane %v6067_v33, 1  ;;  %v5380_v12 = vmul.f32 %v10084_v46, %v5284_v1  ;;  %v4261_v30 = vmul.f32 %v11729_v54, %v11657_v50  ;;  %v4264_v52 = vmul.f32 %v4116_v48, %v11658_v8  ;;  %11731 = vst [vmem:[#allocation45_spill] sm:$0xff] %v10441_v47  ;;  %v10443_v49 = vpop.permute.xlu1 %5807 }
 0x646   :  { %v4345_v44 = vmul.f32 1.442695, %v4267_v7  ;;  %v4347_v25 = vmul.f32 1.442695, %v4268_v36  ;;  %v6883_v27 = vpop.eup %6882  ;;  %v4995_v11 = vrot.slane %v11730_v17, %v8209_v24  ;;  %v4262_v20 = vmul.f32 %v11729_v54, %v11658_v8  ;;  %11732 = vst [vmem:[#allocation109_spill] sm:$0xff] %v10443_v49 }
 0x647   :  { %v6885_v46 = vpop.eup %6884  ;;  %v6069_v34 = vadd.f32 %v6068_v57, %v6067_v33  ;;  %v5417_v6 = vsel %vm183_vm0, %v5380_v12, 0.0  ;;  %v5715_v60 = vmul.f32 %v6883_v27, %v10388_v38  ;;  %v4343_v43 = vmul.f32 1.442695, %v4266_v16  ;;  %v11738_v16 = vld [vmem:[#allocation121_spill] sm:$0xff] }
 0x648   :  { %6894 = vpow2.f32 %v4345_v44  ;;  %v6887_v18 = vpop.eup %6886  ;;  %v5418_v48 = vadd.f32 %v5417_v6, %v10379_v3  ;;  %v5492_v39 = vmul.f32 %v6885_v46, %v5284_v1  ;;  %v4333_v10 = vmul.f32 1.442695, %v4261_v30  ;;  %v10450_v38 = vpop.permute.xlu0 %4679  ;;  %v11736_v3 = vld [vmem:[#allocation42_spill] sm:$0xff]  ;;  %v11737_v44 = vld [vmem:[#allocation41_spill] sm:$0xff] }
 0x649   :  { %6896 = vpow2.f32 %v4347_v25  ;;  %v6141_v31 = vadd.f32 %v6133_v41, %v6069_v34  ;;  %v5731_v23 = vadd.f32 %v5715_v60, %v11733_v14  ;;  %v4339_v63 = vmul.f32 1.442695, %v4264_v52  ;;  %v10452_v36 = vpop.permute.xlu1 %6031  ;;  %v11739_v34 = vld [vmem:[#allocation26_spill] sm:$0xff] }
 0x64a   :  { %6898 = vpow2.f32 %v4337_v55  ;;  %v6889_v59 = vpop.eup %6888  ;;  %v5419_v15 = vrot.slane %v5418_v48, 4  ;;  %v5508_v7 = vadd.f32 %v5492_v39, %v11734_v13  ;;  %v5003_v40 = vcombine.high %v4995_v11, %v4995_v11  ;;  %11735 = vst [vmem:[#allocation67_spill] sm:$0xff] %v10452_v36  ;;  %v11741_v39 = vld [vmem:[#allocation70_spill] sm:$0xff]  ;;  %v11752_v36 = vld [vmem:[#allocation99_spill] sm:$0xff] }
 0x64b   :  { %6900 = vpow2.f32 %v4343_v43  ;;  %6149 = vst.msk [vmem:[#allocation3] sm:$0x1] %vm643_vm2, %v6141_v31  ;;  %v5827_v51 = vmul.f32 %v11736_v3, %v5731_v23  ;;  %v5939_v5 = vmul.f32 %v6887_v18, %v5731_v23  ;;  %v4335_v33 = vmul.f32 1.442695, %v4262_v20 }
 0x64c   :  { %6902 = vpow2.f32 %v4333_v10  ;;  %v5420_v1 = vadd.f32 %v5419_v15, %v5418_v48  ;;  %v5604_v25 = vmul.f32 %v11737_v44, %v5508_v7  ;;  %v5716_v55 = vmul.f32 %v6889_v59, %v5508_v7  ;;  %v10470_v18 = vpop.permute.xlu0 %4727 }
 0x64d   :  { %6904 = vpow2.f32 %v4339_v63  ;;  %v6891_v57 = vpop.eup %6890  ;;  %v5864_v12 = vsel %vm183_vm0, %v5827_v51, 0.0  ;;  %v5955_v54 = vadd.f32 %v5939_v5, %v11738_v16  ;;  %v10460_v30 = vrot.slane %v5003_v40, %v8209_v24  ;;  %v10472_v41 = vpop.permute.xlu1 %4683  ;;  %v11742_v63 = vld [vmem:[#allocation49_spill] sm:$0xff]  ;;  %v11744_v16 = vld [vmem:[#allocation84_spill] sm:$0xff] }
 0x64e   :  { %6906 = vpow2.f32 %v4335_v33  ;;  %v6893_v27 = vpop.eup %6892  ;;  %v5421_v52 = vrot.slane %v5420_v1, 2  ;;  %v5641_v46 = vsel %vm183_vm0, %v5604_v25, 0.0  ;;  %v5732_v20 = vadd.f32 %v5716_v55, %v11739_v34 }
 0x64f   :  { %v11740_v6 = vcombine.high %v11730_v17, %v11730_v17  ;;  %v5642_v48 = vadd.f32 %v5641_v46, %v10407_v29  ;;  %v6051_v43 = vmul.f32 %v11741_v39, %v5955_v54  ;;  %v5035_v31 = vcombine.high %v10460_v30, %v10460_v30  ;;  %v11745_v39 = vld [vmem:[#allocation53_spill] sm:$0xff] }
 0x650   :  { %v10479_v14 = vrot.slane %v4995_v11, %v8209_v24  ;;  %v5422_v10 = vadd.f32 %v5421_v52, %v5420_v1  ;;  %v5828_v17 = vmul.f32 %v11742_v63, %v5732_v20  ;;  %v5940_v59 = vmul.f32 %v6891_v57, %v5732_v20  ;;  %v11743_v1 = vld [vmem:[#allocation56_spill] sm:$0xff]  ;;  %v10490_v55 = vpop.permute.xlu0 %4667 }
 0x651   :  { %v10468_v60 = vrot.slane %v11740_v6, %v8209_v24  ;;  %v5643_v7 = vrot.slane %v5642_v48, 4  ;;  %v6088_v29 = vsel %vm183_vm0, %v6051_v43, 0.0  ;;  %v10486_v3 = vrot.slane %v5035_v31, %v7941_v56  ;;  %v10492_v57 = vpop.permute.xlu1 %4731 }
 0x652   :  { %v6895_v23 = vpop.eup %6894  ;;  %v6157_v5 = vld [vmem:[#allocation3] sm:$0xf]  ;;  %v5423_v11 = vrot.slane %v5422_v10, 1  ;;  %v5865_v33 = vsel %vm183_vm0, %v5828_v17, 0.0  ;;  %v5956_v44 = vadd.f32 %v5940_v59, %v11743_v1  ;;  %v5464_v17 = vld [vmem:[#allocation3 + $0xf] sm:$0x1] }
 0x653   :  { %v5004_v15 = vcombine.high %v10468_v60, %v10468_v60  ;;  %v6897_v13 = vpop.eup %6896  ;;  %v5263_v40 = vmul.f32 0.0, %v6895_v23  ;;  %v6180_v54 = vadd.f32 %v11744_v16, %v6157_v5  ;;  %v5644_v52 = vadd.f32 %v5643_v7, %v5642_v48  ;;  %v11746_v48 = vld [vmem:[#allocation51_spill] sm:$0xff]  ;;  %v11747_v5 = vld [vmem:[#allocation66_spill] sm:$0xff] }
 0x654   :  { %v6899_v51 = vpop.eup %6898  ;;  %v5264_v25 = vmul.f32 0.0, %v6897_v13  ;;  %v5866_v46 = vadd.f32 %v5865_v33, %v5864_v12  ;;  %v5424_v6 = vadd.f32 %v5423_v11, %v5422_v10  ;;  %v6052_v43 = vmul.f32 %v11745_v39, %v5956_v44  ;;  %v10506_v33 = vpop.permute.xlu0 %4715  ;;  %v11749_v39 = vld [vmem:[#allocation73_spill] sm:$0xff] }
 0x655   :  { %v5279_v34 = vadd.f32 %v5263_v40, %v10237_v45  ;;  %v6901_v20 = vpop.eup %6900  ;;  %v10500_v23 = vmul.f32 %v10486_v3, %v10278_v32  ;;  %6188 = vst.msk [vmem:[#allocation3] sm:$0xf] %vm610_vm1, %v6180_v54  ;;  %v5645_v59 = vrot.slane %v5644_v52, 2  ;;  %v10508_v32 = vpop.permute.xlu1 %4671 }
 0x656   :  { %v5280_v31 = vadd.f32 %v5264_v25, %v10234_v35  ;;  %v6903_v63 = vpop.eup %6902  ;;  %v5867_v13 = vrot.slane %v5866_v46, 4  ;;  %v5472_v40 = vadd.f32 %v5464_v17, %v5424_v6  ;;  %v6089_v10 = vsel %vm183_vm0, %v6052_v43, 0.0 }
 0x657   :  { %v5375_v12 = vmul.f32 %v11746_v48, %v5279_v34  ;;  %v5487_v7 = vmul.f32 %v6893_v27, %v5279_v34  ;;  %v6905_v45 = vpop.eup %6904  ;;  %v5646_v44 = vadd.f32 %v5645_v59, %v5644_v52  ;;  %v6090_v54 = vadd.f32 %v6089_v10, %v6088_v29  ;;  %v11748_v27 = vld [vmem:[#allocation24_spill] sm:$0xff]  ;;  %v11750_v52 = vld [vmem:[#allocation57_spill] sm:$0xff] }
 0x658   :  { %v5376_v11 = vmul.f32 %v11747_v5, %v5280_v31  ;;  %v5488_v35 = vmul.f32 %v6901_v20, %v5280_v31  ;;  %v6907_v1 = vpop.eup %6906  ;;  %v5868_v25 = vadd.f32 %v5867_v13, %v5866_v46  ;;  %5480 = vst.msk [vmem:[#allocation3 + $0xf] sm:$0x1] %vm643_vm2, %v5472_v40  ;;  %v10516_v20 = vrot.slane %v5004_v15, %v8209_v24  ;;  %v11751_v13 = vld [vmem:[#allocation95_spill] sm:$0xff]  ;;  %v10520_v40 = vpop.permute.xlu0 %4655 }
 0x659   :  { %v5398_v16 = vsel %vm183_vm0, %v5375_v12, 0.0  ;;  %v5503_v34 = vadd.f32 %v5487_v7, %v11748_v27  ;;  %v5647_v31 = vrot.slane %v5646_v44, 1  ;;  %v6091_v48 = vrot.slane %v6090_v54, 4  ;;  %v10522_v7 = vpop.permute.xlu1 %4719  ;;  %v5688_v15 = vld [vmem:[#allocation3 + $0xe] sm:$0x1] }
 0x65a   :  { %v5399_v6 = vsel %vm183_vm0, %v5376_v11, 0.0  ;;  %v5504_v43 = vadd.f32 %v5488_v35, %v11749_v39  ;;  %v5869_v17 = vrot.slane %v5868_v25, 2 }
 0x65b   :  { %v5400_v5 = vadd.f32 %v5399_v6, %v5398_v16  ;;  %v5599_v46 = vmul.f32 %v11750_v52, %v5503_v34  ;;  %v5711_v59 = vmul.f32 %v6899_v51, %v5503_v34  ;;  %v5648_v10 = vadd.f32 %v5647_v31, %v5646_v44  ;;  %v11753_v6 = vld [vmem:[#allocation28_spill] sm:$0xff] }
 0x65c   :  { %v5600_v29 = vmul.f32 %v11751_v13, %v5504_v43  ;;  %v5712_v12 = vmul.f32 %v6905_v45, %v5504_v43  ;;  %v5870_v11 = vadd.f32 %v5869_v17, %v5868_v25  ;;  %v6092_v35 = vadd.f32 %v6091_v48, %v6090_v54  ;;  %v11754_v13 = vld [vmem:[#allocation122_spill] sm:$0xff]  ;;  %v11755_v25 = vld [vmem:[#allocation44_spill] sm:$0xff]  ;;  %v10530_v31 = vpop.permute.xlu0 %4703 }
 0x65d   :  { %v5401_v27 = vrot.slane %v5400_v5, 4  ;;  %v5622_v39 = vsel %vm183_vm0, %v5599_v46, 0.0  ;;  %v5727_v47 = vadd.f32 %v5711_v59, %v11752_v36  ;;  %v5696_v34 = vadd.f32 %v5688_v15, %v5648_v10  ;;  %v10532_v17 = vpop.permute.xlu1 %4659  ;;  %v11756_v10 = vld [vmem:[#allocation89_spill] sm:$0xff] }
 0x65e   :  { %v5623_v16 = vsel %vm183_vm0, %v5600_v29, 0.0  ;;  %v5728_v51 = vadd.f32 %v5712_v12, %v11753_v6  ;;  %v5871_v52 = vrot.slane %v5870_v11, 1  ;;  %v6093_v45 = vrot.slane %v6092_v35, 2  ;;  %v5912_v29 = vld [vmem:[#allocation3 + $0xd] sm:$0x1] }
 0x65f   :  { %v5402_v43 = vadd.f32 %v5401_v27, %v5400_v5  ;;  %v5823_v49 = vmul.f32 %v11754_v13, %v5727_v47  ;;  %v5624_v28 = vadd.f32 %v5623_v16, %v5622_v39  ;;  %v5935_v44 = vmul.f32 %v6903_v63, %v5727_v47  ;;  %5704 = vst.msk [vmem:[#allocation3 + $0xe] sm:$0x1] %vm643_vm2, %v5696_v34  ;;  %v11757_v13 = vld [vmem:[#allocation77_spill] sm:$0xff] }
 0x660   :  { %v5824_v54 = vmul.f32 %v11755_v25, %v5728_v51  ;;  %v5872_v36 = vadd.f32 %v5871_v52, %v5870_v11  ;;  %v6094_v48 = vadd.f32 %v6093_v45, %v6092_v35  ;;  %v5936_v59 = vmul.f32 %v6907_v1, %v5728_v51  ;;  %v11758_v34 = vld [vmem:[#allocation65_spill] sm:$0xff]  ;;  %v10542_v35 = vpop.permute.xlu0 %4643  ;;  %v11759_v51 = vld [vmem:[#allocation32_spill] sm:$0xff] }
 0x661   :  { %v5403_v46 = vrot.slane %v5402_v43, 2  ;;  %v5846_v12 = vsel %vm183_vm0, %v5823_v49, 0.0  ;;  %v5625_v5 = vrot.slane %v5624_v28, 4  ;;  %v5951_v27 = vadd.f32 %v5935_v44, %v11756_v10  ;;  %v10544_v49 = vpop.permute.xlu1 %4707 }
 0x662   :  { %v5847_v47 = vsel %vm183_vm0, %v5824_v54, 0.0  ;;  %v5920_v63 = vadd.f32 %v5912_v29, %v5872_v36  ;;  %v6095_v15 = vrot.slane %v6094_v48, 1  ;;  %v5952_v11 = vadd.f32 %v5936_v59, %v11758_v34  ;;  %v11763_v29 = vld [vmem:[#allocation97_spill] sm:$0xff] }
 0x663   :  { %v5404_v39 = vadd.f32 %v5403_v46, %v5402_v43  ;;  %v5848_v16 = vadd.f32 %v5847_v47, %v5846_v12  ;;  %v5626_v6 = vadd.f32 %v5625_v5, %v5624_v28  ;;  %v6047_v25 = vmul.f32 %v11757_v13, %v5951_v27  ;;  %v11760_v28 = vld [vmem:[#allocation112_spill] sm:$0xff]  ;;  %v6136_v46 = vld [vmem:[#allocation3 + $0xc] sm:$0x1] }
 0x664   :  { %v5036_v1 = vcombine.high %v10516_v20, %v10516_v20  ;;  %v4286_v52 = vmul.f32 %v11759_v51, %v11658_v8  ;;  %5928 = vst.msk [vmem:[#allocation3 + $0xd] sm:$0x1] %vm643_vm2, %v5920_v63  ;;  %v6096_v45 = vadd.f32 %v6095_v15, %v6094_v48  ;;  %v11761_v54 = vcombine.high %v11760_v28, %v11760_v28  ;;  %v5462_v63 = vld [vmem:[#allocation3 + $0x7] sm:$0x1]  ;;  %v11764_v51 = vld [vmem:[#allocation61_spill] sm:$0xff] }
 0x665   :  { %v5405_v43 = vrot.slane %v5404_v39, 1  ;;  %v5849_v44 = vrot.slane %v5848_v16, 4  ;;  %v5627_v59 = vrot.slane %v5626_v6, 2  ;;  %v6048_v12 = vmul.f32 %v11763_v29, %v5952_v11  ;;  %v10564_v28 = vpop.permute.xlu1 %4647 }
 0x666   :  { %v10553_v36 = vrot.slane %v11761_v54, %v7941_v56  ;;  %v5164_v5 = vrot.slane %v5036_v1, %v7941_v56  ;;  %v6144_v10 = vadd.f32 %v6136_v46, %v6096_v45  ;;  %v5033_v48 = vcombine.high %v10479_v14, %v10479_v14  ;;  %v10568_v45 = vpop.permute.xlu0 %4691  ;;  %v11765_v46 = vld [vmem:[#allocation152_spill] sm:$0xff] }
 0x667   :  { %v5406_v27 = vadd.f32 %v5405_v43, %v5404_v39  ;;  %v5850_v47 = vadd.f32 %v5849_v44, %v5848_v16  ;;  %v5628_v15 = vadd.f32 %v5627_v59, %v5626_v6  ;;  %v6070_v13 = vsel %vm183_vm0, %v6047_v25, 0.0 }
 0x668   :  { %11762 = vst [vmem:[#allocation60_spill] sm:$0xff] %v10553_v36  ;;  %v6071_v34 = vsel %vm183_vm0, %v6048_v12, 0.0  ;;  %v10562_v54 = vmul.f32 %v5164_v5, %v11764_v51  ;;  %6152 = vst.msk [vmem:[#allocation3 + $0xc] sm:$0x1] %vm643_vm2, %v6144_v10  ;;  %v5144_v16 = vrot.slane %v5033_v48, %v7941_v56  ;;  %v5018_v6 = vrot.slane %v10468_v60, %v8209_v24 }
 0x669   :  { %v5470_v11 = vadd.f32 %v5462_v63, %v5406_v27  ;;  %v5851_v1 = vrot.slane %v5850_v47, 2  ;;  %v6072_v39 = vadd.f32 %v6071_v34, %v6070_v13  ;;  %v5629_v43 = vrot.slane %v5628_v15, 1  ;;  %v10589_v63 = vpop.permute.xlu1 %4695  ;;  %v5686_v13 = vld [vmem:[#allocation3 + $0x6] sm:$0x1] }
 0x66a   :  { %v5140_v25 = vrot.slane %v10460_v30, %v7941_v56  ;;  %v5156_v44 = vrot.slane %v10516_v20, %v7941_v56  ;;  %v10577_v59 = vmul.f32 1.442695, %v11765_v46  ;;  %v10581_v10 = vmul.f32 %v5144_v16, %v10329_v9  ;;  %v11769_v46 = vld [vmem:[#allocation144_spill] sm:$0xff] }
 0x66b   :  { %5478 = vst.msk [vmem:[#allocation3 + $0x7] sm:$0x1] %vm643_vm2, %v5470_v11  ;;  %v5852_v29 = vadd.f32 %v5851_v1, %v5850_v47  ;;  %v6073_v12 = vrot.slane %v6072_v39, 4  ;;  %v5630_v27 = vadd.f32 %v5629_v43, %v5628_v15  ;;  %v5034_v48 = vcombine.high %v5018_v6, %v5018_v6  ;;  %v11768_v43 = vld [vmem:[#allocation123_spill] sm:$0xff] }
 0x66c   :  { %v10584_v60 = vmul.f32 %v5140_v25, %v10339_v42  ;;  %v10587_v30 = vmul.f32 %v5156_v44, %v10349_v62  ;;  %v10591_v20 = vmul.f32 1.442695, %v4286_v52  ;;  %v10594_v47 = vmul.f32 %v5140_v25, %v10351_v21  ;;  %v10610_v21 = vpop.permute.xlu0 %5335 }
 0x66d   :  { %v5853_v34 = vrot.slane %v5852_v29, 1  ;;  %v6074_v51 = vadd.f32 %v6073_v12, %v6072_v39  ;;  %v5694_v9 = vadd.f32 %v5686_v13, %v5630_v27  ;;  %v10597_v15 = vrot.slane %v5034_v48, %v7941_v56  ;;  %v5910_v12 = vld [vmem:[#allocation3 + $0x5] sm:$0x1]  ;;  %v11773_v27 = vld [vmem:[#allocation87_spill] sm:$0xff] }
 0x66e   :  { %11766 = vst [vmem:[#allocation125_spill] sm:$0xff] %v10587_v30  ;;  %v10600_v42 = vmul.f32 %v5156_v44, %v10363_v22  ;;  %v5152_v62 = vrot.slane %v5018_v6, %v7941_v56  ;;  %v10604_v52 = vmul.f32 %v5164_v5, %v11768_v43  ;;  %v10608_v39 = vmul.f32 %v10486_v3, %v11769_v46  ;;  %v11772_v44 = vld [vmem:[#allocation105_spill] sm:$0xff]  ;;  %v11775_v43 = vld [vmem:[#allocation82_spill] sm:$0xff] }
 0x66f   :  { %v5854_v11 = vadd.f32 %v5853_v34, %v5852_v29  ;;  %v6075_v1 = vrot.slane %v6074_v51, 2  ;;  %v6160_v25 = vld [vmem:[#allocation3 + $0xc] sm:$0xf]  ;;  %5702 = vst.msk [vmem:[#allocation3 + $0x6] sm:$0x1] %vm643_vm2, %v5694_v9  ;;  %v10615_v22 = vmul.f32 %v10597_v15, %v10341_v4  ;;  %v5136_v6 = vrot.slane %v10479_v14, %v7941_v56  ;;  %v10624_v29 = vpop.permute.xlu1 %5339 }
 0x670   :  { %11767 = vst [vmem:[#allocation63_spill] sm:$0xff] %v10600_v42  ;;  %v10620_v5 = vmul.f32 %v5152_v62, %v10374_v61  ;;  %v4091_v3 = vcombine.high %v11772_v44, %v11772_v44  ;;  %v6183_v48 = vadd.f32 %v11773_v27, %v6160_v25  ;;  %v10628_v9 = vmul.f32 %v5152_v62, %v10395_v53  ;;  %v11776_v61 = vld [vmem:[#allocation107_spill] sm:$0xff]  ;;  %v11778_v62 = vld [vmem:[#allocation108_spill] sm:$0xff] }
 0x671   :  { %11770 = vst [vmem:[#allocation64_spill] sm:$0xff] %v10615_v22  ;;  %v5918_v13 = vadd.f32 %v5910_v12, %v5854_v11  ;;  %v6076_v34 = vadd.f32 %v6075_v1, %v6074_v51  ;;  %v4305_v14 = vmul.f32 %v11775_v43, %v11657_v50  ;;  %v4303_v46 = vmul.f32 %v11776_v61, %v11657_v50  ;;  %v11777_v51 = vld [vmem:[#allocation62_spill] sm:$0xff] }
 0x672   :  { %11771 = vst [vmem:[#allocation128_spill] sm:$0xff] %v10620_v5  ;;  %11774 = vst [vmem:[#allocation130_spill] sm:$0xff] %v10628_v9  ;;  %v4204_v4 = vrot.slane %v4091_v3, %v7941_v56  ;;  %v4306_v44 = vmul.f32 %v11775_v43, %v11658_v8  ;;  %v10640_v1 = vmul.f32 %v5144_v16, %v11777_v51  ;;  %v6134_v9 = vld [vmem:[#allocation3 + $0x4] sm:$0x1]  ;;  %v11779_v51 = vld [vmem:[#allocation36_spill] sm:$0xff]  ;;  %v10654_v5 = vpop.permute.xlu0 %5559 }
 0x673   :  { %6191 = vst.msk [vmem:[#allocation3 + $0xc] sm:$0xf] %vm610_vm1, %v6183_v48  ;;  %v6077_v11 = vrot.slane %v6076_v34, 1  ;;  %v10643_v53 = vmul.f32 %v5136_v6, %v10361_v58  ;;  %v4946_v25 = vrot.slane %v11778_v62, %v8209_v24  ;;  %v4421_v3 = vmul.f32 1.442695, %v4305_v14  ;;  %v10651_v43 = vpop.permute.xlu1 %5563 }
 0x674   :  { %5926 = vst.msk [vmem:[#allocation3 + $0x5] sm:$0x1] %vm643_vm2, %v5918_v13  ;;  %v4307_v12 = vmul.f32 %v4204_v4, %v11657_v50  ;;  %v4308_v27 = vmul.f32 %v4204_v4, %v11658_v8  ;;  %v4304_v48 = vmul.f32 %v11776_v61, %v11658_v8  ;;  %v4417_v16 = vmul.f32 1.442695, %v4303_v46 }
 0x675   :  { %v6078_v13 = vadd.f32 %v6077_v11, %v6076_v34  ;;  %6908 = vpow2.f32 %v11779_v51  ;;  %v4954_v58 = vcombine.high %v4946_v25, %v4946_v25  ;;  %v4423_v30 = vmul.f32 1.442695, %v4306_v44 }
 0x676   :  { %v4425_v42 = vmul.f32 1.442695, %v4307_v12  ;;  %v4427_v22 = vmul.f32 1.442695, %v4308_v27  ;;  %v11780_v4 = vcombine.high %v11778_v62, %v11778_v62  ;;  %6910 = vpow2.f32 %v4421_v3 }
 0x677   :  { %v6142_v36 = vadd.f32 %v6134_v9, %v6078_v13  ;;  %v4976_v61 = vrot.slane %v4954_v58, %v8209_v24  ;;  %v4962_v34 = vrot.slane %v4946_v25, %v8209_v24  ;;  %v4419_v46 = vmul.f32 1.442695, %v4304_v48  ;;  %v10667_v27 = vpop.permute.xlu1 %5787  ;;  %v11781_v25 = vld [vmem:[#allocation113_spill] sm:$0xff] }
 0x678   :  { %v4953_v14 = vrot.slane %v11780_v4, %v8209_v24  ;;  %6912 = vpow2.f32 %v4425_v42  ;;  %v10665_v44 = vmul.f32 %v5136_v6, %v10376_v37  ;;  %v4042_v42 = vcombine.high %v11781_v25, %v11781_v25  ;;  %v11782_v4 = vld [vmem:[#allocation34_spill] sm:$0xff] }
 0x679   :  { %6150 = vst.msk [vmem:[#allocation3 + $0x4] sm:$0x1] %vm643_vm2, %v6142_v36  ;;  %6914 = vpow2.f32 %v4427_v22  ;;  %v4986_v12 = vcombine.high %v4976_v61, %v4976_v61  ;;  %v4984_v62 = vcombine.high %v4962_v34, %v4962_v34  ;;  %v5108_v36 = vrot.slane %v4976_v61, %v7941_v56  ;;  %v10677_v22 = vpop.permute.xlu0 %5783 }
 0x67a   :  { %v4955_v11 = vcombine.high %v4953_v14, %v4953_v14  ;;  %v4969_v51 = vrot.slane %v4953_v14, %v8209_v24  ;;  %6916 = vpow2.f32 %v4417_v16  ;;  %v10675_v37 = vrot.slane %v4962_v34, %v7941_v56 }
 0x67b   :  { %6918 = vpow2.f32 %v4423_v30  ;;  %v5116_v48 = vrot.slane %v4986_v12, %v7941_v56  ;;  %v5112_v30 = vrot.slane %v4984_v62, %v7941_v56  ;;  %v10687_v14 = vmul.f32 %v5108_v36, %v10520_v40 }
 0x67c   :  { %v4983_v9 = vrot.slane %v4955_v11, %v8209_v24  ;;  %v4985_v3 = vcombine.high %v4969_v51, %v4969_v51  ;;  %6920 = vpow2.f32 %v4419_v46 }
 0x67d   :  { %v10682_v58 = vmul.f32 %v5116_v48, %v10450_v38  ;;  %6922 = vpow2.f32 %v11782_v4  ;;  %v10702_v12 = vmul.f32 %v5116_v48, %v10472_v41  ;;  %v10705_v62 = vmul.f32 %v5112_v30, %v10490_v55  ;;  %v11786_v48 = vld [vmem:[#allocation86_spill] sm:$0xff] }
 0x67e   :  { %v4987_v6 = vcombine.high %v4983_v9, %v4983_v9  ;;  %v5128_v13 = vrot.slane %v4985_v3, %v7941_v56  ;;  %v5124_v16 = vrot.slane %v4983_v9, %v7941_v56  ;;  %v10711_v9 = vpop.permute.xlu1 %6011  ;;  %v10720_v41 = vmul.f32 %v5112_v30, %v10508_v32 }
 0x67f   :  { %v10699_v38 = vpop.eup %6908  ;;  %v4172_v55 = vrot.slane %v4042_v42, %v7941_v56  ;;  %v11790_v42 = vld [vmem:[#allocation114_spill] sm:$0xff]  ;;  %6924 = vpow2.f32 %v10577_v59 }
 0x680   :  { %v5132_v61 = vrot.slane %v4987_v6, %v7941_v56  ;;  %v10691_v34 = vmul.f32 %v5128_v13, %v10506_v33  ;;  %v10694_v46 = vmul.f32 %v5128_v13, %v10522_v7  ;;  %v10697_v11 = vmul.f32 %v5124_v16, %v10530_v31  ;;  %v6158_v7 = vld [vmem:[#allocation3 + $0x4] sm:$0xf]  ;;  %v6911_v25 = vpop.eup %6910 }
 0x681   :  { %v10708_v40 = vmul.f32 %v5124_v16, %v10544_v49  ;;  %v5120_v33 = vrot.slane %v4969_v51, %v7941_v56  ;;  %v6181_v49 = vadd.f32 %v11786_v48, %v6158_v7  ;;  %v10732_v16 = vpop.permute.xlu0 %6007  ;;  %v4291_v32 = vmul.f32 %v4172_v55, %v11657_v50 }
 0x682   :  { %11783 = vst [vmem:[#allocation110_spill] sm:$0xff] %v10694_v46  ;;  %11784 = vst [vmem:[#allocation129_spill] sm:$0xff] %v10697_v11  ;;  %v10714_v3 = vmul.f32 %v5132_v61, %v10470_v18  ;;  %v10717_v31 = vmul.f32 %v5132_v61, %v10492_v57  ;;  %v11789_v18 = vld [vmem:[#allocation115_spill] sm:$0xff]  ;;  %v6913_v57 = vpop.eup %6912  ;;  %v4292_v4 = vmul.f32 %v4172_v55, %v11658_v8 }
 0x683   :  { %11785 = vst [vmem:[#allocation127_spill] sm:$0xff] %v10708_v40  ;;  %v10725_v6 = vmul.f32 %v5120_v33, %v10568_v45  ;;  %v10728_v51 = vmul.f32 %v5120_v33, %v10589_v63  ;;  %v4289_v13 = vmul.f32 %v11789_v18, %v11657_v50  ;;  %v4287_v30 = vmul.f32 %v11790_v42, %v11657_v50  ;;  %v6915_v61 = vpop.eup %6914  ;;  %v11791_v40 = vld [vmem:[#allocation138_spill] sm:$0xff] }
 0x684   :  { %v4290_v45 = vmul.f32 %v11789_v18, %v11658_v8  ;;  %6189 = vst.msk [vmem:[#allocation3 + $0x4] sm:$0xf] %vm610_vm1, %v6181_v49  ;;  %v5273_v63 = vmul.f32 0.0, %v6913_v57  ;;  %v4288_v7 = vmul.f32 %v11790_v42, %v11658_v8  ;;  %v6917_v48 = vpop.eup %6916  ;;  %v4395_v55 = vmul.f32 1.442695, %v4292_v4  ;;  %v10754_v57 = vpop.permute.xlu1 %5371 }
 0x685   :  { %11787 = vst [vmem:[#allocation126_spill] sm:$0xff] %v10725_v6  ;;  %11788 = vst [vmem:[#allocation131_spill] sm:$0xff] %v10728_v51  ;;  %v4389_v33 = vmul.f32 1.442695, %v4289_v13  ;;  %v5274_v51 = vmul.f32 0.0, %v6915_v61  ;;  %v11792_v11 = vcombine.high %v11791_v40, %v11791_v40  ;;  %v6919_v18 = vpop.eup %6918  ;;  %v10752_v13 = vmul.f32 %v5108_v36, %v10532_v17 }
 0x686   :  { %v4393_v6 = vmul.f32 1.442695, %v4291_v32  ;;  %v5289_v49 = vadd.f32 %v5273_v63, %v10500_v23  ;;  %v4385_v59 = vmul.f32 1.442695, %v4287_v30  ;;  %v6921_v42 = vpop.eup %6920  ;;  %v10759_v4 = vmul.f32 %v10675_v37, %v10542_v35  ;;  %v10764_v30 = vpop.permute.xlu0 %5367 }
 0x687   :  { %v10748_v46 = vrot.slane %v11792_v11, %v8209_v24  ;;  %6926 = vpow2.f32 %v4389_v33  ;;  %v5290_v32 = vadd.f32 %v5274_v51, %v10608_v39  ;;  %v6923_v40 = vpop.eup %6922  ;;  %v4391_v36 = vmul.f32 1.442695, %v4290_v45 }
 0x688   :  { %6928 = vpow2.f32 %v4393_v6  ;;  %v5385_v23 = vmul.f32 %v10393_v26, %v5289_v49  ;;  %v5497_v17 = vmul.f32 %v6911_v25, %v5289_v49  ;;  %v4387_v39 = vmul.f32 1.442695, %v4288_v7 }
 0x689   :  { %v4092_v11 = vcombine.high %v10748_v46, %v10748_v46  ;;  %6930 = vpow2.f32 %v4395_v55  ;;  %v5386_v61 = vmul.f32 %v10411_v19, %v5290_v32  ;;  %v5498_v63 = vmul.f32 %v6919_v18, %v5290_v32  ;;  %v11793_v19 = vld [vmem:[#allocation33_spill] sm:$0xff]  ;;  %v10783_v32 = vpop.eup %6924 }
 0x68a   :  { %v5443_v35 = vsel %vm183_vm0, %v5385_v23, 0.0  ;;  %v5513_v6 = vadd.f32 %v5497_v17, %v10640_v1  ;;  %v10772_v33 = vmul.f32 %v10675_v37, %v10564_v28  ;;  %6932 = vpow2.f32 %v4385_v59  ;;  %v10780_v1 = vpop.permute.xlu1 %5595  ;;  %v10787_v23 = vpop.permute.xlu0 %5591 }
 0x68b   :  { %v4220_v51 = vrot.slane %v4092_v11, %v7941_v56  ;;  %v5444_v26 = vsel %vm183_vm0, %v5386_v61, 0.0  ;;  %v5514_v25 = vadd.f32 %v5498_v63, %v10581_v10  ;;  %v4313_v7 = vmul.f32 %v11793_v19, %v11657_v50  ;;  %v11794_v63 = vld [vmem:[#allocation124_spill] sm:$0xff] }
 0x68c   :  { %v5609_v55 = vmul.f32 %v10409_v2, %v5513_v6  ;;  %v5445_v18 = vadd.f32 %v5444_v26, %v5443_v35  ;;  %v5721_v49 = vmul.f32 %v6917_v48, %v5513_v6  ;;  %6934 = vpow2.f32 %v4391_v36  ;;  %v11795_v6 = vld [vmem:[#allocation109_spill] sm:$0xff] }
 0x68d   :  { %v4315_v45 = vmul.f32 %v4220_v51, %v11657_v50  ;;  %v5610_v28 = vmul.f32 %v10427_v0, %v5514_v25  ;;  %v5722_v37 = vmul.f32 %v6921_v42, %v5514_v25  ;;  %6936 = vpow2.f32 %v4387_v39 }
 0x68e   :  { %v5446_v10 = vrot.slane %v5445_v18, 4  ;;  %v5737_v11 = vadd.f32 %v5721_v49, %v10584_v60  ;;  %6938 = vpow2.f32 %v10591_v20  ;;  %v4316_v2 = vmul.f32 %v4220_v51, %v11658_v8 }
 0x68f   :  { %v4441_v59 = vmul.f32 1.442695, %v4315_v45  ;;  %v5667_v48 = vsel %vm183_vm0, %v5609_v55, 0.0  ;;  %v5668_v17 = vsel %vm183_vm0, %v5610_v28, 0.0  ;;  %v5738_v0 = vadd.f32 %v5722_v37, %v10594_v47  ;;  %v10800_v28 = vpop.permute.xlu1 %5819 }
 0x690   :  { %v10793_v42 = vmul.f32 1.442695, %v4313_v7  ;;  %v5447_v61 = vadd.f32 %v5446_v10, %v5445_v18  ;;  %v5833_v39 = vmul.f32 %v11794_v63, %v5737_v11  ;;  %v5669_v35 = vadd.f32 %v5668_v17, %v5667_v48  ;;  %v11797_v63 = vld [vmem:[#allocation67_spill] sm:$0xff] }
 0x691   :  { %v6927_v36 = vpop.eup %6926  ;;  %v5945_v60 = vmul.f32 %v10699_v38, %v5737_v11  ;;  %v5834_v26 = vmul.f32 %v11795_v6, %v5738_v0  ;;  %v5946_v25 = vmul.f32 %v6923_v40, %v5738_v0  ;;  %6940 = vpow2.f32 %v4441_v59  ;;  %v11796_v59 = vld [vmem:[#allocation45_spill] sm:$0xff]  ;;  %v10805_v0 = vpop.permute.xlu0 %5815 }
 0x692   :  { %v6929_v20 = vpop.eup %6928  ;;  %v4443_v51 = vmul.f32 1.442695, %v4316_v2  ;;  %v5448_v55 = vrot.slane %v5447_v61, 2  ;;  %v5891_v49 = vsel %vm183_vm0, %v5833_v39, 0.0  ;;  %v5670_v47 = vrot.slane %v5669_v35, 4 }
 0x693   :  { %v6931_v45 = vpop.eup %6930  ;;  %v5961_v7 = vadd.f32 %v5945_v60, %v10643_v53  ;;  %v5892_v18 = vsel %vm183_vm0, %v5834_v26, 0.0  ;;  %v5962_v37 = vadd.f32 %v5946_v25, %v10665_v44  ;;  %v5269_v38 = vmul.f32 0.0, %v6929_v20 }
 0x694   :  { %v5270_v10 = vmul.f32 0.0, %v6931_v45  ;;  %v6933_v11 = vpop.eup %6932  ;;  %v5449_v48 = vadd.f32 %v5448_v55, %v5447_v61  ;;  %v5671_v40 = vadd.f32 %v5670_v47, %v5669_v35  ;;  %v5893_v17 = vadd.f32 %v5892_v18, %v5891_v49  ;;  %v10816_v18 = vpop.permute.xlu1 %5351 }
 0x695   :  { %v6057_v2 = vmul.f32 %v11796_v59, %v5961_v7  ;;  %v6058_v39 = vmul.f32 %v11797_v63, %v5962_v37  ;;  %v5285_v53 = vadd.f32 %v5269_v38, %v10682_v58  ;;  %6942 = vpow2.f32 %v4443_v51  ;;  %v5467_v37 = vld [vmem:[#allocation3 + $0x1b] sm:$0x1] }
 0x696   :  { %v5286_v60 = vadd.f32 %v5270_v10, %v10702_v12  ;;  %v6935_v6 = vpop.eup %6934  ;;  %v5450_v26 = vrot.slane %v5449_v48, 1  ;;  %v5672_v44 = vrot.slane %v5671_v40, 2  ;;  %v5894_v25 = vrot.slane %v5893_v17, 4 }
 0x697   :  { %v6115_v20 = vsel %vm183_vm0, %v6057_v2, 0.0  ;;  %v6937_v61 = vpop.eup %6936  ;;  %v6116_v35 = vsel %vm183_vm0, %v6058_v39, 0.0  ;;  %v5381_v45 = vmul.f32 %v10610_v21, %v5285_v53  ;;  %v5493_v55 = vmul.f32 %v6927_v36, %v5285_v53  ;;  %v10821_v39 = vpop.permute.xlu0 %5347 }
 0x698   :  { %v5382_v49 = vmul.f32 %v10624_v29, %v5286_v60  ;;  %v10814_v47 = vpop.eup %6938  ;;  %v5451_v58 = vadd.f32 %v5450_v26, %v5449_v48  ;;  %v5673_v7 = vadd.f32 %v5672_v44, %v5671_v40  ;;  %v5895_v12 = vadd.f32 %v5894_v25, %v5893_v17 }
 0x699   :  { %v6117_v51 = vadd.f32 %v6116_v35, %v6115_v20  ;;  %v5425_v38 = vsel %vm183_vm0, %v5381_v45, 0.0  ;;  %v5509_v10 = vadd.f32 %v5493_v55, %v10705_v62  ;;  %v5494_v2 = vmul.f32 %v6935_v6, %v5286_v60  ;;  %v5691_v6 = vld [vmem:[#allocation3 + $0x1a] sm:$0x1] }
 0x69a   :  { %v5426_v59 = vsel %vm183_vm0, %v5382_v49, 0.0  ;;  %v5475_v21 = vadd.f32 %v5467_v37, %v5451_v58  ;;  %v5674_v36 = vrot.slane %v5673_v7, 1  ;;  %v5896_v63 = vrot.slane %v5895_v12, 2  ;;  %v10833_v49 = vpop.permute.xlu1 %5575 }
 0x69b   :  { %v6118_v29 = vrot.slane %v6117_v51, 4  ;;  %v6941_v48 = vpop.eup %6940  ;;  %v5605_v40 = vmul.f32 %v10654_v5, %v5509_v10  ;;  %v5427_v17 = vadd.f32 %v5426_v59, %v5425_v38  ;;  %v5717_v53 = vmul.f32 %v6933_v11, %v5509_v10  ;;  %v10840_v38 = vpop.permute.xlu0 %5571 }
 0x69c   :  { %v5510_v26 = vadd.f32 %v5494_v2, %v10720_v41  ;;  %5483 = vst.msk [vmem:[#allocation3 + $0x1b] sm:$0x1] %vm643_vm2, %v5475_v21  ;;  %v5675_v44 = vadd.f32 %v5674_v36, %v5673_v7  ;;  %v5897_v62 = vadd.f32 %v5896_v63, %v5895_v12  ;;  %v10828_v60 = vrot.slane %v10748_v46, %v7941_v56 }
 0x69d   :  { %v6119_v20 = vadd.f32 %v6118_v29, %v6117_v51  ;;  %v5428_v25 = vrot.slane %v5427_v17, 4  ;;  %v5733_v35 = vadd.f32 %v5717_v53, %v10687_v14  ;;  %6944 = vpow2.f32 %v10793_v42 }
 0x69e   :  { %v5606_v45 = vmul.f32 %v10651_v43, %v5510_v26  ;;  %v5699_v5 = vadd.f32 %v5691_v6, %v5675_v44  ;;  %v5898_v11 = vrot.slane %v5897_v62, 1  ;;  %v5718_v55 = vmul.f32 %v6937_v61, %v5510_v26  ;;  %v5915_v61 = vld [vmem:[#allocation3 + $0x19] sm:$0x1]  ;;  %v6139_v6 = vld [vmem:[#allocation3 + $0x18] sm:$0x1] }
 0x69f   :  { %v6120_v41 = vrot.slane %v6119_v20, 2  ;;  %v6943_v58 = vpop.eup %6942  ;;  %v5649_v7 = vsel %vm183_vm0, %v5605_v40, 0.0  ;;  %v5429_v12 = vadd.f32 %v5428_v25, %v5427_v17  ;;  %v5829_v46 = vmul.f32 %v10677_v22, %v5733_v35 }
 0x6a0   :  { %v5650_v51 = vsel %vm183_vm0, %v5606_v45, 0.0  ;;  %5707 = vst.msk [vmem:[#allocation3 + $0x1a] sm:$0x1] %vm643_vm2, %v5699_v5  ;;  %v5899_v14 = vadd.f32 %v5898_v11, %v5897_v62  ;;  %v5734_v42 = vadd.f32 %v5718_v55, %v10752_v13  ;;  %v5941_v59 = vmul.f32 %v10783_v32, %v5733_v35  ;;  %v10852_v62 = vpop.permute.xlu1 %5799 }
 0x6a1   :  { %v6121_v43 = vadd.f32 %v6120_v41, %v6119_v20  ;;  %v5651_v37 = vadd.f32 %v5650_v51, %v5649_v7  ;;  %v5430_v10 = vrot.slane %v5429_v12, 2  ;;  %v5275_v2 = vmul.f32 0.0, %v6941_v48  ;;  %v11798_v20 = vld [vmem:[#allocation58_spill] sm:$0xff]  ;;  %v10859_v41 = vpop.permute.xlu0 %5795 }
 0x6a2   :  { %v4311_v21 = vmul.f32 %v10828_v60, %v11657_v50  ;;  %v5923_v22 = vadd.f32 %v5915_v61, %v5899_v14  ;;  %v5830_v29 = vmul.f32 %v10667_v27, %v5734_v42  ;;  %v5873_v17 = vsel %vm183_vm0, %v5829_v46, 0.0 }
 0x6a3   :  { %v6122_v36 = vrot.slane %v6121_v43, 1  ;;  %v5652_v63 = vrot.slane %v5651_v37, 4  ;;  %v5431_v40 = vadd.f32 %v5430_v10, %v5429_v12  ;;  %v5957_v13 = vadd.f32 %v5941_v59, %v10759_v4 }
 0x6a4   :  { %v5291_v53 = vadd.f32 %v5275_v2, %v10604_v52  ;;  %5931 = vst.msk [vmem:[#allocation3 + $0x19] sm:$0x1] %vm643_vm2, %v5923_v22  ;;  %v5874_v48 = vsel %vm183_vm0, %v5830_v29, 0.0  ;;  %v5942_v44 = vmul.f32 %v10814_v47, %v5734_v42  ;;  %v5257_v27 = vmul.f32 %v10597_v15, %v11798_v20  ;;  %v5465_v15 = vld [vmem:[#allocation3 + $0x13] sm:$0x1]  ;;  %v10870_v59 = vpop.permute.xlu1 %6023 }
 0x6a5   :  { %v6123_v26 = vadd.f32 %v6122_v36, %v6121_v43  ;;  %v5653_v32 = vadd.f32 %v5652_v63, %v5651_v37  ;;  %v5432_v25 = vrot.slane %v5431_v40, 1  ;;  %v6053_v35 = vmul.f32 %v10732_v16, %v5957_v13 }
 0x6a6   :  { %v5875_v4 = vadd.f32 %v5874_v48, %v5873_v17  ;;  %v5387_v5 = vmul.f32 %v10764_v30, %v5291_v53  ;;  %v5958_v11 = vadd.f32 %v5942_v44, %v10772_v33  ;;  %v5276_v12 = vmul.f32 0.0, %v6943_v58  ;;  %v5689_v17 = vld [vmem:[#allocation3 + $0x12] sm:$0x1] }
 0x6a7   :  { %v6147_v45 = vadd.f32 %v6139_v6, %v6123_v26  ;;  %v5654_v52 = vrot.slane %v5653_v32, 2  ;;  %v6945_v55 = vpop.eup %6944  ;;  %v5433_v47 = vadd.f32 %v5432_v25, %v5431_v40  ;;  %v4433_v46 = vmul.f32 1.442695, %v4311_v21  ;;  %v11799_v21 = vld [vmem:[#allocation46_spill] sm:$0xff]  ;;  %v10882_v40 = vpop.permute.xlu0 %6019 }
 0x6a8   :  { %v5876_v7 = vrot.slane %v5875_v4, 4  ;;  %v6054_v16 = vmul.f32 %v10711_v9, %v5958_v11  ;;  %v5499_v14 = vmul.f32 %v6945_v55, %v5291_v53  ;;  %v4314_v43 = vmul.f32 %v11793_v19, %v11658_v8  ;;  %v10891_v55 = vpop.permute.xlu1 %6043 }
 0x6a9   :  { %6155 = vst.msk [vmem:[#allocation3 + $0x18] sm:$0x1] %vm643_vm2, %v6147_v45  ;;  %v5655_v51 = vadd.f32 %v5654_v52, %v5653_v32  ;;  %v5473_v30 = vadd.f32 %v5465_v15, %v5433_v47  ;;  %v10866_v33 = vadd.f32 %v5276_v12, %v10562_v54  ;;  %6946 = vpow2.f32 %v4433_v46 }
 0x6aa   :  { %v5877_v37 = vadd.f32 %v5876_v7, %v5875_v4  ;;  %v6097_v58 = vsel %vm183_vm0, %v6053_v35, 0.0  ;;  %v6098_v61 = vsel %vm183_vm0, %v6054_v16, 0.0  ;;  %v4439_v10 = vmul.f32 1.442695, %v4314_v43 }
 0x6ab   :  { %v5656_v42 = vrot.slane %v5655_v51, 1  ;;  %5481 = vst.msk [vmem:[#allocation3 + $0x13] sm:$0x1] %vm643_vm2, %v5473_v30  ;;  %v6099_v2 = vadd.f32 %v6098_v61, %v6097_v58  ;;  %v5388_v19 = vmul.f32 %v10754_v57, %v10866_v33  ;;  %v11800_v54 = vcombine.high %v11799_v21, %v11799_v21  ;;  %v10901_v30 = vpop.permute.xlu0 %6039 }
 0x6ac   :  { %v5878_v9 = vrot.slane %v5877_v37, 2  ;;  %v5452_v63 = vsel %vm183_vm0, %v5387_v5, 0.0  ;;  %6948 = vpow2.f32 %v4439_v10  ;;  %v4312_v29 = vmul.f32 %v10828_v60, %v11658_v8  ;;  %v11801_v60 = vld [vmem:[#allocation30_spill] sm:$0xff]  ;;  %v11802_v5 = vld [vmem:[#allocation60_spill] sm:$0xff] }
 0x6ad   :  { %v4039_v22 = vrot.slane %v11800_v54, %v8209_v24  ;;  %v5657_v36 = vadd.f32 %v5656_v42, %v5655_v51  ;;  %v6100_v53 = vrot.slane %v6099_v2, 4  ;;  %v5453_v26 = vsel %vm183_vm0, %v5388_v19, 0.0  ;;  %v5913_v51 = vld [vmem:[#allocation3 + $0x11] sm:$0x1] }
 0x6ae   :  { %v5879_v13 = vadd.f32 %v5878_v9, %v5877_v37  ;;  %v5454_v48 = vadd.f32 %v5453_v26, %v5452_v63  ;;  %v4435_v24 = vmul.f32 1.442695, %v4312_v29  ;;  %v5515_v35 = vadd.f32 %v5499_v14, %v5257_v27  ;;  %v11803_v27 = vld [vmem:[#allocation112_spill] sm:$0xff]  ;;  %v11804_v29 = vld [vmem:[#allocation125_spill] sm:$0xff] }
 0x6af   :  { %v4043_v57 = vcombine.high %v4039_v22, %v4039_v22  ;;  %v5697_v32 = vadd.f32 %v5689_v17, %v5657_v36  ;;  %v4180_v44 = vrot.slane %v4039_v22, %v7941_v56  ;;  %v6101_v25 = vadd.f32 %v6100_v53, %v6099_v2 }
 0x6b0   :  { %v6163_v20 = vld [vmem:[#allocation3 + $0x18] sm:$0xf]  ;;  %v5880_v6 = vrot.slane %v5879_v13, 1  ;;  %v5455_v52 = vrot.slane %v5454_v48, 4  ;;  %6950 = vpow2.f32 %v4435_v24  ;;  %v4297_v11 = vmul.f32 %v11802_v5, %v11657_v50  ;;  %v6137_v24 = vld [vmem:[#allocation3 + $0x10] sm:$0x1] }
 0x6b1   :  { %v4188_v4 = vrot.slane %v4043_v57, %v7941_v56  ;;  %v6186_v45 = vadd.f32 %v11801_v60, %v6163_v20  ;;  %5705 = vst.msk [vmem:[#allocation3 + $0x12] sm:$0x1] %vm643_vm2, %v5697_v32  ;;  %v6102_v7 = vrot.slane %v6101_v25, 2  ;;  %v4295_v46 = vmul.f32 %v4180_v44, %v11657_v50  ;;  %v11805_v32 = vld [vmem:[#allocation106_spill] sm:$0xff] }
 0x6b2   :  { %v5881_v47 = vadd.f32 %v5880_v6, %v5879_v13  ;;  %v4176_v15 = vrot.slane %v11803_v27, %v7941_v56  ;;  %v5456_v16 = vadd.f32 %v5455_v52, %v5454_v48  ;;  %v4298_v43 = vmul.f32 %v11802_v5, %v11658_v8 }
 0x6b3   :  { %v4299_v12 = vmul.f32 %v4188_v4, %v11657_v50  ;;  %6194 = vst.msk [vmem:[#allocation3 + $0x18] sm:$0xf] %vm610_vm1, %v6186_v45  ;;  %v4300_v14 = vmul.f32 %v4188_v4, %v11658_v8  ;;  %v6947_v37 = vpop.eup %6946  ;;  %v6103_v58 = vadd.f32 %v6102_v7, %v6101_v25  ;;  %v5611_v61 = vmul.f32 %v10787_v23, %v5515_v35  ;;  %v6215_v23 = vpop.permute.xlu1 %6214  ;;  %v11806_v4 = vld [vmem:[#allocation64_spill] sm:$0xff]  ;;  %v5468_v7 = vld [vmem:[#allocation3 + $0x1f] sm:$0x1] }
 0x6b4   :  { %v5921_v42 = vadd.f32 %v5913_v51, %v5881_v47  ;;  %v5457_v9 = vrot.slane %v5456_v16, 2  ;;  %v5723_v2 = vmul.f32 %v6947_v37, %v5515_v35  ;;  %v4405_v56 = vmul.f32 1.442695, %v4297_v11  ;;  %v6213_v25 = vpop.permute.xlu0 %6212  ;;  %v6196_v11 = vld [vmem:[#allocation3] sm:$0xf]  ;;  %v6245_v47 = vld [vmem:[%s11066_s18 + $0x8] sm:$0xff] }
 0x6b5   :  { %v4409_v10 = vmul.f32 1.442695, %v4299_v12  ;;  %v4411_v19 = vmul.f32 1.442695, %v4300_v14  ;;  %v6104_v21 = vrot.slane %v6103_v58, 1  ;;  %v4296_v13 = vmul.f32 %v4180_v44, %v11658_v8 }
 0x6b6   :  { %5929 = vst.msk [vmem:[#allocation3 + $0x11] sm:$0x1] %vm643_vm2, %v5921_v42  ;;  %v4401_v54 = vmul.f32 1.442695, %v4295_v46  ;;  %v4407_v22 = vmul.f32 1.442695, %v4298_v43  ;;  %v6949_v36 = vpop.eup %6948  ;;  %v5458_v63 = vadd.f32 %v5457_v9, %v5456_v16  ;;  %v10906_v17 = vadd.f32 %v5723_v2, %v11804_v29 }
 0x6b7   :  { %6952 = vpow2.f32 %v4409_v10  ;;  %v6105_v53 = vadd.f32 %v6104_v21, %v6103_v58  ;;  %v5500_v26 = vmul.f32 %v6949_v36, %v10866_v33  ;;  %v4293_v57 = vmul.f32 %v4176_v15, %v11657_v50  ;;  %v6197_v16 = vld [vmem:[#allocation3 + $0x4] sm:$0xf]  ;;  %v6219_v37 = vpop.permute.xlu1 %6218  ;;  %v6246_v42 = vld [vmem:[%s11066_s18 + $0x10] sm:$0xff]  ;;  %v6247_v58 = vld [vmem:[%s11066_s18 + $0x18] sm:$0xff] }
 0x6b8   :  { %6954 = vpow2.f32 %v4411_v19  ;;  %v4309_v48 = vmul.f32 %v11805_v32, %v11657_v50  ;;  %v5676_v20 = vsel %vm183_vm0, %v5611_v61, 0.0  ;;  %v5459_v6 = vrot.slane %v5458_v63, 1  ;;  %v6244_v50 = vld [vmem:[%s11066_s18] sm:$0xff]  ;;  %v11807_v10 = vld [vmem:[#allocation63_spill] sm:$0xff]  ;;  %v6217_v19 = vpop.permute.xlu0 %6216 }
 0x6b9   :  { %6956 = vpow2.f32 %v4405_v56  ;;  %v6145_v35 = vadd.f32 %v6137_v24, %v6105_v53  ;;  %v5516_v60 = vadd.f32 %v5500_v26, %v11806_v4  ;;  %v4403_v33 = vmul.f32 1.442695, %v4296_v13  ;;  %v6198_v26 = vld [vmem:[#allocation3 + $0x8] sm:$0xf] }
 0x6ba   :  { %6958 = vpow2.f32 %v4401_v54  ;;  %v4429_v44 = vmul.f32 1.442695, %v4309_v48  ;;  %v6951_v45 = vpop.eup %6950  ;;  %v5460_v52 = vadd.f32 %v5459_v6, %v5458_v63  ;;  %v4294_v5 = vmul.f32 %v4176_v15, %v11658_v8  ;;  %v6199_v54 = vld [vmem:[#allocation3 + $0xc] sm:$0xf] }
 0x6bb   :  { %6960 = vpow2.f32 %v4407_v22  ;;  %6153 = vst.msk [vmem:[#allocation3 + $0x10] sm:$0x1] %vm643_vm2, %v6145_v35  ;;  %v5612_v12 = vmul.f32 %v10780_v1, %v5516_v60  ;;  %v5724_v46 = vmul.f32 %v6951_v45, %v5516_v60  ;;  %v4397_v27 = vmul.f32 1.442695, %v4293_v57  ;;  %v11808_v60 = vld [vmem:[#allocation31_spill] sm:$0xff] }
 0x6bc   :  { %v6236_v51 = vmul.f32 %v6213_v25, %v6196_v11  ;;  %v5476_v14 = vadd.f32 %v5468_v7, %v5460_v52  ;;  %6962 = vpow2.f32 %v4429_v44  ;;  %v4310_v15 = vmul.f32 %v11805_v32, %v11658_v8 }
 0x6bd   :  { %v6237_v43 = vmul.f32 %v6215_v23, %v6197_v16  ;;  %v5835_v1 = vmul.f32 %v10805_v0, %v10906_v17  ;;  %v5677_v61 = vsel %vm183_vm0, %v5612_v12, 0.0  ;;  %v10936_v9 = vadd.f32 %v5724_v46, %v11807_v10  ;;  %v11810_v10 = vld [vmem:[#allocation128_spill] sm:$0xff] }
 0x6be   :  { %v6562_v2 = vpack.c.bf16 %v6245_v47, %v6244_v50  ;;  %5484 = vst.msk [vmem:[#allocation3 + $0x1f] sm:$0x1] %vm643_vm2, %v5476_v14  ;;  %v5678_v8 = vadd.f32 %v5677_v61, %v5676_v20  ;;  %6964 = vpow2.f32 %v4403_v33  ;;  %v4399_v56 = vmul.f32 1.442695, %v4294_v5  ;;  %v11809_v14 = vld [vmem:[#allocation110_spill] sm:$0xff] }
 0x6bf   :  { %v6256_v21 = vcombine.low %v6236_v51, %v6237_v43  ;;  %v5836_v36 = vmul.f32 %v10800_v28, %v10936_v9  ;;  %v4431_v63 = vmul.f32 1.442695, %v4310_v15  ;;  %v6239_v0 = vmul.f32 %v6219_v37, %v6199_v54  ;;  %v5692_v54 = vld [vmem:[#allocation3 + $0x1e] sm:$0x1] }
 0x6c0   :  { %6563 = vmatprep.subr.bf16.mxu1 %v6562_v2  ;;  %v6566_v29 = vpack.c.bf16 %v6247_v58, %v6246_v42  ;;  %v5679_v23 = vrot.slane %v5678_v8, 4  ;;  %6966 = vpow2.f32 %v4397_v27  ;;  %v5900_v57 = vsel %vm183_vm0, %v5835_v1, 0.0 }
 0x6c1   :  { %v6953_v22 = vpop.eup %6952  ;;  %6565 = vmatpush3.bf16.msra.mxu1 %v6562_v2  ;;  %6532 = vmatprep.mubr.msk.f32.mxu1 %vm183_vm0, %v6256_v21  ;;  %v5901_v32 = vsel %vm183_vm0, %v5836_v36, 0.0  ;;  %v6238_v24 = vmul.f32 %v6217_v19, %v6198_v26  ;;  %6968 = vpow2.f32 %v4399_v56 }
 0x6c2   :  { %v6955_v13 = vpop.eup %6954  ;;  %v5271_v53 = vmul.f32 0.0, %v6953_v22  ;;  %6567 = vmatprep.subr.bf16.mxu1 %v6566_v29  ;;  %v6161_v20 = vld [vmem:[#allocation3 + $0x10] sm:$0xf]  ;;  %v5680_v6 = vadd.f32 %v5679_v23, %v5678_v8  ;;  %v5902_v35 = vadd.f32 %v5901_v32, %v5900_v57  ;;  %6970 = vpow2.f32 %v4431_v63  ;;  %v11811_v22 = vld [vmem:[#allocation129_spill] sm:$0xff] }
 0x6c3   :  { %v5272_v48 = vmul.f32 0.0, %v6955_v13  ;;  %v6957_v28 = vpop.eup %6956  ;;  %v6184_v44 = vadd.f32 %v11808_v60, %v6161_v20  ;;  %v6257_v52 = vcombine.low %v6238_v24, %v6239_v0  ;;  %v11812_v0 = vld [vmem:[#allocation127_spill] sm:$0xff] }
 0x6c4   :  { %v5287_v25 = vadd.f32 %v5271_v53, %v10714_v3  ;;  %v6959_v4 = vpop.eup %6958  ;;  %v5681_v5 = vrot.slane %v5680_v6, 2  ;;  %v5903_v50 = vrot.slane %v5902_v35, 4 }
 0x6c5   :  { %v5288_v45 = vadd.f32 %v5272_v48, %v10717_v31  ;;  %v6961_v33 = vpop.eup %6960  ;;  %6569 = vmatpush3.bf16.msra.mxu1 %v6566_v29  ;;  %6192 = vst.msk [vmem:[#allocation3 + $0x10] sm:$0xf] %vm610_vm1, %v6184_v44 }
 0x6c6   :  { %v5383_v11 = vmul.f32 %v10821_v39, %v5287_v25  ;;  %v5495_v47 = vmul.f32 %v6957_v28, %v5287_v25  ;;  %v6963_v12 = vpop.eup %6962  ;;  %v5682_v46 = vadd.f32 %v5681_v5, %v5680_v6  ;;  %v5904_v27 = vadd.f32 %v5903_v50, %v5902_v35  ;;  %v5916_v25 = vld [vmem:[#allocation3 + $0x1d] sm:$0x1]  ;;  %v11814_v50 = vld [vmem:[#allocation131_spill] sm:$0xff] }
 0x6c7   :  { %v5384_v3 = vmul.f32 %v10816_v18, %v5288_v45  ;;  %v5496_v7 = vmul.f32 %v6961_v33, %v5288_v45  ;;  %v5947_v39 = vmul.f32 %v6963_v12, %v10906_v17 }
 0x6c8   :  { %v5511_v51 = vadd.f32 %v5495_v47, %v10691_v34  ;;  %v5434_v31 = vsel %vm183_vm0, %v5383_v11, 0.0  ;;  %6533 = vmatmul.mubr.msk.f32.vlgmr.msra.gmra.mrb[8].mxu1 %vm183_vm0, %v6257_v52  ;;  %v6965_v43 = vpop.eup %6964  ;;  %v5683_v37 = vrot.slane %v5682_v46, 1  ;;  %v5905_v42 = vrot.slane %v5904_v27, 2 }
 0x6c9   :  { %v5435_v16 = vsel %vm183_vm0, %v5384_v3, 0.0  ;;  %v5512_v15 = vadd.f32 %v5496_v7, %v11809_v14  ;;  %v5963_v2 = vadd.f32 %v5947_v39, %v11810_v10  ;;  %v11815_v3 = vld [vmem:[#allocation130_spill] sm:$0xff] }
 0x6ca   :  { %v5607_v18 = vmul.f32 %v10840_v38, %v5511_v51  ;;  %v5436_v58 = vadd.f32 %v5435_v16, %v5434_v31  ;;  %v5719_v1 = vmul.f32 %v6959_v4, %v5511_v51  ;;  %v6967_v8 = vpop.eup %6966  ;;  %v5684_v56 = vadd.f32 %v5683_v37, %v5682_v46  ;;  %v11813_v4 = vld [vmem:[#allocation126_spill] sm:$0xff] }
 0x6cb   :  { %v5608_v61 = vmul.f32 %v10833_v49, %v5512_v15  ;;  %v5720_v34 = vmul.f32 %v6965_v43, %v5512_v15  ;;  %v5906_v19 = vadd.f32 %v5905_v42, %v5904_v27  ;;  %v6969_v29 = vpop.eup %6968  ;;  %v6059_v11 = vmul.f32 %v10901_v30, %v5963_v2  ;;  %v5466_v15 = vld [vmem:[#allocation3 + $0x17] sm:$0x1] }
 0x6cc   :  { %v5437_v21 = vrot.slane %v5436_v58, 4  ;;  %v5658_v17 = vsel %vm183_vm0, %v5607_v18, 0.0  ;;  %v5735_v36 = vadd.f32 %v5719_v1, %v11811_v22  ;;  %v5700_v13 = vadd.f32 %v5692_v54, %v5684_v56  ;;  %v6971_v26 = vpop.eup %6970 }
 0x6cd   :  { %v5659_v63 = vsel %vm183_vm0, %v5608_v61, 0.0  ;;  %v5736_v38 = vadd.f32 %v5720_v34, %v11812_v0  ;;  %v5907_v23 = vrot.slane %v5906_v19, 1  ;;  %v5948_v45 = vmul.f32 %v6971_v26, %v10936_v9  ;;  %v5690_v34 = vld [vmem:[#allocation3 + $0x16] sm:$0x1]  ;;  %v6140_v26 = vld [vmem:[#allocation3 + $0x1c] sm:$0x1] }
 0x6ce   :  { %v5438_v49 = vadd.f32 %v5437_v21, %v5436_v58  ;;  %v5660_v53 = vadd.f32 %v5659_v63, %v5658_v17  ;;  %v5831_v57 = vmul.f32 %v10859_v41, %v5735_v36  ;;  %v5943_v32 = vmul.f32 %v6967_v8, %v5735_v36  ;;  %5708 = vst.msk [vmem:[#allocation3 + $0x1e] sm:$0x1] %vm643_vm2, %v5700_v13  ;;  %v5914_v17 = vld [vmem:[#allocation3 + $0x15] sm:$0x1] }
 0x6cf   :  { %v5832_v48 = vmul.f32 %v10852_v62, %v5736_v38  ;;  %v5908_v24 = vadd.f32 %v5907_v23, %v5906_v19  ;;  %v5944_v6 = vmul.f32 %v6969_v29, %v5736_v38  ;;  %v5964_v7 = vadd.f32 %v5948_v45, %v11815_v3  ;;  %v6138_v23 = vld [vmem:[#allocation3 + $0x14] sm:$0x1] }
 0x6d0   :  { %v5439_v28 = vrot.slane %v5438_v49, 2  ;;  %v5661_v20 = vrot.slane %v5660_v53, 4  ;;  %v5882_v35 = vsel %vm183_vm0, %v5831_v57, 0.0  ;;  %v5959_v60 = vadd.f32 %v5943_v32, %v11813_v4  ;;  %v6200_v4 = vld [vmem:[#allocation3 + $0x10] sm:$0xf] }
 0x6d1   :  { %v5883_v44 = vsel %vm183_vm0, %v5832_v48, 0.0  ;;  %v5924_v52 = vadd.f32 %v5916_v25, %v5908_v24  ;;  %v5960_v47 = vadd.f32 %v5944_v6, %v11814_v50  ;;  %v6060_v9 = vmul.f32 %v10891_v55, %v5964_v7  ;;  %v11816_v48 = vld [vmem:[#allocation35_spill] sm:$0xff]  ;;  %v6221_v25 = vpop.permute.xlu0 %6220 }
 0x6d2   :  { %v5440_v41 = vadd.f32 %v5439_v28, %v5438_v49  ;;  %v5662_v33 = vadd.f32 %v5661_v20, %v5660_v53  ;;  %v5884_v5 = vadd.f32 %v5883_v44, %v5882_v35  ;;  %v6055_v62 = vmul.f32 %v10882_v40, %v5959_v60  ;;  %v11817_v20 = vld [vmem:[#allocation37_spill] sm:$0xff]  ;;  %v6223_v35 = vpop.permute.xlu1 %6222 }
 0x6d3   :  { %5932 = vst.msk [vmem:[#allocation3 + $0x1d] sm:$0x1] %vm643_vm2, %v5924_v52  ;;  %v6056_v51 = vmul.f32 %v10870_v59, %v5960_v47  ;;  %v6124_v30 = vsel %vm183_vm0, %v6059_v11, 0.0  ;;  %v6125_v43 = vsel %vm183_vm0, %v6060_v9, 0.0  ;;  %v6240_v45 = vmul.f32 %v6221_v25, %v6200_v4  ;;  %v6202_v52 = vld [vmem:[#allocation3 + $0x18] sm:$0xf] }
 0x6d4   :  { %v5441_v12 = vrot.slane %v5440_v41, 1  ;;  %v5663_v46 = vrot.slane %v5662_v33, 2  ;;  %v5885_v27 = vrot.slane %v5884_v5, 4  ;;  %v6106_v40 = vsel %vm183_vm0, %v6055_v62, 0.0  ;;  %v6974_v9 = vld [vmem:[%s11178_s20] sm:$0xf] }
 0x6d5   :  { %v6107_v39 = vsel %vm183_vm0, %v6056_v51, 0.0  ;;  %v6126_v1 = vadd.f32 %v6125_v43, %v6124_v30  ;;  %v6225_v60 = vpop.permute.xlu0 %6224  ;;  %v6977_v43 = vld [vmem:[%s11178_s20 + $0x18] sm:$0xf] }
 0x6d6   :  { %v5442_v31 = vadd.f32 %v5441_v12, %v5440_v41  ;;  %v5664_v16 = vadd.f32 %v5663_v46, %v5662_v33  ;;  %v5886_v14 = vadd.f32 %v5885_v27, %v5884_v5  ;;  %v6108_v58 = vadd.f32 %v6107_v39, %v6106_v40  ;;  %v6227_v33 = vpop.permute.xlu1 %6226  ;;  %v6973_v12 = vld [vmem:[%s11178_s20 + $0x8] sm:$0xf] }
 0x6d7   :  { %v6127_v10 = vrot.slane %v6126_v1, 4  ;;  %v6242_v62 = vmul.f32 %v6225_v60, %v6202_v52 }
 0x6d8   :  { %v5474_v37 = vadd.f32 %v5466_v15, %v5442_v31  ;;  %v5665_v42 = vrot.slane %v5664_v16, 1  ;;  %v5887_v18 = vrot.slane %v5886_v14, 2  ;;  %v6109_v61 = vrot.slane %v6108_v58, 4  ;;  %v6976_v15 = vld [vmem:[%s11178_s20 + $0x4] sm:$0xf] }
 0x6d9   :  { %v6128_v19 = vadd.f32 %v6127_v10, %v6126_v1 }
 0x6da   :  { %5482 = vst.msk [vmem:[#allocation3 + $0x17] sm:$0x1] %vm643_vm2, %v5474_v37  ;;  %v5666_v59 = vadd.f32 %v5665_v42, %v5664_v16  ;;  %v5888_v55 = vadd.f32 %v5887_v18, %v5886_v14  ;;  %v6110_v56 = vadd.f32 %v6109_v61, %v6108_v58  ;;  %v6975_v16 = vld [vmem:[%s11178_s20 + $0xc] sm:$0xf]  ;;  %v6978_v58 = vld [vmem:[%s11178_s20 + $0x10] sm:$0xf] }
 0x6db   :  { %v6129_v22 = vrot.slane %v6128_v19, 2  ;;  %v6980_v61 = vld [vmem:[%s11178_s20 + $0x14] sm:$0xf] }
 0x6dc   :  { %v5698_v2 = vadd.f32 %v5690_v34, %v5666_v59  ;;  %v5889_v8 = vrot.slane %v5888_v55, 1  ;;  %v6111_v54 = vrot.slane %v6110_v56, 2  ;;  %v6979_v59 = vld [vmem:[%s11178_s20 + $0x1c] sm:$0xf] }
 0x6dd   :  { %v6130_v0 = vadd.f32 %v6129_v22, %v6128_v19 }
 0x6de   :  { %5706 = vst.msk [vmem:[#allocation3 + $0x16] sm:$0x1] %vm643_vm2, %v5698_v2  ;;  %v5890_v21 = vadd.f32 %v5889_v8, %v5888_v55  ;;  %v6112_v63 = vadd.f32 %v6111_v54, %v6110_v56 }
 0x6df   :  { %v6131_v29 = vrot.slane %v6130_v0, 1 }
 0x6e0   :  { %v5922_v36 = vadd.f32 %v5914_v17, %v5890_v21  ;;  %v6113_v38 = vrot.slane %v6112_v63, 1 }
 0x6e1   :  { %v6132_v49 = vadd.f32 %v6131_v29, %v6130_v0 }
 0x6e2   :  { %5930 = vst.msk [vmem:[#allocation3 + $0x15] sm:$0x1] %vm643_vm2, %v5922_v36  ;;  %v6114_v13 = vadd.f32 %v6113_v38, %v6112_v63 }
 0x6e3   :  { %v6148_v57 = vadd.f32 %v6140_v26, %v6132_v49 }
 0x6e4   :  { %v6146_v53 = vadd.f32 %v6138_v23, %v6114_v13 }
 0x6e5   :  { %6156 = vst.msk [vmem:[#allocation3 + $0x1c] sm:$0x1] %vm643_vm2, %v6148_v57 }
 0x6e6   :  { %6154 = vst.msk [vmem:[#allocation3 + $0x14] sm:$0x1] %vm643_vm2, %v6146_v53 }
 0x6ec   :  { %v6164_v28 = vld [vmem:[#allocation3 + $0x1c] sm:$0xf] }
 0x6ed   :  { %v6162_v32 = vld [vmem:[#allocation3 + $0x14] sm:$0xf]  ;;  %v6187_v6 = vadd.f32 %v11817_v20, %v6164_v28 }
 0x6ee   :  { %v6185_v24 = vadd.f32 %v11816_v48, %v6162_v32 }
 0x6ef   :  { %6195 = vst.msk [vmem:[#allocation3 + $0x1c] sm:$0xf] %vm610_vm1, %v6187_v6 }
 0x6f0   :  { %6193 = vst.msk [vmem:[#allocation3 + $0x14] sm:$0xf] %vm610_vm1, %v6185_v24 }
 0x6f6   :  { %v6203_v5 = vld [vmem:[#allocation3 + $0x1c] sm:$0xf] }
 0x6f7   :  { %v6201_v44 = vld [vmem:[#allocation3 + $0x14] sm:$0xf]  ;;  %v6243_v11 = vmul.f32 %v6227_v33, %v6203_v5 }
 0x6f8   :  { %v6241_v41 = vmul.f32 %v6223_v35, %v6201_v44 }
 0x6f9   :  { %v6259_v47 = vcombine.low %v6242_v62, %v6243_v11 }
 0x6fa   :  { %v6258_v50 = vcombine.low %v6240_v45, %v6241_v41 }
 0x6fc   :  { %6535 = vmatprep.mubr.msk.f32.mxu1 %vm183_vm0, %v6258_v50 }
 0x6fd   :  { %6536 = vmatmul.mubr.msk.f32.gmra.mrb[10].mxu1 %vm183_vm0, %v6259_v47 }
 0x79b   :  { %v6534_v3 = vpop.f32.mrb[8].mxu1 }
 0x79c   :  { %v6358_v7 = vcombine.high %v6534_v3, %v6534_v3  ;;  %v6367_v46 = vadd.f32 %v6973_v12, %v6534_v3  ;;  %v6334_v27 = vpop.f32.mrb[9].mxu1 }
 0x79d   :  { %v6357_v51 = vcombine.high %v6334_v27, %v6334_v27  ;;  %v6365_v31 = vadd.f32 %v6974_v9, %v6334_v27 }
 0x79e   :  { %v6368_v14 = vadd.f32 %v6975_v16, %v6358_v7  ;;  %6375 = vst.msk [vmem:[%s11067_s19 + $0x8] sm:$0xf] %vm610_vm1, %v6367_v46 }
 0x79f   :  { %v6366_v40 = vadd.f32 %v6976_v15, %v6357_v51  ;;  %6373 = vst.msk [vmem:[%s11067_s19] sm:$0xf] %vm610_vm1, %v6365_v31 }
 0x7a0   :  { %6376 = vst.msk [vmem:[%s11067_s19 + $0xc] sm:$0xf] %vm610_vm1, %v6368_v14 }
 0x7a1   :  { %6374 = vst.msk [vmem:[%s11067_s19 + $0x4] sm:$0xf] %vm610_vm1, %v6366_v40 }
 0x7d0   :  { %v6537_v30 = vpop.f32.mrb[10].mxu1 }
 0x7d1   :  { %v6360_v39 = vcombine.high %v6537_v30, %v6537_v30  ;;  %v6371_v37 = vadd.f32 %v6977_v43, %v6537_v30  ;;  %v6344_v42 = vpop.f32.mrb[11].mxu1 }
 0x7d2   :  { %v6359_v18 = vcombine.high %v6344_v42, %v6344_v42  ;;  %v6369_v1 = vadd.f32 %v6978_v58, %v6344_v42 }
 0x7d3   :  { %v6372_v55 = vadd.f32 %v6979_v59, %v6360_v39  ;;  %6379 = vst.msk [vmem:[%s11067_s19 + $0x18] sm:$0xf] %vm610_vm1, %v6371_v37 }
 0x7d4   :  { %v6370_v34 = vadd.f32 %v6980_v61, %v6359_v18  ;;  %6377 = vst.msk [vmem:[%s11067_s19 + $0x10] sm:$0xf] %vm610_vm1, %v6369_v1 }
 0x7d5   :  { %6380 = vst.msk [vmem:[%s11067_s19 + $0x1c] sm:$0xf] %vm610_vm1, %v6372_v55 }
 0x7d6   :  { %6378 = vst.msk [vmem:[%s11067_s19 + $0x14] sm:$0xf] %vm610_vm1, %v6370_v34 }
 0x7d7   :  { %6385 = vsyncpa [#allocation5], 1 }
 0x7d8   :  { %6386 = vsyncpa [#allocation7], 1 }
 0x7d9   :  { %6387 = vsyncpa [#allocation10], 1 }
 0x7da   :  { %6388 = vsyncpa [#allocation13], 1 }
 0x7db   :  { %6389 = vsyncpa [#allocation16], 1 }

</bundles_post_ra>
